<compile_context>
chip_gen: v7x
topology: tpu7x:2x2x1
jax: 0.10.0
libtpu: 0.0.40
codegen_flags: <defaults>
</compile_context>

<pallas_src>
import functools
import math

import jax
import jax.numpy as jnp
from jax.experimental import pallas as pl
from jax.experimental.pallas import tpu as pltpu


def _mlp_kernel(num_layers,
                pd_ref, freq_ref, phase_ref,
                w0_ref, wrest_ref,
                cf_wx_ref, cf_wd_ref,
                dens_w_ref, dens_b_ref, col_w_ref, col_b_ref,
                out_ref):
    """One (batch, point-tile) step.  Activations kept transposed as [H, TN]."""
    pts = pd_ref[0, 0]                           # [3, TN] bf16 (pre-scaled)
    dirs = pd_ref[0, 1]                          # [3, TN] bf16

    def film(h, l):                              # h: [H, TN] f32, lane-dense
        # phase already contains freq * layer_bias (folded in the wrapper).
        return jnp.sin(freq_ref[0, l] * h + phase_ref[0, l])

    # --- FiLM trunk ---------------------------------------------------------
    h = jnp.dot(w0_ref[...], pts, preferred_element_type=jnp.float32)
    x = film(h, 0)
    for l in range(1, num_layers):
        h = jnp.dot(wrest_ref[l - 1], x, preferred_element_type=jnp.float32)
        x = film(h, l)

    # --- density head: [1, H] @ [H, TN] -> [1, TN] ---------------------------
    dens = (jnp.dot(dens_w_ref[...], x, preferred_element_type=jnp.float32)
            + dens_b_ref[...])

    # --- color branch: concat([x, dirs]) @ Wc^T == Wc_x @ x^T + Wc_d @ d^T ---
    h_c = (jnp.dot(cf_wx_ref[...], x, preferred_element_type=jnp.float32)
           + jnp.dot(cf_wd_ref[...], dirs, preferred_element_type=jnp.float32))
    c = film(h_c, num_layers)
    col = jax.nn.sigmoid(
        jnp.dot(col_w_ref[...], c, preferred_element_type=jnp.float32)
        + col_b_ref[...])

    # Single lane-dense 4-sublane store: row 0 = density, rows 1-3 = color.
    out_ref[0] = jnp.concatenate([dens, col], axis=0)


def mlp_network_pallas(points, latents, ray_dirs, params, grid_scale=0.24,
                       tile_n=1024):
    B, N, _ = points.shape
    layer_ws, layer_bs = params["layer_w"], params["layer_b"]
    num_layers = len(layer_ws)
    H = layer_ws[0].shape[0]
    scale = 2.0 / grid_scale

    # --- tile-size selection --------------------------------------------------
    # TODO(synk): arbitrary N (not a multiple of 128) would need padding or a
    # ragged last tile; production point counts are assumed to tile.
    assert N % 128 == 0, "N must be a multiple of 128"
    tn = min(tile_n, N)
    tn -= tn % 128
    while N % tn != 0:
        tn -= 128
    if B == 1 and N // tn < 2:                   # keep both TCs busy on v7x
        half = (N // 2) - ((N // 2) % 128)
        if half >= 128 and N % half == 0:
            tn = half
    n_tiles = N // tn

    # --- hoist the FiLM style computation out of the kernel ------------------
    # style_wf/style_wp: [L+1, H, w_dim], style_bf/style_bp: [L+1, H]
    freq = (jnp.einsum("blw,lhw->blh", latents, params["style_wf"])
            + params["style_bf"][None]) * 15.0 + 30.0          # [B, L+1, H]
    phase = (jnp.einsum("blw,lhw->blh", latents, params["style_wp"])
             + params["style_bp"][None])                       # [B, L+1, H]
    # Fold the per-layer linear bias (trunk layers + color-FiLM layer) into the
    # phase:  sin(f*(Wx+b)+p) = sin(f*Wx + (f*b + p)).
    layer_bias = jnp.concatenate(
        [jnp.stack(layer_bs), params["color_film_b"][None]], axis=0)  # [L+1, H]
    phase = phase + freq * layer_bias[None]
    freq_in = freq[..., None]                    # [B, L+1, H, 1]
    phase_in = phase[..., None]                  # [B, L+1, H, 1]

    # --- lane-dense packed point/dir input (scale applied here) --------------
    pts_scaled = points * scale                  # UniformBoxWarp, hoisted
    pd = jnp.stack([jnp.swapaxes(pts_scaled, 1, 2),
                    jnp.swapaxes(ray_dirs, 1, 2)], axis=1)     # [B, 2, 3, N]
    pd = pd.astype(jnp.bfloat16)                 # halves streamed input bytes

    # --- bf16 weights (MXU truncates to bf16 at DEFAULT precision anyway) ----
    w0 = layer_ws[0].astype(jnp.bfloat16)                        # [H, 3]
    if num_layers > 1:
        wrest = jnp.stack(layer_ws[1:]).astype(jnp.bfloat16)     # [L-1, H, H]
    else:
        wrest = jnp.zeros((1, H, H), jnp.bfloat16)               # unused
    cf_wx = params["color_film_wx"].astype(jnp.bfloat16)         # [H, H]
    cf_wd = params["color_film_wd"].astype(jnp.bfloat16)         # [H, 3]
    dens_w = params["density_w"].astype(jnp.bfloat16)            # [1, H]
    col_w = params["color_w"].astype(jnp.bfloat16)               # [3, H]
    dens_b = params["density_b"][:, None]                        # [1, 1] f32
    col_b = params["color_b"][:, None]                           # [3, 1] f32

    def rep(arr):
        nd = arr.ndim
        # TODO(synk): pipeline_mode=pl.Buffered(1) would single-buffer these
        # grid-invariant weights (tiny VMEM saving, mostly relevant for H=256
        # class models on v7x's 64 MiB); kept at default buffering for
        # lowering safety — the weights here are only a few KB.
        return pl.BlockSpec(arr.shape, lambda b, n, _nd=nd: (0,) * _nd)

    inputs = [pd, freq_in, phase_in,
              w0, wrest, cf_wx, cf_wd,
              dens_w, dens_b, col_w, col_b]
    in_specs = [
        pl.BlockSpec((1, 2, 3, tn), lambda b, n: (b, 0, 0, n)),
        pl.BlockSpec((1, num_layers + 1, H, 1), lambda b, n: (b, 0, 0, 0)),
        pl.BlockSpec((1, num_layers + 1, H, 1), lambda b, n: (b, 0, 0, 0)),
    ] + [rep(a) for a in inputs[3:]]

    out_shape = jax.ShapeDtypeStruct((B, 4, N), jnp.float32)
    out_specs = pl.BlockSpec((1, 4, tn), lambda b, n: (b, 0, n))

    kernel = functools.partial(_mlp_kernel, num_layers)
    packed = pl.pallas_call(
        kernel,
        out_shape=out_shape,
        grid_spec=pltpu.PrefetchScalarGridSpec(
            num_scalar_prefetch=0,
            grid=(B, n_tiles),
            in_specs=in_specs,
            out_specs=out_specs),
        compiler_params=pltpu.CompilerParams(
            dimension_semantics=("parallel", "parallel"),
            vmem_limit_bytes=32 * 1024 * 1024),
    )(*inputs)

    # Split / transpose back to the module's [B, N, 1] / [B, N, 3] convention.
    packed_t = jnp.swapaxes(packed, 1, 2)        # [B, N, 4]
    return {"density": packed_t[..., 0:1], "color": packed_t[..., 1:4]}


def mlp_network_ref(points, latents, ray_dirs, params, grid_scale=0.24):
    """Plain-JAX reference mirroring the PyTorch forward.  Uses DEFAULT matmul
    precision (same single-pass bf16 MXU path as the kernel) so the comparison
    is apples-to-apples.
    TODO(synk): if bit-parity with an f32 (HIGHEST precision) PyTorch forward
    matters, also compare against a precision=HIGHEST reference."""
    scale = 2.0 / grid_scale
    L = len(params["layer_w"])

    def film(x, wp, w, b, wf, bf, wph, bph):
        h = jnp.einsum("bnd,hd->bnh", x, w) + b[None, None]
        freq = (jnp.einsum("bw,hw->bh", wp, wf) + bf) * 15.0 + 30.0
        phase = jnp.einsum("bw,hw->bh", wp, wph) + bph
        return jnp.sin(freq[:, None] * h + phase[:, None])

    x = points * scale
    for l in range(L):
        x = film(x, latents[:, l], params["layer_w"][l], params["layer_b"][l],
                 params["style_wf"][l], params["style_bf"][l],
                 params["style_wp"][l], params["style_bp"][l])

    density = (jnp.einsum("bnh,oh->bno", x, params["density_w"])
               + params["density_b"][None, None])

    xd = jnp.concatenate([x, ray_dirs], axis=-1)
    wc = jnp.concatenate([params["color_film_wx"], params["color_film_wd"]],
                         axis=-1)
    c = film(xd, latents[:, L], wc, params["color_film_b"],
             params["style_wf"][L], params["style_bf"][L],
             params["style_wp"][L], params["style_bp"][L])
    color = jax.nn.sigmoid(jnp.einsum("bnh,oh->bno", c, params["color_w"])
                           + params["color_b"][None, None])
    return {"density": density, "color": color}


def make_params(key, w_dim, in_channels, num_layers, hidden):
    """Deterministic synthetic parameters in PyTorch [out, in] weight layout,
    mimicking the module's init scheme."""
    L = num_layers
    keys = iter(jax.random.split(key, 64))

    layer_w, layer_b = [], []
    for l in range(L):
        d_in = in_channels if l == 0 else hidden
        lim = (1.0 / d_in) if l == 0 else math.sqrt(6.0 / d_in) / 25.0
        blim = 1.0 / math.sqrt(d_in)
        layer_w.append(jax.random.uniform(next(keys), (hidden, d_in),
                                          jnp.float32, -lim, lim))
        layer_b.append(jax.random.uniform(next(keys), (hidden,),
                                          jnp.float32, -blim, blim))

    # style Linear(w_dim, 2*hidden), split into freq / phase halves (L+1 of them)
    std = 0.25 * math.sqrt(2.0 / (1.0 + 0.2 ** 2) / w_dim)
    style_wf = std * jax.random.normal(next(keys), (L + 1, hidden, w_dim), jnp.float32)
    style_wp = std * jax.random.normal(next(keys), (L + 1, hidden, w_dim), jnp.float32)
    sb_lim = 1.0 / math.sqrt(w_dim)
    style_bf = jax.random.uniform(next(keys), (L + 1, hidden), jnp.float32, -sb_lim, sb_lim)
    style_bp = jax.random.uniform(next(keys), (L + 1, hidden), jnp.float32, -sb_lim, sb_lim)

    # color FiLM layer: Linear(hidden + 3, hidden), split into x-part / dir-part
    lim_c = math.sqrt(6.0 / (hidden + 3)) / 25.0
    blim_c = 1.0 / math.sqrt(hidden + 3)
    color_film_wx = jax.random.uniform(next(keys), (hidden, hidden), jnp.float32, -lim_c, lim_c)
    color_film_wd = jax.random.uniform(next(keys), (hidden, 3), jnp.float32, -lim_c, lim_c)
    color_film_b = jax.random.uniform(next(keys), (hidden,), jnp.float32, -blim_c, blim_c)

    lim_h = math.sqrt(6.0 / hidden) / 25.0
    blim_h = 1.0 / math.sqrt(hidden)
    density_w = jax.random.uniform(next(keys), (1, hidden), jnp.float32, -lim_h, lim_h)
    density_b = jax.random.uniform(next(keys), (1,), jnp.float32, -blim_h, blim_h)
    color_w = jax.random.uniform(next(keys), (3, hidden), jnp.float32, -lim_h, lim_h)
    color_b = jax.random.uniform(next(keys), (3,), jnp.float32, -blim_h, blim_h)

    return dict(layer_w=layer_w, layer_b=layer_b,
                style_wf=style_wf, style_bf=style_bf,
                style_wp=style_wp, style_bp=style_bp,
                color_film_wx=color_film_wx, color_film_wd=color_film_wd,
                color_film_b=color_film_b,
                density_w=density_w, density_b=density_b,
                color_w=color_w, color_b=color_b)


if __name__ == "__main__":
    # Small shapes consistent with the module: 3-D points, a w-latent per layer.
    B, N = 2, 512
    w_dim, in_channels, num_layers, hidden = 32, 3, 3, 32
    grid_scale = 0.24

    key = jax.random.PRNGKey(0)
    k_pts, k_dir, k_lat, k_par = jax.random.split(key, 4)
    points = jax.random.uniform(k_pts, (B, N, 3), jnp.float32, -0.12, 0.12)
    ray_dirs = jax.random.normal(k_dir, (B, N, 3), jnp.float32)
    ray_dirs = ray_dirs / jnp.linalg.norm(ray_dirs, axis=-1, keepdims=True)
    latents = jax.random.normal(k_lat, (B, num_layers + 1, w_dim), jnp.float32)
    params = make_params(k_par, w_dim, in_channels, num_layers, hidden)

    # TODO(synk): the module's unused `lod` buffer has no effect on forward()
    # and is omitted.
    out = mlp_network_pallas(points, latents, ray_dirs, params,
                             grid_scale=grid_scale, tile_n=1024)
    jax.block_until_ready(out)

    ref = mlp_network_ref(points, latents, ray_dirs, params,
                          grid_scale=grid_scale)
    assert out["density"].shape == (B, N, 1) and out["color"].shape == (B, N, 3)
    assert jnp.allclose(out["density"], ref["density"], atol=1e-2, rtol=1e-2)
    assert jnp.allclose(out["color"], ref["color"], atol=1e-2, rtol=1e-2)
    print("KERNEL_OK")
</pallas_src>

<mosaic_0001>
module attributes {stable_mosaic.version = 11 : i64} {
  func.func @_mlp_kernel(%arg0: i32, %arg1: i32, %arg2: memref<1x2x3x512xbf16, #tpu.memory_space<vmem>>, %arg3: memref<1x4x32x1xf32, #tpu.memory_space<vmem>>, %arg4: memref<1x4x32x1xf32, #tpu.memory_space<vmem>>, %arg5: memref<32x3xbf16, #tpu.memory_space<vmem>>, %arg6: memref<2x32x32xbf16, #tpu.memory_space<vmem>>, %arg7: memref<32x32xbf16, #tpu.memory_space<vmem>>, %arg8: memref<32x3xbf16, #tpu.memory_space<vmem>>, %arg9: memref<1x32xbf16, #tpu.memory_space<vmem>>, %arg10: memref<1x1xf32, #tpu.memory_space<vmem>>, %arg11: memref<3x32xbf16, #tpu.memory_space<vmem>>, %arg12: memref<3x1xf32, #tpu.memory_space<vmem>>, %arg13: memref<1x4x512xf32, #tpu.memory_space<vmem>>) attributes {dimension_semantics = [#tpu.dimension_semantics<parallel>, #tpu.dimension_semantics<parallel>], iteration_bounds = array<i64: 2, 1>, scalar_prefetch = 0 : i64, scratch_operands = 0 : i64, tpu.core_type = #tpu.core_type<tc>, window_params = [{transform_indices = @transform_0, window_bounds = array<i64: 1, 2, 3, 512>}, {transform_indices = @transform_1, window_bounds = array<i64: 1, 4, 32, 1>}, {transform_indices = @transform_2, window_bounds = array<i64: 1, 4, 32, 1>}, {pipeline_mode = #tpu.pipeline_mode<synchronous>, transform_indices = @transform_3, window_bounds = array<i64: 32, 3>}, {pipeline_mode = #tpu.pipeline_mode<synchronous>, transform_indices = @transform_4, window_bounds = array<i64: 2, 32, 32>}, {pipeline_mode = #tpu.pipeline_mode<synchronous>, transform_indices = @transform_5, window_bounds = array<i64: 32, 32>}, {pipeline_mode = #tpu.pipeline_mode<synchronous>, transform_indices = @transform_6, window_bounds = array<i64: 32, 3>}, {pipeline_mode = #tpu.pipeline_mode<synchronous>, transform_indices = @transform_7, window_bounds = array<i64: 1, 32>}, {pipeline_mode = #tpu.pipeline_mode<synchronous>, transform_indices = @transform_8, window_bounds = array<i64: 1, 1>}, {pipeline_mode = #tpu.pipeline_mode<synchronous>, transform_indices = @transform_9, window_bounds = array<i64: 3, 32>}, {pipeline_mode = #tpu.pipeline_mode<synchronous>, transform_indices = @transform_10, window_bounds = array<i64: 3, 1>}, {transform_indices = @transform_11, window_bounds = array<i64: 1, 4, 512>}]} {
    %c0 = arith.constant 0 : index
    %c0_0 = arith.constant 0 : index
    %c0_1 = arith.constant 0 : index
    %c0_2 = arith.constant 0 : index
    %0 = vector.load %arg2[%c0, %c0_0, %c0_1, %c0_2] : memref<1x2x3x512xbf16, #tpu.memory_space<vmem>>, vector<1x1x3x512xbf16>
    %1 = vector.shape_cast %0 : vector<1x1x3x512xbf16> to vector<3x512xbf16>
    %c0_3 = arith.constant 0 : index
    %c1 = arith.constant 1 : index
    %c0_4 = arith.constant 0 : index
    %c0_5 = arith.constant 0 : index
    %2 = vector.load %arg2[%c0_3, %c1, %c0_4, %c0_5] : memref<1x2x3x512xbf16, #tpu.memory_space<vmem>>, vector<1x1x3x512xbf16>
    %3 = vector.shape_cast %2 : vector<1x1x3x512xbf16> to vector<3x512xbf16>
    %c0_6 = arith.constant 0 : index
    %c0_7 = arith.constant 0 : index
    %4 = vector.load %arg5[%c0_6, %c0_7] : memref<32x3xbf16, #tpu.memory_space<vmem>>, vector<32x3xbf16>
    %cst = arith.constant dense<0.000000e+00> : vector<32x512xf32>
    %5 = tpu.matmul %4, %1, %cst {dimension_numbers = #tpu.dot_dimension_numbers<[1], [0], [0], [1], [0, 0, 1, 1], [], []>} : vector<32x3xbf16>, vector<3x512xbf16>, vector<32x512xf32> -> vector<32x512xf32>
    %c0_8 = arith.constant 0 : index
    %c0_9 = arith.constant 0 : index
    %c0_10 = arith.constant 0 : index
    %c0_11 = arith.constant 0 : index
    %6 = vector.load %arg3[%c0_8, %c0_9, %c0_10, %c0_11] : memref<1x4x32x1xf32, #tpu.memory_space<vmem>>, vector<1x1x32x1xf32>
    %7 = vector.shape_cast %6 : vector<1x1x32x1xf32> to vector<32x1xf32>
    %8 = vector.broadcast %7 : vector<32x1xf32> to vector<32x512xf32>
    %9 = arith.mulf %8, %5 : vector<32x512xf32>
    %c0_12 = arith.constant 0 : index
    %c0_13 = arith.constant 0 : index
    %c0_14 = arith.constant 0 : index
    %c0_15 = arith.constant 0 : index
    %10 = vector.load %arg4[%c0_12, %c0_13, %c0_14, %c0_15] : memref<1x4x32x1xf32, #tpu.memory_space<vmem>>, vector<1x1x32x1xf32>
    %11 = vector.shape_cast %10 : vector<1x1x32x1xf32> to vector<32x1xf32>
    %12 = vector.broadcast %11 : vector<32x1xf32> to vector<32x512xf32>
    %13 = arith.addf %9, %12 : vector<32x512xf32>
    %14 = math.sin %13 : vector<32x512xf32>
    %c0_16 = arith.constant 0 : index
    %c0_17 = arith.constant 0 : index
    %c0_18 = arith.constant 0 : index
    %15 = vector.load %arg6[%c0_16, %c0_17, %c0_18] : memref<2x32x32xbf16, #tpu.memory_space<vmem>>, vector<1x32x32xbf16>
    %16 = vector.shape_cast %15 : vector<1x32x32xbf16> to vector<32x32xbf16>
    %cst_19 = arith.constant dense<0.000000e+00> : vector<32x512xf32>
    %17 = tpu.matmul %16, %14, %cst_19 {dimension_numbers = #tpu.dot_dimension_numbers<[1], [0], [0], [1], [0, 0, 1, 1], [], []>} : vector<32x32xbf16>, vector<32x512xf32>, vector<32x512xf32> -> vector<32x512xf32>
    %c0_20 = arith.constant 0 : index
    %c1_21 = arith.constant 1 : index
    %c0_22 = arith.constant 0 : index
    %c0_23 = arith.constant 0 : index
    %18 = vector.load %arg3[%c0_20, %c1_21, %c0_22, %c0_23] : memref<1x4x32x1xf32, #tpu.memory_space<vmem>>, vector<1x1x32x1xf32>
    %19 = vector.shape_cast %18 : vector<1x1x32x1xf32> to vector<32x1xf32>
    %20 = vector.broadcast %19 : vector<32x1xf32> to vector<32x512xf32>
    %21 = arith.mulf %20, %17 : vector<32x512xf32>
    %c0_24 = arith.constant 0 : index
    %c1_25 = arith.constant 1 : index
    %c0_26 = arith.constant 0 : index
    %c0_27 = arith.constant 0 : index
    %22 = vector.load %arg4[%c0_24, %c1_25, %c0_26, %c0_27] : memref<1x4x32x1xf32, #tpu.memory_space<vmem>>, vector<1x1x32x1xf32>
    %23 = vector.shape_cast %22 : vector<1x1x32x1xf32> to vector<32x1xf32>
    %24 = vector.broadcast %23 : vector<32x1xf32> to vector<32x512xf32>
    %25 = arith.addf %21, %24 : vector<32x512xf32>
    %26 = math.sin %25 : vector<32x512xf32>
    %c1_28 = arith.constant 1 : index
    %c0_29 = arith.constant 0 : index
    %c0_30 = arith.constant 0 : index
    %27 = vector.load %arg6[%c1_28, %c0_29, %c0_30] : memref<2x32x32xbf16, #tpu.memory_space<vmem>>, vector<1x32x32xbf16>
    %28 = vector.shape_cast %27 : vector<1x32x32xbf16> to vector<32x32xbf16>
    %cst_31 = arith.constant dense<0.000000e+00> : vector<32x512xf32>
    %29 = tpu.matmul %28, %26, %cst_31 {dimension_numbers = #tpu.dot_dimension_numbers<[1], [0], [0], [1], [0, 0, 1, 1], [], []>} : vector<32x32xbf16>, vector<32x512xf32>, vector<32x512xf32> -> vector<32x512xf32>
    %c0_32 = arith.constant 0 : index
    %c2 = arith.constant 2 : index
    %c0_33 = arith.constant 0 : index
    %c0_34 = arith.constant 0 : index
    %30 = vector.load %arg3[%c0_32, %c2, %c0_33, %c0_34] : memref<1x4x32x1xf32, #tpu.memory_space<vmem>>, vector<1x1x32x1xf32>
    %31 = vector.shape_cast %30 : vector<1x1x32x1xf32> to vector<32x1xf32>
    %32 = vector.broadcast %31 : vector<32x1xf32> to vector<32x512xf32>
    %33 = arith.mulf %32, %29 : vector<32x512xf32>
    %c0_35 = arith.constant 0 : index
    %c2_36 = arith.constant 2 : index
    %c0_37 = arith.constant 0 : index
    %c0_38 = arith.constant 0 : index
    %34 = vector.load %arg4[%c0_35, %c2_36, %c0_37, %c0_38] : memref<1x4x32x1xf32, #tpu.memory_space<vmem>>, vector<1x1x32x1xf32>
    %35 = vector.shape_cast %34 : vector<1x1x32x1xf32> to vector<32x1xf32>
    %36 = vector.broadcast %35 : vector<32x1xf32> to vector<32x512xf32>
    %37 = arith.addf %33, %36 : vector<32x512xf32>
    %38 = math.sin %37 : vector<32x512xf32>
    %c0_39 = arith.constant 0 : index
    %c0_40 = arith.constant 0 : index
    %39 = vector.load %arg9[%c0_39, %c0_40] : memref<1x32xbf16, #tpu.memory_space<vmem>>, vector<1x32xbf16>
    %cst_41 = arith.constant dense<0.000000e+00> : vector<1x512xf32>
    %40 = tpu.matmul %39, %38, %cst_41 {dimension_numbers = #tpu.dot_dimension_numbers<[1], [0], [0], [1], [0, 0, 1, 1], [], []>} : vector<1x32xbf16>, vector<32x512xf32>, vector<1x512xf32> -> vector<1x512xf32>
    %c0_42 = arith.constant 0 : index
    %c0_43 = arith.constant 0 : index
    %41 = vector.load %arg10[%c0_42, %c0_43] : memref<1x1xf32, #tpu.memory_space<vmem>>, vector<1x1xf32>
    %42 = vector.broadcast %41 : vector<1x1xf32> to vector<1x512xf32>
    %43 = arith.addf %40, %42 : vector<1x512xf32>
    %c0_44 = arith.constant 0 : index
    %c0_45 = arith.constant 0 : index
    %44 = vector.load %arg7[%c0_44, %c0_45] : memref<32x32xbf16, #tpu.memory_space<vmem>>, vector<32x32xbf16>
    %cst_46 = arith.constant dense<0.000000e+00> : vector<32x512xf32>
    %45 = tpu.matmul %44, %38, %cst_46 {dimension_numbers = #tpu.dot_dimension_numbers<[1], [0], [0], [1], [0, 0, 1, 1], [], []>} : vector<32x32xbf16>, vector<32x512xf32>, vector<32x512xf32> -> vector<32x512xf32>
    %c0_47 = arith.constant 0 : index
    %c0_48 = arith.constant 0 : index
    %46 = vector.load %arg8[%c0_47, %c0_48] : memref<32x3xbf16, #tpu.memory_space<vmem>>, vector<32x3xbf16>
    %cst_49 = arith.constant dense<0.000000e+00> : vector<32x512xf32>
    %47 = tpu.matmul %46, %3, %cst_49 {dimension_numbers = #tpu.dot_dimension_numbers<[1], [0], [0], [1], [0, 0, 1, 1], [], []>} : vector<32x3xbf16>, vector<3x512xbf16>, vector<32x512xf32> -> vector<32x512xf32>
    %48 = arith.addf %45, %47 : vector<32x512xf32>
    %c0_50 = arith.constant 0 : index
    %c3 = arith.constant 3 : index
    %c0_51 = arith.constant 0 : index
    %c0_52 = arith.constant 0 : index
    %49 = vector.load %arg3[%c0_50, %c3, %c0_51, %c0_52] : memref<1x4x32x1xf32, #tpu.memory_space<vmem>>, vector<1x1x32x1xf32>
    %50 = vector.shape_cast %49 : vector<1x1x32x1xf32> to vector<32x1xf32>
    %51 = vector.broadcast %50 : vector<32x1xf32> to vector<32x512xf32>
    %52 = arith.mulf %51, %48 : vector<32x512xf32>
    %c0_53 = arith.constant 0 : index
    %c3_54 = arith.constant 3 : index
    %c0_55 = arith.constant 0 : index
    %c0_56 = arith.constant 0 : index
    %53 = vector.load %arg4[%c0_53, %c3_54, %c0_55, %c0_56] : memref<1x4x32x1xf32, #tpu.memory_space<vmem>>, vector<1x1x32x1xf32>
    %54 = vector.shape_cast %53 : vector<1x1x32x1xf32> to vector<32x1xf32>
    %55 = vector.broadcast %54 : vector<32x1xf32> to vector<32x512xf32>
    %56 = arith.addf %52, %55 : vector<32x512xf32>
    %57 = math.sin %56 : vector<32x512xf32>
    %c0_57 = arith.constant 0 : index
    %c0_58 = arith.constant 0 : index
    %58 = vector.load %arg11[%c0_57, %c0_58] : memref<3x32xbf16, #tpu.memory_space<vmem>>, vector<3x32xbf16>
    %cst_59 = arith.constant dense<0.000000e+00> : vector<3x512xf32>
    %59 = tpu.matmul %58, %57, %cst_59 {dimension_numbers = #tpu.dot_dimension_numbers<[1], [0], [0], [1], [0, 0, 1, 1], [], []>} : vector<3x32xbf16>, vector<32x512xf32>, vector<3x512xf32> -> vector<3x512xf32>
    %c0_60 = arith.constant 0 : index
    %c0_61 = arith.constant 0 : index
    %60 = vector.load %arg12[%c0_60, %c0_61] : memref<3x1xf32, #tpu.memory_space<vmem>>, vector<3x1xf32>
    %61 = vector.broadcast %60 : vector<3x1xf32> to vector<3x512xf32>
    %62 = arith.addf %59, %61 : vector<3x512xf32>
    %63 = arith.negf %62 : vector<3x512xf32>
    %64 = math.exp %63 : vector<3x512xf32>
    %cst_62 = arith.constant 1.000000e+00 : f32
    %65 = vector.broadcast %cst_62 : f32 to vector<3x512xf32>
    %66 = arith.addf %65, %64 : vector<3x512xf32>
    %67 = arith.divf %65, %66 : vector<3x512xf32>
    %68 = tpu.concatenate %43, %67 in 0 : vector<1x512xf32>, vector<3x512xf32> -> vector<4x512xf32>
    %c0_63 = arith.constant 0 : index
    %c0_64 = arith.constant 0 : index
    %c0_65 = arith.constant 0 : index
    %69 = vector.load %arg13[%c0_63, %c0_64, %c0_65] : memref<1x4x512xf32, #tpu.memory_space<vmem>>, vector<1x4x512xf32>
    %70 = vector.shape_cast %69 : vector<1x4x512xf32> to vector<4x512xf32>
    %71 = vector.shape_cast %68 : vector<4x512xf32> to vector<1x4x512xf32>
    tpu.vector_store %arg13[%c0_63, %c0_64, %c0_65], %71 {strides = array<i32>} : memref<1x4x512xf32, #tpu.memory_space<vmem>>, vector<1x4x512xf32>,
    return
  }
  func.func @transform_0(%arg0: i32, %arg1: i32) -> (i32, i32, i32, i32) {
    %c0_i32 = arith.constant 0 : i32
    %c0_i32_0 = arith.constant 0 : i32
    %c0_i32_1 = arith.constant 0 : i32
    return %arg0, %c0_i32, %c0_i32_0, %arg1 : i32, i32, i32, i32
  }
  func.func @transform_1(%arg0: i32, %arg1: i32) -> (i32, i32, i32, i32) {
    %c0_i32 = arith.constant 0 : i32
    %c0_i32_0 = arith.constant 0 : i32
    %c0_i32_1 = arith.constant 0 : i32
    %c0_i32_2 = arith.constant 0 : i32
    return %arg0, %c0_i32, %c0_i32_0, %c0_i32_1 : i32, i32, i32, i32
  }
  func.func @transform_2(%arg0: i32, %arg1: i32) -> (i32, i32, i32, i32) {
    %c0_i32 = arith.constant 0 : i32
    %c0_i32_0 = arith.constant 0 : i32
    %c0_i32_1 = arith.constant 0 : i32
    %c0_i32_2 = arith.constant 0 : i32
    return %arg0, %c0_i32, %c0_i32_0, %c0_i32_1 : i32, i32, i32, i32
  }
  func.func @transform_3(%arg0: i32, %arg1: i32) -> (i32, i32) {
    %c0_i32 = arith.constant 0 : i32
    %c0_i32_0 = arith.constant 0 : i32
    %c0_i32_1 = arith.constant 0 : i32
    return %c0_i32, %c0_i32_0 : i32, i32
  }
  func.func @transform_4(%arg0: i32, %arg1: i32) -> (i32, i32, i32) {
    %c0_i32 = arith.constant 0 : i32
    %c0_i32_0 = arith.constant 0 : i32
    %c0_i32_1 = arith.constant 0 : i32
    %c0_i32_2 = arith.constant 0 : i32
    return %c0_i32, %c0_i32_0, %c0_i32_1 : i32, i32, i32
  }
  func.func @transform_5(%arg0: i32, %arg1: i32) -> (i32, i32) {
    %c0_i32 = arith.constant 0 : i32
    %c0_i32_0 = arith.constant 0 : i32
    %c0_i32_1 = arith.constant 0 : i32
    return %c0_i32, %c0_i32_0 : i32, i32
  }
  func.func @transform_6(%arg0: i32, %arg1: i32) -> (i32, i32) {
    %c0_i32 = arith.constant 0 : i32
    %c0_i32_0 = arith.constant 0 : i32
    %c0_i32_1 = arith.constant 0 : i32
    return %c0_i32, %c0_i32_0 : i32, i32
  }
  func.func @transform_7(%arg0: i32, %arg1: i32) -> (i32, i32) {
    %c0_i32 = arith.constant 0 : i32
    %c0_i32_0 = arith.constant 0 : i32
    %c0_i32_1 = arith.constant 0 : i32
    return %c0_i32, %c0_i32_0 : i32, i32
  }
  func.func @transform_8(%arg0: i32, %arg1: i32) -> (i32, i32) {
    %c0_i32 = arith.constant 0 : i32
    %c0_i32_0 = arith.constant 0 : i32
    %c0_i32_1 = arith.constant 0 : i32
    return %c0_i32, %c0_i32_0 : i32, i32
  }
  func.func @transform_9(%arg0: i32, %arg1: i32) -> (i32, i32) {
    %c0_i32 = arith.constant 0 : i32
    %c0_i32_0 = arith.constant 0 : i32
    %c0_i32_1 = arith.constant 0 : i32
    return %c0_i32, %c0_i32_0 : i32, i32
  }
  func.func @transform_10(%arg0: i32, %arg1: i32) -> (i32, i32) {
    %c0_i32 = arith.constant 0 : i32
    %c0_i32_0 = arith.constant 0 : i32
    %c0_i32_1 = arith.constant 0 : i32
    return %c0_i32, %c0_i32_0 : i32, i32
  }
  func.func @transform_11(%arg0: i32, %arg1: i32) -> (i32, i32, i32) {
    %c0_i32 = arith.constant 0 : i32
    %c0_i32_0 = arith.constant 0 : i32
    return %arg0, %c0_i32, %arg1 : i32, i32, i32
  }
}

</mosaic_0001>

<bundles_post_ra>
// kernel: tpu_custom_call.1
= control target key start
LH: loop header
LB: loop body
LE: loop exit
PB: predicated region body
PF: predicated region fallthrough
CT: control target
= control target key end

     0   :  { %s16732_s0 = inlined_call_operand.vmem [shape: bf16[2,2,3,512], index: 0, kind: input, shape index: {}]   ;;  %s16733_s1 = inlined_call_operand.vmem [shape: f32[2,4,32,1], index: 1, kind: input, shape index: {}]   ;;  %s16734_s2 = inlined_call_operand.vmem [shape: f32[2,4,32,1], index: 2, kind: input, shape index: {}]   ;;  %s16735_s3 = inlined_call_operand.vmem [shape: bf16[32,3], index: 3, kind: input, shape index: {}]   ;;  %s16736_s4 = inlined_call_operand.vmem [shape: bf16[2,32,32], index: 4, kind: input, shape index: {}]   ;;  %s16737_s5 = inlined_call_operand.vmem [shape: bf16[32,32], index: 5, kind: input, shape index: {}]   ;;  %s16738_s6 = inlined_call_operand.vmem [shape: bf16[32,3], index: 6, kind: input, shape index: {}]   ;;  %s16739_s7 = inlined_call_operand.vmem [shape: bf16[1,32], index: 7, kind: input, shape index: {}]   ;;  %s16740_s8 = inlined_call_operand.<no memory space> [shape: f32[1,1], index: 8, kind: input, shape index: {}]   ;;  %s16741_s9 = inlined_call_operand.vmem [shape: bf16[3,32], index: 9, kind: input, shape index: {}]   ;;  %s16742_s10 = inlined_call_operand.vmem [shape: f32[3,1], index: 10, kind: input, shape index: {}]   ;;  %s16743_s11 = inlined_call_operand.hbm [shape: f32[2,4,512], index: 11, kind: output, shape index: {}]  }
   0x1   :  { %v16_v0 = vstv %s16740_s8 }
   0x2   :  { %17 = vst [vmem:[#allocation2] sm:$0x1] %v16_v0 }
   0x3   :  { %18 = vsyncpa [#allocation4], 0 }
   0x4   :  { %20 = vsyncpa [#allocation4 + $0x1], 0  ;;  %s10015_s19 = smov 0   ;;  %s10017_s20 = smov 0  }
   0x5   :  { %s10019_s21 = smov 0   ;;  %s10021_s22 = smov 0  }
   0x6   :  { %s10023_s23 = smov 0   ;;  %s10025_s24 = smov 0  }
   0x7 LB: > { %s8816_s8 = sadd.s32 4294967295, %s9940_s24   ;;  %s8817_s25 = sadd.s32 4294967294, %s9940_s24   ;;  %s9940_s24 = sphi %s10025_s24, %s26_s24   ;;  %s9936_s23 = sphi %s10023_s23, %s17573_s23   ;;  %s9932_s22 = sphi %s10021_s22, %s17572_s22   ;;  %s9928_s21 = sphi %s10019_s21, %s17571_s21   ;;  %s9924_s20 = sphi %s10017_s20, %s17570_s20   ;;  %s9920_s19 = sphi %s10015_s19, %s17569_s19  }
   0x8   : > { %s38_s26 = sadd.s32 1, %s9936_s23  ;;  %s295_s27 = sadd.s32 1, %s9928_s21 }
   0x9   : > { %p40_p0 = scmp.ge.s32.totalorder %s38_s26, 2  ;;  %p305_p1 = scmp.ne.s32.totalorder %s9928_s21, %s9924_s20 }
   0xa   : > { %p306_p2 = scmp.eq.s32.totalorder %s8816_s8, 1  ;;  %p311_p3 = scmp.ne.s32.totalorder %s9924_s20, %s9920_s19 }
   0xb   : > { %s17575_s26 = smov (%p40_p0, %s38_s26), 0  ;;  %p312_p5 = scmp.eq.s32.totalorder %s8817_s25, 1 }
   0xc   : > { %16986 = sst [smem:[#allocation6_spill]] %s17575_s26  ;;  %p10055_p4 = por %p306_p2, %p305_p1 }
   0xd   : > { %s290_s29 = ssub.s32 %s9936_s23, %s17575_s26  ;;  %p8820_p6 = scmp.ge.s32.totalorder %s9940_s24, 1 }
   0xe   : > { %p293_p7 = scmp.eq.s32.totalorder %s290_s29, 0  ;;  %p10062_p8 = por %p312_p5, %p311_p3 }
   0xf   : > { %p383_p9 = scmp.lt.s32.totalorder %s9940_s24, 3 }
  0x10   : > { %s10068_s12 = scalar_select %p293_p7, %s9928_s21, %s295_s27  }
  0x11   : > { %p384_p10 = pnand %p8820_p6, %p383_p9 }
  0x13   : > { %387 = sbr.rel (%p384_p10) target bundleno = 2826 (0xb0a), region = 64 }
  0x1a   : > { %p438_p11 = scmp.lt.s32.totalorder %s9932_s22, 1  ;;  %v481_v1 = vlaneseq  ;;  %vm16805_vm0 = vcmask 1040384   ;;  %v9942_v2 = vmov 1983009808   ;;  %v16745_v5 = vmov 0   ;;  %v9580_v26 = vld [vmem:[%s16735_s3] sm:$0xff]  }
  0x1b   : > { %v479_v3 = vunpack.c.l.s4 %v9942_v2  ;;  %549 = vmatprep.mubr.bf16.mxu0 %v16745_v5  ;;  %602 = vmatprep.mubr.bf16.mxu1 %v16745_v5  ;;  %vm502_vm1 = vcmask 1041408   ;;  %v9944_v7 = vmov 65535   ;;  %vm16806_vm2 = vcmask 23552   ;;  %v9581_v31 = vld [vmem:[%s16735_s3 + $0x8] sm:$0xff]   ;;  %v8494_v55 = vld [vmem:[%s16742_s10] sm:$0x7] }
  0x1c   : > { %s439_s13 = scalar_select %p438_p11, %s9932_s22, 1  ;;  %v10072_v4 = vshrl.u32 %v481_v1, 7  ;;  %9576 = vset.pattern.permute.xlu0 %v16745_v5  ;;  %9577 = vset.pattern.permute.xlu1 %v16745_v5  ;;  %v503_v8 = vsel %vm16805_vm0, 4294967295, %v9944_v7  ;;  %v6242_v56 = vld [vmem:[#allocation2] sm:$0x1] }
  0x1d   : > { %v480_v6 = vunpack.c.0.s8 %v479_v3  ;;  %v10100_v13 = vsel %vm502_vm1, %v503_v8, 0  ;;  %s434_s8 = sand.u32 1, %s9924_s20   ;;  %s9951_s17 = smov [#allocation3]  }
  0x1e   : > { %16989 = vst [vmem:[#allocation7_spill] sm:$0xff] %v10072_v4  ;;  %s9156_s14 = sshll.u32 %s439_s13, 4  ;;  %s9157_s15 = sshll.u32 %s439_s13, 7  ;;  %16991 = vst [vmem:[#allocation9_spill] sm:$0xff] %v10100_v13 }
  0x1f   : > { %s10082_s18 = scalar_lea.vmem %s16732_s0, %s9156_s14  ;;  %s10087_s27 = scalar_lea.vmem %s16733_s1, %s9157_s15  ;;  %v10090_v9 = vsub.s32 %v480_v6, %v10072_v4 }
  0x20   : > { %s10095_s26 = scalar_lea.vmem %s16734_s2, %s9157_s15  ;;  %v459_v10 = vld [vmem:[%s10082_s18] sm:$0xff]  ;;  %v624_v16 = vld [vmem:[%s10087_s27 + $0x8] sm:$0xff]  ;;  %v625_v24 = vld [vmem:[%s10087_s27 + $0x10] sm:$0xff]  ;;  %s8821_s25 = sshll.u32 %s434_s8, 4 }
  0x21   : > { %16990 = vst [vmem:[#allocation8_spill] sm:$0xff] %v10090_v9  ;;  %v623_v11 = vld [vmem:[%s10087_s27] sm:$0xff]  ;;  %v484_v12 = vrot.slane %v459_v10, %v10090_v9  ;;  %v477_v14 = vcombine.high %v459_v10, %v459_v10  ;;  %v664_v19 = vld [vmem:[%s10095_s26 + $0x8] sm:$0xff]  ;;  %v626_v27 = vld [vmem:[%s10087_s27 + $0x18] sm:$0xff]  ;;  %s8700_s16 = scalar_lea.sflag [#allocation4], %s434_s8 }
  0x22   : > { %629 = vperm.xlu0 %9576, %v623_v11   ;;  %v663_v15 = vld [vmem:[%s10095_s26] sm:$0xff]  ;;  %v665_v28 = vld [vmem:[%s10095_s26 + $0x10] sm:$0xff]  ;;  %v666_v29 = vld [vmem:[%s10095_s26 + $0x18] sm:$0xff] }
  0x23   : > { %669 = vperm.xlu1 %9577, %v663_v15   ;;  %v492_v17 = vcombine.high %v484_v12, %v484_v12  ;;  %v491_v18 = vrot.slane %v477_v14, %v10090_v9  ;;  %v506_v20 = vand.u32 %v10100_v13, %v484_v12  ;;  %v8905_v30 = vld [vmem:[%s10087_s27 + $0x20] sm:$0xff]  ;;  %v8906_v32 = vld [vmem:[%s10087_s27 + $0x28] sm:$0xff]  ;;  %v8907_v35 = vld [vmem:[%s10087_s27 + $0x30] sm:$0xff]  ;;  %v17014_v9 = vmov 0 }
  0x24   : > { %v8909_v33 = vld [vmem:[%s10095_s26 + $0x20] sm:$0xff]  ;;  %v8910_v34 = vld [vmem:[%s10095_s26 + $0x28] sm:$0xff]  ;;  %v8908_v36 = vld [vmem:[%s10087_s27 + $0x38] sm:$0xff] }
  0x25   : > { %v509_v21 = vand.u32 %v10100_v13, %v492_v17  ;;  %v493_v22 = vcombine.high %v491_v18, %v491_v18  ;;  %v512_v23 = vand.u32 %v10100_v13, %v491_v18  ;;  %v8911_v37 = vld [vmem:[%s10095_s26 + $0x30] sm:$0xff]  ;;  %v8912_v38 = vld [vmem:[%s10095_s26 + $0x38] sm:$0xff]  ;;  %v8987_v39 = vld [vmem:[%s10087_s27 + $0x40] sm:$0xff] }
  0x26   : > { %634 = vperm.xlu0 %9576, %v624_v16   ;;  %v8988_v40 = vld [vmem:[%s10087_s27 + $0x48] sm:$0xff]  ;;  %v8991_v41 = vld [vmem:[%s10095_s26 + $0x40] sm:$0xff]  ;;  %v8989_v43 = vld [vmem:[%s10087_s27 + $0x50] sm:$0xff] }
  0x27   : > { %674 = vperm.xlu1 %9577, %v664_v19   ;;  %517 = vmatprep.subr.bf16.mxu0 %v509_v21  ;;  %v515_v25 = vand.u32 %v10100_v13, %v493_v22  ;;  %v8992_v42 = vld [vmem:[%s10095_s26 + $0x48] sm:$0xff]  ;;  %v8990_v44 = vld [vmem:[%s10087_s27 + $0x58] sm:$0xff]  ;;  %v8993_v45 = vld [vmem:[%s10095_s26 + $0x50] sm:$0xff] }
  0x28   : > { %518 = vmatpush1.bf16.msra.mxu0 %v506_v20  ;;  %v8994_v46 = vld [vmem:[%s10095_s26 + $0x58] sm:$0xff]  ;;  %v9073_v47 = vld [vmem:[%s10087_s27 + $0x60] sm:$0xff]  ;;  %v9074_v48 = vld [vmem:[%s10087_s27 + $0x68] sm:$0xff] }
  0x29   : > { %570 = vmatprep.subr.bf16.mxu1 %v515_v25  ;;  %v9077_v49 = vld [vmem:[%s10095_s26 + $0x60] sm:$0xff]  ;;  %v9078_v50 = vld [vmem:[%s10095_s26 + $0x68] sm:$0xff]  ;;  %v9075_v51 = vld [vmem:[%s10087_s27 + $0x70] sm:$0xff] }
  0x2a   : > { %639 = vperm.xlu0 %9576, %v625_v24   ;;  %571 = vmatpush1.bf16.msra.mxu1 %v512_v23  ;;  %v9076_v52 = vld [vmem:[%s10087_s27 + $0x78] sm:$0xff]  ;;  %v9079_v53 = vld [vmem:[%s10095_s26 + $0x70] sm:$0xff]  ;;  %s9159_s27 = sshll.u32 %s9932_s22, 8 }
  0x2b   : > { %644 = vperm.xlu1 %9577, %v626_v27   ;;  %8831 = vmatmul.mubr.msk.bf16.vlgmr.msra.gmra.mrb[0].mxu0 %vm16806_vm2, %v9580_v26  ;;  %v9080_v54 = vld [vmem:[%s10095_s26 + $0x78] sm:$0xff]  ;;  %s436_s26 = scalar_lea.vmem [#allocation3], %s8821_s25  ;;  %s16683_s15 = scalar_lea.hbm %s16743_s11, %s9159_s27 }
  0x2c   : > { %559 = vmatprep.mubr.bf16.mxu0 %v16745_v5  ;;  %s8716_s29 = sshll.u32 %s436_s26, 4  ;;  %s16685_s29 = int_to_ptr.vmem [resolvable:$true] %s8716_s29 }
  0x2d   : > { %8833 = vmatmul.mubr.msk.bf16.vlgmr.msra.gmra.mrb[0].mxu1 %vm16806_vm2, %v9580_v26  ;;  %s9862_s22 = scalar_lea.vmem %s16685_s29, 256 }
  0x2e   : > { %679 = vperm.xlu0 %9576, %v665_v28   ;;  %612 = vmatprep.mubr.bf16.mxu1 %v16745_v5  ;;  %p9863_p12 = scmp.ne.s32.totalorder %s16685_s29, %s9862_s22 }
  0x2f   : > { %684 = vperm.xlu1 %9577, %v666_v29  }
  0x30   : > { %p9864_p13 = pnand %p9863_p12, %p10055_p4 }
  0x32   : > { %2565 = vperm.xlu0 %9576, %v8905_v30   ;;  %p9865_p0 = pneg %p9864_p13 }
  0x33   : > { %2570 = vperm.xlu1 %9577, %v8906_v32   ;;  %8832 = vmatmul.mubr.msk.bf16.gmra.mrb[4].mxu0 %vm16806_vm2, %v9581_v31 }
  0x34   : > { %2452 = vmatprep.mubr.bf16.mxu0 %v16745_v5 }
  0x35   : > { %8834 = vmatmul.mubr.msk.bf16.gmra.mrb[4].mxu1 %vm16806_vm2, %v9581_v31 }
  0x36   : > { %2606 = vperm.xlu0 %9576, %v8909_v33   ;;  %2537 = vmatprep.mubr.bf16.mxu1 %v16745_v5 }
  0x37   : > { %2611 = vperm.xlu1 %9577, %v8910_v34  }
  0x3a   : > { %2575 = vperm.xlu0 %9576, %v8907_v35  }
  0x3b   : > { %2580 = vperm.xlu1 %9577, %v8908_v36  }
  0x3e   : > { %2616 = vperm.xlu0 %9576, %v8911_v37  }
  0x3f   : > { %2621 = vperm.xlu1 %9577, %v8912_v38  }
  0x42   : > { %4502 = vperm.xlu0 %9576, %v8987_v39  }
  0x43   : > { %4507 = vperm.xlu1 %9577, %v8988_v40  }
  0x46   : > { %4543 = vperm.xlu0 %9576, %v8991_v41  }
  0x47   : > { %4548 = vperm.xlu1 %9577, %v8992_v42  }
  0x4a   : > { %4512 = vperm.xlu0 %9576, %v8989_v43  }
  0x4b   : > { %4517 = vperm.xlu1 %9577, %v8990_v44  }
  0x4e   : > { %4553 = vperm.xlu0 %9576, %v8993_v45  }
  0x4f   : > { %4558 = vperm.xlu1 %9577, %v8994_v46  }
  0x52   : > { %6754 = vperm.xlu0 %9576, %v9073_v47  }
  0x53   : > { %6759 = vperm.xlu1 %9577, %v9074_v48  }
  0x56   : > { %6795 = vperm.xlu0 %9576, %v9077_v49  }
  0x57   : > { %6800 = vperm.xlu1 %9577, %v9078_v50   ;;  %v16763_v50 = vmov 683565275  }
  0x5a   : > { %6764 = vperm.xlu0 %9576, %v9075_v51  }
  0x5b   : > { %6769 = vperm.xlu1 %9577, %v9076_v52   ;;  %v16761_v52 = vmov 2475754826  }
  0x5e   : > { %6805 = vperm.xlu0 %9576, %v9079_v53  }
  0x5f   : > { %6810 = vperm.xlu1 %9577, %v9080_v54  }
  0x62   : > { %8497 = vperm.xlu0 %9576, %v8494_v55   ;;  %v16758_v55 = vmov 2131351028  }
  0x63   : > { %6245 = vperm.xlu1 %9577, %v6242_v56  }
  0xa1   : > { %v10155_v57 = vpop.permute.xlu0 %629 }
  0xa2   : > { %v10157_v58 = vpop.permute.xlu1 %669 }
  0xa5   : > { %v10159_v60 = vpop.permute.xlu0 %634 }
  0xa6   : > { %v10172_v10 = vpop.permute.xlu1 %674 }
  0xfe   : > { %v551_v59 = vpop.f32.mrb[0].mxu0 }
  0xff   : > { %v647_v61 = vmul.f32 %v10155_v57, %v551_v59  ;;  %v553_v62 = vpop.f32.mrb[1].mxu0  ;;  %v16756_v59 = vmov 2102212464  }
 0x100   : > { %v648_v63 = vmul.f32 %v10155_v57, %v553_v62  ;;  %v555_v0 = vpop.f32.mrb[2].mxu0  ;;  %v604_v1 = vpop.f32.mrb[0].mxu1  ;;  %v16754_v62 = vmov 920167782  }
 0x101   : > { %v10164_v2 = vadd.f32 %v10157_v58, %v647_v61  ;;  %v651_v3 = vmul.f32 %v10159_v60, %v555_v0  ;;  %v649_v6 = vmul.f32 %v10155_v57, %v604_v1  ;;  %v10168_v7 = vpop.f32.mrb[3].mxu0  ;;  %v10170_v8 = vpop.f32.mrb[1].mxu1 }
 0x102   : > { %v10175_v11 = vadd.f32 %v10157_v58, %v648_v63  ;;  %v10177_v12 = vpop.f32.mrb[2].mxu1 }
 0x103   : > { %16992 = vst [vmem:[#allocation10_spill] sm:$0xff] %v10164_v2  ;;  %v16750_v14 = vand.u32 2147483647, %v10164_v2  ;;  %v706_v15 = vand.u32 2139095040, %v10164_v2  ;;  %v10182_v16 = vadd.f32 %v10172_v10, %v651_v3  ;;  %v10184_v17 = vpop.f32.mrb[3].mxu1  ;;  %v10191_v22 = vadd.f32 %v10157_v58, %v649_v6 }
 0x104   : > { %16993 = vst [vmem:[#allocation11_spill] sm:$0xff] %v10175_v11  ;;  %v16747_v18 = vand.u32 2147483647, %v10175_v11  ;;  %v810_v19 = vand.u32 2139095040, %v10175_v11 }
 0x105   : > { %16994 = vst [vmem:[#allocation12_spill] sm:$0xff] %v10182_v16  ;;  %v707_v20 = vshrl.u32 %v706_v15, 23  ;;  %v710_v21 = vand.u32 8388607, %v16750_v14  ;;  %16995 = vst [vmem:[#allocation13_spill] sm:$0xff] %v10191_v22  ;;  %v1122_v26 = vand.u32 2139095040, %v10182_v16 }
 0x106   : > { %v811_v23 = vshrl.u32 %v810_v19, 23  ;;  %v814_v24 = vand.u32 8388607, %v16747_v18  ;;  %v16749_v25 = vand.u32 2147483647, %v10182_v16  ;;  %v914_v36 = vand.u32 2139095040, %v10191_v22 }
 0x107   : > { %v8835_v27 = vadd.s32 4294967169, %v707_v20  ;;  %v711_v28 = vor.u32 8388608, %v710_v21  ;;  %v1123_v30 = vshrl.u32 %v1122_v26, 23  ;;  %v10202_v37 = vpop.f32.mrb[4].mxu0  ;;  %v16752_v19 = vmov 1326507024  }
 0x108   : > { %v8839_v29 = vadd.s32 4294967169, %v811_v23  ;;  %v815_v32 = vor.u32 8388608, %v814_v24  ;;  %v10199_v35 = vand.u32 8388607, %v16749_v25  ;;  %v915_v40 = vshrl.u32 %v914_v36, 23 }
 0x109   : > { %v713_v31 = vadd.s32 1, %v8835_v27  ;;  %v8851_v34 = vadd.s32 4294967169, %v1123_v30  ;;  %v10204_v39 = vshll.u32 %v711_v28, 8  ;;  %v17013_v13 = vand.u32 2147483647, %v10182_v16 }
 0x10a   : > { %v817_v33 = vadd.s32 1, %v8839_v29  ;;  %v10206_v44 = vshll.u32 %v815_v32, 8  ;;  %v1127_v47 = vor.u32 8388608, %v10199_v35  ;;  %v10217_v54 = vadd.s32 4294967169, %v915_v40 }
 0x10b   : > { %vm714_vm3 = vcmp.gt.s32.totalorder %v713_v31, 0  ;;  %v10213_v48 = vadd.s32 1, %v8851_v34 }
 0x10c   : > { %v715_v38 = vsel %vm714_vm3, %v713_v31, 0  ;;  %vm818_vm4 = vcmp.gt.s32.totalorder %v817_v33, 0 }
 0x10d   : > { %v716_v41 = vshrl.u32 %v715_v38, 5  ;;  %v717_v42 = vand.u32 31, %v715_v38  ;;  %v819_v43 = vsel %vm818_vm4, %v817_v33, 0  ;;  %vm1130_vm9 = vcmp.gt.s32.totalorder %v10213_v48, 0 }
 0x10e   : > { %v10208_v45 = vshrl.u32 %v819_v43, 5  ;;  %v10210_v46 = vand.u32 31, %v819_v43 }
 0x10f   : > { %v718_v49 = vsub.s32 32, %v717_v42  ;;  %v720_v51 = vshll.u32 %v16763_v50, %v717_v42  ;;  %v723_v53 = vshll.u32 %v16761_v52, %v717_v42  ;;  %v726_v56 = vshll.u32 %v16758_v55, %v717_v42 }
 0x110   : > { %v729_v61 = vshll.u32 %v16756_v59, %v717_v42  ;;  %v732_v63 = vshll.u32 %v16754_v62, %v717_v42  ;;  %vm735_vm5 = vcmp.lt.s32.totalorder %v716_v41, 1  ;;  %vm736_vm6 = vcmp.lt.s32.totalorder %v716_v41, 2 }
 0x111   : > { %v721_v0 = vshrl.u32 %v16761_v52, %v718_v49  ;;  %v724_v1 = vshrl.u32 %v16758_v55, %v718_v49  ;;  %v727_v3 = vshrl.u32 %v16756_v59, %v718_v49  ;;  %v719_v6 = vshrl.u32 %v16763_v50, %v718_v49 }
 0x112   : > { %v730_v15 = vshrl.u32 %v16754_v62, %v718_v49  ;;  %v733_v20 = vshrl.u32 %v16752_v19, %v718_v49  ;;  %vm737_vm7 = vcmp.lt.s32.totalorder %v716_v41, 3  ;;  %v822_v26 = vsub.s32 32, %v10210_v46 }
 0x113   : > { %v722_v21 = vor.u32 %v721_v0, %v720_v51  ;;  %v725_v23 = vor.u32 %v724_v1, %v723_v53  ;;  %v728_v24 = vor.u32 %v727_v3, %v726_v56  ;;  %vm738_vm8 = vcmp.lt.s32.totalorder %v716_v41, 4 }
 0x114   : > { %v731_v27 = vor.u32 %v730_v15, %v729_v61  ;;  %v734_v28 = vor.u32 %v733_v20, %v732_v63  ;;  %v824_v29 = vshll.u32 %v16763_v50, %v10210_v46  ;;  %v827_v40 = vshll.u32 %v16761_v52, %v10210_v46 }
 0x115   : > { %v739_v30 = vsel %vm735_vm5, %v719_v6, %v722_v21  ;;  %v740_v31 = vsel %vm738_vm8, %v728_v24, 2102212464  ;;  %v743_v32 = vsel %vm735_vm5, %v722_v21, %v725_v23  ;;  %v747_v33 = vsel %vm735_vm5, %v725_v23, %v728_v24 }
 0x116   : > { %v741_v34 = vsel %vm737_vm7, %v725_v23, %v740_v31  ;;  %v744_v36 = vsel %vm738_vm8, %v731_v27, 920167782  ;;  %v748_v38 = vsel %vm738_vm8, %v734_v28, 1326507024  ;;  %v823_v49 = vshrl.u32 %v16763_v50, %v822_v26 }
 0x117   : > { %v745_v42 = vsel %vm737_vm7, %v728_v24, %v744_v36  ;;  %v749_v43 = vsel %vm737_vm7, %v731_v27, %v748_v38  ;;  %v825_v51 = vshrl.u32 %v16761_v52, %v822_v26  ;;  %v742_v53 = vsel %vm736_vm6, %v739_v30, %v741_v34 }
 0x118   : > { %v746_v56 = vsel %vm736_vm6, %v743_v32, %v745_v42  ;;  %v750_v61 = vsel %vm736_vm6, %v747_v33, %v749_v43  ;;  %v828_v63 = vshrl.u32 %v16758_v55, %v822_v26  ;;  %v830_v21 = vshll.u32 %v16758_v55, %v10210_v46 }
 0x119   : > { %v10247_v0 = vmul.u32.u64.low %v10204_v39, %v750_v61  ;;  %v10248_v1 = vmul.u32.u64.high %v10204_v39, %v750_v61, %v10247_v0  ;;  %v10251_v3 = vmul.u32.u64.low %v10204_v39, %v746_v56  ;;  %v10252_v6 = vmul.u32.u64.high %v10204_v39, %v746_v56, %v10251_v3 }
 0x11a   : > { %v826_v15 = vor.u32 %v825_v51, %v824_v29  ;;  %v829_v20 = vor.u32 %v828_v63, %v827_v40  ;;  %v831_v23 = vshrl.u32 %v16756_v59, %v822_v26  ;;  %v758_v41 = vmul.u32 %v10204_v39, %v742_v53  ;;  %v10277_v53 = vpop.f32.mrb[5].mxu0 }
 0x11b   : > { %v833_v24 = vshll.u32 %v16756_v59, %v10210_v46  ;;  %v834_v27 = vshrl.u32 %v16754_v62, %v822_v26  ;;  %v837_v28 = vshrl.u32 %v16752_v19, %v822_v26  ;;  %v836_v31 = vshll.u32 %v16754_v62, %v10210_v46 }
 0x11c   : > { %v832_v30 = vor.u32 %v831_v23, %v830_v21  ;;  %vm839_vm10 = vcmp.lt.s32.totalorder %v10208_v45, 1  ;;  %vm840_vm11 = vcmp.lt.s32.totalorder %v10208_v45, 2  ;;  %vm760_vm12 = vc.u32 %v10248_v1, %v10251_v3 }
 0x11d   : > { %v761_v39 = vadd.s32 1, %v10252_v6  ;;  %v835_v29 = vor.u32 %v834_v27, %v833_v24  ;;  %vm841_vm13 = vcmp.lt.s32.totalorder %v10208_v45, 3  ;;  %v838_v32 = vor.u32 %v837_v28, %v836_v31 }
 0x11e   : > { %vm842_vm14 = vcmp.lt.s32.totalorder %v10208_v45, 4  ;;  %v843_v26 = vsel %vm839_vm10, %v823_v49, %v826_v15  ;;  %v847_v33 = vsel %vm839_vm10, %v826_v15, %v829_v20  ;;  %v851_v38 = vsel %vm839_vm10, %v829_v20, %v832_v30 }
 0x11f   : > { %v762_v34 = vsel %vm760_vm12, %v761_v39, %v10252_v6  ;;  %v844_v46 = vsel %vm842_vm14, %v832_v30, 2102212464  ;;  %v848_v36 = vsel %vm842_vm14, %v835_v29, 920167782  ;;  %v852_v51 = vsel %vm842_vm14, %v838_v32, 1326507024 }
 0x120   : > { %v763_v40 = vadd.s32 %v762_v34, %v758_v41  ;;  %v845_v42 = vsel %vm841_vm13, %v829_v20, %v844_v46  ;;  %v849_v43 = vsel %vm841_vm13, %v832_v30, %v848_v36  ;;  %v853_v61 = vsel %vm841_vm13, %v835_v29, %v852_v51 }
 0x121   : > { %v846_v56 = vsel %vm840_vm11, %v843_v26, %v845_v42  ;;  %v850_v49 = vsel %vm840_vm11, %v847_v33, %v849_v43  ;;  %v1131_v63 = vsel %vm1130_vm9, %v10213_v48, 0  ;;  %v854_v6 = vsel %vm840_vm11, %v851_v38, %v853_v61 }
 0x122   : > { %v764_v0 = vadd.s32 536870912, %v763_v40  ;;  %v10291_v15 = vmul.u32.u64.low %v10206_v44, %v850_v49  ;;  %v10292_v20 = vmul.u32.u64.high %v10206_v44, %v850_v49, %v10291_v15  ;;  %v10299_v41 = vshrl.u32 %v1131_v63, 5 }
 0x123   : > { %v10296_v21 = vmul.u32.u64.low %v10206_v44, %v854_v6  ;;  %v10297_v23 = vmul.u32.u64.high %v10206_v44, %v854_v6, %v10296_v21  ;;  %v1133_v27 = vand.u32 31, %v1131_v63  ;;  %v862_v48 = vmul.u32 %v10206_v44, %v846_v56 }
 0x124   : > { %v10301_v24 = vshrl.u32 %v764_v0, 30  ;;  %v10306_v45 = vshll.u32 %v1127_v47, 8  ;;  %v921_v28 = vadd.s32 1, %v10217_v54  ;;  %v865_v31 = vadd.s32 1, %v10292_v20 }
 0x125   : > { %v1134_v39 = vsub.s32 32, %v1133_v27  ;;  %vm1151_vm15 = vcmp.lt.s32.totalorder %v10299_v41, 1  ;;  %vm864_vm1 = vc.u32 %v10297_v23, %v10291_v15  ;;  %v1136_v29 = vshll.u32 %v16763_v50, %v1133_v27 }
 0x126   : > { %v766_v30 = vshll.u32 %v10301_v24, 30  ;;  %vm1152_vm3 = vcmp.lt.s32.totalorder %v10299_v41, 2  ;;  %vm1153_vm4 = vcmp.lt.s32.totalorder %v10299_v41, 3  ;;  %v866_v44 = vsel %vm864_vm1, %v865_v31, %v10292_v20 }
 0x127   : > { %v1135_v47 = vshrl.u32 %v16763_v50, %v1134_v39  ;;  %v1139_v54 = vshll.u32 %v16761_v52, %v1133_v27  ;;  %v867_v32 = vadd.s32 %v866_v44, %v862_v48  ;;  %v1137_v26 = vshrl.u32 %v16761_v52, %v1134_v39 }
 0x128   : > { %v10317_v35 = vsub.s32 %v763_v40, %v766_v30  ;;  %v1140_v33 = vshrl.u32 %v16758_v55, %v1134_v39  ;;  %v1142_v34 = vshll.u32 %v16758_v55, %v1133_v27  ;;  %v1143_v36 = vshrl.u32 %v16756_v59, %v1134_v39 }
 0x129   : > { %v1145_v38 = vshll.u32 %v16756_v59, %v1133_v27  ;;  %v1146_v40 = vshrl.u32 %v16754_v62, %v1134_v39  ;;  %v868_v42 = vadd.s32 536870912, %v867_v32  ;;  %v1138_v43 = vor.u32 %v1137_v26, %v1136_v29 }
 0x12a   : > { %v769_v46 = vsub.s32 0, %v10317_v35  ;;  %v1141_v51 = vor.u32 %v1140_v33, %v1139_v54  ;;  %v1148_v56 = vshll.u32 %v16754_v62, %v1133_v27  ;;  %v1144_v61 = vor.u32 %v1143_v36, %v1142_v34 }
 0x12b   : > { %v1147_v63 = vor.u32 %v1146_v40, %v1145_v38  ;;  %v1149_v0 = vshrl.u32 %v16752_v19, %v1134_v39  ;;  %v10332_v6 = vshrl.u32 %v868_v42, 30  ;;  %vm1154_vm5 = vcmp.lt.s32.totalorder %v10299_v41, 4 }
 0x12c   : > { %v8836_v49 = vmin.u32 %v769_v46, %v10317_v35  ;;  %v1155_v20 = vsel %vm1151_vm15, %v1135_v47, %v1138_v43  ;;  %v1159_v21 = vsel %vm1151_vm15, %v1138_v43, %v1141_v51  ;;  %v1156_v31 = vsel %vm1154_vm5, %v1144_v61, 2102212464  ;;  %v10359_v43 = vpop.f32.mrb[6].mxu0 }
 0x12d   : > { %v1150_v30 = vor.u32 %v1149_v0, %v1148_v56  ;;  %v1160_v27 = vsel %vm1154_vm5, %v1147_v63, 920167782  ;;  %v870_v29 = vshll.u32 %v10332_v6, 30  ;;  %v1163_v39 = vsel %vm1151_vm15, %v1141_v51, %v1144_v61 }
 0x12e   : > { %v771_v48 = vclz %v8836_v49  ;;  %v1161_v44 = vsel %vm1153_vm4, %v1144_v61, %v1160_v27  ;;  %vm922_vm6 = vcmp.gt.s32.totalorder %v921_v28, 0  ;;  %v1157_v47 = vsel %vm1153_vm4, %v1141_v51, %v1156_v31 }
 0x12f   : > { %v1162_v26 = vsel %vm1152_vm3, %v1159_v21, %v1161_v44  ;;  %v1164_v33 = vsel %vm1154_vm5, %v1150_v30, 1326507024  ;;  %v10348_v34 = vsub.s32 %v867_v32, %v870_v29  ;;  %v923_v42 = vsel %vm922_vm6, %v921_v28, 0 }
 0x130   : > { %v8837_v54 = vadd.s32 4294967294, %v771_v48  ;;  %v1165_v46 = vsel %vm1153_vm4, %v1147_v63, %v1164_v33  ;;  %v10353_v36 = vmul.u32.u64.low %v10306_v45, %v1162_v26  ;;  %v10354_v38 = vmul.u32.u64.high %v10306_v45, %v1162_v26, %v10353_v36 }
 0x131   : > { %v1166_v40 = vsel %vm1152_vm3, %v1163_v39, %v1165_v46  ;;  %v873_v56 = vsub.s32 0, %v10348_v34  ;;  %v1158_v61 = vsel %vm1152_vm3, %v1155_v20, %v1157_v47  ;;  %v16748_v63 = vand.u32 2147483647, %v10191_v22 }
 0x132   : > { %vm8838_vm7 = vcmp.lt.s32.totalorder %v8837_v54, 0  ;;  %v10363_v32 = vmul.u32.u64.low %v10306_v45, %v1166_v40  ;;  %v10364_v49 = vmul.u32.u64.high %v10306_v45, %v1166_v40, %v10363_v32  ;;  %v1177_v0 = vadd.s32 1, %v10354_v38 }
 0x133   : > { %v774_v51 = vsel %vm8838_vm7, 0, %v8837_v54  ;;  %v925_v21 = vand.u32 31, %v923_v42  ;;  %v8840_v28 = vmin.u32 %v873_v56, %v10348_v34  ;;  %v1174_v30 = vmul.u32 %v10306_v45, %v1158_v61 }
 0x134   : > { %v779_v48 = vsub.s32 4294967266, %v774_v51  ;;  %vm1176_vm8 = vc.u32 %v10364_v49, %v10353_v36  ;;  %v918_v27 = vand.u32 8388607, %v16748_v63  ;;  %v775_v29 = vsub.s32 32, %v774_v51 }
 0x135   : > { %v1178_v31 = vsel %vm1176_vm8, %v1177_v0, %v10354_v38  ;;  %v926_v20 = vsub.s32 32, %v925_v21  ;;  %v875_v39 = vclz %v8840_v28  ;;  %v759_v47 = vadd.s32 %v10251_v3, %v10248_v1 }
 0x136   : > { %v1179_v41 = vadd.s32 %v1178_v31, %v1174_v30  ;;  %v780_v44 = vadd.s32 127, %v779_v48  ;;  %v919_v26 = vor.u32 8388608, %v918_v27  ;;  %v652_v45 = vmul.f32 %v10159_v60, %v10168_v7 }
 0x137   : > { %v924_v46 = vshrl.u32 %v923_v42, 5  ;;  %v929_v38 = vshrl.u32 %v16761_v52, %v926_v20  ;;  %v932_v40 = vshrl.u32 %v16758_v55, %v926_v20  ;;  %v777_v56 = vshrl.u32 %v759_v47, %v775_v29 }
 0x138   : > { %v1180_v54 = vadd.s32 536870912, %v1179_v41  ;;  %v781_v32 = vshll.u32 %v780_v44, 23  ;;  %v935_v61 = vshrl.u32 %v16756_v59, %v926_v20  ;;  %v938_v0 = vshrl.u32 %v16754_v62, %v926_v20 }
 0x139   : > { %v8841_v48 = vadd.s32 4294967294, %v875_v39  ;;  %v928_v3 = vshll.u32 %v16763_v50, %v925_v21  ;;  %v931_v7 = vshll.u32 %v16761_v52, %v925_v21  ;;  %v934_v28 = vshll.u32 %v16758_v55, %v925_v21 }
 0x13a   : > { %v10381_v33 = vshrl.u32 %v1180_v54, 30  ;;  %v937_v42 = vshll.u32 %v16756_v59, %v925_v21  ;;  %v940_v30 = vshll.u32 %v16754_v62, %v925_v21  ;;  %v941_v31 = vshrl.u32 %v16752_v19, %v926_v20 }
 0x13b   : > { %v930_v29 = vor.u32 %v929_v38, %v928_v3  ;;  %v933_v44 = vor.u32 %v932_v40, %v931_v7  ;;  %v10397_v39 = vadd.f32 %v10172_v10, %v652_v45  ;;  %v776_v54 = vshll.u32 %v10317_v35, %v774_v51 }
 0x13c   : > { %v1182_v1 = vshll.u32 %v10381_v33, 30  ;;  %v936_v47 = vor.u32 %v935_v61, %v934_v28  ;;  %v939_v5 = vor.u32 %v938_v0, %v937_v42  ;;  %v942_v18 = vor.u32 %v941_v31, %v940_v30 }
 0x13d   : > { %v782_v63 = vor.u32 4788187, %v781_v32  ;;  %vm943_vm9 = vcmp.lt.s32.totalorder %v924_v46, 1  ;;  %v959_v14 = vshll.u32 %v919_v26, 8  ;;  %v778_v21 = vor.u32 %v777_v56, %v776_v54 }
 0x13e   : > { %v10394_v27 = vsub.s32 %v1179_v41, %v1182_v1  ;;  %vm8842_vm10 = vcmp.lt.s32.totalorder %v8841_v48, 0  ;;  %v927_v41 = vshrl.u32 %v16763_v50, %v926_v20  ;;  %vm944_vm11 = vcmp.lt.s32.totalorder %v924_v46, 2  ;;  %v10407_v1 = vpop.f32.mrb[4].mxu1 }
 0x13f   : > { %vm945_vm12 = vcmp.lt.s32.totalorder %v924_v46, 3  ;;  %vm946_vm13 = vcmp.lt.s32.totalorder %v924_v46, 4  ;;  %v951_v45 = vsel %vm943_vm9, %v930_v29, %v933_v44  ;;  %v955_v40 = vsel %vm943_vm9, %v933_v44, %v936_v47 }
 0x140   : > { %v1185_v25 = vsub.s32 0, %v10394_v27  ;;  %v948_v35 = vsel %vm946_vm13, %v936_v47, 2102212464  ;;  %v952_v51 = vsel %vm946_vm13, %v939_v5, 920167782  ;;  %v878_v20 = vsel %vm8842_vm10, 0, %v8841_v48 }
 0x141   : > { %v956_v32 = vsel %vm946_vm13, %v942_v18, 1326507024  ;;  %v783_v61 = vand.u32 2147483647, %v782_v63  ;;  %v953_v26 = vsel %vm945_vm12, %v936_v47, %v952_v51  ;;  %v949_v42 = vsel %vm945_vm12, %v933_v44, %v948_v35 }
 0x142   : > { %v8852_v38 = vmin.u32 %v1185_v25, %v10394_v27  ;;  %v957_v56 = vsel %vm945_vm12, %v939_v5, %v956_v32  ;;  %v947_v25 = vsel %vm943_vm9, %v927_v41, %v930_v29  ;;  %v954_v3 = vsel %vm944_vm11, %v951_v45, %v953_v26 }
 0x143   : > { %v958_v7 = vsel %vm944_vm11, %v955_v40, %v957_v56  ;;  %v10417_v30 = vmul.u32.u64.low %v959_v14, %v954_v3  ;;  %v10418_v31 = vmul.u32.u64.high %v959_v14, %v954_v3, %v10417_v30  ;;  %v1226_v5 = vand.u32 2139095040, %v10397_v39 }
 0x144   : > { %v1187_v0 = vclz %v8852_v38  ;;  %v10414_v18 = vmul.u32.u64.low %v959_v14, %v958_v7  ;;  %v10415_v63 = vmul.u32.u64.high %v959_v14, %v958_v7, %v10414_v18  ;;  %v785_v54 = vcvt.s32.f32 %v778_v21 }
 0x145   : > { %v879_v48 = vsub.s32 32, %v878_v20  ;;  %v650_v29 = vmul.f32 %v10155_v57, %v10170_v8  ;;  %v883_v47 = vsub.s32 4294967266, %v878_v20  ;;  %v950_v41 = vsel %vm944_vm11, %v947_v25, %v949_v42 }
 0x146   : > { %v8853_v28 = vadd.s32 4294967294, %v1187_v0  ;;  %v1227_v38 = vshrl.u32 %v1226_v5, 23  ;;  %vm705_vm15 = vcmp.lt.s32.totalorder %v10164_v2, 0  ;;  %v786_v44 = vmul.f32 %v785_v54, %v783_v61 }
 0x147   : > { %v863_v45 = vadd.s32 %v10291_v15, %v10297_v23  ;;  %vm968_vm1 = vc.u32 %v10415_v63, %v10417_v30  ;;  %v969_v21 = vadd.s32 1, %v10418_v31  ;;  %v16751_v35 = vand.u32 2147483647, %v10397_v39 }
 0x148   : > { %vm8854_vm14 = vcmp.lt.s32.totalorder %v8853_v28, 0  ;;  %v8855_v51 = vadd.s32 4294967169, %v1227_v38  ;;  %v789_v57 = vsub.s32 4, %v10301_v24  ;;  %v966_v46 = vmul.u32 %v959_v14, %v950_v41 }
 0x149   : > { %v10433_v8 = vsel %vm8854_vm14, 0, %v8853_v28  ;;  %v10436_v40 = vadd.f32 %v10157_v58, %v650_v29  ;;  %v881_v32 = vshrl.u32 %v863_v45, %v879_v48  ;;  %v10438_v61 = vadd.s32 127, %v883_v47 }
 0x14a   : > { %v970_v15 = vsel %vm968_vm1, %v969_v21, %v10418_v31  ;;  %v1233_v23 = vadd.s32 1, %v8855_v51  ;;  %v787_v0 = vxor.u32 2147483648, %v786_v44  ;;  %vm1121_vm3 = vcmp.lt.s32.totalorder %v10182_v16, 0 }
 0x14b   : > { %v1205_v26 = vsub.s32 4, %v10381_v33  ;;  %v971_v56 = vadd.s32 %v970_v15, %v966_v46  ;;  %v880_v25 = vshll.u32 %v10348_v34, %v878_v20  ;;  %v1195_v3 = vsub.s32 4294967266, %v10433_v8 }
 0x14c   : > { %v1230_v58 = vand.u32 8388607, %v16751_v35  ;;  %vm1234_vm4 = vcmp.gt.s32.totalorder %v1233_v23, 0  ;;  %v10450_v14 = vsel %vm705_vm15, %v789_v57, %v10301_v24  ;;  %v1018_v42 = vand.u32 2139095040, %v10436_v40 }
 0x14d   : > { %16996 = vst [vmem:[#allocation14_spill] sm:$0xff] %v10450_v14  ;;  %v972_v7 = vadd.s32 536870912, %v971_v56  ;;  %v1235_v28 = vsel %vm1234_vm4, %v1233_v23, 0  ;;  %v10453_v18 = vor.u32 %v881_v32, %v880_v25  ;;  %v885_v31 = vshll.u32 %v10438_v61, 23 }
 0x14e   : > { %v1175_v34 = vadd.s32 %v10353_v36, %v10364_v49  ;;  %v1237_v20 = vand.u32 31, %v1235_v28  ;;  %v788_v5 = vsel %vm705_vm15, %v787_v0, %v786_v44  ;;  %v1191_v54 = vsub.s32 32, %v10433_v8 }
 0x14f   : > { %v10464_v24 = vsel %vm1121_vm3, %v1205_v26, %v10381_v33  ;;  %v10466_v48 = vshrl.u32 %v972_v7, 30  ;;  %v1192_v29 = vshll.u32 %v10394_v27, %v10433_v8  ;;  %v1196_v47 = vadd.s32 127, %v1195_v3 }
 0x150   : > { %16997 = vst [vmem:[#allocation15_spill] sm:$0xff] %v10464_v24  ;;  %v1231_v41 = vor.u32 8388608, %v1230_v58  ;;  %v1238_v38 = vsub.s32 32, %v1237_v20  ;;  %v1240_v49 = vshll.u32 %v16763_v50, %v1237_v20  ;;  %v1243_v44 = vshll.u32 %v16761_v52, %v1237_v20 }
 0x151   : > { %v974_v36 = vshll.u32 %v10466_v48, 30  ;;  %v1019_v45 = vshrl.u32 %v1018_v42, 23  ;;  %v1246_v51 = vshll.u32 %v16758_v55, %v1237_v20  ;;  %v1236_v27 = vshrl.u32 %v1235_v28, 5 }
 0x152   : > { %v1241_v21 = vshrl.u32 %v16761_v52, %v1238_v38  ;;  %v1244_v33 = vshrl.u32 %v16758_v55, %v1238_v38  ;;  %v1247_v57 = vshrl.u32 %v16756_v59, %v1238_v38  ;;  %v1249_v8 = vshll.u32 %v16756_v59, %v1237_v20 }
 0x153   : > { %v10477_v46 = vsub.s32 %v971_v56, %v974_v36  ;;  %v1250_v32 = vshrl.u32 %v16754_v62, %v1238_v38  ;;  %v1193_v15 = vshrl.u32 %v1175_v34, %v1191_v54  ;;  %v16998_v25 = vand.u32 2147483647, %v10164_v2 }
 0x154   : > { %v1242_v23 = vor.u32 %v1241_v21, %v1240_v49  ;;  %v1245_v0 = vor.u32 %v1244_v33, %v1243_v44  ;;  %v1248_v26 = vor.u32 %v1247_v57, %v1246_v51  ;;  %v16999_v3 = vmov 0 }
 0x155   : > { %vm10483_vm5 = vcmp.le.f32.partialorder %v16998_v25, 0.7853982  ;;  %v977_v58 = vsub.s32 0, %v10477_v46  ;;  %v1251_v7 = vor.u32 %v1250_v32, %v1249_v8  ;;  %v1252_v56 = vshll.u32 %v16754_v62, %v1237_v20  ;;  %v10493_v32 = vpop.f32.mrb[7].mxu0 }
 0x156   : > { %v17000_v3 = vsel %vm10483_vm5, 4294967295, %v16999_v3  ;;  %v1253_v28 = vshrl.u32 %v16752_v19, %v1238_v38  ;;  %v1197_v42 = vshll.u32 %v1196_v47, 23  ;;  %v1271_v36 = vshll.u32 %v1231_v41, 8 }
 0x157   : > { %17001 = vst [vmem:[#allocation16_spill] sm:$0xff] %v17000_v3  ;;  %v16760_v34 = vand.u32 2147483647, %v10436_v40  ;;  %v8847_v54 = vadd.s32 4294967169, %v1019_v45  ;;  %v8844_v49 = vmin.u32 %v977_v58, %v10477_v46  ;;  %vm1255_vm6 = vcmp.lt.s32.totalorder %v1236_v27, 1 }
 0x158   : > { %v1254_v44 = vor.u32 %v1253_v28, %v1252_v56  ;;  %vm1258_vm7 = vcmp.lt.s32.totalorder %v1236_v27, 4  ;;  %v1239_v21 = vshrl.u32 %v16763_v50, %v1238_v38  ;;  %vm1256_vm8 = vcmp.lt.s32.totalorder %v1236_v27, 2 }
 0x159   : > { %v1260_v33 = vsel %vm1258_vm7, %v1248_v26, 2102212464  ;;  %v1263_v51 = vsel %vm1255_vm6, %v1242_v23, %v1245_v0  ;;  %v979_v57 = vclz %v8844_v49  ;;  %vm1257_vm9 = vcmp.lt.s32.totalorder %v1236_v27, 3 }
 0x15a   : > { %v1264_v20 = vsel %vm1258_vm7, %v1251_v7, 920167782  ;;  %v1267_v8 = vsel %vm1255_vm6, %v1245_v0, %v1248_v26  ;;  %v1259_v47 = vsel %vm1255_vm6, %v1239_v21, %v1242_v23  ;;  %v1268_v25 = vsel %vm1258_vm7, %v1254_v44, 1326507024 }
 0x15b   : > { %v1265_v41 = vsel %vm1257_vm9, %v1248_v26, %v1264_v20  ;;  %v1025_v45 = vadd.s32 1, %v8847_v54  ;;  %v8845_v35 = vadd.s32 4294967294, %v979_v57  ;;  %v1261_v58 = vsel %vm1257_vm9, %v1245_v0, %v1260_v33 }
 0x15c   : > { %v1266_v56 = vsel %vm1256_vm8, %v1263_v51, %v1265_v41  ;;  %v1269_v28 = vsel %vm1257_vm9, %v1251_v7, %v1268_v25  ;;  %v1194_v49 = vor.u32 %v1193_v15, %v1192_v29  ;;  %v10507_v26 = vsel %vm10483_vm5, %v10164_v2, %v788_v5 }
 0x15d   : > { %v1270_v38 = vsel %vm1256_vm8, %v1267_v8, %v1269_v28  ;;  %v10497_v19 = vmul.u32.u64.low %v1271_v36, %v1266_v56  ;;  %v10498_v62 = vmul.u32.u64.high %v1271_v36, %v1266_v56, %v10497_v19  ;;  %vm1026_vm10 = vcmp.gt.s32.totalorder %v1025_v45, 0 }
 0x15e   : > { %v10501_v59 = vmul.u32.u64.low %v1271_v36, %v1270_v38  ;;  %v10502_v55 = vmul.u32.u64.high %v1271_v36, %v1270_v38, %v10501_v59  ;;  %v1027_v23 = vsel %vm1026_vm10, %v1025_v45, 0  ;;  %vm8846_vm11 = vcmp.lt.s32.totalorder %v8845_v35, 0 }
 0x15f   : > { %v1262_v0 = vsel %vm1256_vm8, %v1259_v47, %v1261_v58  ;;  %v1029_v7 = vand.u32 31, %v1027_v23  ;;  %v10512_v54 = vor.u32 4788187, %v885_v31  ;;  %v1198_v44 = vor.u32 4788187, %v1197_v42 }
 0x160   : > { %v653_v29 = vmul.f32 %v10159_v60, %v10177_v12  ;;  %v10518_v59 = vmul.f32 %v10159_v60, %v10184_v17  ;;  %v967_v5 = vadd.s32 %v10417_v30, %v10415_v63  ;;  %v1281_v15 = vadd.s32 1, %v10498_v62 }
 0x161   : > { %v1022_v27 = vand.u32 8388607, %v16760_v34  ;;  %v1030_v21 = vsub.s32 32, %v1029_v7  ;;  %v1201_v61 = vcvt.s32.f32 %v1194_v49  ;;  %v10525_v31 = vsel %vm8846_vm11, 0, %v8845_v35 }
 0x162   : > { %v1278_v42 = vmul.u32 %v1271_v36, %v1262_v0  ;;  %vm1280_vm12 = vc.u32 %v10502_v55, %v10497_v19  ;;  %v1032_v60 = vshll.u32 %v16763_v50, %v1029_v7  ;;  %v17002_v63 = vmov 2131351028  }
 0x163   : > { %v1282_v12 = vsel %vm1280_vm12, %v1281_v15, %v10498_v62  ;;  %v1033_v17 = vshrl.u32 %v16761_v52, %v1030_v21  ;;  %v1036_v30 = vshrl.u32 %v17002_v63, %v1030_v21  ;;  %v1199_v33 = vand.u32 2147483647, %v1198_v44 }
 0x164   : > { %v1283_v51 = vadd.s32 %v1282_v12, %v1278_v42  ;;  %v1028_v57 = vshrl.u32 %v1027_v23, 5  ;;  %v1035_v20 = vshll.u32 %v16761_v52, %v1029_v7  ;;  %v987_v35 = vsub.s32 4294967266, %v10525_v31 }
 0x165   : > { %v1034_v8 = vor.u32 %v1033_v17, %v1032_v60  ;;  %v1038_v36 = vshll.u32 %v17002_v63, %v1029_v7  ;;  %v17003_v47 = vmov 2102212464   ;;  %v17004_v58 = vmov 920167782  }
 0x166   : > { %v1039_v41 = vshrl.u32 %v17003_v47, %v1030_v21  ;;  %v1284_v25 = vadd.s32 536870912, %v1283_v51  ;;  %v1037_v62 = vor.u32 %v1036_v30, %v1035_v20  ;;  %v1041_v45 = vshll.u32 %v17003_v47, %v1029_v7 }
 0x167   : > { %v1042_v56 = vshrl.u32 %v17004_v58, %v1030_v21  ;;  %v1044_v38 = vshll.u32 %v17004_v58, %v1029_v7  ;;  %v17005_v49 = vmov 1326507024   ;;  %v10542_v0 = vadd.f32 %v10172_v10, %v653_v29  ;;  %v10552_v29 = vpop.f32.mrb[5].mxu1 }
 0x168   : > { %v1040_v28 = vor.u32 %v1039_v41, %v1038_v36  ;;  %v1045_v23 = vshrl.u32 %v17005_v49, %v1030_v21  ;;  %v10544_v44 = vmul.f32 %v1201_v61, %v1199_v33  ;;  %v10546_v15 = vshrl.u32 %v1284_v25, 30 }
 0x169   : > { %17006 = vst [vmem:[#allocation17_spill] sm:$0xff] %v10542_v0  ;;  %v1023_v42 = vor.u32 8388608, %v1022_v27  ;;  %v1043_v12 = vor.u32 %v1042_v56, %v1041_v45  ;;  %v983_v60 = vsub.s32 32, %v10525_v31  ;;  %v988_v17 = vadd.s32 127, %v987_v35 }
 0x16a   : > { %17007 = vst [vmem:[#allocation18_spill] sm:$0xff] %v10546_v15  ;;  %v1046_v30 = vor.u32 %v1045_v23, %v1044_v38  ;;  %vm1047_vm13 = vcmp.lt.s32.totalorder %v1028_v57, 1  ;;  %v1286_v20 = vshll.u32 %v10546_v15, 30  ;;  %v1031_v7 = vshrl.u32 %v16763_v50, %v1030_v21 }
 0x16b   : > { %vm1050_vm14 = vcmp.lt.s32.totalorder %v1028_v57, 4  ;;  %v1055_v36 = vsel %vm1047_vm13, %v1034_v8, %v1037_v62  ;;  %vm1049_vm15 = vcmp.lt.s32.totalorder %v1028_v57, 3  ;;  %v1059_v33 = vsel %vm1047_vm13, %v1037_v62, %v1040_v28 }
 0x16c   : > { %v1056_v61 = vsel %vm1050_vm14, %v1043_v12, 920167782  ;;  %v1060_v27 = vsel %vm1050_vm14, %v1046_v30, 1326507024  ;;  %v10555_v41 = vsub.s32 %v1283_v51, %v1286_v20  ;;  %vm1048_vm1 = vcmp.lt.s32.totalorder %v1028_v57, 2 }
 0x16d   : > { %v1052_v35 = vsel %vm1050_vm14, %v1040_v28, 2102212464  ;;  %v1057_v25 = vsel %vm1049_vm15, %v1040_v28, %v1056_v61  ;;  %v1061_v21 = vsel %vm1049_vm15, %v1043_v12, %v1060_v27  ;;  %v1063_v56 = vshll.u32 %v1023_v42, 8 }
 0x16e   : > { %v1058_v45 = vsel %vm1048_vm1, %v1055_v36, %v1057_v25  ;;  %v1330_v38 = vand.u32 2139095040, %v10542_v0  ;;  %v985_v23 = vshrl.u32 %v967_v5, %v983_v60  ;;  %v1289_v34 = vsub.s32 0, %v10555_v41 }
 0x16f   : > { %v1051_v52 = vsel %vm1047_vm13, %v1031_v7, %v1034_v8  ;;  %v1062_v30 = vsel %vm1048_vm1, %v1059_v33, %v1061_v21  ;;  %v1053_v51 = vsel %vm1049_vm15, %v1037_v62, %v1052_v35  ;;  %v989_v61 = vshll.u32 %v988_v17, 23 }
 0x170   : > { %v10565_v20 = vmul.u32.u64.low %v1063_v56, %v1062_v30  ;;  %v10566_v50 = vmul.u32.u64.high %v1063_v56, %v1062_v30, %v10565_v20  ;;  %v1331_v28 = vshrl.u32 %v1330_v38, 23  ;;  %v8856_v36 = vmin.u32 %v1289_v34, %v10555_v41 }
 0x171   : > { %v10569_v12 = vmul.u32.u64.low %v1063_v56, %v1058_v45  ;;  %v10570_v42 = vmul.u32.u64.high %v1063_v56, %v1058_v45, %v10569_v12  ;;  %9590 = vcosq.f32 %v10507_v26  ;;  %v889_v5 = vcvt.s32.f32 %v10453_v18 }
 0x172   : > { %v16765_v8 = vand.u32 2147483647, %v10542_v0  ;;  %v8859_v60 = vadd.s32 4294967169, %v1331_v28  ;;  %v984_v62 = vshll.u32 %v10477_v46, %v10525_v31  ;;  %v1291_v7 = vclz %v8856_v36 }
 0x173   : > { %v1054_v33 = vsel %vm1048_vm1, %v1051_v52, %v1053_v51  ;;  %v10581_v34 = vadd.f32 %v10172_v10, %v10518_v59  ;;  %v887_v17 = vand.u32 2147483647, %v10512_v54  ;;  %v1203_v27 = vxor.u32 2147483648, %v10544_v44 }
 0x174   : > { %vm1072_vm4 = vc.u32 %v10566_v50, %v10569_v12  ;;  %v1337_v18 = vadd.s32 1, %v8859_v60  ;;  %v986_v35 = vor.u32 %v985_v23, %v984_v62  ;;  %v990_v25 = vor.u32 4788187, %v989_v61 }
 0x175   : > { %v8857_v45 = vadd.s32 4294967294, %v1291_v7  ;;  %v1073_v46 = vadd.s32 1, %v10570_v42  ;;  %9592 = vsinq.f32 %v10507_v26  ;;  %v1070_v52 = vmul.u32 %v1063_v56, %v1054_v33 }
 0x176   : > { %v1334_v10 = vand.u32 8388607, %v16765_v8  ;;  %vm1338_vm6 = vcmp.gt.s32.totalorder %v1337_v18, 0  ;;  %v1434_v31 = vand.u32 2139095040, %v10581_v34  ;;  %v10593_v57 = vmul.f32 %v889_v5, %v887_v17 }
 0x177   : > { %vm8858_vm7 = vcmp.lt.s32.totalorder %v8857_v45, 0  ;;  %v1074_v54 = vsel %vm1072_vm4, %v1073_v46, %v10570_v42  ;;  %v1339_v59 = vsel %vm1338_vm6, %v1337_v18, 0  ;;  %v10600_v26 = vsel %vm1121_vm3, %v1203_v27, %v10544_v44 }
 0x178   : > { %v10595_v21 = vsel %vm8858_vm7, 0, %v8857_v45  ;;  %v1075_v38 = vadd.s32 %v1074_v54, %v1070_v52  ;;  %v1341_v23 = vand.u32 31, %v1339_v59  ;;  %v991_v56 = vand.u32 2147483647, %v990_v25 }
 0x179   : > { %v993_v30 = vcvt.s32.f32 %v986_v35  ;;  %v1279_v51 = vadd.s32 %v10497_v19, %v10502_v55  ;;  %v1335_v28 = vor.u32 8388608, %v1334_v10  ;;  %v16771_v36 = vand.u32 2147483647, %v10581_v34 }
 0x17a   : > { %v1076_v20 = vadd.s32 536870912, %v1075_v38  ;;  %v1342_v61 = vsub.s32 32, %v1341_v23  ;;  %v1299_v42 = vsub.s32 4294967266, %v10595_v21  ;;  %v1340_v5 = vshrl.u32 %v1339_v59, 5 }
 0x17b   : > { %v17008_v60 = vmov 683565275   ;;  %v1435_v7 = vshrl.u32 %v1434_v31, 23  ;;  %v10607_v33 = vpop.eup %9590  ;;  %v17011_v17 = vmov 2475754826   ;;  %v1350_v19 = vshll.u32 %v17002_v63, %v1341_v23 }
 0x17c   : > { %v1344_v62 = vshll.u32 %v17008_v60, %v1341_v23  ;;  %17009 = vst [vmem:[#allocation19_spill] sm:$0xff] %v10607_v33  ;;  %v10609_v44 = vshrl.u32 %v1076_v20, 30  ;;  %v1345_v27 = vshrl.u32 %v17011_v17, %v1342_v61  ;;  %v1347_v18 = vshll.u32 %v17011_v17, %v1341_v23 }
 0x17d   : > { %v1348_v55 = vshrl.u32 %v17002_v63, %v1342_v61  ;;  %v1351_v35 = vshrl.u32 %v17003_v47, %v1342_v61  ;;  %v1353_v25 = vshll.u32 %v17003_v47, %v1341_v23  ;;  %v1354_v45 = vshrl.u32 %v17004_v58, %v1342_v61 }
 0x17e   : > { %17010 = vst [vmem:[#allocation20_spill] sm:$0xff] %v10609_v44  ;;  %v10618_v46 = vmul.f32 %v993_v30, %v991_v56  ;;  %v1078_v52 = vshll.u32 %v10609_v44, 30  ;;  %v1346_v10 = vor.u32 %v1345_v27, %v1344_v62  ;;  %v10621_v20 = vshll.u32 %v1335_v28, 8 }
 0x17f   : > { %v1349_v54 = vor.u32 %v1348_v55, %v1347_v18  ;;  %v1352_v59 = vor.u32 %v1351_v35, %v1350_v19  ;;  %v1355_v31 = vor.u32 %v1354_v45, %v1353_v25  ;;  %v10625_v8 = vand.u32 8388607, %v16771_v36  ;;  %v10627_v4 = vpop.eup %9592  ;;  %v10642_v25 = vpop.f32.mrb[6].mxu1 }
 0x180   : > { %17012 = vst [vmem:[#allocation21_spill] sm:$0xff] %v10627_v4  ;;  %vm10631_vm3 = vcmp.le.f32.partialorder %v17013_v13, 0.7853982  ;;  %v10635_v56 = vsub.s32 %v1075_v38, %v1078_v52  ;;  %v1356_v30 = vshll.u32 %v17004_v58, %v1341_v23  ;;  %v1357_v62 = vshrl.u32 %v17005_v49, %v1342_v61 }
 0x181   : > { %v17015_v9 = vsel %vm10631_vm3, 4294967295, %v17014_v9  ;;  %v8863_v28 = vadd.s32 4294967169, %v1435_v7  ;;  %v1295_v27 = vsub.s32 32, %v10595_v21  ;;  %v1300_v18 = vadd.s32 127, %v1299_v42 }
 0x182   : > { %17016 = vst [vmem:[#allocation22_spill] sm:$0xff] %v17015_v9  ;;  %vm1359_vm8 = vcmp.lt.s32.totalorder %v1340_v5, 1  ;;  %vm1362_vm9 = vcmp.lt.s32.totalorder %v1340_v5, 4  ;;  %v1081_v55 = vsub.s32 0, %v10635_v56  ;;  %v1358_v19 = vor.u32 %v1357_v62, %v1356_v30  ;;  %v10649_v30 = vpop.permute.xlu0 %639 }
 0x183   : > { %v1364_v35 = vsel %vm1362_vm9, %v1352_v59, 2102212464  ;;  %v1367_v13 = vsel %vm1359_vm8, %v1346_v10, %v1349_v54  ;;  %vm809_vm10 = vcmp.lt.s32.totalorder %v10175_v11, 0  ;;  %vm913_vm11 = vcmp.lt.s32.totalorder %v10191_v22, 0 }
 0x184   : > { %v1343_v38 = vshrl.u32 %v17008_v60, %v1342_v61  ;;  %vm1361_vm12 = vcmp.lt.s32.totalorder %v1340_v5, 3  ;;  %v1368_v23 = vsel %vm1362_vm9, %v1355_v31, 920167782  ;;  %v1371_v42 = vsel %vm1359_vm8, %v1349_v54, %v1352_v59 }
 0x185   : > { %v8848_v7 = vmin.u32 %v1081_v55, %v10635_v56  ;;  %vm1360_vm13 = vcmp.lt.s32.totalorder %v1340_v5, 2  ;;  %v1369_v45 = vsel %vm1361_vm12, %v1352_v59, %v1368_v23  ;;  %v1372_v52 = vsel %vm1362_vm9, %v1358_v19, 1326507024 }
 0x186   : > { %v1363_v62 = vsel %vm1359_vm8, %v1343_v38, %v1346_v10  ;;  %v1365_v36 = vsel %vm1361_vm12, %v1349_v54, %v1364_v35  ;;  %v1370_v44 = vsel %vm1360_vm13, %v1367_v13, %v1369_v45  ;;  %v1373_v2 = vsel %vm1361_vm12, %v1355_v31, %v1372_v52 }
 0x187   : > { %v1083_v24 = vclz %v8848_v7  ;;  %v1374_v61 = vsel %vm1360_vm13, %v1371_v42, %v1373_v2  ;;  %v10655_v33 = vmul.u32.u64.low %v10621_v20, %v1370_v44  ;;  %v10656_v4 = vmul.u32.u64.high %v10621_v20, %v1370_v44, %v10655_v33 }
 0x188   : > { %v1297_v55 = vshrl.u32 %v1279_v51, %v1295_v27  ;;  %v10660_v59 = vmul.u32.u64.low %v10621_v20, %v1374_v61  ;;  %v10661_v19 = vmul.u32.u64.high %v10621_v20, %v1374_v61, %v10660_v59  ;;  %v1441_v23 = vadd.s32 1, %v8863_v28 }
 0x189   : > { %v891_v10 = vxor.u32 2147483648, %v10593_v57  ;;  %v997_v54 = vsub.s32 4, %v10466_v48  ;;  %v1366_v31 = vsel %vm1360_vm13, %v1363_v62, %v1365_v36  ;;  %v655_v2 = vmul.f32 %v10649_v30, %v10202_v37  ;;  %v10676_v36 = vpop.permute.xlu0 %679 }
 0x18a   : > { %v1207_v44 = vsel %vm10631_vm3, %v10182_v16, %v10600_v26  ;;  %v1296_v51 = vshll.u32 %v10555_v41, %v10595_v21  ;;  %v8849_v27 = vadd.s32 4294967294, %v1083_v24  ;;  %vm1442_vm14 = vcmp.gt.s32.totalorder %v1441_v23, 0 }
 0x18b   : > { %v995_v28 = vxor.u32 2147483648, %v10618_v46  ;;  %v1301_v35 = vshll.u32 %v1300_v18, 23  ;;  %v1385_v13 = vadd.s32 1, %v10656_v4  ;;  %v1443_v5 = vsel %vm1442_vm14, %v1441_v23, 0 }
 0x18c   : > { %v10678_v38 = vor.u32 %v1297_v55, %v1296_v51  ;;  %v1382_v37 = vmul.u32 %v10621_v20, %v1366_v31  ;;  %vm1384_vm15 = vc.u32 %v10661_v19, %v10655_v33  ;;  %v1439_v26 = vor.u32 8388608, %v10625_v8 }
 0x18d   : > { %v10687_v24 = vsel %vm809_vm10, %v891_v10, %v10593_v57  ;;  %v10692_v41 = vsel %vm913_vm11, %v997_v54, %v10466_v48  ;;  %v1386_v21 = vsel %vm1384_vm15, %v1385_v13, %v10656_v4  ;;  %v10696_v18 = vadd.f32 %v10676_v36, %v655_v2 }
 0x18e   : > { %17017 = vst [vmem:[#allocation23_spill] sm:$0xff] %v10687_v24  ;;  %17018 = vst [vmem:[#allocation24_spill] sm:$0xff] %v10692_v41  ;;  %9594 = vcosq.f32 %v1207_v44  ;;  %vm8850_vm1 = vcmp.lt.s32.totalorder %v8849_v27, 0  ;;  %v1387_v20 = vadd.s32 %v1386_v21, %v1382_v37  ;;  %v1445_v42 = vand.u32 31, %v1443_v5 }
 0x18f   : > { %17019 = vst [vmem:[#allocation25_spill] sm:$0xff] %v10696_v18  ;;  %9596 = vsinq.f32 %v1207_v44  ;;  %v10701_v8 = vsel %vm913_vm11, %v995_v28, %v10618_v46  ;;  %v10703_v57 = vor.u32 4788187, %v1301_v35  ;;  %v10707_v48 = vmul.f32 %v10649_v30, %v10277_v53 }
 0x190   : > { %v1388_v7 = vadd.s32 536870912, %v1387_v20  ;;  %v1446_v45 = vsub.s32 32, %v1445_v42  ;;  %v10710_v52 = vshll.u32 %v1439_v26, 8  ;;  %v10712_v62 = vsel %vm8850_vm1, 0, %v8849_v27 }
 0x191   : > { %v1444_v61 = vshrl.u32 %v1443_v5, 5  ;;  %v1448_v55 = vshll.u32 %v17008_v60, %v1445_v42  ;;  %v1538_v46 = vand.u32 2139095040, %v10696_v18  ;;  %v1451_v53 = vshll.u32 %v17011_v17, %v1445_v42 }
 0x192   : > { %v10716_v59 = vshrl.u32 %v1388_v7, 30  ;;  %v1449_v23 = vshrl.u32 %v17011_v17, %v1446_v45  ;;  %v1452_v10 = vshrl.u32 %v17002_v63, %v1446_v45  ;;  %v1454_v54 = vshll.u32 %v17002_v63, %v1445_v42 }
 0x193   : > { %v1455_v31 = vshrl.u32 %v17003_v47, %v1446_v45  ;;  %v1457_v2 = vshll.u32 %v17003_v47, %v1445_v42  ;;  %v1458_v44 = vshrl.u32 %v17004_v58, %v1446_v45  ;;  %v1091_v51 = vsub.s32 4294967266, %v10712_v62 }
 0x194   : > { %v1390_v27 = vshll.u32 %v10716_v59, 30  ;;  %v1450_v28 = vor.u32 %v1449_v23, %v1448_v55  ;;  %v1453_v35 = vor.u32 %v1452_v10, %v1451_v53  ;;  %vm1463_vm4 = vcmp.lt.s32.totalorder %v1444_v61, 1 }
 0x195   : > { %v1456_v13 = vor.u32 %v1455_v31, %v1454_v54  ;;  %v1459_v5 = vor.u32 %v1458_v44, %v1457_v2  ;;  %vm1465_vm6 = vcmp.lt.s32.totalorder %v1444_v61, 3  ;;  %v17020_v37 = vand.u32 2147483647, %v10191_v22 }
 0x196   : > { %v17021_v26 = vmov 0  ;;  %v10733_v21 = vsub.s32 %v1387_v20, %v1390_v27  ;;  %v1460_v7 = vshll.u32 %v17004_v58, %v1445_v42  ;;  %v1461_v4 = vshrl.u32 %v17005_v49, %v1446_v45 }
 0x197   : > { %vm10729_vm7 = vcmp.le.f32.partialorder %v17020_v37, 0.7853982  ;;  %vm1466_vm8 = vcmp.lt.s32.totalorder %v1444_v61, 4  ;;  %v1447_v55 = vshrl.u32 %v17008_v60, %v1446_v45  ;;  %v1471_v53 = vsel %vm1463_vm4, %v1450_v28, %v1453_v35 }
 0x198   : > { %v17022_v26 = vsel %vm10729_vm7, 4294967295, %v17021_v26  ;;  %v1468_v23 = vsel %vm1466_vm8, %v1456_v13, 2102212464  ;;  %v1472_v10 = vsel %vm1466_vm8, %v1459_v5, 920167782  ;;  %v10741_v54 = vpop.eup %9594  ;;  %v1393_v31 = vsub.s32 0, %v10733_v21 }
 0x199   : > { %17023 = vst [vmem:[#allocation26_spill] sm:$0xff] %v17022_v26  ;;  %17024 = vst [vmem:[#allocation27_spill] sm:$0xff] %v10741_v54  ;;  %v1462_v2 = vor.u32 %v1461_v4, %v1460_v7  ;;  %vm1464_vm9 = vcmp.lt.s32.totalorder %v1444_v61, 2  ;;  %v1473_v20 = vsel %vm1465_vm6, %v1456_v13, %v1472_v10  ;;  %v10745_v42 = vpop.eup %9596  ;;  %v1467_v44 = vsel %vm1463_vm4, %v1447_v55, %v1450_v28 }
 0x19a   : > { %17025 = vst [vmem:[#allocation28_spill] sm:$0xff] %v10745_v42  ;;  %v1469_v45 = vsel %vm1465_vm6, %v1453_v35, %v1468_v23  ;;  %v1474_v27 = vsel %vm1464_vm9, %v1471_v53, %v1473_v20  ;;  %v1475_v37 = vsel %vm1463_vm4, %v1453_v35, %v1456_v13  ;;  %v8860_v41 = vmin.u32 %v1393_v31, %v10733_v21  ;;  %v10761_v23 = vpop.f32.mrb[7].mxu1 }
 0x19b   : > { %v1476_v16 = vsel %vm1466_vm8, %v1462_v2, 1326507024  ;;  %v10754_v54 = vmul.u32.u64.low %v10710_v52, %v1474_v27  ;;  %v10755_v4 = vmul.u32.u64.high %v10710_v52, %v1474_v27, %v10754_v54  ;;  %v1303_v7 = vand.u32 2147483647, %v10703_v57  ;;  %v10765_v2 = vpop.permute.xlu1 %644 }
 0x19c   : > { %v1477_v10 = vsel %vm1465_vm6, %v1459_v5, %v1476_v16  ;;  %v1539_v55 = vshrl.u32 %v1538_v46, 23  ;;  %v1087_v35 = vsub.s32 32, %v10712_v62  ;;  %v1092_v13 = vadd.s32 127, %v1091_v51 }
 0x19d   : > { %v1395_v53 = vclz %v8860_v41  ;;  %v1478_v31 = vsel %vm1464_vm9, %v1475_v37, %v1477_v10  ;;  %v1470_v20 = vsel %vm1464_vm9, %v1467_v44, %v1469_v45  ;;  %v1071_v46 = vadd.s32 %v10569_v12, %v10566_v50 }
 0x19e   : > { %v10769_v27 = vmul.u32.u64.low %v10710_v52, %v1478_v31  ;;  %v10770_v57 = vmul.u32.u64.high %v10710_v52, %v1478_v31, %v10769_v27  ;;  %v8867_v16 = vadd.s32 4294967169, %v1539_v55  ;;  %v1489_v28 = vadd.s32 1, %v10755_v4 }
 0x19f   : > { %v8861_v5 = vadd.s32 4294967294, %v1395_v53  ;;  %v10777_v41 = vadd.f32 %v10676_v36, %v10707_v48  ;;  %v10783_v61 = vsel %vm10729_vm7, %v10191_v22, %v10701_v8  ;;  %v17026_v51 = vcvt.s32.f32 %v10678_v38 }
 0x1a0   : > { %v1545_v45 = vadd.s32 1, %v8867_v16  ;;  %v659_v50 = vmul.f32 %v10765_v2, %v10359_v43  ;;  %v1089_v12 = vshrl.u32 %v1071_v46, %v1087_v35  ;;  %v1093_v37 = vshll.u32 %v1092_v13, 23  ;;  %v10802_v35 = vpop.permute.xlu1 %684 }
 0x1a1   : > { %v10787_v44 = vmul.f32 %v17026_v51, %v1303_v7  ;;  %vm8862_vm11 = vcmp.lt.s32.totalorder %v8861_v5, 0  ;;  %v1486_v48 = vmul.u32 %v10710_v52, %v1470_v20  ;;  %vm1488_vm12 = vc.u32 %v10770_v57, %v10754_v54 }
 0x1a2   : > { %v10792_v10 = vsel %vm8862_vm11, 0, %v8861_v5  ;;  %v17027_v8 = vand.u32 2147483647, %v10696_v18  ;;  %vm1546_vm13 = vcmp.gt.s32.totalorder %v1545_v45, 0  ;;  %9598 = vcosq.f32 %v10783_v61 }
 0x1a3   : > { %v1490_v38 = vsel %vm1488_vm12, %v1489_v28, %v10755_v4  ;;  %v16780_v43 = vand.u32 2147483647, %v10777_v41  ;;  %v1642_v7 = vand.u32 2139095040, %v10777_v41  ;;  %v1088_v52 = vshll.u32 %v10635_v56, %v10712_v62 }
 0x1a4   : > { %v1542_v55 = vand.u32 8388607, %v17027_v8  ;;  %v1403_v13 = vsub.s32 4294967266, %v10792_v10  ;;  %v1491_v53 = vadd.s32 %v1490_v38, %v1486_v48  ;;  %v1547_v31 = vsel %vm1546_vm13, %v1545_v45, 0 }
 0x1a5   : > { %v1383_v27 = vadd.s32 %v10655_v33, %v10661_v19  ;;  %v1549_v16 = vand.u32 31, %v1547_v31  ;;  %v10811_v4 = vadd.f32 %v10802_v35, %v659_v50  ;;  %v10813_v28 = vor.u32 %v1089_v12, %v1088_v52 }
 0x1a6   : > { %v10815_v46 = vor.u32 4788187, %v1093_v37  ;;  %v1492_v5 = vadd.s32 536870912, %v1491_v53  ;;  %v1543_v51 = vor.u32 8388608, %v1542_v55  ;;  %v1399_v56 = vsub.s32 32, %v10792_v10 }
 0x1a7   : > { %17028 = vst [vmem:[#allocation29_spill] sm:$0xff] %v10811_v4  ;;  %v1550_v62 = vsub.s32 32, %v1549_v16  ;;  %v1643_v48 = vshrl.u32 %v1642_v7, 23  ;;  %v10820_v45 = vand.u32 8388607, %v16780_v43  ;;  %v1404_v8 = vadd.s32 127, %v1403_v13 }
 0x1a8   : > { %v10822_v33 = vshrl.u32 %v1492_v5, 30  ;;  %v1548_v19 = vshrl.u32 %v1547_v31, 5  ;;  %v1552_v50 = vshll.u32 %v17008_v60, %v1549_v16  ;;  %v1555_v37 = vshll.u32 %v17011_v17, %v1549_v16 }
 0x1a9   : > { %v1553_v12 = vshrl.u32 %v17011_v17, %v1550_v62  ;;  %v1558_v55 = vshll.u32 %v17002_v63, %v1549_v16  ;;  %v1561_v38 = vshll.u32 %v17003_v47, %v1549_v16  ;;  %v1556_v52 = vshrl.u32 %v17002_v63, %v1550_v62 }
 0x1aa   : > { %17029 = vst [vmem:[#allocation30_spill] sm:$0xff] %v10822_v33  ;;  %v1494_v7 = vshll.u32 %v10822_v33, 30  ;;  %v1559_v43 = vshrl.u32 %v17003_v47, %v1550_v62  ;;  %v1562_v13 = vshrl.u32 %v17004_v58, %v1550_v62  ;;  %v1564_v31 = vshll.u32 %v17004_v58, %v1549_v16 }
 0x1ab   : > { %v1554_v5 = vor.u32 %v1553_v12, %v1552_v50  ;;  %v1565_v20 = vshrl.u32 %v17005_v49, %v1550_v62  ;;  %v10835_v22 = vshll.u32 %v1543_v51, 8  ;;  %v1557_v42 = vor.u32 %v1556_v52, %v1555_v37 }
 0x1ac   : > { %v10837_v26 = vsub.s32 %v1491_v53, %v1494_v7  ;;  %v1560_v9 = vor.u32 %v1559_v43, %v1558_v55  ;;  %v1563_v3 = vor.u32 %v1562_v13, %v1561_v38  ;;  %v10839_v14 = vpop.eup %9598  ;;  %v1401_v33 = vshrl.u32 %v1383_v27, %v1399_v56 }
 0x1ad   : > { %17030 = vst [vmem:[#allocation31_spill] sm:$0xff] %v10839_v14  ;;  %v1405_v15 = vshll.u32 %v1404_v8, 23  ;;  %v1566_v24 = vor.u32 %v1565_v20, %v1564_v31  ;;  %v8871_v11 = vadd.s32 4294967169, %v1643_v48  ;;  %vm1225_vm14 = vcmp.lt.s32.totalorder %v10397_v39, 0 }
 0x1ae   : > { %v1497_v50 = vsub.s32 0, %v10837_v26  ;;  %v1551_v16 = vshrl.u32 %v17008_v60, %v1550_v62  ;;  %vm1567_vm15 = vcmp.lt.s32.totalorder %v1548_v19, 1  ;;  %vm1570_vm1 = vcmp.lt.s32.totalorder %v1548_v19, 4 }
 0x1af   : > { %vm1568_vm4 = vcmp.lt.s32.totalorder %v1548_v19, 2  ;;  %vm1569_vm6 = vcmp.lt.s32.totalorder %v1548_v19, 3  ;;  %v1575_v53 = vsel %vm1567_vm15, %v1554_v5, %v1557_v42  ;;  %v1576_v43 = vsel %vm1570_vm1, %v1563_v3, 920167782 }
 0x1b0   : > { %v8864_v51 = vmin.u32 %v1497_v50, %v10837_v26  ;;  %v1572_v12 = vsel %vm1570_vm1, %v1560_v9, 2102212464  ;;  %v1577_v27 = vsel %vm1569_vm6, %v1560_v9, %v1576_v43  ;;  %v1579_v20 = vsel %vm1567_vm15, %v1557_v42, %v1560_v9 }
 0x1b1   : > { %v1400_v56 = vshll.u32 %v10733_v21, %v10792_v10  ;;  %v1578_v48 = vsel %vm1568_vm4, %v1575_v53, %v1577_v27  ;;  %v1580_v8 = vsel %vm1570_vm1, %v1566_v24, 1326507024  ;;  %v1649_v62 = vadd.s32 1, %v8871_v11 }
 0x1b2   : > { %v1406_v37 = vor.u32 4788187, %v1405_v15  ;;  %v1499_v55 = vclz %v8864_v51  ;;  %v1571_v38 = vsel %vm1567_vm15, %v1551_v16, %v1554_v5  ;;  %v1581_v7 = vsel %vm1569_vm6, %v1563_v3, %v1580_v8 }
 0x1b3   : > { %v1573_v52 = vsel %vm1569_vm6, %v1557_v42, %v1572_v12  ;;  %v1582_v13 = vsel %vm1568_vm4, %v1579_v20, %v1581_v7  ;;  %v10853_v31 = vmul.u32.u64.low %v10835_v22, %v1578_v48  ;;  %v10854_v50 = vmul.u32.u64.high %v10835_v22, %v1578_v48, %v10853_v31 }
 0x1b4   : > { %v1402_v9 = vor.u32 %v1401_v33, %v1400_v56  ;;  %v8865_v43 = vadd.s32 4294967294, %v1499_v55  ;;  %v10858_v21 = vmul.u32.u64.low %v10835_v22, %v1582_v13  ;;  %v10859_v10 = vmul.u32.u64.high %v10835_v22, %v1582_v13, %v10858_v21 }
 0x1b5   : > { %9600 = vsinq.f32 %v10783_v61  ;;  %v1647_v11 = vor.u32 8388608, %v10820_v45  ;;  %vm1650_vm8 = vcmp.gt.s32.totalorder %v1649_v62, 0  ;;  %v1954_v3 = vand.u32 2139095040, %v10811_v4 }
 0x1b6   : > { %v1407_v15 = vand.u32 2147483647, %v1406_v37  ;;  %vm8866_vm9 = vcmp.lt.s32.totalorder %v8865_v43, 0  ;;  %v1574_v24 = vsel %vm1568_vm4, %v1571_v38, %v1573_v52  ;;  %v1651_v42 = vsel %vm1650_vm8, %v1649_v62, 0 }
 0x1b7   : > { %v17031_v33 = vxor.u32 2147483648, %v10787_v44  ;;  %v1593_v61 = vadd.s32 1, %v10854_v50  ;;  %v1653_v45 = vand.u32 31, %v1651_v42  ;;  %v1095_v53 = vand.u32 2147483647, %v10815_v46 }
 0x1b8   : > { %v1409_v51 = vcvt.s32.f32 %v1402_v9  ;;  %v1502_v12 = vsel %vm8866_vm9, 0, %v8865_v43  ;;  %v16792_v19 = vand.u32 2147483647, %v10811_v4  ;;  %v1487_v27 = vadd.s32 %v10754_v54, %v10770_v57 }
 0x1b9   : > { %v10870_v5 = vsel %vm1225_vm14, %v17031_v33, %v10787_v44  ;;  %v1590_v20 = vmul.u32 %v10835_v22, %v1574_v24  ;;  %vm1592_vm11 = vc.u32 %v10859_v10, %v10853_v31  ;;  %v1654_v44 = vsub.s32 32, %v1653_v45 }
 0x1ba   : > { %v10881_v56 = vmul.f32 %v1409_v51, %v1407_v15  ;;  %v1594_v48 = vsel %vm1592_vm11, %v1593_v61, %v10854_v50  ;;  %v10884_v8 = vshll.u32 %v1647_v11, 8  ;;  %v1955_v62 = vshrl.u32 %v1954_v3, 23 }
 0x1bb   : > { %v1507_v37 = vsub.s32 4294967266, %v1502_v12  ;;  %v1595_v55 = vadd.s32 %v1594_v48, %v1590_v20  ;;  %v1657_v38 = vshrl.u32 %v17011_v17, %v1654_v44  ;;  %v1660_v7 = vshrl.u32 %v17002_v63, %v1654_v44 }
 0x1bc   : > { %v1656_v54 = vshll.u32 %v17008_v60, %v1653_v45  ;;  %v1659_v22 = vshll.u32 %v17011_v17, %v1653_v45  ;;  %v1662_v57 = vshll.u32 %v17002_v63, %v1653_v45  ;;  %v1663_v52 = vshrl.u32 %v17003_v47, %v1654_v44 }
 0x1bd   : > { %v1596_v13 = vadd.s32 536870912, %v1595_v55  ;;  %v1652_v9 = vshrl.u32 %v1651_v42, 5  ;;  %v1665_v50 = vshll.u32 %v17003_v47, %v1653_v45  ;;  %v1666_v43 = vshrl.u32 %v17004_v58, %v1654_v44 }
 0x1be   : > { %v1503_v21 = vsub.s32 32, %v1502_v12  ;;  %v1658_v11 = vor.u32 %v1657_v38, %v1656_v54  ;;  %v1661_v3 = vor.u32 %v1660_v7, %v1659_v22  ;;  %v1664_v15 = vor.u32 %v1663_v52, %v1662_v57 }
 0x1bf   : > { %v10894_v24 = vpop.eup %9600  ;;  %v10896_v33 = vshrl.u32 %v1596_v13, 30  ;;  %v1667_v61 = vor.u32 %v1666_v43, %v1665_v50  ;;  %v1668_v51 = vshll.u32 %v17004_v58, %v1653_v45  ;;  %v1669_v20 = vshrl.u32 %v17005_v49, %v1654_v44 }
 0x1c0   : > { %v1504_v48 = vshll.u32 %v10837_v26, %v1502_v12  ;;  %v1508_v42 = vadd.s32 127, %v1507_v37  ;;  %v1958_v16 = vand.u32 8388607, %v16792_v19  ;;  %v657_v38 = vmul.f32 %v10649_v30, %v10407_v1 }
 0x1c1   : > { %v1598_v7 = vshll.u32 %v10896_v33, 30  ;;  %v1670_v54 = vor.u32 %v1669_v20, %v1668_v51  ;;  %vm1671_vm12 = vcmp.lt.s32.totalorder %v1652_v9, 1  ;;  %vm1674_vm13 = vcmp.lt.s32.totalorder %v1652_v9, 4 }
 0x1c2   : > { %v1505_v22 = vshrl.u32 %v1487_v27, %v1503_v21  ;;  %vm1673_vm15 = vcmp.lt.s32.totalorder %v1652_v9, 3  ;;  %v1679_v45 = vsel %vm1671_vm12, %v1658_v11, %v1661_v3  ;;  %v1680_v57 = vsel %vm1674_vm13, %v1667_v61, 920167782 }
 0x1c3   : > { %v10907_v52 = vsub.s32 %v1595_v55, %v1598_v7  ;;  %vm1672_vm1 = vcmp.lt.s32.totalorder %v1652_v9, 2  ;;  %v1676_v26 = vsel %vm1674_vm13, %v1664_v15, 2102212464  ;;  %v1681_v12 = vsel %vm1673_vm15, %v1664_v15, %v1680_v57 }
 0x1c4   : > { %v1509_v37 = vshll.u32 %v1508_v42, 23  ;;  %v1655_v13 = vshrl.u32 %v17008_v60, %v1654_v44  ;;  %v1682_v1 = vsel %vm1672_vm1, %v1679_v45, %v1681_v12  ;;  %v1683_v50 = vsel %vm1671_vm12, %v1661_v3, %v1664_v15 }
 0x1c5   : > { %v1601_v43 = vsub.s32 0, %v10907_v52  ;;  %v1684_v27 = vsel %vm1674_vm13, %v1670_v54, 1326507024  ;;  %v10915_v21 = vmul.u32.u64.low %v10884_v8, %v1682_v1  ;;  %v10916_v51 = vmul.u32.u64.high %v10884_v8, %v1682_v1, %v10915_v21 }
 0x1c6   : > { %v1675_v55 = vsel %vm1671_vm12, %v1655_v13, %v1658_v11  ;;  %v1677_v20 = vsel %vm1673_vm15, %v1661_v3, %v1676_v26  ;;  %v1685_v42 = vsel %vm1673_vm15, %v1667_v61, %v1684_v27  ;;  %v8883_v7 = vadd.s32 4294967169, %v1955_v62 }
 0x1c7   : > { %v10922_v44 = vor.u32 %v1505_v22, %v1504_v48  ;;  %v8868_v45 = vmin.u32 %v1601_v43, %v10907_v52  ;;  %v1686_v15 = vsel %vm1672_vm1, %v1683_v50, %v1685_v42  ;;  %v660_v54 = vmul.f32 %v10765_v2, %v10493_v32 }
 0x1c8   : > { %v10928_v57 = vor.u32 4788187, %v1509_v37  ;;  %v10931_v12 = vmul.u32.u64.low %v10884_v8, %v1686_v15  ;;  %v10932_v1 = vmul.u32.u64.high %v10884_v8, %v1686_v15, %v10931_v12  ;;  %v1961_v11 = vadd.s32 1, %v8883_v7 }
 0x1c9   : > { %v1603_v3 = vclz %v8868_v45  ;;  %v1678_v61 = vsel %vm1672_vm1, %v1675_v55, %v1677_v20  ;;  %v1697_v62 = vadd.s32 1, %v10916_v51  ;;  %v1959_v48 = vor.u32 8388608, %v1958_v16 }
 0x1ca   : > { %v17032_v22 = vcvt.s32.f32 %v10813_v28  ;;  %vm1962_vm4 = vcmp.gt.s32.totalorder %v1961_v11, 0  ;;  %v10944_v37 = vadd.f32 %v10676_v36, %v657_v38  ;;  %v1591_v9 = vadd.s32 %v10853_v31, %v10859_v10 }
 0x1cb   : > { %v8869_v50 = vadd.s32 4294967294, %v1603_v3  ;;  %v1963_v43 = vsel %vm1962_vm4, %v1961_v11, 0  ;;  %v1694_v46 = vmul.u32 %v10884_v8, %v1678_v61  ;;  %vm1696_vm6 = vc.u32 %v10932_v1, %v10915_v21 }
 0x1cc   : > { %v10940_v26 = vmul.f32 %v17032_v22, %v1095_v53  ;;  %v1965_v28 = vand.u32 31, %v1963_v43  ;;  %v1698_v53 = vsel %vm1696_vm6, %v1697_v62, %v10916_v51  ;;  %v10954_v38 = vshll.u32 %v1959_v48, 8 }
 0x1cd   : > { %vm8870_vm8 = vcmp.lt.s32.totalorder %v8869_v50, 0  ;;  %v10957_v27 = vadd.f32 %v10802_v35, %v660_v54  ;;  %v1699_v31 = vadd.s32 %v1698_v53, %v1694_v46  ;;  %v1746_v45 = vand.u32 2139095040, %v10944_v37 }
 0x1ce   : > { %v1606_v55 = vsel %vm8870_vm8, 0, %v8869_v50  ;;  %v1966_v10 = vsub.s32 32, %v1965_v28  ;;  %v1968_v8 = vshll.u32 %v17008_v60, %v1965_v28  ;;  %v1971_v51 = vshll.u32 %v17011_v17, %v1965_v28 }
 0x1cf   : > { %v1607_v42 = vsub.s32 32, %v1606_v55  ;;  %v1611_v7 = vsub.s32 4294967266, %v1606_v55  ;;  %v1700_v15 = vadd.s32 536870912, %v1699_v31  ;;  %v1964_v3 = vshrl.u32 %v1963_v43, 5 }
 0x1d0   : > { %v1969_v12 = vshrl.u32 %v17011_v17, %v1966_v10  ;;  %v1972_v11 = vshrl.u32 %v17002_v63, %v1966_v10  ;;  %v1974_v61 = vshll.u32 %v17002_v63, %v1965_v28  ;;  %v1975_v62 = vshrl.u32 %v17003_v47, %v1966_v10 }
 0x1d1   : > { %v1612_v54 = vadd.s32 127, %v1611_v7  ;;  %v1609_v48 = vshrl.u32 %v1591_v9, %v1607_v42  ;;  %v10967_v22 = vshrl.u32 %v1700_v15, 30  ;;  %v1977_v20 = vshll.u32 %v17003_v47, %v1965_v28 }
 0x1d2   : > { %v1970_v50 = vor.u32 %v1969_v12, %v1968_v8  ;;  %v1973_v46 = vor.u32 %v1972_v11, %v1971_v51  ;;  %v1976_v19 = vor.u32 %v1975_v62, %v1974_v61  ;;  %v1978_v13 = vshrl.u32 %v17004_v58, %v1966_v10 }
 0x1d3   : > { %17033 = vst [vmem:[#allocation32_spill] sm:$0xff] %v10967_v22  ;;  %v1613_v53 = vshll.u32 %v1612_v54, 23  ;;  %vm1329_vm9 = vcmp.lt.s32.totalorder %v10542_v0, 0  ;;  %v1702_v7 = vshll.u32 %v10967_v22, 30  ;;  %v1980_v43 = vshll.u32 %v17004_v58, %v1965_v28  ;;  %v17099_v54 = vld [vmem:[#allocation17_spill] sm:$0xff] }
 0x1d4   : > { %v1981_v16 = vshrl.u32 %v17005_v49, %v1966_v10  ;;  %v1747_v32 = vshrl.u32 %v1746_v45, 23  ;;  %v1608_v9 = vshll.u32 %v10907_v52, %v1606_v55  ;;  %v1967_v8 = vshrl.u32 %v17008_v60, %v1966_v10 }
 0x1d5   : > { %v1614_v42 = vor.u32 4788187, %v1613_v53  ;;  %v1979_v15 = vor.u32 %v1978_v13, %v1977_v20  ;;  %v10977_v12 = vsub.s32 %v1699_v31, %v1702_v7  ;;  %vm1983_vm11 = vcmp.lt.s32.totalorder %v1964_v3, 1 }
 0x1d6   : > { %v1982_v51 = vor.u32 %v1981_v16, %v1980_v43  ;;  %vm1986_vm12 = vcmp.lt.s32.totalorder %v1964_v3, 4  ;;  %v17034_v11 = vand.u32 2147483647, %v10542_v0  ;;  %v1610_v28 = vor.u32 %v1609_v48, %v1608_v9 }
 0x1d7   : > { %vm1984_vm15 = vcmp.lt.s32.totalorder %v1964_v3, 2  ;;  %v1988_v45 = vsel %vm1986_vm12, %v1976_v19, 2102212464  ;;  %v1991_v61 = vsel %vm1983_vm11, %v1970_v50, %v1973_v46  ;;  %v1705_v52 = vsub.s32 0, %v10977_v12 }
 0x1d8   : > { %vm10981_vm13 = vcmp.le.f32.partialorder %v17034_v11, 0.7853982  ;;  %vm1985_vm1 = vcmp.lt.s32.totalorder %v1964_v3, 3  ;;  %v1992_v55 = vsel %vm1986_vm12, %v1979_v15, 920167782  ;;  %v1995_v13 = vsel %vm1983_vm11, %v1973_v46, %v1976_v19 }
 0x1d9   : > { %v1615_v31 = vand.u32 2147483647, %v1614_v42  ;;  %v1987_v10 = vsel %vm1983_vm11, %v1967_v8, %v1970_v50  ;;  %v1993_v16 = vsel %vm1985_vm1, %v1976_v19, %v1992_v55  ;;  %v1996_v20 = vsel %vm1986_vm12, %v1982_v51, 1326507024 }
 0x1da   : > { %v8872_v62 = vmin.u32 %v1705_v52, %v10977_v12  ;;  %v1989_v53 = vsel %vm1985_vm1, %v1973_v46, %v1988_v45  ;;  %v1994_v7 = vsel %vm1984_vm15, %v1991_v61, %v1993_v16  ;;  %v1997_v43 = vsel %vm1985_vm1, %v1979_v15, %v1996_v20 }
 0x1db   : > { %vm16818_vm4 = vcmp.lt.s32.totalorder %v10436_v40, 0  ;;  %v1617_v48 = vcvt.s32.f32 %v1610_v28  ;;  %v1998_v9 = vsel %vm1984_vm15, %v1995_v13, %v1997_v43  ;;  %vm16817_vm6 = vcmp.lt.s32.totalorder %v10581_v34, 0 }
 0x1dc   : > { %v10991_v11 = vmul.u32.u64.low %v10954_v38, %v1994_v7  ;;  %v10992_v22 = vmul.u32.u64.high %v10954_v38, %v1994_v7, %v10991_v11  ;;  %v1707_v19 = vclz %v8872_v62  ;;  %v8875_v46 = vadd.s32 4294967169, %v1747_v32 }
 0x1dd   : > { %v10997_v50 = vmul.u32.u64.low %v10954_v38, %v1998_v9  ;;  %v10998_v42 = vmul.u32.u64.high %v10954_v38, %v1998_v9, %v10997_v50  ;;  %v17037_v8 = vxor.u32 2147483648, %v10881_v56  ;;  %v17038_v51 = vand.u32 2147483647, %v10928_v57 }
 0x1de   : > { %v17039_v28 = vcvt.s32.f32 %v10922_v44  ;;  %v1990_v61 = vsel %vm1984_vm15, %v1987_v10, %v1989_v53  ;;  %v2058_v52 = vand.u32 2139095040, %v10957_v27  ;;  %v1413_v55 = vsub.s32 4, %v10716_v59 }
 0x1df   : > { %v1412_v15 = vsel %vm1329_vm9, %v17037_v8, %v10881_v56  ;;  %v1618_v13 = vmul.f32 %v1617_v48, %v1615_v31  ;;  %v17040_v32 = vand.u32 2147483647, %v10944_v37  ;;  %v1753_v20 = vadd.s32 1, %v8875_v46 }
 0x1e0   : > { %v1514_v45 = vmul.f32 %v17039_v28, %v17038_v51  ;;  %v1099_v62 = vxor.u32 2147483648, %v10940_v26  ;;  %vm1537_vm8 = vcmp.lt.s32.totalorder %v10696_v18, 0  ;;  %v2009_v56 = vadd.s32 1, %v10992_v22 }
 0x1e1   : > { %v1750_v16 = vand.u32 8388607, %v17040_v32  ;;  %v2059_v57 = vshrl.u32 %v2058_v52, 23  ;;  %v1415_v44 = vsel %vm10981_vm13, %v10542_v0, %v1412_v15  ;;  %v8873_v3 = vadd.s32 4294967294, %v1707_v19 }
 0x1e2   : > { %v2006_v10 = vmul.u32 %v10954_v38, %v1990_v61  ;;  %vm2008_vm11 = vc.u32 %v10998_v42, %v10991_v11  ;;  %v1515_v31 = vxor.u32 2147483648, %v1514_v45  ;;  %v1621_v53 = vsub.s32 4, %v10896_v33 }
 0x1e3   : > { %v2010_v7 = vsel %vm2008_vm11, %v2009_v56, %v10992_v22  ;;  %vm1754_vm12 = vcmp.gt.s32.totalorder %v1753_v20, 0  ;;  %v11028_v43 = vsel %vm1329_vm9, %v1413_v55, %v10716_v59  ;;  %v1619_v48 = vxor.u32 2147483648, %v1618_v13 }
 0x1e4   : > { %v2011_v9 = vadd.s32 %v2010_v7, %v2006_v10  ;;  %v1751_v50 = vor.u32 8388608, %v1750_v16  ;;  %9602 = vcosq.f32 %v1415_v44  ;;  %v1755_v19 = vsel %vm1754_vm12, %v1753_v20, 0 }
 0x1e5   : > { %v16795_v38 = vand.u32 2147483647, %v10957_v27  ;;  %v8887_v46 = vadd.s32 4294967169, %v2059_v57  ;;  %v11034_v8 = vsel %vm16818_vm4, %v1099_v62, %v10940_v26  ;;  %9604 = vsinq.f32 %v1415_v44 }
 0x1e6   : > { %vm8874_vm15 = vcmp.lt.s32.totalorder %v8873_v3, 0  ;;  %v2012_v22 = vadd.s32 536870912, %v2011_v9  ;;  %v11038_v59 = vsel %vm16817_vm6, %v1515_v31, %v1514_v45  ;;  %v11043_v15 = vsel %vm1537_vm8, %v1621_v53, %v10896_v33 }
 0x1e7   : > { %17041 = vst [vmem:[#allocation33_spill] sm:$0xff] %v11043_v15  ;;  %v1757_v51 = vand.u32 31, %v1755_v19  ;;  %v658_v28 = vmul.f32 %v10649_v30, %v10552_v29  ;;  %v11049_v26 = vsel %vm1537_vm8, %v1619_v48, %v1618_v13  ;;  %v11053_v61 = vadd.s32 %v10915_v21, %v10932_v1 }
 0x1e8   : > { %v11055_v52 = vshrl.u32 %v2012_v22, 30  ;;  %v11057_v45 = vshll.u32 %v1751_v50, 8  ;;  %v11059_v55 = vsel %vm8874_vm15, 0, %v8873_v3  ;;  %v11063_v32 = vand.u32 8388607, %v16795_v38 }
 0x1e9   : > { %v1758_v33 = vsub.s32 32, %v1757_v51  ;;  %v2065_v29 = vadd.s32 1, %v8887_v46  ;;  %v1756_v13 = vshrl.u32 %v1755_v19, 5  ;;  %v1760_v16 = vshll.u32 %v17008_v60, %v1757_v51 }
 0x1ea   : > { %v2014_v30 = vshll.u32 %v11055_v52, 30  ;;  %v1763_v21 = vshll.u32 %v17011_v17, %v1757_v51  ;;  %v1766_v62 = vshll.u32 %v17002_v63, %v1757_v51  ;;  %v1711_v57 = vsub.s32 32, %v11059_v55 }
 0x1eb   : > { %v1761_v1 = vshrl.u32 %v17011_v17, %v1758_v33  ;;  %v1764_v20 = vshrl.u32 %v17002_v63, %v1758_v33  ;;  %v1767_v56 = vshrl.u32 %v17003_v47, %v1758_v33  ;;  %v1769_v3 = vshll.u32 %v17003_v47, %v1757_v51 }
 0x1ec   : > { %v11073_v44 = vsub.s32 %v2011_v9, %v2014_v30  ;;  %v11077_v10 = vadd.f32 %v10676_v36, %v658_v28  ;;  %v1770_v48 = vshrl.u32 %v17004_v58, %v1758_v33  ;;  %v1715_v50 = vsub.s32 4294967266, %v11059_v55 }
 0x1ed   : > { %v1762_v31 = vor.u32 %v1761_v1, %v1760_v16  ;;  %v1765_v53 = vor.u32 %v1764_v20, %v1763_v21  ;;  %v1768_v7 = vor.u32 %v1767_v56, %v1766_v62  ;;  %v1772_v46 = vshll.u32 %v17004_v58, %v1757_v51 }
 0x1ee   : > { %17042 = vst [vmem:[#allocation34_spill] sm:$0xff] %v11077_v10  ;;  %v2017_v19 = vsub.s32 0, %v11073_v44  ;;  %v1773_v22 = vshrl.u32 %v17005_v49, %v1758_v33  ;;  %v11084_v9 = vpop.eup %9602  ;;  %v1759_v30 = vshrl.u32 %v17008_v60, %v1758_v33  ;;  %v1771_v38 = vor.u32 %v1770_v48, %v1769_v3 }
 0x1ef   : > { %17043 = vst [vmem:[#allocation35_spill] sm:$0xff] %v11084_v9  ;;  %vm1775_vm9 = vcmp.lt.s32.totalorder %v1756_v13, 1  ;;  %vm2066_vm1 = vcmp.gt.s32.totalorder %v2065_v29, 0  ;;  %v11087_v36 = vpop.eup %9604  ;;  %vm1776_vm8 = vcmp.lt.s32.totalorder %v1756_v13, 2  ;;  %vm1778_vm11 = vcmp.lt.s32.totalorder %v1756_v13, 4 }
 0x1f0   : > { %17044 = vst [vmem:[#allocation36_spill] sm:$0xff] %v11087_v36  ;;  %v8884_v28 = vmin.u32 %v2017_v19, %v11073_v44  ;;  %v1774_v16 = vor.u32 %v1773_v22, %v1772_v46  ;;  %vm1777_vm12 = vcmp.lt.s32.totalorder %v1756_v13, 3  ;;  %v1780_v21 = vsel %vm1778_vm11, %v1768_v7, 2102212464 }
 0x1f1   : > { %v1783_v1 = vsel %vm1775_vm9, %v1762_v31, %v1765_v53  ;;  %v1784_v51 = vsel %vm1778_vm11, %v1771_v38, 920167782  ;;  %v1779_v62 = vsel %vm1775_vm9, %v1759_v30, %v1762_v31  ;;  %v1787_v15 = vsel %vm1775_vm9, %v1765_v53, %v1768_v7 }
 0x1f2   : > { %v2019_v20 = vclz %v8884_v28  ;;  %v1785_v56 = vsel %vm1777_vm12, %v1768_v7, %v1784_v51  ;;  %v1781_v9 = vsel %vm1777_vm12, %v1765_v53, %v1780_v21  ;;  %v1788_v3 = vsel %vm1778_vm11, %v1774_v16, 1326507024 }
 0x1f3   : > { %v1786_v33 = vsel %vm1776_vm8, %v1783_v1, %v1785_v56  ;;  %v2067_v48 = vsel %vm2066_vm1, %v2065_v29, 0  ;;  %v1789_v0 = vsel %vm1777_vm12, %v1771_v38, %v1788_v3  ;;  %v2007_v22 = vadd.s32 %v10991_v11, %v10998_v42 }
 0x1f4   : > { %v8885_v36 = vadd.s32 4294967294, %v2019_v20  ;;  %v11093_v19 = vmul.u32.u64.low %v11057_v45, %v1786_v33  ;;  %v11094_v46 = vmul.u32.u64.high %v11057_v45, %v1786_v33, %v11093_v19  ;;  %v1790_v31 = vsel %vm1776_vm8, %v1787_v15, %v1789_v0 }
 0x1f5   : > { %v2063_v7 = vor.u32 8388608, %v11063_v32  ;;  %v2069_v53 = vand.u32 31, %v2067_v48  ;;  %v1782_v30 = vsel %vm1776_vm8, %v1779_v62, %v1781_v9  ;;  %v1712_v38 = vshll.u32 %v10977_v12, %v11059_v55 }
 0x1f6   : > { %vm8886_vm15 = vcmp.lt.s32.totalorder %v8885_v36, 0  ;;  %v11103_v29 = vmul.u32.u64.low %v11057_v45, %v1790_v31  ;;  %v11104_v28 = vmul.u32.u64.high %v11057_v45, %v1790_v31, %v11103_v29  ;;  %v1713_v11 = vshrl.u32 %v11053_v61, %v1711_v57 }
 0x1f7   : > { %v2022_v16 = vsel %vm8886_vm15, 0, %v8885_v36  ;;  %v2070_v21 = vsub.s32 32, %v2069_v53  ;;  %v1716_v0 = vadd.s32 127, %v1715_v50  ;;  %v1801_v15 = vadd.s32 1, %v11094_v46 }
 0x1f8   : > { %v2027_v42 = vsub.s32 4294967266, %v2022_v16  ;;  %v1798_v32 = vmul.u32 %v11057_v45, %v1782_v30  ;;  %v11114_v51 = vshll.u32 %v2063_v7, 8  ;;  %vm1800_vm9 = vc.u32 %v11104_v28, %v11093_v19 }
 0x1f9   : > { %v2073_v13 = vshrl.u32 %v17011_v17, %v2070_v21  ;;  %v2076_v9 = vshrl.u32 %v17002_v63, %v2070_v21  ;;  %v2068_v12 = vshrl.u32 %v2067_v48, 5  ;;  %v2072_v55 = vshll.u32 %v17008_v60, %v2069_v53 }
 0x1fa   : > { %v2075_v61 = vshll.u32 %v17011_v17, %v2069_v53  ;;  %v2023_v57 = vsub.s32 32, %v2022_v16  ;;  %v1802_v50 = vsel %vm1800_vm9, %v1801_v15, %v11094_v46  ;;  %v2078_v36 = vshll.u32 %v17002_v63, %v2069_v53 }
 0x1fb   : > { %v2079_v45 = vshrl.u32 %v17003_v47, %v2070_v21  ;;  %v2028_v20 = vadd.s32 127, %v2027_v42  ;;  %v1803_v62 = vadd.s32 %v1802_v50, %v1798_v32  ;;  %v2074_v56 = vor.u32 %v2073_v13, %v2072_v55 }
 0x1fc   : > { %v2077_v33 = vor.u32 %v2076_v9, %v2075_v61  ;;  %v2081_v3 = vshll.u32 %v17003_v47, %v2069_v53  ;;  %v2082_v31 = vshrl.u32 %v17004_v58, %v2070_v21  ;;  %v2084_v48 = vshll.u32 %v17004_v58, %v2069_v53 }
 0x1fd   : > { %v2085_v7 = vshrl.u32 %v17005_v49, %v2070_v21  ;;  %v11127_v30 = vor.u32 %v1713_v11, %v1712_v38  ;;  %v1717_v29 = vshll.u32 %v1716_v0, 23  ;;  %v1804_v46 = vadd.s32 536870912, %v1803_v62 }
 0x1fe   : > { %v2080_v15 = vor.u32 %v2079_v45, %v2078_v36  ;;  %v2024_v1 = vshll.u32 %v11073_v44, %v2022_v16  ;;  %v2083_v14 = vor.u32 %v2082_v31, %v2081_v3  ;;  %v1850_v32 = vand.u32 2139095040, %v11077_v10 }
 0x1ff   : > { %v2086_v42 = vor.u32 %v2085_v7, %v2084_v48  ;;  %v17045_v13 = vand.u32 2147483647, %v10696_v18  ;;  %v2029_v53 = vshll.u32 %v2028_v20, 23  ;;  %v11137_v55 = vshrl.u32 %v1804_v46, 30 }
 0x200   : > { %vm2087_vm8 = vcmp.lt.s32.totalorder %v2068_v12, 1  ;;  %vm2090_vm11 = vcmp.lt.s32.totalorder %v2068_v12, 4  ;;  %v2025_v38 = vshrl.u32 %v2007_v22, %v2023_v57  ;;  %v2071_v11 = vshrl.u32 %v17008_v60, %v2070_v21 }
 0x201   : > { %vm11133_vm1 = vcmp.le.f32.partialorder %v17045_v13, 0.7853982  ;;  %v2095_v44 = vsel %vm2087_vm8, %v2074_v56, %v2077_v33  ;;  %v2096_v16 = vsel %vm2090_vm11, %v2083_v14, 920167782  ;;  %v1806_v0 = vshll.u32 %v11137_v55, 30 }
 0x202   : > { %vm2088_vm12 = vcmp.lt.s32.totalorder %v2068_v12, 2  ;;  %vm2089_vm15 = vcmp.lt.s32.totalorder %v2068_v12, 3  ;;  %v2092_v61 = vsel %vm2090_vm11, %v2080_v15, 2102212464  ;;  %v2099_v36 = vsel %vm2087_vm8, %v2077_v33, %v2080_v15 }
 0x203   : > { %v2097_v50 = vsel %vm2089_vm15, %v2080_v15, %v2096_v16  ;;  %v2100_v45 = vsel %vm2090_vm11, %v2086_v42, 1326507024  ;;  %v1851_v20 = vshrl.u32 %v1850_v32, 23  ;;  %v2030_v3 = vor.u32 4788187, %v2029_v53 }
 0x204   : > { %v11143_v31 = vsub.s32 %v1803_v62, %v1806_v0  ;;  %v2091_v22 = vsel %vm2087_vm8, %v2071_v11, %v2074_v56  ;;  %v2098_v21 = vsel %vm2088_vm12, %v2095_v44, %v2097_v50  ;;  %v2093_v57 = vsel %vm2089_vm15, %v2077_v33, %v2092_v61 }
 0x205   : > { %v2101_v48 = vsel %vm2089_vm15, %v2083_v14, %v2100_v45  ;;  %v11148_v7 = vmul.u32.u64.low %v11114_v51, %v2098_v21  ;;  %v11149_v46 = vmul.u32.u64.high %v11114_v51, %v2098_v21, %v11148_v7  ;;  %v2026_v13 = vor.u32 %v2025_v38, %v2024_v1 }
 0x206   : > { %v1809_v16 = vsub.s32 0, %v11143_v31  ;;  %v2102_v15 = vsel %vm2088_vm12, %v2099_v36, %v2101_v48  ;;  %v8879_v42 = vadd.s32 4294967169, %v1851_v20  ;;  %v11154_v32 = vor.u32 4788187, %v1717_v29 }
 0x207   : > { %v11157_v62 = vmul.u32.u64.low %v11114_v51, %v2102_v15  ;;  %v11158_v56 = vmul.u32.u64.high %v11114_v51, %v2102_v15, %v11157_v62  ;;  %v17048_v33 = vand.u32 2147483647, %v11077_v10  ;;  %v2094_v11 = vsel %vm2088_vm12, %v2091_v22, %v2093_v57 }
 0x208   : > { %v8876_v53 = vmin.u32 %v1809_v16, %v11143_v31  ;;  %v1857_v44 = vadd.s32 1, %v8879_v42  ;;  %v661_v1 = vmul.f32 %v10765_v2, %v10642_v25  ;;  %v11170_v29 = vsel %vm11133_vm1, %v10696_v18, %v11049_v26 }
 0x209   : > { %v1854_v14 = vand.u32 8388607, %v17048_v33  ;;  %v2031_v0 = vand.u32 2147483647, %v2030_v3  ;;  %v2113_v61 = vadd.s32 1, %v11149_v46  ;;  %v2033_v50 = vcvt.s32.f32 %v2026_v13 }
 0x20a   : > { %v1811_v36 = vclz %v8876_v53  ;;  %vm1858_vm9 = vcmp.gt.s32.totalorder %v1857_v44, 0  ;;  %v2110_v12 = vmul.u32 %v11114_v51, %v2094_v11  ;;  %vm2112_vm8 = vc.u32 %v11158_v56, %v11148_v7 }
 0x20b   : > { %v1855_v45 = vor.u32 8388608, %v1854_v14  ;;  %v1859_v25 = vsel %vm1858_vm9, %v1857_v44, 0  ;;  %v11178_v20 = vadd.f32 %v10802_v35, %v661_v1  ;;  %v2114_v3 = vsel %vm2112_vm8, %v2113_v61, %v11149_v46 }
 0x20c   : > { %v8877_v22 = vadd.s32 4294967294, %v1811_v36  ;;  %v1861_v21 = vand.u32 31, %v1859_v25  ;;  %v11182_v57 = vmul.f32 %v2033_v50, %v2031_v0  ;;  %v1799_v48 = vadd.s32 %v11093_v19, %v11104_v28 }
 0x20d   : > { %v2115_v13 = vadd.s32 %v2114_v3, %v2110_v12  ;;  %v11188_v51 = vmul.f32 %v10765_v2, %v10761_v23  ;;  %v11190_v16 = vshrl.u32 %v1859_v25, 5  ;;  %v11192_v42 = vshll.u32 %v1855_v45, 8 }
 0x20e   : > { %vm8878_vm11 = vcmp.lt.s32.totalorder %v8877_v22, 0  ;;  %v1862_v15 = vsub.s32 32, %v1861_v21  ;;  %v1864_v46 = vshll.u32 %v17008_v60, %v1861_v21  ;;  %v1867_v19 = vshll.u32 %v17011_v17, %v1861_v21 }
 0x20f   : > { %v1814_v62 = vsel %vm8878_vm11, 0, %v8877_v22  ;;  %v2116_v33 = vadd.s32 536870912, %v2115_v13  ;;  %v1870_v28 = vshll.u32 %v17002_v63, %v1861_v21  ;;  %v1873_v50 = vshll.u32 %v17003_v47, %v1861_v21 }
 0x210   : > { %v1815_v53 = vsub.s32 32, %v1814_v62  ;;  %v1819_v11 = vsub.s32 4294967266, %v1814_v62  ;;  %v1865_v2 = vshrl.u32 %v17011_v17, %v1862_v15  ;;  %v1868_v44 = vshrl.u32 %v17002_v63, %v1862_v15 }
 0x211   : > { %v11198_v23 = vshrl.u32 %v2116_v33, 30  ;;  %v1871_v1 = vshrl.u32 %v17003_v47, %v1862_v15  ;;  %v1874_v36 = vshrl.u32 %v17004_v58, %v1862_v15  ;;  %v1876_v14 = vshll.u32 %v17004_v58, %v1861_v21 }
 0x212   : > { %v1817_v0 = vshrl.u32 %v1799_v48, %v1815_v53  ;;  %v1820_v61 = vadd.s32 127, %v1819_v11  ;;  %v1866_v12 = vor.u32 %v1865_v2, %v1864_v46  ;;  %v1869_v25 = vor.u32 %v1868_v44, %v1867_v19 }
 0x213   : > { %v2118_v45 = vshll.u32 %v11198_v23, 30  ;;  %v1872_v22 = vor.u32 %v1871_v1, %v1870_v28  ;;  %v1875_v33 = vor.u32 %v1874_v36, %v1873_v50  ;;  %v1877_v38 = vshrl.u32 %v17005_v49, %v1862_v15 }
 0x214   : > { %v1821_v3 = vshll.u32 %v1820_v61, 23  ;;  %v1816_v26 = vshll.u32 %v11143_v31, %v1814_v62  ;;  %v1863_v48 = vshrl.u32 %v17008_v60, %v1862_v15  ;;  %v2162_v53 = vand.u32 2139095040, %v11178_v20 }
 0x215   : > { %v11209_v18 = vsub.s32 %v2115_v13, %v2118_v45  ;;  %v1878_v10 = vor.u32 %v1877_v38, %v1876_v14  ;;  %vm1879_vm12 = vcmp.lt.s32.totalorder %v11190_v16, 1  ;;  %vm1882_vm15 = vcmp.lt.s32.totalorder %v11190_v16, 4 }
 0x216   : > { %v1822_v11 = vor.u32 4788187, %v1821_v3  ;;  %v1818_v46 = vor.u32 %v1817_v0, %v1816_v26  ;;  %v1884_v21 = vsel %vm1882_vm15, %v1872_v22, 2102212464  ;;  %v1887_v28 = vsel %vm1879_vm12, %v1866_v12, %v1869_v25 }
 0x217   : > { %v2121_v19 = vsub.s32 0, %v11209_v18  ;;  %vm1953_vm9 = vcmp.lt.s32.totalorder %v10811_v4, 0  ;;  %vm1880_vm8 = vcmp.lt.s32.totalorder %v11190_v16, 2  ;;  %vm1881_vm11 = vcmp.lt.s32.totalorder %v11190_v16, 3 }
 0x218   : > { %v1888_v31 = vsel %vm1882_vm15, %v1875_v33, 920167782  ;;  %v1891_v13 = vsel %vm1879_vm12, %v1869_v25, %v1872_v22  ;;  %v1883_v38 = vsel %vm1879_vm12, %v1863_v48, %v1866_v12  ;;  %v1892_v14 = vsel %vm1882_vm15, %v1878_v10, 1326507024 }
 0x219   : > { %v8888_v15 = vmin.u32 %v2121_v19, %v11209_v18  ;;  %v1889_v62 = vsel %vm1881_vm11, %v1872_v22, %v1888_v31  ;;  %v1823_v2 = vand.u32 2147483647, %v1822_v11  ;;  %v1885_v44 = vsel %vm1881_vm11, %v1869_v25, %v1884_v21 }
 0x21a   : > { %v1890_v26 = vsel %vm1880_vm8, %v1887_v28, %v1889_v62  ;;  %v1893_v1 = vsel %vm1881_vm11, %v1875_v33, %v1892_v14  ;;  %vm16815_vm0 = vcmp.lt.s32.totalorder %v10777_v41, 0  ;;  %v17049_v45 = vand.u32 2147483647, %v11154_v32 }
 0x21b   : > { %v2123_v0 = vclz %v8888_v15  ;;  %v1894_v61 = vsel %vm1880_vm8, %v1891_v13, %v1893_v1  ;;  %v11226_v50 = vmul.u32.u64.low %v11192_v42, %v1890_v26  ;;  %v11227_v36 = vmul.u32.u64.high %v11192_v42, %v1890_v26, %v11226_v50 }
 0x21c   : > { %v17050_v10 = vcvt.s32.f32 %v11127_v30  ;;  %v17051_v25 = vand.u32 2147483647, %v10811_v4  ;;  %v1825_v3 = vcvt.s32.f32 %v1818_v46  ;;  %9606 = vcosq.f32 %v11170_v29 }
 0x21d   : > { %v11241_v33 = vmul.u32.u64.low %v11192_v42, %v1894_v61  ;;  %v11242_v48 = vmul.u32.u64.high %v11192_v42, %v1894_v61, %v11241_v33  ;;  %v2035_v11 = vxor.u32 2147483648, %v11182_v57  ;;  %vm16814_vm15 = vcmp.lt.s32.totalorder %v10944_v37, 0 }
 0x21e   : > { %v1722_v12 = vmul.f32 %v17050_v10, %v17049_v45  ;;  %vm11236_vm12 = vcmp.le.f32.partialorder %v17051_v25, 0.7853982  ;;  %v8889_v32 = vadd.s32 4294967294, %v2123_v0  ;;  %v2163_v30 = vshrl.u32 %v2162_v53, 23 }
 0x21f   : > { %9608 = vsinq.f32 %v11170_v29  ;;  %v1826_v19 = vmul.f32 %v1825_v3, %v1823_v2  ;;  %v1886_v21 = vsel %vm1880_vm8, %v1883_v38, %v1885_v44  ;;  %v17054_v46 = vand.u32 2147483647, %v11178_v20 }
 0x220   : > { %vm8890_vm11 = vcmp.lt.s32.totalorder %v8889_v32, 0  ;;  %v1905_v31 = vadd.s32 1, %v11227_v36  ;;  %v8891_v13 = vadd.s32 4294967169, %v2163_v30  ;;  %v11255_v15 = vadd.f32 %v10802_v35, %v11188_v51 }
 0x221   : > { %v2166_v28 = vand.u32 8388607, %v17054_v46  ;;  %v1723_v62 = vxor.u32 2147483648, %v1722_v12  ;;  %v2037_v53 = vsub.s32 4, %v11055_v52  ;;  %v2126_v14 = vsel %vm8890_vm11, 0, %v8889_v32 }
 0x222   : > { %vm1904_vm2 = vc.u32 %v11242_v48, %v11226_v50  ;;  %v2036_v29 = vsel %vm1953_vm9, %v2035_v11, %v11182_v57  ;;  %v2127_v16 = vsub.s32 32, %v2126_v14  ;;  %v2131_v38 = vsub.s32 4294967266, %v2126_v14 }
 0x223   : > { %v1902_v2 = vmul.u32 %v11192_v42, %v1886_v21  ;;  %v1827_v44 = vxor.u32 2147483648, %v1826_v19  ;;  %v2111_v35 = vadd.s32 %v11148_v7, %v11158_v56  ;;  %v1906_v51 = vsel %vm1904_vm2, %v1905_v31, %v11227_v36 }
 0x224   : > { %v2169_v26 = vadd.s32 1, %v8891_v13  ;;  %v2132_v1 = vadd.s32 127, %v2131_v38  ;;  %v2167_v61 = vor.u32 8388608, %v2166_v28  ;;  %v16807_v45 = vand.u32 2147483647, %v11255_v15 }
 0x225   : > { %v1907_v0 = vadd.s32 %v1906_v51, %v1902_v2  ;;  %v11270_v10 = vsel %vm16815_vm0, %v1723_v62, %v1722_v12  ;;  %v11275_v57 = vsel %vm1953_vm9, %v2037_v53, %v11055_v52  ;;  %v2129_v42 = vshrl.u32 %v2111_v35, %v2127_v16 }
 0x226   : > { %vm2170_vm8 = vcmp.gt.s32.totalorder %v2169_v26, 0  ;;  %v11280_v7 = vsel %vm11236_vm12, %v10811_v4, %v2036_v29  ;;  %v2133_v56 = vshll.u32 %v2132_v1, 23  ;;  %v11284_v3 = vsel %vm16814_vm15, %v1827_v44, %v1826_v19  ;;  %v11288_v11 = vpop.eup %9606 }
 0x227   : > { %v1908_v36 = vadd.s32 536870912, %v1907_v0  ;;  %v2171_v25 = vsel %vm2170_vm8, %v2169_v26, 0  ;;  %v2128_v12 = vshll.u32 %v11209_v18, %v2126_v14  ;;  %v893_v52 = vsub.s32 4, %v10332_v6  ;;  %17055 = vst [vmem:[#allocation37_spill] sm:$0xff] %v11288_v11 }
 0x228   : > { %v2173_v33 = vand.u32 31, %v2171_v25  ;;  %v11292_v30 = vshll.u32 %v2167_v61, 8  ;;  %v2266_v21 = vand.u32 2139095040, %v11255_v15  ;;  %v11297_v46 = vand.u32 8388607, %v16807_v45  ;;  %v17058_v61 = vld [vmem:[#allocation11_spill] sm:$0xff] }
 0x229   : > { %v11290_v32 = vshrl.u32 %v1908_v36, 30  ;;  %v11299_v28 = vpop.eup %9608  ;;  %v2130_v19 = vor.u32 %v2129_v42, %v2128_v12  ;;  %v2134_v31 = vor.u32 4788187, %v2133_v56  ;;  %v2172_v18 = vshrl.u32 %v2171_v25, 5 }
 0x22a   : > { %17057 = vst [vmem:[#allocation39_spill] sm:$0xff] %v11299_v28  ;;  %v2174_v13 = vsub.s32 32, %v2173_v33  ;;  %v2176_v53 = vshll.u32 %v17008_v60, %v2173_v33  ;;  %v2179_v14 = vshll.u32 %v17011_v17, %v2173_v33  ;;  %v2182_v29 = vshll.u32 %v17002_v63, %v2173_v33 }
 0x22b   : > { %17056 = vst [vmem:[#allocation38_spill] sm:$0xff] %v11290_v32  ;;  %v1910_v62 = vshll.u32 %v11290_v32, 30  ;;  %v2185_v44 = vshll.u32 %v17003_v47, %v2173_v33  ;;  %v2188_v26 = vshll.u32 %v17004_v58, %v2173_v33  ;;  %v17059_v42 = vand.u32 2147483647, %v17058_v61 }
 0x22c   : > { %v2177_v16 = vshrl.u32 %v17011_v17, %v2174_v13  ;;  %v2180_v38 = vshrl.u32 %v17002_v63, %v2174_v13  ;;  %v2183_v2 = vshrl.u32 %v17003_v47, %v2174_v13  ;;  %v2186_v51 = vshrl.u32 %v17004_v58, %v2174_v13 }
 0x22d   : > { %v11309_v35 = vsub.s32 %v1907_v0, %v1910_v62  ;;  %v2189_v1 = vshrl.u32 %v17005_v49, %v2174_v13  ;;  %vm11316_vm2 = vcmp.le.f32.partialorder %v17059_v42, 0.7853982  ;;  %v2267_v45 = vshrl.u32 %v2266_v21, 23 }
 0x22e   : > { %v2178_v36 = vor.u32 %v2177_v16, %v2176_v53  ;;  %v2181_v25 = vor.u32 %v2180_v38, %v2179_v14  ;;  %v2184_v12 = vor.u32 %v2183_v2, %v2182_v29  ;;  %v2137_v32 = vcvt.s32.f32 %v2130_v19 }
 0x22f   : > { %v1913_v0 = vsub.s32 0, %v11309_v35  ;;  %v2187_v62 = vor.u32 %v2186_v51, %v2185_v44  ;;  %v2190_v4 = vor.u32 %v2189_v1, %v2188_v26  ;;  %v17062_v11 = vand.u32 2147483647, %v10944_v37 }
 0x230   : > { %v2135_v28 = vand.u32 2147483647, %v2134_v31  ;;  %v2175_v42 = vshrl.u32 %v17008_v60, %v2174_v13  ;;  %vm2191_vm11 = vcmp.lt.s32.totalorder %v2172_v18, 1  ;;  %v894_v53 = vsel %vm809_vm10, %v893_v52, %v10332_v6 }
 0x231   : > { %vm11323_vm9 = vcmp.le.f32.partialorder %v17062_v11, 0.7853982  ;;  %v8880_v21 = vmin.u32 %v1913_v0, %v11309_v35  ;;  %vm2193_vm8 = vcmp.lt.s32.totalorder %v2172_v18, 3  ;;  %vm2194_vm15 = vcmp.lt.s32.totalorder %v2172_v18, 4 }
 0x232   : > { %v2199_v19 = vsel %vm2191_vm11, %v2178_v36, %v2181_v25  ;;  %v2196_v14 = vsel %vm2194_vm15, %v2184_v12, 2102212464  ;;  %v2200_v29 = vsel %vm2194_vm15, %v2187_v62, 920167782  ;;  %v2203_v16 = vsel %vm2191_vm11, %v2181_v25, %v2184_v12 }
 0x233   : > { %v2204_v11 = vsel %vm2194_vm15, %v2190_v4, 1326507024  ;;  %v1915_v38 = vclz %v8880_v21  ;;  %vm2192_vm0 = vcmp.lt.s32.totalorder %v2172_v18, 2  ;;  %v2201_v31 = vsel %vm2193_vm8, %v2184_v12, %v2200_v29 }
 0x234   : > { %v2205_v13 = vsel %vm2193_vm8, %v2187_v62, %v2204_v11  ;;  %v2195_v2 = vsel %vm2191_vm11, %v2175_v42, %v2178_v36  ;;  %v2202_v44 = vsel %vm2192_vm0, %v2199_v19, %v2201_v31  ;;  %v8895_v52 = vadd.s32 4294967169, %v2267_v45  ;;  %v17065_v62 = vld [vmem:[#allocation23_spill] sm:$0xff] }
 0x235   : > { %v2206_v6 = vsel %vm2192_vm0, %v2203_v16, %v2205_v13  ;;  %v8881_v51 = vadd.s32 4294967294, %v1915_v38  ;;  %v2197_v26 = vsel %vm2193_vm8, %v2181_v25, %v2196_v14  ;;  %v896_v36 = vsel %vm11316_vm2, 0, %v894_v53 }
 0x236   : > { %v11338_v1 = vmul.u32.u64.low %v11292_v30, %v2206_v6  ;;  %v11339_v0 = vmul.u32.u64.high %v11292_v30, %v2206_v6, %v11338_v1  ;;  %v11342_v4 = vmul.u32.u64.low %v11292_v30, %v2202_v44  ;;  %v11343_v21 = vmul.u32.u64.high %v11292_v30, %v2202_v44, %v11342_v4  ;;  %v17066_v44 = vld [vmem:[#allocation18_spill] sm:$0xff] }
 0x237   : > { %v2273_v12 = vadd.s32 1, %v8895_v52  ;;  %9610 = vcosq.f32 %v11280_v7  ;;  %vm8882_vm10 = vcmp.lt.s32.totalorder %v8881_v51, 0  ;;  %v2271_v45 = vor.u32 8388608, %v11297_v46 }
 0x238   : > { %v895_v25 = vsel %vm11316_vm2, %v17058_v61, %v17065_v62  ;;  %v11354_v42 = vmul.f32 %v2137_v32, %v2135_v28  ;;  %v11356_v19 = vsel %vm8882_vm10, 0, %v8881_v51  ;;  %v2198_v14 = vsel %vm2192_vm0, %v2195_v2, %v2197_v26 }
 0x239   : > { %vm2274_vm15 = vcmp.gt.s32.totalorder %v2273_v12, 0  ;;  %9612 = vsinq.f32 %v11280_v7  ;;  %v11365_v46 = vsel %vm11323_vm9, %v10944_v37, %v11284_v3  ;;  %v900_v29 = vadd.s32 3, %v896_v36 }
 0x23a   : > { %v1923_v56 = vsub.s32 4294967266, %v11356_v19  ;;  %vm2216_vm2 = vc.u32 %v11339_v0, %v11342_v4  ;;  %v2217_v32 = vadd.s32 1, %v11343_v21  ;;  %v2275_v28 = vsel %vm2274_vm15, %v2273_v12, 0 }
 0x23b   : > { %v1903_v7 = vadd.s32 %v11226_v50, %v11242_v48  ;;  %v2214_v18 = vmul.u32 %v11292_v30, %v2198_v14  ;;  %v2277_v16 = vand.u32 31, %v2275_v28  ;;  %9614 = vsinq.f32 %v895_v25 }
 0x23c   : > { %v2218_v3 = vsel %vm2216_vm2, %v2217_v32, %v11343_v21  ;;  %v11376_v38 = vshll.u32 %v2271_v45, 8  ;;  %9616 = vcosq.f32 %v895_v25  ;;  %v1919_v31 = vsub.s32 32, %v11356_v19 }
 0x23d   : > { %v2219_v13 = vadd.s32 %v2218_v3, %v2214_v18  ;;  %v2278_v2 = vsub.s32 32, %v2277_v16  ;;  %v1924_v52 = vadd.s32 127, %v1923_v56  ;;  %v2276_v51 = vshrl.u32 %v2275_v28, 5 }
 0x23e   : > { %v2280_v50 = vshll.u32 %v17008_v60, %v2277_v16  ;;  %v11381_v48 = vand.u32 3, %v900_v29  ;;  %v2283_v26 = vshll.u32 %v17011_v17, %v2277_v16  ;;  %v2286_v1 = vshll.u32 %v17002_v63, %v2277_v16 }
 0x23f   : > { %v2220_v30 = vadd.s32 536870912, %v2219_v13  ;;  %v2289_v21 = vshll.u32 %v17003_v47, %v2277_v16  ;;  %v2281_v12 = vshrl.u32 %v17011_v17, %v2278_v2  ;;  %v2284_v36 = vshrl.u32 %v17002_v63, %v2278_v2 }
 0x240   : > { %v2287_v45 = vshrl.u32 %v17003_v47, %v2278_v2  ;;  %v2290_v62 = vshrl.u32 %v17004_v58, %v2278_v2  ;;  %v1920_v14 = vshll.u32 %v11309_v35, %v11356_v19  ;;  %v2292_v56 = vshll.u32 %v17004_v58, %v2277_v16 }
 0x241   : > { %v11390_v25 = vpop.eup %9610  ;;  %v11394_v29 = vshrl.u32 %v2220_v30, 30  ;;  %v2293_v32 = vshrl.u32 %v17005_v49, %v2278_v2  ;;  %v2282_v28 = vor.u32 %v2281_v12, %v2280_v50  ;;  %v2285_v18 = vor.u32 %v2284_v36, %v2283_v26 }
 0x242   : > { %v2288_v3 = vor.u32 %v2287_v45, %v2286_v1  ;;  %v2291_v53 = vor.u32 %v2290_v62, %v2289_v21  ;;  %v1921_v6 = vshrl.u32 %v1903_v7, %v1919_v31  ;;  %vm903_vm0 = vcmp.eq.s32.totalorder %v11381_v48, 0 }
 0x243   : > { %v11398_v11 = vpop.eup %9612  ;;  %v2222_v47 = vshll.u32 %v11394_v29, 30  ;;  %vm906_vm11 = vcmp.eq.s32.totalorder %v11381_v48, 2  ;;  %v17067_v35 = vand.u32 2147483647, %v10397_v39  ;;  %v1925_v16 = vshll.u32 %v1924_v52, 23 }
 0x244   : > { %v2279_v50 = vshrl.u32 %v17008_v60, %v2278_v2  ;;  %v2294_v30 = vor.u32 %v2293_v32, %v2292_v56  ;;  %vm2295_vm10 = vcmp.lt.s32.totalorder %v2276_v51, 1  ;;  %vm2296_vm15 = vcmp.lt.s32.totalorder %v2276_v51, 2 }
 0x245   : > { %vm11405_vm8 = vcmp.le.f32.partialorder %v17067_v35, 0.7853982  ;;  %v9615_v26 = vpop.eup %9614  ;;  %v11410_v1 = vsub.s32 %v2219_v13, %v2222_v47  ;;  %vm2297_vm2 = vcmp.lt.s32.totalorder %v2276_v51, 3  ;;  %vm2298_vm6 = vcmp.lt.s32.totalorder %v2276_v51, 4 }
 0x246   : > { %v9617_v7 = vpop.eup %9616  ;;  %v2299_v31 = vsel %vm2295_vm10, %v2279_v50, %v2282_v28  ;;  %v2300_v21 = vsel %vm2298_vm6, %v2288_v3, 2102212464  ;;  %v2303_v12 = vsel %vm2295_vm10, %v2282_v28, %v2285_v18  ;;  %v2304_v36 = vsel %vm2298_vm6, %v2291_v53, 920167782 }
 0x247   : > { %v2225_v45 = vsub.s32 0, %v11410_v1  ;;  %v2301_v52 = vsel %vm2297_vm2, %v2285_v18, %v2300_v21  ;;  %v2305_v2 = vsel %vm2297_vm2, %v2288_v3, %v2304_v36  ;;  %v2307_v62 = vsel %vm2295_vm10, %v2285_v18, %v2288_v3 }
 0x248   : > { %v1922_v56 = vor.u32 %v1921_v6, %v1920_v14  ;;  %v2306_v47 = vsel %vm2296_vm15, %v2303_v12, %v2305_v2  ;;  %v2308_v13 = vsel %vm2298_vm6, %v2294_v30, 1326507024  ;;  %v904_v32 = vxor.u32 2147483648, %v9615_v26 }
 0x249   : > { %v8892_v35 = vmin.u32 %v2225_v45, %v11410_v1  ;;  %v2309_v50 = vsel %vm2297_vm2, %v2291_v53, %v2308_v13  ;;  %v11420_v28 = vmul.u32.u64.low %v11376_v38, %v2306_v47  ;;  %v11421_v49 = vmul.u32.u64.high %v11376_v38, %v2306_v47, %v11420_v28  ;;  %v17078_v13 = vld [vmem:[#allocation10_spill] sm:$0xff] }
 0x24a   : > { %vm899_vm4 = vweird.f32 %v17058_v61  ;;  %v1926_v21 = vor.u32 4788187, %v1925_v16  ;;  %v2302_v36 = vsel %vm2296_vm15, %v2299_v31, %v2301_v52  ;;  %v2310_v6 = vsel %vm2296_vm15, %v2307_v62, %v2309_v50 }
 0x24b   : > { %v907_v14 = vxor.u32 2147483648, %v9617_v7  ;;  %v2227_v18 = vclz %v8892_v35  ;;  %v11428_v3 = vmul.u32.u64.low %v11376_v38, %v2310_v6  ;;  %v11429_v30 = vmul.u32.u64.high %v11376_v38, %v2310_v6, %v11428_v3 }
 0x24c   : > { %v17070_v53 = vsub.s32 4, %v17066_v44  ;;  %v905_v45 = vsel %vm903_vm0, %v9617_v7, %v904_v32  ;;  %v1311_v51 = vsel %vm11405_vm8, %v10397_v39, %v10870_v5  ;;  %v1929_v52 = vcvt.s32.f32 %v1922_v56  ;;  %v17071_v7 = vld [vmem:[#allocation14_spill] sm:$0xff] }
 0x24d   : > { %v908_v16 = vsel %vm906_vm11, %v907_v14, %v9615_v26  ;;  %v8893_v2 = vadd.s32 4294967294, %v2227_v18  ;;  %v2321_v62 = vadd.s32 1, %v11421_v49  ;;  %9618 = vcosq.f32 %v1311_v51 }
 0x24e   : > { %v1310_v12 = vsel %vm1225_vm14, %v17070_v53, %v17066_v44  ;;  %v1927_v44 = vand.u32 2147483647, %v1926_v21  ;;  %9620 = vsinq.f32 %v1311_v51  ;;  %v792_v26 = vsel %vm10483_vm5, 0, %v17071_v7 }
 0x24f   : > { %v1312_v31 = vsel %vm11405_vm8, 0, %v1310_v12  ;;  %vm8894_vm14 = vcmp.lt.s32.totalorder %v8893_v2, 0  ;;  %v2318_v32 = vmul.u32 %v11376_v38, %v2302_v36  ;;  %vm2320_vm6 = vc.u32 %v11429_v30, %v11420_v28 }
 0x250   : > { %v1316_v47 = vadd.s32 3, %v1312_v31  ;;  %vm17073_vm0 = vcmp.lt.s32.totalorder %v11381_v48, 2  ;;  %v2230_v19 = vsel %vm8894_vm14, 0, %v8893_v2  ;;  %v2322_v56 = vsel %vm2320_vm6, %v2321_v62, %v11421_v49  ;;  %v17074_v49 = vld [vmem:[#allocation21_spill] sm:$0xff] }
 0x251   : > { %v909_v5 = vsel %vm17073_vm0, %v905_v45, %v908_v16  ;;  %v796_v50 = vadd.s32 3, %v792_v26  ;;  %v2215_v21 = vadd.s32 %v11342_v4, %v11339_v0  ;;  %v2231_v6 = vsub.s32 32, %v2230_v19  ;;  %v17075_v0 = vld [vmem:[#allocation19_spill] sm:$0xff] }
 0x252   : > { %v1317_v35 = vand.u32 3, %v1316_v47  ;;  %v2235_v14 = vsub.s32 4294967266, %v2230_v19  ;;  %v2323_v18 = vadd.s32 %v2322_v56, %v2318_v32  ;;  %v11458_v3 = vmul.f32 %v1929_v52, %v1927_v44  ;;  %v17079_v32 = vld [vmem:[#allocation28_spill] sm:$0xff] }
 0x253   : > { %v2232_v38 = vshll.u32 %v11410_v1, %v2230_v19  ;;  %v910_v36 = vsel %vm899_vm4, nan, %v909_v5  ;;  %v797_v48 = vand.u32 3, %v796_v50  ;;  %v2233_v53 = vshrl.u32 %v2215_v21, %v2231_v6  ;;  %v17076_v1 = vld [vmem:[#allocation15_spill] sm:$0xff] }
 0x254   : > { %v2236_v12 = vadd.s32 127, %v2235_v14  ;;  %v2324_v45 = vadd.s32 536870912, %v2323_v18  ;;  %v800_v16 = vxor.u32 2147483648, %v17074_v49  ;;  %vm1315_vm5 = vweird.f32 %v10397_v39  ;;  %v17080_v6 = vld [vmem:[#allocation27_spill] sm:$0xff] }
 0x255   : > { %vm1318_vm11 = vcmp.lt.s32.totalorder %v1317_v35, 2  ;;  %vm1319_vm8 = vcmp.eq.s32.totalorder %v1317_v35, 0  ;;  %vm1322_vm10 = vcmp.eq.s32.totalorder %v1317_v35, 2  ;;  %v803_v4 = vxor.u32 2147483648, %v17075_v0 }
 0x256   : > { %v2234_v51 = vor.u32 %v2233_v53, %v2232_v38  ;;  %v2237_v31 = vshll.u32 %v2236_v12, 23  ;;  %v11466_v52 = vshrl.u32 %v2324_v45, 30  ;;  %vm799_vm15 = vcmp.eq.s32.totalorder %v797_v48, 0 }
 0x257   : > { %vm798_vm2 = vcmp.lt.s32.totalorder %v797_v48, 2  ;;  %v801_v61 = vsel %vm799_vm15, %v17075_v0, %v800_v16  ;;  %vm802_vm4 = vcmp.eq.s32.totalorder %v797_v48, 2  ;;  %v1208_v62 = vsel %vm10631_vm3, 0, %v17076_v1  ;;  %v9619_v44 = vpop.eup %9618 }
 0x258   : > { %v2238_v47 = vor.u32 4788187, %v2237_v31  ;;  %v2326_v7 = vshll.u32 %v11466_v52, 30  ;;  %vm795_vm14 = vweird.f32 %v17078_v13  ;;  %v804_v26 = vsel %vm802_vm4, %v803_v4, %v17074_v49  ;;  %v9621_v19 = vpop.eup %9620  ;;  %v17084_v4 = vld [vmem:[#allocation20_spill] sm:$0xff] }
 0x259   : > { %v1216_v5 = vxor.u32 2147483648, %v17079_v32  ;;  %v2241_v56 = vcvt.s32.f32 %v2234_v51  ;;  %v1323_v50 = vxor.u32 2147483648, %v9619_v44  ;;  %v1212_v21 = vadd.s32 3, %v1208_v62 }
 0x25a   : > { %v1219_v14 = vxor.u32 2147483648, %v17080_v6  ;;  %vm16821_vm6 = vcmp.lt.s32.totalorder %v10957_v27, 0  ;;  %v2239_v38 = vand.u32 2147483647, %v2238_v47  ;;  %v11478_v53 = vsub.s32 %v2323_v18, %v2326_v7 }
 0x25b   : > { %v1320_v12 = vxor.u32 2147483648, %v9621_v19  ;;  %v17081_v45 = vand.u32 2147483647, %v10436_v40  ;;  %v1324_v49 = vsel %vm1322_vm10, %v1323_v50, %v9621_v19  ;;  %v1213_v0 = vand.u32 3, %v1212_v21 }
 0x25c   : > { %v1101_v51 = vsub.s32 4, %v17084_v4  ;;  %v2329_v18 = vsub.s32 0, %v11478_v53  ;;  %v805_v2 = vsel %vm798_vm2, %v801_v61, %v804_v26  ;;  %vm16820_vm0 = vcmp.lt.s32.totalorder %v11178_v20, 0 }
 0x25d   : > { %vm11482_vm3 = vcmp.le.f32.partialorder %v17081_v45, 0.7853982  ;;  %v1321_v1 = vsel %vm1319_vm8, %v9619_v44, %v1320_v12  ;;  %v2242_v62 = vmul.f32 %v2241_v56, %v2239_v38  ;;  %vm1214_vm10 = vcmp.lt.s32.totalorder %v1213_v0, 2  ;;  %v17086_v44 = vld [vmem:[#allocation12_spill] sm:$0xff] }
 0x25e   : > { %v1103_v31 = vsel %vm11482_vm3, %v10436_v40, %v11034_v8  ;;  %v1325_v47 = vsel %vm1318_vm11, %v1321_v1, %v1324_v49  ;;  %vm1215_vm15 = vcmp.eq.s32.totalorder %v1213_v0, 0  ;;  %v8896_v7 = vmin.u32 %v2329_v18, %v11478_v53  ;;  %v17094_v49 = vld [vmem:[#allocation30_spill] sm:$0xff] }
 0x25f   : > { %9622 = vcosq.f32 %v1103_v31  ;;  %v1326_v19 = vsel %vm1315_vm5, nan, %v1325_v47  ;;  %v1217_v8 = vsel %vm1215_vm15, %v17080_v6, %v1216_v5  ;;  %vm1218_vm4 = vcmp.eq.s32.totalorder %v1213_v0, 2  ;;  %v17101_v47 = vld [vmem:[#allocation35_spill] sm:$0xff] }
 0x260   : > { %v9160_v50 = vpack.c.bf16 %v1326_v19, %v910_v36  ;;  %v1220_v48 = vsel %vm1218_vm4, %v1219_v14, %v17079_v32  ;;  %vm17085_vm8 = vcmp.lt.s32.totalorder %v10436_v40, 0  ;;  %9624 = vsinq.f32 %v1103_v31 }
 0x261   : > { %v1102_v61 = vsel %vm17085_vm8, %v1101_v51, %v17084_v4  ;;  %v2331_v35 = vclz %v8896_v7  ;;  %vm1211_vm11 = vweird.f32 %v17086_v44  ;;  %v1221_v26 = vsel %vm1214_vm10, %v1217_v8, %v1220_v48 }
 0x262   : > { %v1104_v56 = vsel %vm11482_vm3, 0, %v1102_v61  ;;  %v17087_v39 = vand.u32 2147483647, %v11178_v20  ;;  %9161 = vmatprep.subr.bf16.mxu0 %v9160_v50  ;;  %v806_v36 = vsel %vm795_vm14, nan, %v805_v2  ;;  %v1222_v32 = vsel %vm1211_vm11, nan, %v1221_v26  ;;  %v17095_v2 = vld [vmem:[#allocation24_spill] sm:$0xff] }
 0x263   : > { %v1108_v21 = vadd.s32 3, %v1104_v56  ;;  %v2243_v6 = vxor.u32 2147483648, %v2242_v62  ;;  %v8897_v14 = vadd.s32 4294967294, %v2331_v35  ;;  %v9162_v38 = vpack.c.bf16 %v1222_v32, %v806_v36 }
 0x264   : > { %vm11510_vm5 = vcmp.le.f32.partialorder %v17087_v39, 0.7853982  ;;  %v17090_v12 = vand.u32 2147483647, %v10581_v34  ;;  %9626 = vcosq.f32 %v11365_v46  ;;  %v17093_v16 = vxor.u32 2147483648, %v11354_v42 }
 0x265   : > { %v1517_v0 = vsub.s32 4, %v17094_v49  ;;  %v1931_v51 = vxor.u32 2147483648, %v11458_v3  ;;  %v2245_v31 = vsub.s32 4, %v11394_v29  ;;  %vm8898_vm14 = vcmp.lt.s32.totalorder %v8897_v14, 0  ;;  %9163 = vmatpush1.bf16.msra.mxu0 %v9162_v38 }
 0x266   : > { %vm11518_vm2 = vcmp.le.f32.partialorder %v17090_v12, 0.7853982  ;;  %v11528_v13 = vsel %vm16821_vm6, %v17093_v16, %v11354_v42  ;;  %v2319_v18 = vadd.s32 %v11420_v28, %v11429_v30  ;;  %v2334_v1 = vsel %vm8898_vm14, 0, %v8897_v14 }
 0x267   : > { %v1519_v4 = vsel %vm11518_vm2, %v10581_v34, %v11038_v59  ;;  %v1109_v42 = vand.u32 3, %v1108_v21  ;;  %v1000_v7 = vsel %vm10729_vm7, 0, %v17095_v2  ;;  %v2244_v59 = vsel %vm16820_vm0, %v2243_v6, %v2242_v62 }
 0x268   : > { %9628 = vcosq.f32 %v1519_v4  ;;  %v2335_v8 = vsub.s32 32, %v2334_v1  ;;  %v2339_v50 = vsub.s32 4294967266, %v2334_v1  ;;  %vm17097_vm3 = vcmp.lt.s32.totalorder %v10581_v34, 0 }
 0x269   : > { %v9623_v19 = vpop.eup %9622  ;;  %v1518_v48 = vsel %vm17097_vm3, %v1517_v0, %v17094_v49  ;;  %v2336_v61 = vshll.u32 %v11478_v53, %v2334_v1  ;;  %9630 = vsinq.f32 %v1519_v4  ;;  %v1004_v56 = vadd.s32 3, %v1000_v7  ;;  %v17098_v0 = vld [vmem:[#allocation31_spill] sm:$0xff] }
 0x26a   : > { %v1115_v35 = vxor.u32 2147483648, %v9623_v19  ;;  %v1520_v28 = vsel %vm11518_vm2, 0, %v1518_v48  ;;  %v2337_v30 = vshrl.u32 %v2319_v18, %v2335_v8  ;;  %v2340_v44 = vadd.s32 127, %v2339_v50  ;;  %v9625_v39 = vpop.eup %9624 }
 0x26b   : > { %v1524_v26 = vadd.s32 3, %v1520_v28  ;;  %v11553_v62 = vsel %vm11510_vm5, %v11178_v20, %v2244_v59  ;;  %vm1110_vm7 = vcmp.lt.s32.totalorder %v1109_v42, 2  ;;  %vm1111_vm10 = vcmp.eq.s32.totalorder %v1109_v42, 0 }
 0x26c   : > { %v1416_v53 = vsel %vm10981_vm13, 0, %v11028_v43  ;;  %v2338_v36 = vor.u32 %v2337_v30, %v2336_v61  ;;  %v2341_v32 = vshll.u32 %v2340_v44, 23  ;;  %v1112_v21 = vxor.u32 2147483648, %v9625_v39  ;;  %v17100_v43 = vld [vmem:[#allocation36_spill] sm:$0xff] }
 0x26d   : > { %vm1114_vm15 = vcmp.eq.s32.totalorder %v1109_v42, 2  ;;  %v1525_v14 = vand.u32 3, %v1524_v26  ;;  %v1005_v38 = vand.u32 3, %v1004_v56  ;;  %v1420_v12 = vadd.s32 3, %v1416_v53 }
 0x26e   : > { %v1116_v6 = vsel %vm1114_vm15, %v1115_v35, %v9625_v39  ;;  %v2342_v45 = vor.u32 4788187, %v2341_v32  ;;  %v1113_v16 = vsel %vm1111_vm10, %v9623_v19, %v1112_v21  ;;  %v1008_v49 = vxor.u32 2147483648, %v10894_v24  ;;  %v11560_v18 = vpop.eup %9626  ;;  %v17102_v35 = vld [vmem:[#allocation32_spill] sm:$0xff] }
 0x26f   : > { %v1011_v4 = vxor.u32 2147483648, %v17098_v0  ;;  %v2345_v1 = vcvt.s32.f32 %v2338_v36  ;;  %vm1107_vm4 = vweird.f32 %v10436_v40  ;;  %vm1419_vm8 = vweird.f32 %v17099_v54 }
 0x270   : > { %v1424_v2 = vxor.u32 2147483648, %v17100_v43  ;;  %v1427_v7 = vxor.u32 2147483648, %v17101_v47  ;;  %v2343_v8 = vand.u32 2147483647, %v2342_v45  ;;  %v1117_v19 = vsel %vm1110_vm7, %v1113_v16, %v1116_v6 }
 0x271   : > { %vm1526_vm11 = vcmp.lt.s32.totalorder %v1525_v14, 2  ;;  %vm1527_vm2 = vcmp.eq.s32.totalorder %v1525_v14, 0  ;;  %vm1530_vm14 = vcmp.eq.s32.totalorder %v1525_v14, 2  ;;  %vm1007_vm3 = vcmp.eq.s32.totalorder %v1005_v38, 0 }
 0x272   : > { %v9629_v59 = vpop.eup %9628  ;;  %v1421_v48 = vand.u32 3, %v1420_v12  ;;  %vm1006_vm10 = vcmp.lt.s32.totalorder %v1005_v38, 2  ;;  %v1009_v61 = vsel %vm1007_vm3, %v17098_v0, %v1008_v49  ;;  %vm1010_vm15 = vcmp.eq.s32.totalorder %v1005_v38, 2  ;;  %v17107_v0 = vld [vmem:[#allocation13_spill] sm:$0xff] }
 0x273   : > { %v1531_v50 = vxor.u32 2147483648, %v9629_v59  ;;  %v1725_v28 = vsub.s32 4, %v17102_v35  ;;  %v9631_v30 = vpop.eup %9630  ;;  %v2346_v44 = vmul.f32 %v2345_v1, %v2343_v8  ;;  %v1012_v26 = vsel %vm1010_vm15, %v1011_v4, %v10894_v24 }
 0x274   : > { %vm1422_vm0 = vcmp.lt.s32.totalorder %v1421_v48, 2  ;;  %v17103_v42 = vand.u32 2147483647, %v10777_v41  ;;  %v1528_v39 = vxor.u32 2147483648, %v9631_v30  ;;  %vm1423_vm6 = vcmp.eq.s32.totalorder %v1421_v48, 0 }
 0x275   : > { %v1532_v53 = vsel %vm1530_vm14, %v1531_v50, %v9631_v30  ;;  %vm1426_vm13 = vcmp.eq.s32.totalorder %v1421_v48, 2  ;;  %v1425_v36 = vsel %vm1423_vm6, %v17101_v47, %v1424_v2  ;;  %vm17106_vm3 = vcmp.lt.s32.totalorder %v10777_v41, 0 }
 0x276   : > { %vm11573_vm7 = vcmp.le.f32.partialorder %v17103_v42, 0.7853982  ;;  %v1428_v32 = vsel %vm1426_vm13, %v1427_v7, %v17100_v43  ;;  %v1726_v21 = vsel %vm17106_vm3, %v1725_v28, %v17102_v35  ;;  %v1529_v6 = vsel %vm1527_vm2, %v9629_v59, %v1528_v39  ;;  %v17119_v42 = vld [vmem:[#allocation37_spill] sm:$0xff] }
 0x277   : > { %v1727_v24 = vsel %vm11573_vm7, %v10777_v41, %v11270_v10  ;;  %v1013_v12 = vsel %vm1006_vm10, %v1009_v61, %v1012_v26  ;;  %v1429_v45 = vsel %vm1422_vm0, %v1425_v36, %v1428_v32  ;;  %v1728_v16 = vsel %vm11573_vm7, 0, %v1726_v21  ;;  %v17121_v32 = vld [vmem:[#allocation38_spill] sm:$0xff] }
 0x278   : > { %v1533_v49 = vsel %vm1526_vm11, %v1529_v6, %v1532_v53  ;;  %vm1003_vm6 = vweird.f32 %v17107_v0  ;;  %v1430_v4 = vsel %vm1419_vm8, nan, %v1429_v45  ;;  %9632 = vcosq.f32 %v1727_v24  ;;  %v17120_v53 = vld [vmem:[#allocation29_spill] sm:$0xff] }
 0x279   : > { %v1118_v1 = vsel %vm1107_vm4, nan, %v1117_v19  ;;  %vm17108_vm13 = vweird.f32 %v10581_v34  ;;  %9634 = vsinq.f32 %v1727_v24  ;;  %v1732_v38 = vadd.s32 3, %v1728_v16  ;;  %v17112_v34 = vld [vmem:[#allocation33_spill] sm:$0xff] }
 0x27a   : > { %v1534_v10 = vsel %vm17108_vm13, nan, %v1533_v49  ;;  %v1014_v2 = vsel %vm1003_vm6, nan, %v1013_v12  ;;  %v17109_v47 = vand.u32 2147483647, %v10957_v27  ;;  %v2141_v54 = vsub.s32 4, %v11198_v23  ;;  %v17125_v49 = vld [vmem:[#allocation25_spill] sm:$0xff] }
 0x27b   : > { %v9168_v43 = vpack.c.bf16 %v1534_v10, %v1118_v1  ;;  %v2347_v7 = vxor.u32 2147483648, %v2346_v44  ;;  %v9170_v59 = vpack.c.bf16 %v1430_v4, %v1014_v2  ;;  %v1624_v8 = vsel %vm11133_vm1, 0, %v17112_v34 }
 0x27c   : > { %vm11600_vm0 = vcmp.le.f32.partialorder %v17109_v47, 0.7853982  ;;  %v1733_v19 = vand.u32 3, %v1732_v38  ;;  %vm17113_vm4 = vcmp.lt.s32.totalorder %v10957_v27, 0  ;;  %v1628_v48 = vadd.s32 3, %v1624_v8 }
 0x27d   : > { %v2143_v40 = vsel %vm11600_vm0, %v10957_v27, %v11528_v13  ;;  %9169 = vmatprep.subr.bf16.mxu1 %v9168_v43  ;;  %v2142_v50 = vsel %vm17113_vm4, %v2141_v54, %v11198_v23  ;;  %v17114_v61 = vsub.s32 4, %v11137_v55  ;;  %vm17115_vm8 = vcmp.lt.s32.totalorder %v10944_v37, 0  ;;  %v17116_v13 = vld [vmem:[#allocation34_spill] sm:$0xff] }
 0x27e   : > { %9636 = vcosq.f32 %v2143_v40  ;;  %vm1849_vm11 = vcmp.lt.s32.totalorder %v17116_v13, 0  ;;  %9171 = vmatpush1.bf16.msra.mxu1 %v9170_v59  ;;  %v2144_v9 = vsel %vm11600_vm0, 0, %v2142_v50  ;;  %vm16822_vm1 = vcmp.lt.s32.totalorder %v11255_v15, 0 }
 0x27f   : > { %v11620_v35 = vsel %vm17115_vm8, %v17114_v61, %v11137_v55  ;;  %9638 = vsinq.f32 %v11365_v46  ;;  %v2148_v23 = vadd.s32 3, %v2144_v9  ;;  %v11627_v28 = vand.u32 3, %v1628_v48 }
 0x280   : > { %9640 = vsinq.f32 %v2143_v40  ;;  %v1932_v55 = vsel %vm1849_vm11, %v1931_v51, %v11458_v3  ;;  %vm17117_vm2 = vcmp.lt.s32.totalorder %v11178_v20, 0  ;;  %v2040_v30 = vsel %vm11236_vm12, 0, %v11275_v57  ;;  %v17118_v3 = vld [vmem:[#allocation39_spill] sm:$0xff] }
 0x281   : > { %v11639_v46 = vsel %vm17117_vm2, %v2245_v31, %v11394_v29  ;;  %9642 = vcosq.f32 %v11553_v62  ;;  %v2348_v26 = vsel %vm16822_vm1, %v2347_v7, %v2346_v44  ;;  %vm1734_vm14 = vcmp.lt.s32.totalorder %v1733_v19, 2 }
 0x282   : > { %9644 = vsinq.f32 %v11553_v62  ;;  %v1632_v51 = vxor.u32 2147483648, %v17118_v3  ;;  %vm1735_vm10 = vcmp.eq.s32.totalorder %v1733_v19, 0  ;;  %vm1738_vm15 = vcmp.eq.s32.totalorder %v1733_v19, 2  ;;  %v9633_v31 = vpop.eup %9632 }
 0x283   : > { %v1635_v56 = vxor.u32 2147483648, %v17119_v42  ;;  %v2044_v29 = vadd.s32 3, %v2040_v30  ;;  %v2149_v39 = vand.u32 3, %v2148_v23  ;;  %vm1630_vm7 = vcmp.lt.s32.totalorder %v11627_v28, 2  ;;  %v9635_v62 = vpop.eup %9634 }
 0x284   : > { %v2048_v22 = vxor.u32 2147483648, %v11398_v11  ;;  %v2051_v57 = vxor.u32 2147483648, %v11390_v25  ;;  %vm1731_vm12 = vweird.f32 %v10777_v41  ;;  %v1739_v44 = vxor.u32 2147483648, %v9633_v31 }
 0x285   : > { %vm1631_vm3 = vcmp.eq.s32.totalorder %v11627_v28, 0  ;;  %vm2043_vm6 = vweird.f32 %v17120_v53  ;;  %v2045_v36 = vand.u32 3, %v2044_v29  ;;  %v1933_v21 = vsub.s32 4, %v17121_v32 }
 0x286   : > { %v1736_v24 = vxor.u32 2147483648, %v9635_v62  ;;  %vm2147_vm13 = vweird.f32 %v10957_v27  ;;  %v1633_v6 = vsel %vm1631_vm3, %v17119_v42, %v1632_v51  ;;  %vm1634_vm0 = vcmp.eq.s32.totalorder %v11627_v28, 2 }
 0x287   : > { %v17122_v12 = vand.u32 2147483647, %v17116_v13  ;;  %v1740_v16 = vsel %vm1738_vm15, %v1739_v44, %v9635_v62  ;;  %vm1627_vm8 = vweird.f32 %v17125_v49  ;;  %vm2047_vm2 = vcmp.eq.s32.totalorder %v2045_v36, 0 }
 0x288   : > { %vm2050_vm1 = vcmp.eq.s32.totalorder %v2045_v36, 2  ;;  %v9637_v4 = vpop.eup %9636  ;;  %v1737_v1 = vsel %vm1735_vm10, %v9633_v31, %v1736_v24  ;;  %v2049_v10 = vsel %vm2047_vm2, %v11390_v25, %v2048_v22  ;;  %v1934_v43 = vsel %vm1849_vm11, %v1933_v21, %v17121_v32 }
 0x289   : > { %vm11662_vm4 = vcmp.le.f32.partialorder %v17122_v12, 0.7853982  ;;  %v2052_v38 = vsel %vm2050_vm1, %v2051_v57, %v11398_v11  ;;  %v11677_v2 = vpop.eup %9638  ;;  %vm2154_vm15 = vcmp.eq.s32.totalorder %v2149_v39, 2  ;;  %v2155_v47 = vxor.u32 2147483648, %v9637_v4 }
 0x28a   : > { %v1935_v0 = vsel %vm11662_vm4, %v17116_v13, %v1932_v55  ;;  %v1636_v14 = vsel %vm1634_vm0, %v1635_v56, %v17118_v3  ;;  %vm2046_vm3 = vcmp.lt.s32.totalorder %v2045_v36, 2  ;;  %v9641_v54 = vpop.eup %9640  ;;  %v1741_v7 = vsel %vm1734_vm14, %v1737_v1, %v1740_v16 }
 0x28b   : > { %v2053_v59 = vsel %vm2046_vm3, %v2049_v10, %v2052_v38  ;;  %9646 = vcosq.f32 %v1935_v0  ;;  %v17126_v25 = vand.u32 2147483647, %v11255_v15  ;;  %v9643_v40 = vpop.eup %9642  ;;  %v2152_v34 = vxor.u32 2147483648, %v9641_v54 }
 0x28c   : > { %v2156_v8 = vsel %vm2154_vm15, %v2155_v47, %v9641_v54  ;;  %v1936_v50 = vsel %vm11662_vm4, 0, %v1934_v43  ;;  %9648 = vsinq.f32 %v1935_v0  ;;  %v9645_v48 = vpop.eup %9644  ;;  %vm2150_vm11 = vcmp.lt.s32.totalorder %v2149_v39, 2 }
 0x28d   : > { %vm11683_vm10 = vcmp.le.f32.partialorder %v17126_v25, 0.7853982  ;;  %vm2151_vm1 = vcmp.eq.s32.totalorder %v2149_v39, 0  ;;  %v2349_v19 = vsub.s32 4, %v11466_v52  ;;  %v1637_v23 = vsel %vm1630_vm7, %v1633_v6, %v1636_v14 }
 0x28e   : > { %v2351_v61 = vsel %vm11683_vm10, %v11255_v15, %v2348_v26  ;;  %v2153_v9 = vsel %vm2151_vm1, %v9637_v4, %v2152_v34  ;;  %v1832_v55 = vsel %vm11323_vm9, 0, %v11620_v35  ;;  %v1742_v30 = vsel %vm1731_vm12, nan, %v1741_v7  ;;  %v9583_v7 = vld [vmem:[%s16736_s4 + $0x8] sm:$0xff]  }
 0x28f   : > { %9650 = vcosq.f32 %v2351_v61  ;;  %v2157_v3 = vsel %vm2150_vm11, %v2153_v9, %v2156_v8  ;;  %v2054_v51 = vsel %vm2043_vm6, nan, %v2053_v59  ;;  %v1940_v42 = vadd.s32 3, %v1936_v50 }
 0x290   : > { %v2158_v26 = vsel %vm2147_vm13, nan, %v2157_v3  ;;  %vm17129_vm14 = vcmp.lt.s32.totalorder %v11255_v15, 0  ;;  %9652 = vsinq.f32 %v2351_v61  ;;  %v1836_v56 = vadd.s32 3, %v1832_v55 }
 0x291   : > { %v2350_v28 = vsel %vm17129_vm14, %v2349_v19, %v11466_v52  ;;  %v9164_v29 = vpack.c.bf16 %v2158_v26, %v1742_v30  ;;  %v1638_v33 = vsel %vm1627_vm8, nan, %v1637_v23  ;;  %v2248_v27 = vsel %vm11510_vm5, 0, %v11639_v46  ;;  %v9582_v52 = vld [vmem:[%s16736_s4] sm:$0xff]  }
 0x292   : > { %v2352_v41 = vsel %vm11683_vm10, 0, %v2350_v28  ;;  %v9166_v35 = vpack.c.bf16 %v2054_v51, %v1638_v33  ;;  %v1941_v39 = vand.u32 3, %v1940_v42  ;;  %v2252_v22 = vadd.s32 3, %v2248_v27 }
 0x293   : > { %v2356_v31 = vadd.s32 3, %v2352_v41  ;;  %9165 = vmatprep.subr.bf16.mxu0 %v9164_v29  ;;  %v1837_v57 = vand.u32 3, %v1836_v56  ;;  %v2256_v62 = vxor.u32 2147483648, %v9645_v48  ;;  %vm16860_vm9 = vcmask 261120  }
 0x294   : > { %9167 = vmatpush1.bf16.msra.mxu0 %v9166_v35  ;;  %v2253_v53 = vand.u32 3, %v2252_v22  ;;  %v2259_v36 = vxor.u32 2147483648, %v9643_v40  ;;  %v1840_v5 = vxor.u32 2147483648, %v11677_v2  ;;  %v1843_v46 = vxor.u32 2147483648, %v11560_v18 }
 0x295   : > { %v9647_v44 = vpop.eup %9646  ;;  %v2357_v24 = vand.u32 3, %v2356_v31  ;;  %vm1943_vm5 = vcmp.eq.s32.totalorder %v1941_v39, 0  ;;  %vm1946_vm7 = vcmp.eq.s32.totalorder %v1941_v39, 2  ;;  %vm1839_vm6 = vcmp.eq.s32.totalorder %v1837_v57, 0 }
 0x296   : > { %v9649_v32 = vpop.eup %9648  ;;  %v1947_v21 = vxor.u32 2147483648, %v9647_v44  ;;  %vm2255_vm12 = vcmp.eq.s32.totalorder %v2253_v53, 0  ;;  %vm1842_vm13 = vcmp.eq.s32.totalorder %v1837_v57, 2  ;;  %vm2258_vm0 = vcmp.eq.s32.totalorder %v2253_v53, 2 }
 0x297   : > { %v1944_v6 = vxor.u32 2147483648, %v9649_v32  ;;  %8901 = vmatmul.mubr.msk.bf16.vlgmr.msra.gmra.mrb[8].mxu0 %vm16860_vm9, %v9582_v52  ;;  %v2257_v45 = vsel %vm2255_vm12, %v9643_v40, %v2256_v62  ;;  %v17130_v16 = vmov 0   ;;  %v2260_v1 = vsel %vm2258_vm0, %v2259_v36, %v9645_v48 }
 0x298   : > { %2462 = vmatprep.mubr.bf16.mxu0 %v17130_v16  ;;  %v1948_v0 = vsel %vm1946_vm7, %v1947_v21, %v9649_v32  ;;  %vm2362_vm4 = vcmp.eq.s32.totalorder %v2357_v24, 2  ;;  %v1841_v38 = vsel %vm1839_vm6, %v11560_v18, %v1840_v5  ;;  %v1844_v43 = vsel %vm1842_vm13, %v1843_v46, %v11677_v2 }
 0x299   : > { %v9651_v12 = vpop.eup %9650  ;;  %v1945_v49 = vsel %vm1943_vm5, %v9647_v44, %v1944_v6  ;;  %vm2254_vm8 = vcmp.lt.s32.totalorder %v2253_v53, 2  ;;  %vm1942_vm2 = vcmp.lt.s32.totalorder %v1941_v39, 2  ;;  %vm2359_vm15 = vcmp.eq.s32.totalorder %v2357_v24, 0 }
 0x29a   : > { %v2363_v4 = vxor.u32 2147483648, %v9651_v12  ;;  %v9653_v10 = vpop.eup %9652  ;;  %v2261_v54 = vsel %vm2254_vm8, %v2257_v45, %v2260_v1  ;;  %v1949_v59 = vsel %vm1942_vm2, %v1945_v49, %v1948_v0  ;;  %vm1838_vm3 = vcmp.lt.s32.totalorder %v1837_v57, 2 }
 0x29b   : > { %v2360_v47 = vxor.u32 2147483648, %v9653_v10  ;;  %vm2358_vm10 = vcmp.lt.s32.totalorder %v2357_v24, 2  ;;  %v1845_v11 = vsel %vm1838_vm3, %v1841_v38, %v1844_v43  ;;  %vm2251_vm11 = vweird.f32 %v11178_v20  ;;  %v11736_v20 = vpop.permute.xlu0 %2565 }
 0x29c   : > { %v2364_v14 = vsel %vm2362_vm4, %v2363_v4, %v9653_v10  ;;  %vm1939_vm1 = vweird.f32 %v17116_v13  ;;  %vm2355_vm14 = vweird.f32 %v11255_v15  ;;  %v2262_v2 = vsel %vm2251_vm11, nan, %v2261_v54 }
 0x29d   : > { %v2361_v25 = vsel %vm2359_vm15, %v9651_v12, %v2360_v47  ;;  %v1950_v40 = vsel %vm1939_vm1, nan, %v1949_v59  ;;  %vm1835_vm5 = vweird.f32 %v10944_v37  ;;  %v11738_v37 = vpop.permute.xlu1 %2570 }
 0x29e   : > { %v2365_v18 = vsel %vm2358_vm10, %v2361_v25, %v2364_v14  ;;  %v1846_v50 = vsel %vm1835_vm5, nan, %v1845_v11 }
 0x29f   : > { %v2366_v34 = vsel %vm2355_vm14, nan, %v2365_v18  ;;  %8902 = vmatmul.mubr.msk.bf16.gmra.mrb[12].mxu0 %vm16860_vm9, %v9583_v7  ;;  %v9174_v48 = vpack.c.bf16 %v2262_v2, %v1846_v50  ;;  %v11741_v61 = vpop.permute.xlu0 %2606 }
 0x2a0   : > { %v9172_v8 = vpack.c.bf16 %v2366_v34, %v1950_v40  ;;  %4389 = vmatprep.mubr.bf16.mxu0 %v17130_v16  ;;  %v17133_v40 = vmov 2102212464  }
 0x2a1   : > { %v11748_v51 = vpop.permute.xlu1 %2611 }
 0x2a2   : > { %9173 = vmatprep.subr.bf16.mxu1 %v9172_v8 }
 0x2a3   : > { %9175 = vmatpush1.bf16.msra.mxu1 %v9174_v48 }
 0x2a6   : > { %8903 = vmatmul.mubr.msk.bf16.vlgmr.msra.gmra.mrb[8].mxu1 %vm16860_vm9, %v9582_v52 }
 0x2a7   : > { %2547 = vmatprep.mubr.bf16.mxu1 %v17130_v16 }
 0x2ae   : > { %8904 = vmatmul.mubr.msk.bf16.gmra.mrb[12].mxu1 %vm16860_vm9, %v9583_v7 }
 0x2af   : > { %4474 = vmatprep.mubr.bf16.mxu1 %v17130_v16 }
 0x36a   : > { %v2454_v15 = vpop.f32.mrb[8].mxu0 }
 0x36b   : > { %v2583_v13 = vmul.f32 %v11736_v20, %v2454_v15  ;;  %v2456_v19 = vpop.f32.mrb[9].mxu0 }
 0x36c   : > { %v2584_v9 = vmul.f32 %v11736_v20, %v2456_v19  ;;  %v2458_v23 = vpop.f32.mrb[10].mxu0 }
 0x36d   : > { %v11745_v55 = vadd.f32 %v11741_v61, %v2583_v13  ;;  %v2587_v30 = vmul.f32 %v11738_v37, %v2458_v23  ;;  %v2460_v3 = vpop.f32.mrb[11].mxu0  ;;  %v17134_v23 = vmov 1326507024  }
 0x36e   : > { %v11751_v42 = vadd.f32 %v11741_v61, %v2584_v9  ;;  %v2588_v53 = vmul.f32 %v11738_v37, %v2460_v3 }
 0x36f   : > { %17131 = vst [vmem:[#allocation11_spill] sm:$0xff] %v11745_v55  ;;  %v16827_v26 = vand.u32 2147483647, %v11745_v55  ;;  %v2643_v28 = vand.u32 2139095040, %v11745_v55  ;;  %v11756_v56 = vadd.f32 %v11748_v51, %v2587_v30 }
 0x370   : > { %v16824_v29 = vand.u32 2147483647, %v11751_v42  ;;  %v2747_v33 = vand.u32 2139095040, %v11751_v42  ;;  %v11776_v45 = vadd.f32 %v11748_v51, %v2588_v53 }
 0x371   : > { %17132 = vst [vmem:[#allocation23_spill] sm:$0xff] %v11756_v56  ;;  %v2644_v41 = vshrl.u32 %v2643_v28, 23  ;;  %v2647_v35 = vand.u32 8388607, %v16827_v26  ;;  %v16826_v39 = vand.u32 2147483647, %v11756_v56 }
 0x372   : > { %v2748_v31 = vshrl.u32 %v2747_v33, 23  ;;  %v2751_v27 = vand.u32 8388607, %v16824_v29  ;;  %v3059_v22 = vand.u32 2139095040, %v11756_v56  ;;  %v11771_v46 = vpop.f32.mrb[12].mxu0 }
 0x373   : > { %v8913_v52 = vadd.s32 4294967169, %v2644_v41  ;;  %v2648_v57 = vor.u32 8388608, %v2647_v35  ;;  %v11769_v5 = vand.u32 8388607, %v16826_v39 }
 0x374   : > { %v8917_v62 = vadd.s32 4294967169, %v2748_v31  ;;  %v3060_v44 = vshrl.u32 %v3059_v22, 23  ;;  %v2752_v32 = vor.u32 8388608, %v2751_v27 }
 0x375   : > { %v2650_v36 = vadd.s32 1, %v8913_v52  ;;  %v11773_v12 = vshll.u32 %v2648_v57, 8  ;;  %v3064_v47 = vor.u32 8388608, %v11769_v5 }
 0x376   : > { %v2754_v21 = vadd.s32 1, %v8917_v62  ;;  %v8929_v24 = vadd.s32 4294967169, %v3060_v44  ;;  %v11778_v1 = vshll.u32 %v2752_v32, 8 }
 0x377   : > { %vm2651_vm7 = vcmp.gt.s32.totalorder %v2650_v36, 0 }
 0x378   : > { %v2652_v6 = vsel %vm2651_vm7, %v2650_v36, 0  ;;  %vm2755_vm12 = vcmp.gt.s32.totalorder %v2754_v21, 0  ;;  %v11783_v14 = vadd.s32 1, %v8929_v24 }
 0x379   : > { %v2653_v49 = vshrl.u32 %v2652_v6, 5  ;;  %v2654_v0 = vand.u32 31, %v2652_v6  ;;  %v2756_v4 = vsel %vm2755_vm12, %v2754_v21, 0  ;;  %v2539_v10 = vpop.f32.mrb[8].mxu1 }
 0x37a   : > { %v11780_v38 = vshrl.u32 %v2756_v4, 5  ;;  %v2758_v43 = vand.u32 31, %v2756_v4  ;;  %v11785_v54 = vpop.f32.mrb[9].mxu1  ;;  %v11790_v11 = vmul.f32 %v11736_v20, %v2539_v10  ;;  %vm3067_vm8 = vcmp.gt.s32.totalorder %v11783_v14, 0 }
 0x37b   : > { %v2655_v7 = vsub.s32 32, %v2654_v0  ;;  %v2657_v59 = vshll.u32 %v17008_v60, %v2654_v0  ;;  %v2660_v25 = vshll.u32 %v17011_v17, %v2654_v0  ;;  %v11792_v18 = vpop.f32.mrb[10].mxu1  ;;  %v2663_v2 = vshll.u32 %v17002_v63, %v2654_v0 }
 0x37c   : > { %v2666_v34 = vshll.u32 %v17133_v40, %v2654_v0  ;;  %v2669_v8 = vshll.u32 %v17004_v58, %v2654_v0  ;;  %vm2672_vm6 = vcmp.lt.s32.totalorder %v2653_v49, 1  ;;  %v11797_v50 = vpop.f32.mrb[11].mxu1  ;;  %vm2673_vm13 = vcmp.lt.s32.totalorder %v2653_v49, 2 }
 0x37d   : > { %v2658_v48 = vshrl.u32 %v17011_v17, %v2655_v7  ;;  %v2661_v15 = vshrl.u32 %v17002_v63, %v2655_v7  ;;  %v2664_v13 = vshrl.u32 %v17133_v40, %v2655_v7  ;;  %v2656_v19 = vshrl.u32 %v17008_v60, %v2655_v7 }
 0x37e   : > { %v2667_v9 = vshrl.u32 %v17004_v58, %v2655_v7  ;;  %v2670_v30 = vshrl.u32 %v17134_v23, %v2655_v7  ;;  %vm2674_vm0 = vcmp.lt.s32.totalorder %v2653_v49, 3  ;;  %v2759_v41 = vsub.s32 32, %v2758_v43 }
 0x37f   : > { %v2659_v3 = vor.u32 %v2658_v48, %v2657_v59  ;;  %v2662_v28 = vor.u32 %v2661_v15, %v2660_v25  ;;  %v2665_v33 = vor.u32 %v2664_v13, %v2663_v2  ;;  %vm2675_vm4 = vcmp.lt.s32.totalorder %v2653_v49, 4 }
 0x380   : > { %v2668_v35 = vor.u32 %v2667_v9, %v2666_v34  ;;  %v2671_v31 = vor.u32 %v2670_v30, %v2669_v8  ;;  %v2761_v27 = vshll.u32 %v17008_v60, %v2758_v43  ;;  %v2764_v32 = vshll.u32 %v17011_v17, %v2758_v43 }
 0x381   : > { %v2676_v22 = vsel %vm2672_vm6, %v2656_v19, %v2659_v3  ;;  %v2677_v52 = vsel %vm2675_vm4, %v2665_v33, 2102212464  ;;  %v2680_v57 = vsel %vm2672_vm6, %v2659_v3, %v2662_v28  ;;  %v2684_v62 = vsel %vm2672_vm6, %v2662_v28, %v2665_v33 }
 0x382   : > { %v2678_v44 = vsel %vm2674_vm0, %v2662_v28, %v2677_v52  ;;  %v2681_v53 = vsel %vm2675_vm4, %v2668_v35, 920167782  ;;  %v2685_v36 = vsel %vm2675_vm4, %v2671_v31, 1326507024  ;;  %v2760_v6 = vshrl.u32 %v17008_v60, %v2759_v41 }
 0x383   : > { %v2682_v21 = vsel %vm2674_vm0, %v2665_v33, %v2681_v53  ;;  %v2686_v24 = vsel %vm2674_vm0, %v2668_v35, %v2685_v36  ;;  %v2762_v0 = vshrl.u32 %v17011_v17, %v2759_v41  ;;  %v2679_v4 = vsel %vm2673_vm13, %v2676_v22, %v2678_v44 }
 0x384   : > { %v2683_v10 = vsel %vm2673_vm13, %v2680_v57, %v2682_v21  ;;  %v2687_v7 = vsel %vm2673_vm13, %v2684_v62, %v2686_v24  ;;  %v2765_v59 = vshrl.u32 %v17002_v63, %v2759_v41  ;;  %v2767_v13 = vshll.u32 %v17002_v63, %v2758_v43  ;;  %v11844_v62 = vpop.f32.mrb[13].mxu0 }
 0x385   : > { %v11821_v25 = vmul.u32.u64.low %v11773_v12, %v2687_v7  ;;  %v11822_v2 = vmul.u32.u64.high %v11773_v12, %v2687_v7, %v11821_v25  ;;  %v11825_v34 = vmul.u32.u64.low %v11773_v12, %v2683_v10  ;;  %v11826_v8 = vmul.u32.u64.high %v11773_v12, %v2683_v10, %v11825_v34 }
 0x386   : > { %v2763_v48 = vor.u32 %v2762_v0, %v2761_v27  ;;  %v2766_v15 = vor.u32 %v2765_v59, %v2764_v32  ;;  %v2768_v19 = vshrl.u32 %v17133_v40, %v2759_v41  ;;  %v2695_v49 = vmul.u32 %v11773_v12, %v2679_v4 }
 0x387   : > { %v2770_v9 = vshll.u32 %v17133_v40, %v2758_v43  ;;  %v2771_v30 = vshrl.u32 %v17004_v58, %v2759_v41  ;;  %v2774_v3 = vshrl.u32 %v17134_v23, %v2759_v41  ;;  %v2773_v33 = vshll.u32 %v17004_v58, %v2758_v43 }
 0x388   : > { %v2769_v28 = vor.u32 %v2768_v19, %v2767_v13  ;;  %vm2776_vm2 = vcmp.lt.s32.totalorder %v11780_v38, 1  ;;  %vm2777_vm15 = vcmp.lt.s32.totalorder %v11780_v38, 2  ;;  %vm2697_vm3 = vc.u32 %v11822_v2, %v11825_v34 }
 0x389   : > { %v2698_v35 = vadd.s32 1, %v11826_v8  ;;  %v2772_v31 = vor.u32 %v2771_v30, %v2770_v9  ;;  %vm2778_vm10 = vcmp.lt.s32.totalorder %v11780_v38, 3  ;;  %v2775_v12 = vor.u32 %v2774_v3, %v2773_v33 }
 0x38a   : > { %vm2779_vm11 = vcmp.lt.s32.totalorder %v11780_v38, 4  ;;  %v2780_v27 = vsel %vm2776_vm2, %v2760_v6, %v2763_v48  ;;  %v2784_v41 = vsel %vm2776_vm2, %v2763_v48, %v2766_v15  ;;  %v2788_v57 = vsel %vm2776_vm2, %v2766_v15, %v2769_v28 }
 0x38b   : > { %v2699_v22 = vsel %vm2697_vm3, %v2698_v35, %v11826_v8  ;;  %v2781_v43 = vsel %vm2779_vm11, %v2769_v28, 2102212464  ;;  %v2785_v52 = vsel %vm2779_vm11, %v2772_v31, 920167782  ;;  %v2789_v32 = vsel %vm2779_vm11, %v2775_v12, 1326507024 }
 0x38c   : > { %v2700_v44 = vadd.s32 %v2699_v22, %v2695_v49  ;;  %v2782_v53 = vsel %vm2778_vm10, %v2766_v15, %v2781_v43  ;;  %v2786_v36 = vsel %vm2778_vm10, %v2769_v28, %v2785_v52  ;;  %v2790_v6 = vsel %vm2778_vm10, %v2772_v31, %v2789_v32 }
 0x38d   : > { %v2783_v21 = vsel %vm2777_vm15, %v2780_v27, %v2782_v53  ;;  %v2787_v24 = vsel %vm2777_vm15, %v2784_v41, %v2786_v36  ;;  %v3068_v0 = vsel %vm3067_vm8, %v11783_v14, 0  ;;  %v2791_v10 = vsel %vm2777_vm15, %v2788_v57, %v2790_v6 }
 0x38e   : > { %v2701_v4 = vadd.s32 536870912, %v2700_v44  ;;  %v11862_v7 = vmul.u32.u64.low %v11778_v1, %v2787_v24  ;;  %v11863_v59 = vmul.u32.u64.high %v11778_v1, %v2787_v24, %v11862_v7  ;;  %v11870_v48 = vshrl.u32 %v3068_v0, 5 }
 0x38f   : > { %v11867_v25 = vmul.u32.u64.low %v11778_v1, %v2791_v10  ;;  %v11868_v8 = vmul.u32.u64.high %v11778_v1, %v2791_v10, %v11867_v25  ;;  %v3070_v13 = vand.u32 31, %v3068_v0  ;;  %v2799_v14 = vmul.u32 %v11778_v1, %v2783_v21 }
 0x390   : > { %v11872_v15 = vshrl.u32 %v2701_v4, 30  ;;  %v11877_v38 = vshll.u32 %v3064_v47, 8  ;;  %v3163_v19 = vand.u32 2139095040, %v11776_v45  ;;  %v2802_v9 = vadd.s32 1, %v11863_v59 }
 0x391   : > { %v3071_v30 = vsub.s32 32, %v3070_v13  ;;  %v11884_v3 = vadd.f32 %v11741_v61, %v11790_v11  ;;  %vm2801_vm1 = vc.u32 %v11868_v8, %v11862_v7  ;;  %vm3088_vm14 = vcmp.lt.s32.totalorder %v11870_v48, 1 }
 0x392   : > { %v2703_v49 = vshll.u32 %v11872_v15, 30  ;;  %vm3089_vm5 = vcmp.lt.s32.totalorder %v11870_v48, 2  ;;  %vm3090_vm7 = vcmp.lt.s32.totalorder %v11870_v48, 3  ;;  %v2803_v1 = vsel %vm2801_vm1, %v2802_v9, %v11863_v59 }
 0x393   : > { %17135 = vst [vmem:[#allocation18_spill] sm:$0xff] %v11884_v3  ;;  %v3073_v47 = vshll.u32 %v17008_v60, %v3070_v13  ;;  %v3076_v28 = vshll.u32 %v17011_v17, %v3070_v13  ;;  %v2804_v33 = vadd.s32 %v2803_v1, %v2799_v14  ;;  %v3074_v11 = vshrl.u32 %v17011_v17, %v3071_v30 }
 0x394   : > { %v11891_v5 = vsub.s32 %v2700_v44, %v2703_v49  ;;  %v3077_v35 = vshrl.u32 %v17002_v63, %v3071_v30  ;;  %v3079_v31 = vshll.u32 %v17002_v63, %v3070_v13  ;;  %v3080_v27 = vshrl.u32 %v17133_v40, %v3071_v30 }
 0x395   : > { %v3082_v41 = vshll.u32 %v17133_v40, %v3070_v13  ;;  %v3083_v22 = vshrl.u32 %v17004_v58, %v3071_v30  ;;  %v2805_v43 = vadd.s32 536870912, %v2804_v33  ;;  %v3075_v52 = vor.u32 %v3074_v11, %v3073_v47 }
 0x396   : > { %v2706_v12 = vsub.s32 0, %v11891_v5  ;;  %v3078_v57 = vor.u32 %v3077_v35, %v3076_v28  ;;  %v3085_v44 = vshll.u32 %v17004_v58, %v3070_v13  ;;  %v3081_v36 = vor.u32 %v3080_v27, %v3079_v31 }
 0x397   : > { %v3084_v32 = vor.u32 %v3083_v22, %v3082_v41  ;;  %v3086_v21 = vshrl.u32 %v17134_v23, %v3071_v30  ;;  %v11906_v24 = vshrl.u32 %v2805_v43, 30  ;;  %v3072_v6 = vshrl.u32 %v17008_v60, %v3071_v30 }
 0x398   : > { %v8914_v53 = vmin.u32 %v2706_v12, %v11891_v5  ;;  %vm3091_vm12 = vcmp.lt.s32.totalorder %v11870_v48, 4  ;;  %v3096_v0 = vsel %vm3088_vm14, %v3075_v52, %v3078_v57  ;;  %v3100_v9 = vsel %vm3088_vm14, %v3078_v57, %v3081_v36 }
 0x399   : > { %v3087_v10 = vor.u32 %v3086_v21, %v3085_v44  ;;  %v3093_v59 = vsel %vm3091_vm12, %v3081_v36, 2102212464  ;;  %v3097_v25 = vsel %vm3091_vm12, %v3084_v32, 920167782  ;;  %v2807_v13 = vshll.u32 %v11906_v24, 30 }
 0x39a   : > { %v2708_v4 = vclz %v8914_v53  ;;  %v3092_v14 = vsel %vm3088_vm14, %v3072_v6, %v3075_v52  ;;  %v3098_v49 = vsel %vm3090_vm7, %v3081_v36, %v3097_v25  ;;  %v3094_v1 = vsel %vm3090_vm7, %v3078_v57, %v3093_v59  ;;  %v11947_v59 = vpop.f32.mrb[14].mxu0 }
 0x39b   : > { %v3099_v47 = vsel %vm3089_vm5, %v3096_v0, %v3098_v49  ;;  %v3101_v28 = vsel %vm3091_vm12, %v3087_v10, 1326507024  ;;  %v11923_v11 = vsub.s32 %v2804_v33, %v2807_v13  ;;  %v3164_v41 = vshrl.u32 %v3163_v19, 23 }
 0x39c   : > { %v8915_v30 = vadd.s32 4294967294, %v2708_v4  ;;  %v3102_v35 = vsel %vm3090_vm7, %v3084_v32, %v3101_v28  ;;  %v11928_v31 = vmul.u32.u64.low %v11877_v38, %v3099_v47  ;;  %v11929_v12 = vmul.u32.u64.high %v11877_v38, %v3099_v47, %v11928_v31 }
 0x39d   : > { %v3103_v27 = vsel %vm3089_vm5, %v3100_v9, %v3102_v35  ;;  %v2810_v43 = vsub.s32 0, %v11923_v11  ;;  %v3095_v44 = vsel %vm3089_vm5, %v3092_v14, %v3094_v1  ;;  %v2851_v36 = vand.u32 2139095040, %v11884_v3 }
 0x39e   : > { %vm8916_vm6 = vcmp.lt.s32.totalorder %v8915_v30, 0  ;;  %v11935_v52 = vmul.u32.u64.low %v11877_v38, %v3103_v27  ;;  %v11936_v57 = vmul.u32.u64.high %v11877_v38, %v3103_v27, %v11935_v52  ;;  %v3114_v53 = vadd.s32 1, %v11929_v12 }
 0x39f   : > { %v2711_v22 = vsel %vm8916_vm6, 0, %v8915_v30  ;;  %v8918_v32 = vmin.u32 %v2810_v43, %v11923_v11  ;;  %v16825_v21 = vand.u32 2147483647, %v11884_v3  ;;  %v16823_v19 = vand.u32 2147483647, %v11776_v45 }
 0x3a0   : > { %v2716_v33 = vsub.s32 4294967266, %v2711_v22  ;;  %v8933_v6 = vadd.s32 4294967169, %v3164_v41  ;;  %v2712_v0 = vsub.s32 32, %v2711_v22  ;;  %v3111_v4 = vmul.u32 %v11877_v38, %v3095_v44 }
 0x3a1   : > { %vm3113_vm13 = vc.u32 %v11936_v57, %v11928_v31  ;;  %v2852_v10 = vshrl.u32 %v2851_v36, 23  ;;  %v2696_v13 = vadd.s32 %v11825_v34, %v11822_v2  ;;  %v2812_v9 = vclz %v8918_v32 }
 0x3a2   : > { %v2717_v48 = vadd.s32 127, %v2716_v33  ;;  %v3115_v25 = vsel %vm3113_vm13, %v3114_v53, %v11929_v12  ;;  %v3167_v30 = vand.u32 8388607, %v16823_v19  ;;  %v3170_v1 = vadd.s32 1, %v8933_v6 }
 0x3a3   : > { %v3116_v14 = vadd.s32 %v3115_v25, %v3111_v4  ;;  %v8921_v49 = vadd.s32 4294967169, %v2852_v10  ;;  %v2714_v47 = vshrl.u32 %v2696_v13, %v2712_v0  ;;  %v2855_v28 = vand.u32 8388607, %v16825_v21 }
 0x3a4   : > { %v2718_v27 = vshll.u32 %v2717_v48, 23  ;;  %v2713_v41 = vshll.u32 %v11891_v5, %v2711_v22  ;;  %v8919_v43 = vadd.s32 4294967294, %v2812_v9  ;;  %v3168_v2 = vor.u32 8388608, %v3167_v30 }
 0x3a5   : > { %v3117_v38 = vadd.s32 536870912, %v3116_v14  ;;  %v2858_v35 = vadd.s32 1, %v8921_v49  ;;  %vm3171_vm4 = vcmp.gt.s32.totalorder %v3170_v1, 0  ;;  %v2856_v33 = vor.u32 8388608, %v2855_v28 }
 0x3a6   : > { %v2715_v34 = vor.u32 %v2714_v47, %v2713_v41  ;;  %v2719_v44 = vor.u32 4788187, %v2718_v27  ;;  %v3172_v32 = vsel %vm3171_vm4, %v3170_v1, 0  ;;  %v2800_v6 = vadd.s32 %v11862_v7, %v11868_v8  ;;  %v11987_v41 = vpop.f32.mrb[12].mxu1 }
 0x3a7   : > { %v11957_v12 = vshrl.u32 %v3117_v38, 30  ;;  %vm2859_vm0 = vcmp.gt.s32.totalorder %v2858_v35, 0  ;;  %vm8920_vm8 = vcmp.lt.s32.totalorder %v8919_v43, 0  ;;  %v11964_v22 = vshll.u32 %v3168_v2, 8 }
 0x3a8   : > { %v2860_v53 = vsel %vm2859_vm0, %v2858_v35, 0  ;;  %v2722_v0 = vcvt.s32.f32 %v2715_v34  ;;  %v11967_v4 = vadd.s32 %v11928_v31, %v11936_v57  ;;  %v11970_v48 = vshll.u32 %v2856_v33, 8 }
 0x3a9   : > { %v3119_v52 = vshll.u32 %v11957_v12, 30  ;;  %v2862_v5 = vand.u32 31, %v2860_v53  ;;  %v2720_v25 = vand.u32 2147483647, %v2719_v44  ;;  %v11974_v49 = vand.u32 31, %v3172_v32 }
 0x3aa   : > { %v11976_v9 = vsel %vm8920_vm8, 0, %v8919_v43  ;;  %v2861_v28 = vshrl.u32 %v2860_v53, 5  ;;  %vm2642_vm12 = vcmp.lt.s32.totalorder %v11745_v55, 0  ;;  %vm3058_vm4 = vcmp.lt.s32.totalorder %v11756_v56, 0 }
 0x3ab   : > { %v11960_v36 = vsub.s32 %v3116_v14, %v3119_v52  ;;  %v2863_v13 = vsub.s32 32, %v2862_v5  ;;  %v11972_v14 = vshrl.u32 %v3172_v32, 5  ;;  %v2865_v8 = vshll.u32 %v17008_v60, %v2862_v5 }
 0x3ac   : > { %v2868_v30 = vshll.u32 %v17011_v17, %v2862_v5  ;;  %v2871_v1 = vshll.u32 %v17002_v63, %v2862_v5  ;;  %v2874_v35 = vshll.u32 %v17133_v40, %v2862_v5  ;;  %v3175_v52 = vsub.s32 32, %v11974_v49 }
 0x3ad   : > { %v3122_v10 = vsub.s32 0, %v11960_v36  ;;  %v2866_v31 = vshrl.u32 %v17011_v17, %v2863_v13  ;;  %v2869_v57 = vshrl.u32 %v17002_v63, %v2863_v13  ;;  %v2872_v47 = vshrl.u32 %v17133_v40, %v2863_v13 }
 0x3ae   : > { %v2875_v27 = vshrl.u32 %v17004_v58, %v2863_v13  ;;  %v2877_v32 = vshll.u32 %v17004_v58, %v2862_v5  ;;  %v2820_v19 = vsub.s32 4294967266, %v11976_v9  ;;  %vm2880_vm15 = vcmp.lt.s32.totalorder %v2861_v28, 1 }
 0x3af   : > { %v8930_v7 = vmin.u32 %v3122_v10, %v11960_v36  ;;  %v2867_v43 = vor.u32 %v2866_v31, %v2865_v8  ;;  %v2870_v2 = vor.u32 %v2869_v57, %v2868_v30  ;;  %v2873_v34 = vor.u32 %v2872_v47, %v2871_v1 }
 0x3b0   : > { %v2876_v44 = vor.u32 %v2875_v27, %v2874_v35  ;;  %v2878_v10 = vshrl.u32 %v17134_v23, %v2863_v13  ;;  %v11998_v8 = vmul.f32 %v11736_v20, %v11785_v54  ;;  %vm2883_vm3 = vcmp.lt.s32.totalorder %v2861_v28, 4 }
 0x3b1   : > { %v3124_v38 = vclz %v8930_v7  ;;  %v2816_v7 = vsub.s32 32, %v11976_v9  ;;  %v12000_v31 = vmul.f32 %v2722_v0, %v2720_v25  ;;  %v2885_v5 = vsel %vm2883_vm3, %v2873_v34, 2102212464 }
 0x3b2   : > { %v2879_v30 = vor.u32 %v2878_v10, %v2877_v32  ;;  %v2888_v57 = vsel %vm2880_vm15, %v2867_v43, %v2870_v2  ;;  %v2889_v1 = vsel %vm2883_vm3, %v2876_v44, 920167782  ;;  %vm2882_vm10 = vcmp.lt.s32.totalorder %v2861_v28, 3 }
 0x3b3   : > { %v8931_v33 = vadd.s32 4294967294, %v3124_v38  ;;  %v2864_v38 = vshrl.u32 %v17008_v60, %v2863_v13  ;;  %v3178_v35 = vshrl.u32 %v17011_v17, %v3175_v52  ;;  %vm2881_vm11 = vcmp.lt.s32.totalorder %v2861_v28, 2 }
 0x3b4   : > { %v2890_v27 = vsel %vm2882_vm10, %v2873_v34, %v2889_v1  ;;  %v2892_v20 = vsel %vm2880_vm15, %v2870_v2, %v2873_v34  ;;  %v2893_v54 = vsel %vm2883_vm3, %v2879_v30, 1326507024  ;;  %v2886_v32 = vsel %vm2882_vm10, %v2870_v2, %v2885_v5 }
 0x3b5   : > { %vm8932_vm2 = vcmp.lt.s32.totalorder %v8931_v33, 0  ;;  %v2884_v29 = vsel %vm2880_vm15, %v2864_v38, %v2867_v43  ;;  %v2891_v10 = vsel %vm2881_vm11, %v2888_v57, %v2890_v27  ;;  %v2894_v21 = vsel %vm2882_vm10, %v2876_v44, %v2893_v54 }
 0x3b6   : > { %v12002_v47 = vsel %vm8932_vm2, 0, %v8931_v33  ;;  %v2895_v25 = vsel %vm2881_vm11, %v2892_v20, %v2894_v21  ;;  %v12008_v39 = vmul.u32.u64.low %v11970_v48, %v2891_v10  ;;  %v12009_v33 = vmul.u32.u64.high %v11970_v48, %v2891_v10, %v12008_v39 }
 0x3b7   : > { %v3132_v0 = vsub.s32 4294967266, %v12002_v47  ;;  %v12012_v13 = vshrl.u32 %v2800_v6, %v2816_v7  ;;  %v12015_v26 = vmul.u32.u64.low %v11970_v48, %v2895_v25  ;;  %v12016_v28 = vmul.u32.u64.high %v11970_v48, %v2895_v25, %v12015_v26 }
 0x3b8   : > { %v3177_v43 = vshll.u32 %v17008_v60, %v11974_v49  ;;  %v2887_v2 = vsel %vm2881_vm11, %v2884_v29, %v2886_v32  ;;  %v3180_v34 = vshll.u32 %v17011_v17, %v11974_v49  ;;  %v3181_v21 = vshrl.u32 %v17002_v63, %v3175_v52 }
 0x3b9   : > { %v3184_v44 = vshrl.u32 %v17133_v40, %v3175_v52  ;;  %v3128_v30 = vsub.s32 32, %v12002_v47  ;;  %v3183_v6 = vshll.u32 %v17002_v63, %v11974_v49  ;;  %v3186_v7 = vshll.u32 %v17133_v40, %v11974_v49 }
 0x3ba   : > { %v3187_v26 = vshrl.u32 %v17004_v58, %v3175_v52  ;;  %v3133_v5 = vadd.s32 127, %v3132_v0  ;;  %v2906_v29 = vadd.s32 1, %v12009_v33  ;;  %v3179_v57 = vor.u32 %v3178_v35, %v3177_v43 }
 0x3bb   : > { %v3182_v1 = vor.u32 %v3181_v21, %v3180_v34  ;;  %v2903_v38 = vmul.u32 %v11970_v48, %v2887_v2  ;;  %vm2905_vm1 = vc.u32 %v12016_v28, %v12008_v39  ;;  %v3185_v27 = vor.u32 %v3184_v44, %v3183_v6 }
 0x3bc   : > { %v3188_v20 = vor.u32 %v3187_v26, %v3186_v7  ;;  %v2821_v54 = vadd.s32 127, %v2820_v19  ;;  %v2907_v32 = vsel %vm2905_vm1, %v2906_v29, %v12009_v33  ;;  %v3189_v10 = vshll.u32 %v17004_v58, %v11974_v49 }
 0x3bd   : > { %v3190_v25 = vshrl.u32 %v17134_v23, %v3175_v52  ;;  %v3130_v0 = vshrl.u32 %v11967_v4, %v3128_v30  ;;  %v2908_v53 = vadd.s32 %v2907_v32, %v2903_v38  ;;  %v3176_v35 = vshrl.u32 %v17008_v60, %v3175_v52 }
 0x3be   : > { %vm3192_vm14 = vcmp.lt.s32.totalorder %v11972_v14, 1  ;;  %v3134_v48 = vshll.u32 %v3133_v5, 23  ;;  %vm3195_vm5 = vcmp.lt.s32.totalorder %v11972_v14, 4  ;;  %vm3194_vm7 = vcmp.lt.s32.totalorder %v11972_v14, 3 }
 0x3bf   : > { %v3191_v43 = vor.u32 %v3190_v25, %v3189_v10  ;;  %v3200_v2 = vsel %vm3192_vm14, %v3179_v57, %v3182_v1  ;;  %v2909_v19 = vadd.s32 536870912, %v2908_v53  ;;  %v3197_v33 = vsel %vm3195_vm5, %v3185_v27, 2102212464 }
 0x3c0   : > { %v3201_v34 = vsel %vm3195_vm5, %v3188_v20, 920167782  ;;  %vm3193_vm6 = vcmp.lt.s32.totalorder %v11972_v14, 2  ;;  %v3204_v49 = vsel %vm3192_vm14, %v3182_v1, %v3185_v27  ;;  %v3196_v44 = vsel %vm3192_vm14, %v3176_v35, %v3179_v57  ;;  %v12068_v35 = vpop.f32.mrb[15].mxu0 }
 0x3c1   : > { %v3202_v4 = vsel %vm3194_vm7, %v3185_v27, %v3201_v34  ;;  %v3205_v21 = vsel %vm3195_vm5, %v3191_v43, 1326507024  ;;  %v12045_v52 = vshrl.u32 %v2909_v19, 30  ;;  %v3198_v7 = vsel %vm3194_vm7, %v3182_v1, %v3197_v33 }
 0x3c2   : > { %v3203_v30 = vsel %vm3193_vm6, %v3200_v2, %v3202_v4  ;;  %v3206_v6 = vsel %vm3194_vm7, %v3188_v20, %v3205_v21  ;;  %v2724_v38 = vxor.u32 2147483648, %v12000_v31  ;;  %v2822_v27 = vshll.u32 %v2821_v54, 23 }
 0x3c3   : > { %v3207_v26 = vsel %vm3193_vm6, %v3204_v49, %v3206_v6  ;;  %v12052_v5 = vmul.u32.u64.low %v11964_v22, %v3203_v30  ;;  %v12053_v29 = vmul.u32.u64.high %v11964_v22, %v3203_v30, %v12052_v5  ;;  %v3129_v32 = vshll.u32 %v11960_v36, %v12002_v47 }
 0x3c4   : > { %v2911_v57 = vshll.u32 %v12045_v52, 30  ;;  %v3135_v10 = vor.u32 4788187, %v3134_v48  ;;  %v12061_v20 = vmul.u32.u64.low %v11964_v22, %v3207_v26  ;;  %v12062_v1 = vmul.u32.u64.high %v11964_v22, %v3207_v26, %v12061_v20 }
 0x3c5   : > { %v12066_v25 = vadd.f32 %v11741_v61, %v11998_v8  ;;  %v3131_v43 = vor.u32 %v3130_v0, %v3129_v32  ;;  %v3199_v54 = vsel %vm3193_vm6, %v3196_v44, %v3198_v7  ;;  %v2589_v36 = vmul.f32 %v11738_v37, %v11792_v18 }
 0x3c6   : > { %v12070_v2 = vsub.s32 %v2908_v53, %v2911_v57  ;;  %v2726_v47 = vsub.s32 4, %v11872_v15  ;;  %v3142_v48 = vsub.s32 4, %v11957_v12  ;;  %v3218_v19 = vadd.s32 1, %v12053_v29 }
 0x3c7   : > { %v2955_v61 = vand.u32 2139095040, %v12066_v25  ;;  %v17136_v8 = vshll.u32 %v11923_v11, %v11976_v9  ;;  %v2823_v0 = vor.u32 4788187, %v2822_v27  ;;  %v12086_v33 = vadd.f32 %v11748_v51, %v2589_v36 }
 0x3c8   : > { %v2914_v14 = vsub.s32 0, %v12070_v2  ;;  %v3136_v18 = vand.u32 2147483647, %v3135_v10  ;;  %v3215_v34 = vmul.u32 %v11964_v22, %v3199_v54  ;;  %vm3217_vm13 = vc.u32 %v12062_v1, %v12052_v5 }
 0x3c9   : > { %v2819_v53 = vor.u32 %v12012_v13, %v17136_v8  ;;  %17137 = vst [vmem:[#allocation14_spill] sm:$0xff] %v12086_v33  ;;  %v2956_v4 = vshrl.u32 %v2955_v61, 23  ;;  %v2725_v49 = vsel %vm2642_vm12, %v2724_v38, %v12000_v31  ;;  %v3138_v11 = vcvt.s32.f32 %v3131_v43 }
 0x3ca   : > { %v8922_v9 = vmin.u32 %v2914_v14, %v12070_v2  ;;  %v3219_v13 = vsel %vm3217_vm13, %v3218_v19, %v12053_v29  ;;  %v16828_v44 = vand.u32 2147483647, %v12066_v25  ;;  %v3267_v6 = vand.u32 2139095040, %v12086_v33 }
 0x3cb   : > { %v3220_v21 = vadd.s32 %v3219_v13, %v3215_v34  ;;  %v8925_v30 = vadd.s32 4294967169, %v2956_v4  ;;  %v17138_v22 = vand.u32 2147483647, %v11745_v55  ;;  %v17139_v7 = vmov 0 }
 0x3cc   : > { %v2824_v26 = vand.u32 2147483647, %v2823_v0  ;;  %v2916_v31 = vclz %v8922_v9  ;;  %v12108_v29 = vsel %vm2642_vm12, %v2726_v47, %v11872_v15  ;;  %v12110_v38 = vmul.f32 %v3138_v11, %v3136_v18  ;;  %v12153_v18 = vpop.f32.mrb[13].mxu1 }
 0x3cd   : > { %vm12100_vm0 = vcmp.le.f32.partialorder %v17138_v22, 0.7853982  ;;  %17142 = vst [vmem:[#allocation21_spill] sm:$0xff] %v12108_v29  ;;  %v3221_v27 = vadd.s32 536870912, %v3220_v21  ;;  %v2962_v32 = vadd.s32 1, %v8925_v30  ;;  %v2826_v10 = vcvt.s32.f32 %v2819_v53 }
 0x3ce   : > { %v17140_v7 = vsel %vm12100_vm0, 4294967295, %v17139_v7  ;;  %v12115_v57 = vsel %vm12100_vm0, %v11745_v55, %v2725_v49  ;;  %v12120_v20 = vsel %vm3058_vm4, %v3142_v48, %v11957_v12  ;;  %v8923_v43 = vadd.s32 4294967294, %v2916_v31 }
 0x3cf   : > { %17141 = vst [vmem:[#allocation16_spill] sm:$0xff] %v17140_v7  ;;  %17143 = vst [vmem:[#allocation19_spill] sm:$0xff] %v12120_v20  ;;  %v12122_v54 = vshrl.u32 %v3221_v27, 30  ;;  %v2959_v15 = vand.u32 8388607, %v16828_v44  ;;  %vm2963_vm8 = vcmp.gt.s32.totalorder %v2962_v32, 0  ;;  %v12126_v47 = vmul.f32 %v2826_v10, %v2824_v26 }
 0x3d0   : > { %v3268_v36 = vshrl.u32 %v3267_v6, 23  ;;  %v2904_v19 = vadd.s32 %v12008_v39, %v12016_v28  ;;  %vm8924_vm2 = vcmp.lt.s32.totalorder %v8923_v43, 0  ;;  %v2964_v61 = vsel %vm2963_vm8, %v2962_v32, 0 }
 0x3d1   : > { %17144 = vst [vmem:[#allocation15_spill] sm:$0xff] %v12122_v54  ;;  %v2919_v53 = vsel %vm8924_vm2, 0, %v8923_v43  ;;  %v3223_v12 = vshll.u32 %v12122_v54, 30  ;;  %v2966_v48 = vand.u32 31, %v2964_v61  ;;  %v2590_v34 = vmul.f32 %v11738_v37, %v11797_v50 }
 0x3d2   : > { %v2920_v0 = vsub.s32 32, %v2919_v53  ;;  %v2924_v14 = vsub.s32 4294967266, %v2919_v53  ;;  %v2960_v49 = vor.u32 8388608, %v2959_v15  ;;  %v8937_v39 = vadd.s32 4294967169, %v3268_v36 }
 0x3d3   : > { %v12135_v4 = vsub.s32 %v3220_v21, %v3223_v12  ;;  %v2967_v11 = vsub.s32 32, %v2966_v48  ;;  %v2969_v13 = vshll.u32 %v17008_v60, %v2966_v48  ;;  %v2972_v30 = vshll.u32 %v17011_v17, %v2966_v48 }
 0x3d4   : > { %v2922_v28 = vshrl.u32 %v2904_v19, %v2920_v0  ;;  %v2925_v9 = vadd.s32 127, %v2924_v14  ;;  %v2975_v31 = vshll.u32 %v17002_v63, %v2966_v48  ;;  %v2978_v21 = vshll.u32 %v17133_v40, %v2966_v48 }
 0x3d5   : > { %v3226_v6 = vsub.s32 0, %v12135_v4  ;;  %v2970_v22 = vshrl.u32 %v17011_v17, %v2967_v11  ;;  %v2973_v26 = vshrl.u32 %v17002_v63, %v2967_v11  ;;  %v2976_v50 = vshrl.u32 %v17133_v40, %v2967_v11 }
 0x3d6   : > { %v2926_v37 = vshll.u32 %v2925_v9, 23  ;;  %v2979_v27 = vshrl.u32 %v17004_v58, %v2967_v11  ;;  %v2921_v32 = vshll.u32 %v12070_v2, %v2919_v53  ;;  %v2965_v43 = vshrl.u32 %v2964_v61, 5 }
 0x3d7   : > { %v8934_v10 = vmin.u32 %v3226_v6, %v12135_v4  ;;  %v12149_v15 = vadd.f32 %v11748_v51, %v2590_v34  ;;  %v2971_v36 = vor.u32 %v2970_v22, %v2969_v13  ;;  %v2974_v19 = vor.u32 %v2973_v26, %v2972_v30 }
 0x3d8   : > { %v2977_v12 = vor.u32 %v2976_v50, %v2975_v31  ;;  %v2980_v0 = vor.u32 %v2979_v27, %v2978_v21  ;;  %v2927_v14 = vor.u32 4788187, %v2926_v37  ;;  %v2981_v44 = vshll.u32 %v17004_v58, %v2966_v48 }
 0x3d9   : > { %v3228_v9 = vclz %v8934_v10  ;;  %v2982_v8 = vshrl.u32 %v17134_v23, %v2967_v11  ;;  %v2923_v16 = vor.u32 %v2922_v28, %v2921_v32  ;;  %v3000_v2 = vshll.u32 %v2960_v49, 8 }
 0x3da   : > { %v17145_v53 = vand.u32 2147483647, %v12086_v33  ;;  %v3274_v6 = vadd.s32 1, %v8937_v39  ;;  %vm2984_vm15 = vcmp.lt.s32.totalorder %v2965_v43, 1  ;;  %vm2987_vm3 = vcmp.lt.s32.totalorder %v2965_v43, 4 }
 0x3db   : > { %v8935_v51 = vadd.s32 4294967294, %v3228_v9  ;;  %v2983_v34 = vor.u32 %v2982_v8, %v2981_v44  ;;  %vm2986_vm10 = vcmp.lt.s32.totalorder %v2965_v43, 3  ;;  %v2992_v13 = vsel %vm2984_vm15, %v2971_v36, %v2974_v19 }
 0x3dc   : > { %v3271_v61 = vand.u32 8388607, %v17145_v53  ;;  %v2993_v30 = vsel %vm2987_vm3, %v2980_v0, 920167782  ;;  %v2996_v48 = vsel %vm2984_vm15, %v2974_v19, %v2977_v12  ;;  %v2928_v22 = vand.u32 2147483647, %v2927_v14 }
 0x3dd   : > { %v2989_v26 = vsel %vm2987_vm3, %v2977_v12, 2102212464  ;;  %v2994_v31 = vsel %vm2986_vm10, %v2977_v12, %v2993_v30  ;;  %v2997_v28 = vsel %vm2987_vm3, %v2983_v34, 1326507024  ;;  %v2968_v49 = vshrl.u32 %v17008_v60, %v2967_v11 }
 0x3de   : > { %vm2985_vm11 = vcmp.lt.s32.totalorder %v2965_v43, 2  ;;  %v2998_v39 = vsel %vm2986_vm10, %v2980_v0, %v2997_v28  ;;  %v3371_v44 = vand.u32 2139095040, %v12149_v15  ;;  %v2930_v8 = vcvt.s32.f32 %v2923_v16 }
 0x3df   : > { %vm8936_vm1 = vcmp.lt.s32.totalorder %v8935_v51, 0  ;;  %v2995_v37 = vsel %vm2985_vm11, %v2992_v13, %v2994_v31  ;;  %v2999_v50 = vsel %vm2985_vm11, %v2996_v48, %v2998_v39  ;;  %v2988_v21 = vsel %vm2984_vm15, %v2968_v49, %v2971_v36 }
 0x3e0   : > { %v2990_v27 = vsel %vm2986_vm10, %v2974_v19, %v2989_v26  ;;  %v12167_v32 = vmul.u32.u64.low %v3000_v2, %v2999_v50  ;;  %v12168_v10 = vmul.u32.u64.high %v3000_v2, %v2999_v50, %v12167_v32  ;;  %9654 = vcosq.f32 %v12115_v57 }
 0x3e1   : > { %v12171_v11 = vmul.f32 %v2930_v8, %v2928_v22  ;;  %v3272_v12 = vor.u32 8388608, %v3271_v61  ;;  %vm3275_vm14 = vcmp.gt.s32.totalorder %v3274_v6, 0  ;;  %v12173_v0 = vsel %vm8936_vm1, 0, %v8935_v51 }
 0x3e2   : > { %v12175_v16 = vmul.u32.u64.low %v3000_v2, %v2995_v37  ;;  %v12176_v14 = vmul.u32.u64.high %v3000_v2, %v2995_v37, %v12175_v16  ;;  %v3276_v9 = vsel %vm3275_vm14, %v3274_v6, 0  ;;  %9656 = vsinq.f32 %v12115_v57 }
 0x3e3   : > { %v2991_v36 = vsel %vm2985_vm11, %v2988_v21, %v2990_v27  ;;  %v12181_v19 = vshrl.u32 %v3276_v9, 5  ;;  %v3372_v53 = vshrl.u32 %v3371_v44, 23  ;;  %v17146_v61 = vxor.u32 2147483648, %v12110_v38 }
 0x3e4   : > { %v3278_v13 = vand.u32 31, %v3276_v9  ;;  %vm3009_vm5 = vc.u32 %v12168_v10, %v12175_v16  ;;  %v12194_v43 = vshll.u32 %v3272_v12, 8  ;;  %v3236_v48 = vsub.s32 4294967266, %v12173_v0 }
 0x3e5   : > { %v3141_v51 = vsel %vm3058_vm4, %v17146_v61, %v12110_v38  ;;  %v3007_v22 = vmul.u32 %v3000_v2, %v2991_v36  ;;  %v3010_v26 = vadd.s32 1, %v12176_v14  ;;  %vm3296_vm7 = vcmp.lt.s32.totalorder %v12181_v19, 1 }
 0x3e6   : > { %v3279_v31 = vsub.s32 32, %v3278_v13  ;;  %v3281_v38 = vshll.u32 %v17008_v60, %v3278_v13  ;;  %v3284_v28 = vshll.u32 %v17011_v17, %v3278_v13  ;;  %v8941_v49 = vadd.s32 4294967169, %v3372_v53 }
 0x3e7   : > { %v17147_v39 = vand.u32 2147483647, %v11756_v56  ;;  %v17148_v44 = vmov 0  ;;  %v3011_v8 = vsel %vm3009_vm5, %v3010_v26, %v12176_v14  ;;  %v3287_v50 = vshll.u32 %v17002_v63, %v3278_v13 }
 0x3e8   : > { %v3282_v2 = vshrl.u32 %v17011_v17, %v3279_v31  ;;  %v3285_v37 = vshrl.u32 %v17002_v63, %v3279_v31  ;;  %v3012_v21 = vadd.s32 %v3011_v8, %v3007_v22  ;;  %v3288_v27 = vshrl.u32 %v17133_v40, %v3279_v31 }
 0x3e9   : > { %vm12203_vm12 = vcmp.le.f32.partialorder %v17147_v39, 0.7853982  ;;  %v3290_v32 = vshll.u32 %v17133_v40, %v3278_v13  ;;  %v3291_v12 = vshrl.u32 %v17004_v58, %v3279_v31  ;;  %vm2850_vm6 = vcmp.lt.s32.totalorder %v11884_v3, 0 }
 0x3ea   : > { %v17149_v44 = vsel %vm12203_vm12, 4294967295, %v17148_v44  ;;  %v3283_v9 = vor.u32 %v3282_v2, %v3281_v38  ;;  %v3286_v36 = vor.u32 %v3285_v37, %v3284_v28  ;;  %v3293_v53 = vshll.u32 %v17004_v58, %v3278_v13  ;;  %v12217_v61 = vpop.eup %9654 }
 0x3eb   : > { %17150 = vst [vmem:[#allocation22_spill] sm:$0xff] %v17149_v44  ;;  %v3294_v14 = vshrl.u32 %v17134_v23, %v3279_v31  ;;  %17151 = vst [vmem:[#allocation10_spill] sm:$0xff] %v12217_v61  ;;  %v3013_v26 = vadd.s32 536870912, %v3012_v21  ;;  %v3289_v39 = vor.u32 %v3288_v27, %v3287_v50  ;;  %v3292_v34 = vor.u32 %v3291_v12, %v3290_v32  ;;  %v12234_v12 = vpop.permute.xlu0 %2575 }
 0x3ec   : > { %vm3297_vm13 = vcmp.lt.s32.totalorder %v12181_v19, 2  ;;  %v3280_v22 = vshrl.u32 %v17008_v60, %v3279_v31  ;;  %vm3299_vm4 = vcmp.lt.s32.totalorder %v12181_v19, 4  ;;  %v3304_v38 = vsel %vm3296_vm7, %v3283_v9, %v3286_v36  ;;  %v12224_v28 = vpop.eup %9656 }
 0x3ed   : > { %v3295_v8 = vor.u32 %v3294_v14, %v3293_v53  ;;  %17152 = vst [vmem:[#allocation28_spill] sm:$0xff] %v12224_v28  ;;  %vm2746_vm8 = vcmp.lt.s32.totalorder %v11751_v42, 0  ;;  %v12227_v13 = vshrl.u32 %v3013_v26, 30  ;;  %vm3298_vm2 = vcmp.lt.s32.totalorder %v12181_v19, 3 }
 0x3ee   : > { %v3301_v2 = vsel %vm3299_vm4, %v3289_v39, 2102212464  ;;  %v3305_v37 = vsel %vm3299_vm4, %v3292_v34, 920167782  ;;  %v3300_v50 = vsel %vm3296_vm7, %v3280_v22, %v3283_v9  ;;  %v3308_v27 = vsel %vm3296_vm7, %v3286_v36, %v3289_v39 }
 0x3ef   : > { %17153 = vst [vmem:[#allocation27_spill] sm:$0xff] %v12227_v13  ;;  %v3306_v31 = vsel %vm3298_vm2, %v3289_v39, %v3305_v37  ;;  %v3309_v32 = vsel %vm3299_vm4, %v3295_v8, 1326507024  ;;  %v17154_v53 = vand.u32 2147483647, %v11884_v3  ;;  %v17155_v14 = vmov 0 }
 0x3f0   : > { %v3015_v26 = vshll.u32 %v12227_v13, 30  ;;  %v3302_v57 = vsel %vm3298_vm2, %v3286_v36, %v3301_v2  ;;  %v3307_v30 = vsel %vm3297_vm13, %v3304_v38, %v3306_v31  ;;  %v3310_v9 = vsel %vm3298_vm2, %v3292_v34, %v3309_v32  ;;  %v12261_v34 = vpop.f32.mrb[14].mxu1 }
 0x3f1   : > { %vm12238_vm15 = vcmp.le.f32.partialorder %v17154_v53, 0.7853982  ;;  %v3237_v22 = vadd.s32 127, %v3236_v48  ;;  %v3311_v39 = vsel %vm3297_vm13, %v3308_v27, %v3310_v9  ;;  %v3144_v53 = vsel %vm12203_vm12, %v11756_v56, %v3141_v51  ;;  %v12356_v20 = vpop.f32.mrb[15].mxu1 }
 0x3f2   : > { %v17156_v14 = vsel %vm12238_vm15, 4294967295, %v17155_v14  ;;  %v12248_v8 = vmul.u32.u64.low %v12194_v43, %v3307_v30  ;;  %v12249_v37 = vmul.u32.u64.high %v12194_v43, %v3307_v30, %v12248_v8  ;;  %v12255_v6 = vsub.s32 %v3012_v21, %v3015_v26 }
 0x3f3   : > { %17157 = vst [vmem:[#allocation20_spill] sm:$0xff] %v17156_v14  ;;  %v12258_v36 = vmul.u32.u64.low %v12194_v43, %v3311_v39  ;;  %v12259_v2 = vmul.u32.u64.high %v12194_v43, %v3311_v39, %v12258_v36  ;;  %v3216_v48 = vadd.s32 %v12052_v5, %v12062_v1  ;;  %v3303_v30 = vsel %vm3297_vm13, %v3300_v50, %v3302_v57 }
 0x3f4   : > { %v3378_v38 = vadd.s32 1, %v8941_v49  ;;  %v2591_v31 = vmul.f32 %v12234_v12, %v11771_v46  ;;  %v17158_v51 = vxor.u32 2147483648, %v12171_v11  ;;  %v2934_v27 = vsub.s32 4, %v12045_v52  ;;  %v12281_v46 = vpop.permute.xlu0 %2616 }
 0x3f5   : > { %v3018_v32 = vsub.s32 0, %v12255_v6  ;;  %v17159_v26 = vand.u32 2147483647, %v12149_v15  ;;  %v17160_v1 = vsub.s32 32, %v12173_v0  ;;  %v3238_v57 = vshll.u32 %v3237_v22, 23 }
 0x3f6   : > { %v2933_v21 = vsel %vm2850_vm6, %v17158_v51, %v12171_v11  ;;  %v3322_v49 = vadd.s32 1, %v12249_v37  ;;  %vm3379_vm3 = vcmp.gt.s32.totalorder %v3378_v38, 0  ;;  %v3319_v11 = vmul.u32 %v12194_v43, %v3303_v30 }
 0x3f7   : > { %v3375_v5 = vand.u32 8388607, %v17159_v26  ;;  %v3234_v19 = vshrl.u32 %v3216_v48, %v17160_v1  ;;  %v8926_v50 = vmin.u32 %v3018_v32, %v12255_v6  ;;  %vm3321_vm10 = vc.u32 %v12259_v2, %v12248_v8 }
 0x3f8   : > { %v3380_v9 = vsel %vm3379_vm3, %v3378_v38, 0  ;;  %v17161_v39 = vxor.u32 2147483648, %v12126_v47  ;;  %v3323_v22 = vsel %vm3321_vm10, %v3322_v49, %v12249_v37  ;;  %v12296_v51 = vadd.f32 %v12281_v46, %v2591_v31 }
 0x3f9   : > { %v3382_v48 = vand.u32 31, %v3380_v9  ;;  %9658 = vcosq.f32 %v3144_v53  ;;  %v3233_v43 = vshll.u32 %v12135_v4, %v12173_v0  ;;  %v3020_v30 = vclz %v8926_v50 }
 0x3fa   : > { %v12292_v36 = vsel %vm2746_vm8, %v17161_v39, %v12126_v47  ;;  %17162 = vst [vmem:[#allocation12_spill] sm:$0xff] %v12296_v51  ;;  %v3324_v32 = vadd.s32 %v3323_v22, %v3319_v11  ;;  %9660 = vsinq.f32 %v3144_v53  ;;  %v12303_v38 = vsel %vm2850_vm6, %v2934_v27, %v12045_v52 }
 0x3fb   : > { %17163 = vst [vmem:[#allocation30_spill] sm:$0xff] %v12303_v38  ;;  %v12308_v47 = vsel %vm12238_vm15, %v11884_v3, %v2933_v21  ;;  %v3383_v37 = vsub.s32 32, %v3382_v48  ;;  %v12310_v31 = vor.u32 %v3234_v19, %v3233_v43  ;;  %v12312_v26 = vor.u32 4788187, %v3238_v57 }
 0x3fc   : > { %v3325_v1 = vadd.s32 536870912, %v3324_v32  ;;  %v3376_v4 = vor.u32 8388608, %v3375_v5  ;;  %v8927_v27 = vadd.s32 4294967294, %v3020_v30  ;;  %v3385_v21 = vshll.u32 %v17008_v60, %v3382_v48 }
 0x3fd   : > { %v3386_v0 = vshrl.u32 %v17011_v17, %v3383_v37  ;;  %v3389_v53 = vshrl.u32 %v17002_v63, %v3383_v37  ;;  %v3392_v49 = vshrl.u32 %v17133_v40, %v3383_v37  ;;  %v3395_v19 = vshrl.u32 %v17004_v58, %v3383_v37 }
 0x3fe   : > { %v12318_v50 = vshrl.u32 %v3325_v1, 30  ;;  %v3388_v57 = vshll.u32 %v17011_v17, %v3382_v48  ;;  %v3391_v11 = vshll.u32 %v17002_v63, %v3382_v48  ;;  %v3394_v5 = vshll.u32 %v17133_v40, %v3382_v48 }
 0x3ff   : > { %v3398_v39 = vshrl.u32 %v17134_v23, %v3383_v37  ;;  %9662 = vcosq.f32 %v12308_v47  ;;  %v3381_v43 = vshrl.u32 %v3380_v9, 5  ;;  %v3397_v30 = vshll.u32 %v17004_v58, %v3382_v48 }
 0x400   : > { %v3327_v22 = vshll.u32 %v12318_v50, 30  ;;  %v3387_v1 = vor.u32 %v3386_v0, %v3385_v21  ;;  %v3390_v52 = vor.u32 %v3389_v53, %v3388_v57  ;;  %v3393_v3 = vor.u32 %v3392_v49, %v3391_v11 }
 0x401   : > { %v3396_v14 = vor.u32 %v3395_v19, %v3394_v5  ;;  %v3240_v38 = vand.u32 2147483647, %v12312_v26  ;;  %v3242_v56 = vcvt.s32.f32 %v12310_v31  ;;  %vm8928_vm11 = vcmp.lt.s32.totalorder %v8927_v27, 0 }
 0x402   : > { %v12331_v13 = vsub.s32 %v3324_v32, %v3327_v22  ;;  %v3399_v55 = vor.u32 %v3398_v39, %v3397_v30  ;;  %v12333_v61 = vshll.u32 %v3376_v4, 8  ;;  %v3475_v28 = vand.u32 2139095040, %v12296_v51 }
 0x403   : > { %v17164_v9 = vand.u32 2147483647, %v12296_v51  ;;  %v12340_v48 = vpop.eup %9658  ;;  %v3384_v26 = vshrl.u32 %v17008_v60, %v3383_v37  ;;  %vm3400_vm1 = vcmp.lt.s32.totalorder %v3381_v43, 1  ;;  %vm3403_vm14 = vcmp.lt.s32.totalorder %v3381_v43, 4 }
 0x404   : > { %17165 = vst [vmem:[#allocation24_spill] sm:$0xff] %v12340_v48  ;;  %v3330_v0 = vsub.s32 0, %v12331_v13  ;;  %v12344_v31 = vpop.eup %9660  ;;  %v12346_v32 = vsel %vm8928_vm11, 0, %v8927_v27  ;;  %v3405_v4 = vsel %vm3403_vm14, %v3393_v3, 2102212464  ;;  %v3408_v53 = vsel %vm3400_vm1, %v3387_v1, %v3390_v52 }
 0x405   : > { %v12338_v44 = vand.u32 8388607, %v17164_v9  ;;  %17166 = vst [vmem:[#allocation26_spill] sm:$0xff] %v12344_v31  ;;  %v3409_v49 = vsel %vm3403_vm14, %v3396_v14, 920167782  ;;  %vm3401_vm5 = vcmp.lt.s32.totalorder %v3381_v43, 2  ;;  %v3412_v19 = vsel %vm3400_vm1, %v3390_v52, %v3393_v3 }
 0x406   : > { %v8938_v21 = vmin.u32 %v3330_v0, %v12331_v13  ;;  %vm3402_vm7 = vcmp.lt.s32.totalorder %v3381_v43, 3  ;;  %v3404_v57 = vsel %vm3400_vm1, %v3384_v26, %v3387_v1  ;;  %v3413_v5 = vsel %vm3403_vm14, %v3399_v55, 1326507024 }
 0x407   : > { %v3410_v11 = vsel %vm3402_vm7, %v3393_v3, %v3409_v49  ;;  %v3476_v39 = vshrl.u32 %v3475_v28, 23  ;;  %v3406_v37 = vsel %vm3402_vm7, %v3390_v52, %v3405_v4  ;;  %v3414_v9 = vsel %vm3402_vm7, %v3396_v14, %v3413_v5  ;;  %v12365_v14 = vpop.permute.xlu1 %2580 }
 0x408   : > { %v3332_v22 = vclz %v8938_v21  ;;  %v3411_v30 = vsel %vm3401_vm5, %v3408_v53, %v3410_v11  ;;  %v3415_v27 = vsel %vm3401_vm5, %v3412_v19, %v3414_v9  ;;  %v3028_v55 = vsub.s32 4294967266, %v12346_v32 }
 0x409   : > { %v12352_v48 = vmul.u32.u64.low %v12333_v61, %v3411_v30  ;;  %v12353_v31 = vmul.u32.u64.high %v12333_v61, %v3411_v30, %v12352_v48  ;;  %v8945_v0 = vadd.s32 4294967169, %v3476_v39  ;;  %v12358_v7 = vpop.eup %9662  ;;  %v12367_v1 = vmul.f32 %v3242_v56, %v3240_v38 }
 0x40a   : > { %17167 = vst [vmem:[#allocation31_spill] sm:$0xff] %v12358_v7  ;;  %v8939_v3 = vadd.s32 4294967294, %v3332_v22  ;;  %v12362_v28 = vmul.u32.u64.low %v12333_v61, %v3415_v27  ;;  %v12363_v52 = vmul.u32.u64.high %v12333_v61, %v3415_v27, %v12362_v28  ;;  %v3008_v26 = vadd.s32 %v12175_v16, %v12168_v10 }
 0x40b   : > { %v3482_v4 = vadd.s32 1, %v8945_v0  ;;  %v2592_v53 = vmul.f32 %v12234_v12, %v11844_v62  ;;  %v3320_v49 = vadd.s32 %v12248_v8, %v12259_v2  ;;  %v3407_v21 = vsel %vm3401_vm5, %v3404_v57, %v3406_v37 }
 0x40c   : > { %vm8940_vm6 = vcmp.lt.s32.totalorder %v8939_v3, 0  ;;  %v12378_v19 = vmul.f32 %v12365_v14, %v11947_v59  ;;  %v3024_v56 = vsub.s32 32, %v12346_v32  ;;  %v3426_v11 = vadd.s32 1, %v12353_v31 }
 0x40d   : > { %v3335_v38 = vsel %vm8940_vm6, 0, %v8939_v3  ;;  %vm3483_vm13 = vcmp.gt.s32.totalorder %v3482_v4, 0  ;;  %v12382_v10 = vadd.s32 127, %v3028_v55  ;;  %v3480_v5 = vor.u32 8388608, %v12338_v44 }
 0x40e   : > { %v3336_v16 = vsub.s32 32, %v3335_v38  ;;  %v3340_v62 = vsub.s32 4294967266, %v3335_v38  ;;  %v3423_v8 = vmul.u32 %v12333_v61, %v3407_v21  ;;  %vm3425_vm4 = vc.u32 %v12363_v52, %v12352_v48 }
 0x40f   : > { %v3484_v2 = vsel %vm3483_vm13, %v3482_v4, 0  ;;  %v12389_v59 = vadd.f32 %v12281_v46, %v2592_v53  ;;  %v3427_v39 = vsel %vm3425_vm4, %v3426_v11, %v12353_v31  ;;  %v3025_v37 = vshll.u32 %v12255_v6, %v12346_v32 }
 0x410   : > { %v3338_v43 = vshrl.u32 %v3320_v49, %v3336_v16  ;;  %v3341_v57 = vadd.s32 127, %v3340_v62  ;;  %v12392_v22 = vshrl.u32 %v3484_v2, 5  ;;  %v3337_v44 = vshll.u32 %v12331_v13, %v3335_v38 }
 0x411   : > { %v3428_v30 = vadd.s32 %v3427_v39, %v3423_v8  ;;  %v3486_v61 = vand.u32 31, %v3484_v2  ;;  %v12397_v9 = vshrl.u32 %v3008_v26, %v3024_v56  ;;  %v3030_v27 = vshll.u32 %v12382_v10, 23 }
 0x412   : > { %v3342_v0 = vshll.u32 %v3341_v57, 23  ;;  %v12400_v55 = vshll.u32 %v3480_v5, 8  ;;  %v3339_v3 = vor.u32 %v3338_v43, %v3337_v44  ;;  %vm3504_vm2 = vcmp.lt.s32.totalorder %v12392_v22, 1 }
 0x413   : > { %v3429_v28 = vadd.s32 536870912, %v3428_v30  ;;  %v3487_v4 = vsub.s32 32, %v3486_v61  ;;  %v3489_v49 = vshll.u32 %v17008_v60, %v3486_v61  ;;  %v3492_v21 = vshll.u32 %v17011_v17, %v3486_v61 }
 0x414   : > { %v3343_v53 = vor.u32 4788187, %v3342_v0  ;;  %v3495_v38 = vshll.u32 %v17002_v63, %v3486_v61  ;;  %v3498_v10 = vshll.u32 %v17133_v40, %v3486_v61  ;;  %v3501_v62 = vshll.u32 %v17004_v58, %v3486_v61 }
 0x415   : > { %v12406_v13 = vshrl.u32 %v3429_v28, 30  ;;  %v3490_v26 = vshrl.u32 %v17011_v17, %v3487_v4  ;;  %v3493_v56 = vshrl.u32 %v17002_v63, %v3487_v4  ;;  %v3496_v11 = vshrl.u32 %v17133_v40, %v3487_v4 }
 0x416   : > { %v3499_v16 = vshrl.u32 %v17004_v58, %v3487_v4  ;;  %v3502_v43 = vshrl.u32 %v17134_v23, %v3487_v4  ;;  %v3344_v57 = vand.u32 2147483647, %v3343_v53  ;;  %vm3505_vm3 = vcmp.lt.s32.totalorder %v12392_v22, 2 }
 0x417   : > { %17168 = vst [vmem:[#allocation17_spill] sm:$0xff] %v12406_v13  ;;  %v3431_v5 = vshll.u32 %v12406_v13, 30  ;;  %v3491_v8 = vor.u32 %v3490_v26, %v3489_v49  ;;  %v3494_v2 = vor.u32 %v3493_v56, %v3492_v21  ;;  %v3497_v39 = vor.u32 %v3496_v11, %v3495_v38 }
 0x418   : > { %v3500_v44 = vor.u32 %v3499_v16, %v3498_v10  ;;  %v3346_v0 = vcvt.s32.f32 %v3339_v3  ;;  %v3503_v31 = vor.u32 %v3502_v43, %v3501_v62  ;;  %vm3507_vm10 = vcmp.lt.s32.totalorder %v12392_v22, 4  ;;  %v12435_v16 = vpop.permute.xlu1 %2621 }
 0x419   : > { %v12418_v28 = vsub.s32 %v3428_v30, %v3431_v5  ;;  %vm3506_vm11 = vcmp.lt.s32.totalorder %v12392_v22, 3  ;;  %v3509_v61 = vsel %vm3507_vm10, %v3497_v39, 2102212464  ;;  %v3512_v49 = vsel %vm3504_vm2, %v3491_v8, %v3494_v2 }
 0x41a   : > { %v3513_v21 = vsel %vm3507_vm10, %v3500_v44, 920167782  ;;  %vm3162_vm1 = vcmp.lt.s32.totalorder %v11776_v45, 0  ;;  %v3488_v26 = vshrl.u32 %v17008_v60, %v3487_v4  ;;  %v3516_v3 = vsel %vm3504_vm2, %v3494_v2, %v3497_v39 }
 0x41b   : > { %v3434_v53 = vsub.s32 0, %v12418_v28  ;;  %v3514_v30 = vsel %vm3506_vm11, %v3497_v39, %v3513_v21  ;;  %vm3266_vm14 = vcmp.lt.s32.totalorder %v12086_v33, 0  ;;  %v3347_v56 = vmul.f32 %v3346_v0, %v3344_v57 }
 0x41c   : > { %v3515_v38 = vsel %vm3505_vm3, %v3512_v49, %v3514_v30  ;;  %v3517_v11 = vsel %vm3507_vm10, %v3503_v31, 1326507024  ;;  %v3579_v10 = vand.u32 2139095040, %v12389_v59  ;;  %v3508_v4 = vsel %vm3504_vm2, %v3488_v26, %v3491_v8 }
 0x41d   : > { %v8942_v62 = vmin.u32 %v3434_v53, %v12418_v28  ;;  %v3510_v5 = vsel %vm3506_vm11, %v3494_v2, %v3509_v61  ;;  %v3518_v43 = vsel %vm3506_vm11, %v3500_v44, %v3517_v11  ;;  %v12452_v0 = vadd.f32 %v12435_v16, %v12378_v19 }
 0x41e   : > { %v3519_v57 = vsel %vm3505_vm3, %v3516_v3, %v3518_v43  ;;  %v12447_v31 = vmul.u32.u64.low %v12400_v55, %v3515_v38  ;;  %v12448_v39 = vmul.u32.u64.high %v12400_v55, %v3515_v38, %v12447_v31  ;;  %v3031_v49 = vor.u32 4788187, %v3030_v27 }
 0x41f   : > { %17169 = vst [vmem:[#allocation36_spill] sm:$0xff] %v12452_v0  ;;  %v17170_v8 = vand.u32 2147483647, %v12086_v33  ;;  %v17171_v21 = vmov 0  ;;  %v3436_v2 = vclz %v8942_v62  ;;  %9664 = vsinq.f32 %v12308_v47 }
 0x420   : > { %v12461_v44 = vmul.u32.u64.low %v12400_v55, %v3519_v57  ;;  %v12462_v61 = vmul.u32.u64.high %v12400_v55, %v3519_v57, %v12461_v44  ;;  %v3244_v53 = vxor.u32 2147483648, %v12367_v1  ;;  %v3511_v19 = vsel %vm3505_vm3, %v3508_v4, %v3510_v5 }
 0x421   : > { %vm12456_vm5 = vcmp.le.f32.partialorder %v17170_v8, 0.7853982  ;;  %v3580_v26 = vshrl.u32 %v3579_v10, 23  ;;  %v3027_v27 = vor.u32 %v12397_v9, %v3025_v37  ;;  %v3348_v30 = vxor.u32 2147483648, %v3347_v56 }
 0x422   : > { %v17172_v21 = vsel %vm12456_vm5, 4294967295, %v17171_v21  ;;  %v8943_v3 = vadd.s32 4294967294, %v3436_v2  ;;  %v17174_v38 = vand.u32 2147483647, %v12389_v59  ;;  %v3530_v62 = vadd.s32 1, %v12448_v39 }
 0x423   : > { %17173 = vst [vmem:[#allocation35_spill] sm:$0xff] %v17172_v21  ;;  %v8949_v43 = vadd.s32 4294967169, %v3580_v26  ;;  %v3891_v47 = vand.u32 2139095040, %v12452_v0  ;;  %v2593_v22 = vmul.f32 %v12234_v12, %v11987_v41  ;;  %v3032_v4 = vand.u32 2147483647, %v3031_v49 }
 0x424   : > { %v3583_v11 = vand.u32 8388607, %v17174_v38  ;;  %vm8944_vm7 = vcmp.lt.s32.totalorder %v8943_v3, 0  ;;  %v3527_v10 = vmul.u32 %v12400_v55, %v3511_v19  ;;  %vm3529_vm6 = vc.u32 %v12462_v61, %v12447_v31 }
 0x425   : > { %v12483_v6 = vsel %vm3162_vm1, %v3244_v53, %v12367_v1  ;;  %v3531_v32 = vsel %vm3529_vm6, %v3530_v62, %v12448_v39  ;;  %v3586_v37 = vadd.s32 1, %v8949_v43  ;;  %v12488_v9 = vmul.f32 %v12365_v14, %v12068_v35 }
 0x426   : > { %17175 = vst [vmem:[#allocation32_spill] sm:$0xff] %v12483_v6  ;;  %v3034_v5 = vcvt.s32.f32 %v3027_v27  ;;  %v3349_v41 = vsel %vm3266_vm14, %v3348_v30, %v3347_v56  ;;  %v3532_v57 = vadd.s32 %v3531_v32, %v3527_v10  ;;  %v3584_v55 = vor.u32 8388608, %v3583_v11 }
 0x427   : > { %v12493_v8 = vsel %vm8944_vm7, 0, %v8943_v3  ;;  %vm3587_vm13 = vcmp.gt.s32.totalorder %v3586_v37, 0  ;;  %v3892_v1 = vshrl.u32 %v3891_v47, 23  ;;  %v12498_v53 = vadd.f32 %v12281_v46, %v2593_v22 }
 0x428   : > { %v12495_v2 = vmul.f32 %v3034_v5, %v3032_v4  ;;  %v3533_v39 = vadd.s32 536870912, %v3532_v57  ;;  %v3588_v44 = vsel %vm3587_vm13, %v3586_v37, 0  ;;  %v12503_v35 = vsel %vm12456_vm5, %v12086_v33, %v3349_v41 }
 0x429   : > { %v3424_v56 = vadd.s32 %v12352_v48, %v12363_v52  ;;  %v3590_v19 = vand.u32 31, %v3588_v44  ;;  %v16847_v26 = vand.u32 2147483647, %v12452_v0  ;;  %v3440_v27 = vsub.s32 32, %v12493_v8  ;;  %v12516_v11 = vpop.eup %9664 }
 0x42a   : > { %v12510_v30 = vadd.s32 %v12447_v31, %v12462_v61  ;;  %v12512_v3 = vshrl.u32 %v3533_v39, 30  ;;  %v12514_v38 = vshll.u32 %v3584_v55, 8  ;;  %17176 = vst [vmem:[#allocation13_spill] sm:$0xff] %v12516_v11  ;;  %v3441_v62 = vshll.u32 %v12418_v28, %v12493_v8 }
 0x42b   : > { %v3444_v43 = vsub.s32 4294967266, %v12493_v8  ;;  %v3591_v48 = vsub.s32 32, %v3590_v19  ;;  %v8961_v52 = vadd.s32 4294967169, %v3892_v1  ;;  %v3589_v22 = vshrl.u32 %v3588_v44, 5 }
 0x42c   : > { %v3535_v47 = vshll.u32 %v12512_v3, 30  ;;  %v3593_v4 = vshll.u32 %v17008_v60, %v3590_v19  ;;  %v3596_v31 = vshll.u32 %v17011_v17, %v3590_v19  ;;  %v3599_v32 = vshll.u32 %v17002_v63, %v3590_v19 }
 0x42d   : > { %v3594_v61 = vshrl.u32 %v17011_v17, %v3591_v48  ;;  %v3597_v10 = vshrl.u32 %v17002_v63, %v3591_v48  ;;  %v3600_v37 = vshrl.u32 %v17133_v40, %v3591_v48  ;;  %v3442_v28 = vshrl.u32 %v3424_v56, %v3440_v27 }
 0x42e   : > { %v12528_v5 = vsub.s32 %v3532_v57, %v3535_v47  ;;  %v3602_v41 = vshll.u32 %v17133_v40, %v3590_v19  ;;  %v3895_v55 = vand.u32 8388607, %v16847_v26  ;;  %v3603_v44 = vshrl.u32 %v17004_v58, %v3591_v48 }
 0x42f   : > { %v3595_v8 = vor.u32 %v3594_v61, %v3593_v4  ;;  %v3598_v1 = vor.u32 %v3597_v10, %v3596_v31  ;;  %v3601_v39 = vor.u32 %v3600_v37, %v3599_v32  ;;  %v3445_v49 = vadd.s32 127, %v3444_v43 }
 0x430   : > { %v3538_v7 = vsub.s32 0, %v12528_v5  ;;  %v3605_v21 = vshll.u32 %v17004_v58, %v3590_v19  ;;  %v3606_v11 = vshrl.u32 %v17134_v23, %v3591_v48  ;;  %v3592_v57 = vshrl.u32 %v17008_v60, %v3591_v48 }
 0x431   : > { %v3604_v56 = vor.u32 %v3603_v44, %v3602_v41  ;;  %vm3608_vm4 = vcmp.lt.s32.totalorder %v3589_v22, 1  ;;  %v3898_v27 = vadd.s32 1, %v8961_v52  ;;  %vm3609_vm2 = vcmp.lt.s32.totalorder %v3589_v22, 2 }
 0x432   : > { %v8946_v47 = vmin.u32 %v3538_v7, %v12528_v5  ;;  %v3607_v26 = vor.u32 %v3606_v11, %v3605_v21  ;;  %vm3611_vm3 = vcmp.lt.s32.totalorder %v3589_v22, 4  ;;  %vm3610_vm10 = vcmp.lt.s32.totalorder %v3589_v22, 3 }
 0x433   : > { %v3613_v4 = vsel %vm3611_vm3, %v3601_v39, 2102212464  ;;  %v3616_v43 = vsel %vm3608_vm4, %v3595_v8, %v3598_v1  ;;  %v3617_v31 = vsel %vm3611_vm3, %v3604_v56, 920167782  ;;  %v3612_v19 = vsel %vm3608_vm4, %v3592_v57, %v3595_v8 }
 0x434   : > { %v3540_v61 = vclz %v8946_v47  ;;  %v3614_v10 = vsel %vm3610_vm10, %v3598_v1, %v3613_v4  ;;  %v3618_v32 = vsel %vm3610_vm10, %v3601_v39, %v3617_v31  ;;  %v3446_v37 = vshll.u32 %v3445_v49, 23 }
 0x435   : > { %v3619_v48 = vsel %vm3609_vm2, %v3616_v43, %v3618_v32  ;;  %v3620_v52 = vsel %vm3608_vm4, %v3598_v1, %v3601_v39  ;;  %v3621_v41 = vsel %vm3611_vm3, %v3607_v26, 1326507024  ;;  %v3615_v13 = vsel %vm3609_vm2, %v3612_v19, %v3614_v10 }
 0x436   : > { %v8947_v7 = vadd.s32 4294967294, %v3540_v61  ;;  %v3622_v21 = vsel %vm3610_vm10, %v3604_v56, %v3621_v41  ;;  %v12544_v11 = vmul.u32.u64.low %v12514_v38, %v3619_v48  ;;  %v12545_v44 = vmul.u32.u64.high %v12514_v38, %v3619_v48, %v12544_v11 }
 0x437   : > { %v3623_v47 = vsel %vm3609_vm2, %v3620_v52, %v3622_v21  ;;  %v3896_v8 = vor.u32 8388608, %v3895_v55  ;;  %vm3899_vm11 = vcmp.gt.s32.totalorder %v3898_v27, 0  ;;  %v12554_v26 = vor.u32 %v3442_v28, %v3441_v62 }
 0x438   : > { %vm8948_vm7 = vcmp.lt.s32.totalorder %v8947_v7, 0  ;;  %v12551_v49 = vmul.u32.u64.low %v12514_v38, %v3623_v47  ;;  %v12552_v57 = vmul.u32.u64.high %v12514_v38, %v3623_v47, %v12551_v49  ;;  %v3900_v1 = vsel %vm3899_vm11, %v3898_v27, 0 }
 0x439   : > { %v3543_v39 = vsel %vm8948_vm7, 0, %v8947_v7  ;;  %v3902_v56 = vand.u32 31, %v3900_v1  ;;  %v3683_v4 = vand.u32 2139095040, %v12498_v53  ;;  %v12557_v43 = vor.u32 4788187, %v3446_v37 }
 0x43a   : > { %v3544_v31 = vsub.s32 32, %v3543_v39  ;;  %v3548_v61 = vsub.s32 4294967266, %v3543_v39  ;;  %v3634_v22 = vadd.s32 1, %v12545_v44  ;;  %v3631_v55 = vmul.u32 %v12514_v38, %v3615_v13 }
 0x43b   : > { %v12561_v19 = vshrl.u32 %v3900_v1, 5  ;;  %v3903_v10 = vsub.s32 32, %v3902_v56  ;;  %v12563_v32 = vshll.u32 %v3896_v8, 8  ;;  %vm3633_vm6 = vc.u32 %v12552_v57, %v12544_v11 }
 0x43c   : > { %v3549_v27 = vadd.s32 127, %v3548_v61  ;;  %v3905_v62 = vshll.u32 %v17008_v60, %v3902_v56  ;;  %v3908_v28 = vshll.u32 %v17011_v17, %v3902_v56  ;;  %v3635_v37 = vsel %vm3633_vm6, %v3634_v22, %v12545_v44 }
 0x43d   : > { %v3906_v48 = vshrl.u32 %v17011_v17, %v3903_v10  ;;  %v3909_v52 = vshrl.u32 %v17002_v63, %v3903_v10  ;;  %v3911_v13 = vshll.u32 %v17002_v63, %v3902_v56  ;;  %v3546_v38 = vshrl.u32 %v12510_v30, %v3544_v31 }
 0x43e   : > { %v3550_v41 = vshll.u32 %v3549_v27, 23  ;;  %v3636_v7 = vadd.s32 %v3635_v37, %v3631_v55  ;;  %v3912_v21 = vshrl.u32 %v17133_v40, %v3903_v10  ;;  %v3914_v49 = vshll.u32 %v17133_v40, %v3902_v56 }
 0x43f   : > { %v3907_v47 = vor.u32 %v3906_v48, %v3905_v62  ;;  %v3910_v8 = vor.u32 %v3909_v52, %v3908_v28  ;;  %v3915_v1 = vshrl.u32 %v17004_v58, %v3903_v10  ;;  %v3545_v44 = vshll.u32 %v12528_v5, %v3543_v39 }
 0x440   : > { %v3551_v61 = vor.u32 4788187, %v3550_v41  ;;  %v3637_v22 = vadd.s32 536870912, %v3636_v7  ;;  %v3913_v29 = vor.u32 %v3912_v21, %v3911_v13  ;;  %v3917_v54 = vshll.u32 %v17004_v58, %v3902_v56 }
 0x441   : > { %v3916_v6 = vor.u32 %v3915_v1, %v3914_v49  ;;  %v3918_v30 = vshrl.u32 %v17134_v23, %v3903_v10  ;;  %v3684_v31 = vshrl.u32 %v3683_v4, 23  ;;  %v3547_v55 = vor.u32 %v3546_v38, %v3545_v44 }
 0x442   : > { %v12580_v27 = vshrl.u32 %v3637_v22, 30  ;;  %v3904_v62 = vshrl.u32 %v17008_v60, %v3903_v10  ;;  %vm3920_vm13 = vcmp.lt.s32.totalorder %v12561_v19, 1  ;;  %v3552_v28 = vand.u32 2147483647, %v3551_v61 }
 0x443   : > { %v3919_v37 = vor.u32 %v3918_v30, %v3917_v54  ;;  %vm3923_vm4 = vcmp.lt.s32.totalorder %v12561_v19, 4  ;;  %v3928_v5 = vsel %vm3920_vm13, %v3907_v47, %v3910_v8  ;;  %vm3922_vm2 = vcmp.lt.s32.totalorder %v12561_v19, 3 }
 0x444   : > { %17177 = vst [vmem:[#allocation33_spill] sm:$0xff] %v12580_v27  ;;  %v3639_v39 = vshll.u32 %v12580_v27, 30  ;;  %v3925_v56 = vsel %vm3923_vm4, %v3913_v29, 2102212464  ;;  %v3929_v4 = vsel %vm3923_vm4, %v3916_v6, 920167782  ;;  %v3932_v10 = vsel %vm3920_vm13, %v3910_v8, %v3913_v29 }
 0x445   : > { %vm3921_vm3 = vcmp.lt.s32.totalorder %v12561_v19, 2  ;;  %v3930_v48 = vsel %vm3922_vm2, %v3913_v29, %v3929_v4  ;;  %v3933_v52 = vsel %vm3923_vm4, %v3919_v37, 1326507024  ;;  %vm2954_vm10 = vcmp.lt.s32.totalorder %v12066_v25, 0 }
 0x446   : > { %v3554_v54 = vcvt.s32.f32 %v3547_v55  ;;  %v12593_v13 = vsub.s32 %v3636_v7, %v3639_v39  ;;  %v3924_v38 = vsel %vm3920_vm13, %v3904_v62, %v3907_v47  ;;  %v3931_v41 = vsel %vm3921_vm3, %v3928_v5, %v3930_v48 }
 0x447   : > { %v3926_v21 = vsel %vm3922_vm2, %v3910_v8, %v3925_v56  ;;  %v3934_v49 = vsel %vm3922_vm2, %v3916_v6, %v3933_v52  ;;  %v12600_v1 = vmul.u32.u64.low %v12563_v32, %v3931_v41  ;;  %v12601_v44 = vmul.u32.u64.high %v12563_v32, %v3931_v41, %v12600_v1 }
 0x448   : > { %vm3474_vm11 = vcmp.lt.s32.totalorder %v12296_v51, 0  ;;  %v3555_v29 = vmul.f32 %v3554_v54, %v3552_v28  ;;  %v3642_v61 = vsub.s32 0, %v12593_v13  ;;  %v3935_v7 = vsel %vm3921_vm3, %v3932_v10, %v3934_v49 }
 0x449   : > { %v8953_v22 = vadd.s32 4294967169, %v3684_v31  ;;  %v17178_v47 = vsub.s32 4, %v12318_v50  ;;  %v12616_v8 = vmul.u32.u64.low %v12563_v32, %v3935_v7  ;;  %v12617_v30 = vmul.u32.u64.high %v12563_v32, %v3935_v7, %v12616_v8 }
 0x44a   : > { %v16853_v55 = vand.u32 2147483647, %v12498_v53  ;;  %v8950_v62 = vmin.u32 %v3642_v61, %v12593_v13  ;;  %v3927_v28 = vsel %vm3921_vm3, %v3924_v38, %v3926_v21  ;;  %v12625_v31 = vadd.f32 %v12435_v16, %v12488_v9 }
 0x44b   : > { %v12613_v6 = vsel %vm3266_vm14, %v17178_v47, %v12318_v50  ;;  %v3690_v37 = vadd.s32 1, %v8953_v22  ;;  %v3036_v5 = vxor.u32 2147483648, %v12495_v2  ;;  %9666 = vcosq.f32 %v12503_v35 }
 0x44c   : > { %v3450_v50 = vcvt.s32.f32 %v12554_v26  ;;  %v3946_v39 = vadd.s32 1, %v12601_v44  ;;  %v3448_v56 = vand.u32 2147483647, %v12557_v43  ;;  %v3556_v4 = vxor.u32 2147483648, %v3555_v29 }
 0x44d   : > { %v3644_v48 = vclz %v8950_v62  ;;  %vm3691_vm14 = vcmp.gt.s32.totalorder %v3690_v37, 0  ;;  %v3943_v19 = vmul.u32 %v12563_v32, %v3927_v28  ;;  %vm3945_vm7 = vc.u32 %v12617_v30, %v12600_v1 }
 0x44e   : > { %v3687_v9 = vand.u32 8388607, %v16853_v55  ;;  %v3692_v10 = vsel %vm3691_vm14, %v3690_v37, 0  ;;  %v3947_v54 = vsel %vm3945_vm7, %v3946_v39, %v12601_v44  ;;  %v16852_v38 = vand.u32 2147483647, %v12625_v31 }
 0x44f   : > { %v8951_v52 = vadd.s32 4294967294, %v3644_v48  ;;  %v3694_v26 = vand.u32 31, %v3692_v10  ;;  %v12642_v43 = vsel %vm2954_vm10, %v3036_v5, %v12495_v2  ;;  %9668 = vsinq.f32 %v12503_v35 }
 0x450   : > { %v3948_v41 = vadd.s32 %v3947_v54, %v3943_v19  ;;  %v12646_v21 = vmul.f32 %v3450_v50, %v3448_v56  ;;  %v3632_v49 = vadd.s32 %v12544_v11, %v12552_v57  ;;  %v12652_v61 = vsel %vm3474_vm11, %v3556_v4, %v3555_v29 }
 0x451   : > { %vm8952_vm6 = vcmp.lt.s32.totalorder %v8951_v52, 0  ;;  %v3695_v44 = vsub.s32 32, %v3694_v26  ;;  %v3688_v22 = vor.u32 8388608, %v3687_v9  ;;  %v3697_v47 = vshll.u32 %v17008_v60, %v3694_v26 }
 0x452   : > { %v12654_v7 = vsel %vm8952_vm6, 0, %v8951_v52  ;;  %v3949_v2 = vadd.s32 536870912, %v3948_v41  ;;  %v3995_v8 = vand.u32 2139095040, %v12625_v31  ;;  %v12661_v62 = vand.u32 8388607, %v16852_v38 }
 0x453   : > { %v3652_v35 = vsub.s32 4294967266, %v12654_v7  ;;  %v3698_v57 = vshrl.u32 %v17011_v17, %v3695_v44  ;;  %v3701_v29 = vshrl.u32 %v17002_v63, %v3695_v44  ;;  %v3704_v28 = vshrl.u32 %v17133_v40, %v3695_v44 }
 0x454   : > { %v12663_v11 = vshrl.u32 %v3949_v2, 30  ;;  %v3700_v5 = vshll.u32 %v17011_v17, %v3694_v26  ;;  %v3706_v50 = vshll.u32 %v17133_v40, %v3694_v26  ;;  %v3707_v39 = vshrl.u32 %v17004_v58, %v3695_v44 }
 0x455   : > { %v3653_v37 = vadd.s32 127, %v3652_v35  ;;  %v12671_v56 = vpop.eup %9666  ;;  %v3693_v48 = vshrl.u32 %v3692_v10, 5  ;;  %v3703_v19 = vshll.u32 %v17002_v63, %v3694_v26  ;;  %v12675_v9 = vshll.u32 %v3688_v22, 8 }
 0x456   : > { %17179 = vst [vmem:[#allocation34_spill] sm:$0xff] %v12671_v56  ;;  %v3951_v4 = vshll.u32 %v12663_v11, 30  ;;  %v3699_v52 = vor.u32 %v3698_v57, %v3697_v47  ;;  %v3702_v54 = vor.u32 %v3701_v29, %v3700_v5  ;;  %v3708_v2 = vor.u32 %v3707_v39, %v3706_v50 }
 0x457   : > { %v3996_v38 = vshrl.u32 %v3995_v8, 23  ;;  %v17180_v35 = vand.u32 2147483647, %v12296_v51  ;;  %v3705_v27 = vor.u32 %v3704_v28, %v3703_v19  ;;  %v3709_v56 = vshll.u32 %v17004_v58, %v3694_v26 }
 0x458   : > { %v12683_v32 = vsub.s32 %v3948_v41, %v3951_v4  ;;  %v3710_v10 = vshrl.u32 %v17134_v23, %v3695_v44  ;;  %v3648_v22 = vsub.s32 32, %v12654_v7  ;;  %v3649_v47 = vshll.u32 %v12593_v13, %v12654_v7 }
 0x459   : > { %vm12679_vm13 = vcmp.le.f32.partialorder %v17180_v35, 0.7853982  ;;  %v3654_v57 = vshll.u32 %v3653_v37, 23  ;;  %v2594_v8 = vmul.f32 %v12234_v12, %v12153_v18  ;;  %v12692_v29 = vpop.eup %9668  ;;  %vm3712_vm4 = vcmp.lt.s32.totalorder %v3693_v48, 1 }
 0x45a   : > { %17183 = vst [vmem:[#allocation39_spill] sm:$0xff] %v12692_v29  ;;  %v3954_v5 = vsub.s32 0, %v12683_v32  ;;  %v3711_v41 = vor.u32 %v3710_v10, %v3709_v56  ;;  %vm3715_vm2 = vcmp.lt.s32.totalorder %v3693_v48, 4  ;;  %vm3713_vm3 = vcmp.lt.s32.totalorder %v3693_v48, 2 }
 0x45b   : > { %vm3714_vm14 = vcmp.lt.s32.totalorder %v3693_v48, 3  ;;  %v3720_v26 = vsel %vm3712_vm4, %v3699_v52, %v3702_v54  ;;  %v3721_v28 = vsel %vm3715_vm2, %v3708_v2, 920167782  ;;  %v3717_v39 = vsel %vm3715_vm2, %v3705_v27, 2102212464 }
 0x45c   : > { %v8962_v50 = vmin.u32 %v3954_v5, %v12683_v32  ;;  %v3722_v13 = vsel %vm3714_vm14, %v3705_v27, %v3721_v28  ;;  %v3724_v7 = vsel %vm3712_vm4, %v3702_v54, %v3705_v27  ;;  %v3650_v37 = vshrl.u32 %v3632_v49, %v3648_v22 }
 0x45d   : > { %v3696_v18 = vshrl.u32 %v17008_v60, %v3695_v44  ;;  %v3723_v12 = vsel %vm3713_vm3, %v3720_v26, %v3722_v13  ;;  %v3725_v4 = vsel %vm3715_vm2, %v3711_v41, 1326507024  ;;  %v3718_v5 = vsel %vm3714_vm14, %v3702_v54, %v3717_v39 }
 0x45e   : > { %v3956_v56 = vclz %v8962_v50  ;;  %v3726_v19 = vsel %vm3714_vm14, %v3708_v2, %v3725_v4  ;;  %v12701_v35 = vmul.u32.u64.low %v12675_v9, %v3723_v12  ;;  %v12702_v10 = vmul.u32.u64.high %v12675_v9, %v3723_v12, %v12701_v35 }
 0x45f   : > { %v3716_v29 = vsel %vm3712_vm4, %v3696_v18, %v3699_v52  ;;  %v3727_v28 = vsel %vm3713_vm3, %v3724_v7, %v3726_v19  ;;  %v8965_v33 = vadd.s32 4294967169, %v3996_v38  ;;  %v3655_v27 = vor.u32 4788187, %v3654_v57 }
 0x460   : > { %v8963_v49 = vadd.s32 4294967294, %v3956_v56  ;;  %v12708_v44 = vmul.u32.u64.low %v12675_v9, %v3727_v28  ;;  %v12709_v22 = vmul.u32.u64.high %v12675_v9, %v3727_v28, %v12708_v44  ;;  %v3452_v41 = vxor.u32 2147483648, %v12646_v21 }
 0x461   : > { %v17184_v2 = vsub.s32 4, %v12512_v3  ;;  %v12723_v38 = vsel %vm12679_vm13, %v12296_v51, %v12652_v61  ;;  %v4002_v52 = vadd.s32 1, %v8965_v33  ;;  %v3651_v54 = vor.u32 %v3650_v37, %v3649_v47 }
 0x462   : > { %vm8964_vm7 = vcmp.lt.s32.totalorder %v8963_v49, 0  ;;  %v3719_v57 = vsel %vm3713_vm3, %v3716_v29, %v3718_v5  ;;  %v3738_v50 = vadd.s32 1, %v12702_v10  ;;  %v3944_v39 = vadd.s32 %v12600_v1, %v12617_v30 }
 0x463   : > { %v12717_v26 = vsel %vm3474_vm11, %v17184_v2, %v12512_v3  ;;  %v3959_v13 = vsel %vm8964_vm7, 0, %v8963_v49  ;;  %v4000_v3 = vor.u32 8388608, %v12661_v62  ;;  %vm4003_vm11 = vcmp.gt.s32.totalorder %v4002_v52, 0 }
 0x464   : > { %v3656_v7 = vand.u32 2147483647, %v3655_v27  ;;  %v3960_v18 = vsub.s32 32, %v3959_v13  ;;  %v3964_v12 = vsub.s32 4294967266, %v3959_v13  ;;  %v12731_v61 = vadd.f32 %v12281_v46, %v2594_v8 }
 0x465   : > { %9670 = vcosq.f32 %v12723_v38  ;;  %v3735_v33 = vmul.u32 %v12675_v9, %v3719_v57  ;;  %vm3737_vm6 = vc.u32 %v12709_v22, %v12701_v35  ;;  %v4004_v48 = vsel %vm4003_vm11, %v4002_v52, 0 }
 0x466   : > { %v3658_v47 = vcvt.s32.f32 %v3651_v54  ;;  %v3962_v1 = vshrl.u32 %v3944_v39, %v3960_v18  ;;  %v3965_v30 = vadd.s32 127, %v3964_v12  ;;  %v3739_v62 = vsel %vm3737_vm6, %v3738_v50, %v12702_v10 }
 0x467   : > { %v3961_v29 = vshll.u32 %v12683_v32, %v3959_v13  ;;  %v3740_v4 = vadd.s32 %v3739_v62, %v3735_v33  ;;  %v4006_v46 = vand.u32 31, %v4004_v48  ;;  %v12742_v19 = vshll.u32 %v4000_v3, 8 }
 0x468   : > { %v12740_v8 = vmul.f32 %v3658_v47, %v3656_v7  ;;  %v3966_v56 = vshll.u32 %v3965_v30, 23  ;;  %v16861_v9 = vand.u32 2147483647, %v12731_v61  ;;  %v3787_v49 = vand.u32 2139095040, %v12731_v61 }
 0x469   : > { %v3963_v5 = vor.u32 %v3962_v1, %v3961_v29  ;;  %v3741_v28 = vadd.s32 536870912, %v3740_v4  ;;  %v4007_v27 = vsub.s32 32, %v4006_v46  ;;  %v4005_v10 = vshrl.u32 %v4004_v48, 5 }
 0x46a   : > { %v3967_v44 = vor.u32 4788187, %v3966_v56  ;;  %v4009_v32 = vshll.u32 %v17008_v60, %v4006_v46  ;;  %v4012_v2 = vshll.u32 %v17011_v17, %v4006_v46  ;;  %v4015_v50 = vshll.u32 %v17002_v63, %v4006_v46 }
 0x46b   : > { %v12748_v52 = vshrl.u32 %v3741_v28, 30  ;;  %v4010_v54 = vshrl.u32 %v17011_v17, %v4007_v27  ;;  %v4013_v57 = vshrl.u32 %v17002_v63, %v4007_v27  ;;  %v4016_v13 = vshrl.u32 %v17133_v40, %v4007_v27 }
 0x46c   : > { %v3968_v39 = vand.u32 2147483647, %v3967_v44  ;;  %v4018_v3 = vshll.u32 %v17133_v40, %v4006_v46  ;;  %v4019_v7 = vshrl.u32 %v17004_v58, %v4007_v27  ;;  %v3970_v18 = vcvt.s32.f32 %v3963_v5 }
 0x46d   : > { %v3743_v12 = vshll.u32 %v12748_v52, 30  ;;  %v4011_v33 = vor.u32 %v4010_v54, %v4009_v32  ;;  %v4014_v48 = vor.u32 %v4013_v57, %v4012_v2  ;;  %vm16867_vm4 = vcmp.lt.s32.totalorder %v12149_v15, 0 }
 0x46e   : > { %vm3890_vm2 = vcmp.lt.s32.totalorder %v12452_v0, 0  ;;  %v4017_v47 = vor.u32 %v4016_v13, %v4015_v50  ;;  %v4020_v1 = vor.u32 %v4019_v7, %v4018_v3  ;;  %v4021_v30 = vshll.u32 %v17004_v58, %v4006_v46 }
 0x46f   : > { %v4022_v62 = vshrl.u32 %v17134_v23, %v4007_v27  ;;  %v12761_v29 = vpop.eup %9670  ;;  %v12763_v56 = vsub.s32 %v3740_v4, %v3743_v12  ;;  %vm4024_vm3 = vcmp.lt.s32.totalorder %v4005_v10, 1  ;;  %vm4027_vm14 = vcmp.lt.s32.totalorder %v4005_v10, 4 }
 0x470   : > { %v3788_v5 = vshrl.u32 %v3787_v49, 23  ;;  %v3971_v28 = vmul.f32 %v3970_v18, %v3968_v39  ;;  %v4008_v44 = vshrl.u32 %v17008_v60, %v4007_v27  ;;  %v4029_v2 = vsel %vm4027_vm14, %v4017_v47, 2102212464 }
 0x471   : > { %v4023_v32 = vor.u32 %v4022_v62, %v4021_v30  ;;  %v3746_v54 = vsub.s32 0, %v12763_v56  ;;  %vm4026_vm7 = vcmp.lt.s32.totalorder %v4005_v10, 3  ;;  %v4032_v57 = vsel %vm4024_vm3, %v4011_v33, %v4014_v48 }
 0x472   : > { %v4033_v46 = vsel %vm4027_vm14, %v4020_v1, 920167782  ;;  %v17185_v50 = vand.u32 2147483647, %v12452_v0  ;;  %vm4025_vm6 = vcmp.lt.s32.totalorder %v4005_v10, 2  ;;  %v4028_v49 = vsel %vm4024_vm3, %v4008_v44, %v4011_v33 }
 0x473   : > { %v4034_v39 = vsel %vm4026_vm7, %v4017_v47, %v4033_v46  ;;  %v4036_v13 = vsel %vm4024_vm3, %v4014_v48, %v4017_v47  ;;  %vm16866_vm9 = vcmp.lt.s32.totalorder %v12389_v59, 0  ;;  %v8954_v27 = vmin.u32 %v3746_v54, %v12763_v56 }
 0x474   : > { %vm12771_vm11 = vcmp.le.f32.partialorder %v17185_v50, 0.7853982  ;;  %v4030_v3 = vsel %vm4026_vm7, %v4014_v48, %v4029_v2  ;;  %v4035_v7 = vsel %vm4025_vm6, %v4032_v57, %v4034_v39  ;;  %v4037_v18 = vsel %vm4027_vm14, %v4023_v32, 1326507024 }
 0x475   : > { %v3972_v12 = vxor.u32 2147483648, %v3971_v28  ;;  %v4038_v30 = vsel %vm4026_vm7, %v4020_v1, %v4037_v18  ;;  %v12780_v62 = vmul.u32.u64.low %v12742_v19, %v4035_v7  ;;  %v12781_v50 = vmul.u32.u64.high %v12742_v19, %v4035_v7, %v12780_v62 }
 0x476   : > { %v3748_v37 = vclz %v8954_v27  ;;  %v4039_v33 = vsel %vm4025_vm6, %v4036_v13, %v4038_v30  ;;  %v3791_v47 = vand.u32 8388607, %v16861_v9  ;;  %v2597_v48 = vmul.f32 %v12365_v14, %v12261_v34 }
 0x477   : > { %v4031_v44 = vsel %vm4025_vm6, %v4028_v49, %v4030_v3  ;;  %v12791_v32 = vmul.u32.u64.low %v12742_v19, %v4039_v33  ;;  %v12792_v2 = vmul.u32.u64.high %v12742_v19, %v4039_v33, %v12791_v32  ;;  %v8957_v1 = vadd.s32 4294967169, %v3788_v5 }
 0x478   : > { %v12799_v54 = vsel %vm16867_vm4, %v3452_v41, %v12646_v21  ;;  %9672 = vsinq.f32 %v12723_v38  ;;  %v17188_v57 = vsub.s32 4, %v12663_v11  ;;  %v8955_v10 = vadd.s32 4294967294, %v3748_v37 }
 0x479   : > { %v3660_v46 = vxor.u32 2147483648, %v12740_v8  ;;  %v3973_v5 = vsel %vm3890_vm2, %v3972_v12, %v3971_v28  ;;  %v4050_v49 = vadd.s32 1, %v12781_v50  ;;  %v3794_v39 = vadd.s32 1, %v8957_v1 }
 0x47a   : > { %v12807_v34 = vsel %vm3890_vm2, %v17188_v57, %v12663_v11  ;;  %v3736_v21 = vadd.s32 %v12701_v35, %v12709_v22  ;;  %vm8956_vm3 = vcmp.lt.s32.totalorder %v8955_v10, 0  ;;  %v4047_v41 = vmul.u32 %v12742_v19, %v4031_v44 }
 0x47b   : > { %v3792_v38 = vor.u32 8388608, %v3791_v47  ;;  %v3751_v13 = vsel %vm8956_vm3, 0, %v8955_v10  ;;  %vm4049_vm14 = vc.u32 %v12792_v2, %v12780_v62  ;;  %vm3795_vm7 = vcmp.gt.s32.totalorder %v3794_v39, 0 }
 0x47c   : > { %v12819_v11 = vadd.f32 %v12435_v16, %v2597_v48  ;;  %v12824_v37 = vsel %vm12771_vm11, %v12452_v0, %v3973_v5  ;;  %v3752_v28 = vsub.s32 32, %v3751_v13  ;;  %v3756_v27 = vsub.s32 4294967266, %v3751_v13 }
 0x47d   : > { %v4051_v35 = vsel %vm4049_vm14, %v4050_v49, %v12781_v50  ;;  %v12830_v22 = vsel %vm16866_vm9, %v3660_v46, %v12740_v8  ;;  %v3796_v3 = vsel %vm3795_vm7, %v3794_v39, 0  ;;  %v2598_v7 = vmul.f32 %v12365_v14, %v12356_v20 }
 0x47e   : > { %v4052_v19 = vadd.s32 %v4051_v35, %v4047_v41  ;;  %v3753_v18 = vshll.u32 %v12763_v56, %v3751_v13  ;;  %v3754_v12 = vshrl.u32 %v3736_v21, %v3752_v28  ;;  %v3757_v30 = vadd.s32 127, %v3756_v27 }
 0x47f   : > { %v3798_v33 = vand.u32 31, %v3796_v3  ;;  %9674 = vcosq.f32 %v12824_v37  ;;  %v12836_v48 = vshll.u32 %v3792_v38, 8  ;;  %v4099_v50 = vand.u32 2139095040, %v12819_v11 }
 0x480   : > { %v4053_v47 = vadd.s32 536870912, %v4052_v19  ;;  %v3755_v44 = vor.u32 %v3754_v12, %v3753_v18  ;;  %v3758_v8 = vshll.u32 %v3757_v30, 23  ;;  %v12839_v32 = vshrl.u32 %v3796_v3, 5 }
 0x481   : > { %v3799_v1 = vsub.s32 32, %v3798_v33  ;;  %v3801_v20 = vshll.u32 %v17008_v60, %v3798_v33  ;;  %v3804_v14 = vshll.u32 %v17011_v17, %v3798_v33  ;;  %v3807_v56 = vshll.u32 %v17002_v63, %v3798_v33 }
 0x482   : > { %v12841_v57 = vshrl.u32 %v4053_v47, 30  ;;  %v12846_v10 = vpop.eup %9672  ;;  %v3759_v46 = vor.u32 4788187, %v3758_v8  ;;  %v3762_v5 = vcvt.s32.f32 %v3755_v44  ;;  %v3810_v39 = vshll.u32 %v17133_v40, %v3798_v33 }
 0x483   : > { %v3802_v49 = vshrl.u32 %v17011_v17, %v3799_v1  ;;  %v3805_v41 = vshrl.u32 %v17002_v63, %v3799_v1  ;;  %v3808_v38 = vshrl.u32 %v17133_v40, %v3799_v1  ;;  %v3811_v13 = vshrl.u32 %v17004_v58, %v3799_v1 }
 0x484   : > { %v4055_v21 = vshll.u32 %v12841_v57, 30  ;;  %v3760_v28 = vand.u32 2147483647, %v3759_v46  ;;  %v3813_v35 = vshll.u32 %v17004_v58, %v3798_v33  ;;  %v3814_v3 = vshrl.u32 %v17134_v23, %v3799_v1 }
 0x485   : > { %v3803_v27 = vor.u32 %v3802_v49, %v3801_v20  ;;  %v3806_v12 = vor.u32 %v3805_v41, %v3804_v14  ;;  %v3809_v30 = vor.u32 %v3808_v38, %v3807_v56  ;;  %v3812_v47 = vor.u32 %v3811_v13, %v3810_v39 }
 0x486   : > { %v12856_v18 = vsub.s32 %v4052_v19, %v4055_v21  ;;  %v3800_v44 = vshrl.u32 %v17008_v60, %v3799_v1  ;;  %v3815_v8 = vor.u32 %v3814_v3, %v3813_v35  ;;  %v16869_v9 = vand.u32 2147483647, %v12819_v11 }
 0x487   : > { %v4100_v51 = vshrl.u32 %v4099_v50, 23  ;;  %v17189_v0 = vand.u32 2147483647, %v11751_v42  ;;  %v3763_v33 = vmul.f32 %v3762_v5, %v3760_v28  ;;  %vm3816_vm6 = vcmp.lt.s32.totalorder %v12839_v32, 1 }
 0x488   : > { %v4058_v20 = vsub.s32 0, %v12856_v18  ;;  %vm3819_vm3 = vcmp.lt.s32.totalorder %v12839_v32, 4  ;;  %vm16879_vm14 = vcmp.lt.s32.totalorder %v12498_v53, 0  ;;  %vm3817_vm7 = vcmp.lt.s32.totalorder %v12839_v32, 2 }
 0x489   : > { %vm12862_vm2 = vcmp.le.f32.partialorder %v17189_v0, 0.7853982  ;;  %vm3818_vm9 = vcmp.lt.s32.totalorder %v12839_v32, 3  ;;  %v3824_v19 = vsel %vm3816_vm6, %v3803_v27, %v3806_v12  ;;  %v3825_v0 = vsel %vm3819_vm3, %v3812_v47, 920167782  ;;  %v12874_v50 = vpop.eup %9674 }
 0x48a   : > { %17192 = vst [vmem:[#allocation37_spill] sm:$0xff] %v12874_v50  ;;  %v8966_v1 = vmin.u32 %v4058_v20, %v12856_v18  ;;  %v3821_v14 = vsel %vm3819_vm3, %v3809_v30, 2102212464  ;;  %v3826_v56 = vsel %vm3818_vm9, %v3809_v30, %v3825_v0  ;;  %v3828_v5 = vsel %vm3816_vm6, %v3806_v12, %v3809_v30 }
 0x48b   : > { %v3827_v49 = vsel %vm3817_vm7, %v3824_v19, %v3826_v56  ;;  %v3829_v39 = vsel %vm3819_vm3, %v3815_v8, 1326507024  ;;  %v8969_v21 = vadd.s32 4294967169, %v4100_v51  ;;  %v12884_v41 = vadd.f32 %v12435_v16, %v2598_v7 }
 0x48c   : > { %v17193_v38 = vand.u32 2147483647, %v12498_v53  ;;  %v17194_v13 = vmov 0  ;;  %v4060_v28 = vclz %v8966_v1  ;;  %v3820_v35 = vsel %vm3816_vm6, %v3800_v44, %v3803_v27 }
 0x48d   : > { %v3830_v3 = vsel %vm3818_vm9, %v3812_v47, %v3829_v39  ;;  %v4103_v30 = vand.u32 8388607, %v16869_v9  ;;  %v3822_v51 = vsel %vm3818_vm9, %v3806_v12, %v3821_v14  ;;  %v3764_v20 = vxor.u32 2147483648, %v3763_v33 }
 0x48e   : > { %vm12888_vm4 = vcmp.le.f32.partialorder %v17193_v38, 0.7853982  ;;  %v3831_v16 = vsel %vm3817_vm7, %v3828_v5, %v3830_v3  ;;  %v12903_v7 = vmul.u32.u64.low %v12836_v48, %v3827_v49  ;;  %v12904_v8 = vmul.u32.u64.high %v12836_v48, %v3827_v49, %v12903_v7 }
 0x48f   : > { %v17195_v13 = vsel %vm12888_vm4, 4294967295, %v17194_v13  ;;  %v8967_v19 = vadd.s32 4294967294, %v4060_v28  ;;  %v12908_v27 = vmul.u32.u64.low %v12836_v48, %v3831_v16  ;;  %v12909_v44 = vmul.u32.u64.high %v12836_v48, %v3831_v16, %v12908_v27 }
 0x490   : > { %17196 = vst [vmem:[#allocation29_spill] sm:$0xff] %v17195_v13  ;;  %9676 = vsinq.f32 %v12824_v37  ;;  %v4106_v47 = vadd.s32 1, %v8969_v21  ;;  %v4203_v0 = vand.u32 2139095040, %v12884_v41  ;;  %v4048_v1 = vadd.s32 %v12780_v62, %v12792_v2 }
 0x491   : > { %vm8968_vm9 = vcmp.lt.s32.totalorder %v8967_v19, 0  ;;  %v3823_v14 = vsel %vm3817_vm7, %v3820_v35, %v3822_v51  ;;  %v12922_v56 = vsel %vm12862_vm2, %v11751_v42, %v12292_v36  ;;  %v3842_v37 = vadd.s32 1, %v12904_v8 }
 0x492   : > { %v4063_v5 = vsel %vm8968_vm9, 0, %v8967_v19  ;;  %vm4107_vm6 = vcmp.gt.s32.totalorder %v4106_v47, 0  ;;  %v16868_v49 = vand.u32 2147483647, %v12884_v41  ;;  %v3765_v39 = vsel %vm16879_vm14, %v3764_v20, %v3763_v33 }
 0x493   : > { %v4064_v62 = vsub.s32 32, %v4063_v5  ;;  %v4068_v2 = vsub.s32 4294967266, %v4063_v5  ;;  %v4104_v21 = vor.u32 8388608, %v4103_v30  ;;  %v3839_v32 = vmul.u32 %v12836_v48, %v3823_v14 }
 0x494   : > { %vm3841_vm3 = vc.u32 %v12909_v44, %v12903_v7  ;;  %v4108_v38 = vsel %vm4107_vm6, %v4106_v47, 0  ;;  %v4204_v36 = vshrl.u32 %v4203_v0, 23  ;;  %v12937_v33 = vsel %vm12888_vm4, %v12498_v53, %v3765_v39 }
 0x495   : > { %v4066_v28 = vshrl.u32 %v4048_v1, %v4064_v62  ;;  %v4069_v35 = vadd.s32 127, %v4068_v2  ;;  %v3843_v3 = vsel %vm3841_vm3, %v3842_v37, %v12904_v8  ;;  %v12932_v51 = vshrl.u32 %v4108_v38, 5 }
 0x496   : > { %v4065_v30 = vshll.u32 %v12856_v18, %v4063_v5  ;;  %v3844_v16 = vadd.s32 %v3843_v3, %v3839_v32  ;;  %v4110_v48 = vand.u32 31, %v4108_v38  ;;  %v12940_v19 = vshll.u32 %v4104_v21, 8 }
 0x497   : > { %v4070_v20 = vshll.u32 %v4069_v35, 23  ;;  %v12944_v27 = vand.u32 8388607, %v16868_v49  ;;  %9678 = vcosq.f32 %v12922_v56  ;;  %v8973_v1 = vadd.s32 4294967169, %v4204_v36 }
 0x498   : > { %v4067_v8 = vor.u32 %v4066_v28, %v4065_v30  ;;  %v3845_v47 = vadd.s32 536870912, %v3844_v16  ;;  %v4111_v0 = vsub.s32 32, %v4110_v48  ;;  %v4113_v37 = vshll.u32 %v17008_v60, %v4110_v48 }
 0x499   : > { %v4071_v14 = vor.u32 4788187, %v4070_v20  ;;  %v4116_v18 = vshll.u32 %v17011_v17, %v4110_v48  ;;  %vm4128_vm7 = vcmp.lt.s32.totalorder %v12932_v51, 1  ;;  %v4119_v21 = vshll.u32 %v17002_v63, %v4110_v48 }
 0x49a   : > { %v12950_v5 = vpop.eup %9676  ;;  %v12952_v39 = vshrl.u32 %v3845_v47, 30  ;;  %v4114_v62 = vshrl.u32 %v17011_v17, %v4111_v0  ;;  %v4117_v2 = vshrl.u32 %v17002_v63, %v4111_v0  ;;  %v4120_v32 = vshrl.u32 %v17133_v40, %v4111_v0 }
 0x49b   : > { %v4122_v38 = vshll.u32 %v17133_v40, %v4110_v48  ;;  %v4123_v36 = vshrl.u32 %v17004_v58, %v4111_v0  ;;  %v4125_v28 = vshll.u32 %v17004_v58, %v4110_v48  ;;  %v4126_v20 = vshrl.u32 %v17134_v23, %v4111_v0 }
 0x49c   : > { %17197 = vst [vmem:[#allocation38_spill] sm:$0xff] %v12952_v39  ;;  %v3847_v35 = vshll.u32 %v12952_v39, 30  ;;  %v4115_v3 = vor.u32 %v4114_v62, %v4113_v37  ;;  %v4118_v30 = vor.u32 %v4117_v2, %v4116_v18  ;;  %v4074_v47 = vcvt.s32.f32 %v4067_v8 }
 0x49d   : > { %v4121_v49 = vor.u32 %v4120_v32, %v4119_v21  ;;  %v4124_v9 = vor.u32 %v4123_v36, %v4122_v38  ;;  %vm4129_vm9 = vcmp.lt.s32.totalorder %v12932_v51, 2  ;;  %v4112_v13 = vshrl.u32 %v17008_v60, %v4111_v0 }
 0x49e   : > { %v12964_v12 = vsub.s32 %v3844_v16, %v3847_v35  ;;  %v4127_v50 = vor.u32 %v4126_v20, %v4125_v28  ;;  %vm4131_vm6 = vcmp.lt.s32.totalorder %v12932_v51, 4  ;;  %vm4130_vm3 = vcmp.lt.s32.totalorder %v12932_v51, 3 }
 0x49f   : > { %v4133_v48 = vsel %vm4131_vm6, %v4121_v49, 2102212464  ;;  %v4136_v37 = vsel %vm4128_vm7, %v4115_v3, %v4118_v30  ;;  %v4137_v18 = vsel %vm4131_vm6, %v4124_v9, 920167782  ;;  %v4072_v62 = vand.u32 2147483647, %v4071_v14 }
 0x4a0   : > { %v3850_v8 = vsub.s32 0, %v12964_v12  ;;  %v4138_v2 = vsel %vm4130_vm3, %v4121_v49, %v4137_v18  ;;  %v4140_v16 = vsel %vm4128_vm7, %v4118_v30, %v4121_v49  ;;  %v4132_v0 = vsel %vm4128_vm7, %v4112_v13, %v4115_v3 }
 0x4a1   : > { %v12974_v21 = vpop.eup %9678  ;;  %v4134_v32 = vsel %vm4130_vm3, %v4118_v30, %v4133_v48  ;;  %v4139_v38 = vsel %vm4129_vm9, %v4136_v37, %v4138_v2  ;;  %v4141_v36 = vsel %vm4131_vm6, %v4127_v50, 1326507024  ;;  %v4208_v18 = vor.u32 8388608, %v12944_v27 }
 0x4a2   : > { %v8958_v28 = vmin.u32 %v3850_v8, %v12964_v12  ;;  %v4142_v35 = vsel %vm4130_vm3, %v4124_v9, %v4141_v36  ;;  %v12982_v14 = vmul.u32.u64.low %v12940_v19, %v4139_v38  ;;  %v12983_v20 = vmul.u32.u64.high %v12940_v19, %v4139_v38, %v12982_v14 }
 0x4a3   : > { %v4143_v49 = vsel %vm4129_vm9, %v4140_v16, %v4142_v35  ;;  %v4210_v39 = vadd.s32 1, %v8973_v1  ;;  %v17198_v13 = vsub.s32 4, %v11906_v24  ;;  %v12994_v3 = vmul.f32 %v4074_v47, %v4072_v62 }
 0x4a4   : > { %v3852_v9 = vclz %v8958_v28  ;;  %v12997_v30 = vmul.u32.u64.low %v12940_v19, %v4143_v49  ;;  %v12998_v48 = vmul.u32.u64.high %v12940_v19, %v4143_v49, %v12997_v30  ;;  %9680 = vcosq.f32 %v12937_v33  ;;  %v17202_v49 = vld [vmem:[#allocation15_spill] sm:$0xff] }
 0x4a5   : > { %v2831_v50 = vsel %vm2746_vm8, %v17198_v13, %v11906_v24  ;;  %v4135_v27 = vsel %vm4129_vm9, %v4132_v0, %v4134_v32  ;;  %vm4211_vm7 = vcmp.gt.s32.totalorder %v4210_v39, 0  ;;  %9682 = vsinq.f32 %v12937_v33 }
 0x4a6   : > { %v8959_v1 = vadd.s32 4294967294, %v3852_v9  ;;  %v4154_v24 = vadd.s32 1, %v12983_v20  ;;  %v4212_v47 = vsel %vm4211_vm7, %v4210_v39, 0  ;;  %v3840_v62 = vadd.s32 %v12903_v7, %v12909_v44 }
 0x4a7   : > { %v4214_v8 = vand.u32 31, %v4212_v47  ;;  %v13008_v2 = vshll.u32 %v4208_v18, 8  ;;  %v2833_v16 = vsel %vm12862_vm2, 0, %v2831_v50  ;;  %v4151_v51 = vmul.u32 %v12940_v19, %v4135_v27 }
 0x4a8   : > { %vm8960_vm8 = vcmp.lt.s32.totalorder %v8959_v1, 0  ;;  %vm4153_vm9 = vc.u32 %v12998_v48, %v12982_v14  ;;  %9684 = vsinq.f32 %v12922_v56  ;;  %v2837_v32 = vadd.s32 3, %v2833_v16 }
 0x4a9   : > { %v3855_v33 = vsel %vm8960_vm8, 0, %v8959_v1  ;;  %v4155_v39 = vsel %vm4153_vm9, %v4154_v24, %v12983_v20  ;;  %v4215_v0 = vsub.s32 32, %v4214_v8  ;;  %v17199_v19 = vand.u32 2147483647, %v11776_v45 }
 0x4aa   : > { %v3860_v7 = vsub.s32 4294967266, %v3855_v33  ;;  %v4156_v44 = vadd.s32 %v4155_v39, %v4151_v51  ;;  %v3246_v20 = vsub.s32 4, %v17202_v49  ;;  %v4213_v13 = vshrl.u32 %v4212_v47, 5 }
 0x4ab   : > { %v4218_v36 = vshrl.u32 %v17011_v17, %v4215_v0  ;;  %v4221_v28 = vshrl.u32 %v17002_v63, %v4215_v0  ;;  %vm13023_vm2 = vcmp.le.f32.partialorder %v17199_v19, 0.7853982  ;;  %v4217_v56 = vshll.u32 %v17008_v60, %v4214_v8 }
 0x4ac   : > { %v4157_v18 = vadd.s32 536870912, %v4156_v44  ;;  %v4220_v50 = vshll.u32 %v17011_v17, %v4214_v8  ;;  %v3856_v9 = vsub.s32 32, %v3855_v33  ;;  %v3861_v30 = vadd.s32 127, %v3860_v7 }
 0x4ad   : > { %v4223_v27 = vshll.u32 %v17002_v63, %v4214_v8  ;;  %v4224_v1 = vshrl.u32 %v17133_v40, %v4215_v0  ;;  %v4219_v16 = vor.u32 %v4218_v36, %v4217_v56  ;;  %v4227_v39 = vshrl.u32 %v17004_v58, %v4215_v0  ;;  %v17203_v36 = vld [vmem:[#allocation32_spill] sm:$0xff] }
 0x4ae   : > { %v13032_v24 = vshrl.u32 %v4157_v18, 30  ;;  %v4222_v51 = vor.u32 %v4221_v28, %v4220_v50  ;;  %v13035_v19 = vpop.eup %9680  ;;  %v4226_v47 = vshll.u32 %v17133_v40, %v4214_v8  ;;  %v4229_v38 = vshll.u32 %v17004_v58, %v4214_v8 }
 0x4af   : > { %v4225_v37 = vor.u32 %v4224_v1, %v4223_v27  ;;  %v4230_v46 = vshrl.u32 %v17134_v23, %v4215_v0  ;;  %v13040_v7 = vpop.eup %9682  ;;  %v3857_v63 = vshll.u32 %v12964_v12, %v3855_v33  ;;  %v2838_v17 = vand.u32 3, %v2837_v32 }
 0x4b0   : > { %v4159_v18 = vshll.u32 %v13032_v24, 30  ;;  %v3248_v28 = vsel %vm13023_vm2, %v11776_v45, %v17203_v36  ;;  %v3858_v56 = vshrl.u32 %v3840_v62, %v3856_v9  ;;  %v4216_v50 = vshrl.u32 %v17008_v60, %v4215_v0 }
 0x4b1   : > { %v4228_v27 = vor.u32 %v4227_v39, %v4226_v47  ;;  %v4231_v1 = vor.u32 %v4230_v46, %v4229_v38  ;;  %v3862_v8 = vshll.u32 %v3861_v30, 23  ;;  %vm4232_vm6 = vcmp.lt.s32.totalorder %v4213_v13, 1 }
 0x4b2   : > { %v13049_v58 = vsub.s32 %v4156_v44, %v4159_v18  ;;  %vm4235_vm3 = vcmp.lt.s32.totalorder %v4213_v13, 4  ;;  %v9685_v23 = vpop.eup %9684  ;;  %vm4234_vm7 = vcmp.lt.s32.totalorder %v4213_v13, 3  ;;  %v4240_v33 = vsel %vm4232_vm6, %v4219_v16, %v4222_v51 }
 0x4b3   : > { %v4237_v12 = vsel %vm4235_vm3, %v4225_v37, 2102212464  ;;  %v4241_v32 = vsel %vm4235_vm3, %v4228_v27, 920167782  ;;  %vm16881_vm8 = vcmp.lt.s32.totalorder %v12625_v31, 0  ;;  %vm4233_vm9 = vcmp.lt.s32.totalorder %v4213_v13, 2 }
 0x4b4   : > { %v4162_v40 = vsub.s32 0, %v13049_v58  ;;  %v4236_v62 = vsel %vm4232_vm6, %v4216_v50, %v4219_v16  ;;  %v4242_v9 = vsel %vm4234_vm7, %v4225_v37, %v4241_v32  ;;  %v4238_v0 = vsel %vm4234_vm7, %v4222_v51, %v4237_v12 }
 0x4b5   : > { %v4243_v38 = vsel %vm4233_vm9, %v4240_v33, %v4242_v9  ;;  %v4244_v46 = vsel %vm4232_vm6, %v4222_v51, %v4225_v37  ;;  %v4245_v44 = vsel %vm4235_vm3, %v4231_v1, 1326507024  ;;  %v13054_v30 = vor.u32 %v3858_v56, %v3857_v63 }
 0x4b6   : > { %v8970_v39 = vmin.u32 %v4162_v40, %v13049_v58  ;;  %v4246_v47 = vsel %vm4234_vm7, %v4228_v27, %v4245_v44  ;;  %vm2836_vm14 = vweird.f32 %v11751_v42  ;;  %v3247_v18 = vsel %vm3162_vm1, %v3246_v20, %v17202_v49 }
 0x4b7   : > { %v13061_v36 = vor.u32 4788187, %v3862_v8  ;;  %v4247_v16 = vsel %vm4233_vm9, %v4244_v46, %v4246_v47  ;;  %v13065_v50 = vmul.u32.u64.low %v13008_v2, %v4243_v38  ;;  %v13066_v12 = vmul.u32.u64.high %v13008_v2, %v4243_v38, %v13065_v50  ;;  %v17206_v47 = vld [vmem:[#allocation21_spill] sm:$0xff] }
 0x4b8   : > { %v4164_v63 = vclz %v8970_v39  ;;  %v4239_v37 = vsel %vm4233_vm9, %v4236_v62, %v4238_v0  ;;  %v13071_v40 = vmul.u32.u64.low %v13008_v2, %v4247_v16  ;;  %v13072_v51 = vmul.u32.u64.high %v13008_v2, %v4247_v16, %v13071_v40 }
 0x4b9   : > { %vm2839_vm6 = vcmp.lt.s32.totalorder %v2838_v17, 2  ;;  %v2841_v56 = vxor.u32 2147483648, %v9685_v23  ;;  %vm2843_vm3 = vcmp.eq.s32.totalorder %v2838_v17, 2  ;;  %v3249_v49 = vsel %vm13023_vm2, 0, %v3247_v18 }
 0x4ba   : > { %v8971_v20 = vadd.s32 4294967294, %v4164_v63  ;;  %vm2840_vm1 = vcmp.eq.s32.totalorder %v2838_v17, 0  ;;  %v17204_v27 = vxor.u32 2147483648, %v12974_v21  ;;  %9686 = vcosq.f32 %v3248_v28 }
 0x4bb   : > { %v4258_v8 = vadd.s32 1, %v13066_v12  ;;  %v2842_v13 = vsel %vm2840_vm1, %v12974_v21, %v2841_v56  ;;  %9688 = vsinq.f32 %v3248_v28  ;;  %v3253_v33 = vadd.s32 3, %v3249_v49 }
 0x4bc   : > { %v2845_v1 = vsel %vm2843_vm3, %v17204_v27, %v9685_v23  ;;  %vm8972_vm7 = vcmp.lt.s32.totalorder %v8971_v20, 0  ;;  %v4255_v32 = vmul.u32 %v13008_v2, %v4239_v37  ;;  %vm4257_vm9 = vc.u32 %v13072_v51, %v13065_v50  ;;  %v17210_v27 = vld [vmem:[#allocation28_spill] sm:$0xff] }
 0x4bd   : > { %v2846_v35 = vsel %vm2839_vm6, %v2842_v13, %v2845_v1  ;;  %v17205_v62 = vxor.u32 2147483648, %v12994_v3  ;;  %v4167_v9 = vsel %vm8972_vm7, 0, %v8971_v20  ;;  %v4259_v21 = vsel %vm4257_vm9, %v4258_v8, %v13066_v12  ;;  %v17211_v8 = vld [vmem:[#allocation10_spill] sm:$0xff] }
 0x4be   : > { %v3254_v28 = vand.u32 3, %v3253_v33  ;;  %v4152_v0 = vadd.s32 %v12982_v14, %v12998_v48  ;;  %v4168_v2 = vsub.s32 32, %v4167_v9  ;;  %v4172_v38 = vsub.s32 4294967266, %v4167_v9  ;;  %v17208_v48 = vld [vmem:[#allocation19_spill] sm:$0xff] }
 0x4bf   : > { %v13089_v23 = vsel %vm16881_vm8, %v17205_v62, %v12994_v3  ;;  %v4260_v46 = vadd.s32 %v4259_v21, %v4255_v32  ;;  %v3864_v17 = vand.u32 2147483647, %v13061_v36  ;;  %v2847_v39 = vsel %vm2836_vm14, nan, %v2846_v35  ;;  %v17213_v21 = vld [vmem:[#allocation26_spill] sm:$0xff] }
 0x4c0   : > { %v2729_v18 = vsel %vm12100_vm0, 0, %v17206_v47  ;;  %v4169_v16 = vshll.u32 %v13049_v58, %v4167_v9  ;;  %v4170_v12 = vshrl.u32 %v4152_v0, %v4168_v2  ;;  %v4173_v63 = vadd.s32 127, %v4172_v38  ;;  %v17212_v9 = vld [vmem:[#allocation11_spill] sm:$0xff] }
 0x4c1   : > { %v4261_v37 = vadd.s32 536870912, %v4260_v46  ;;  %vm3252_vm2 = vweird.f32 %v11776_v45  ;;  %vm3255_vm6 = vcmp.lt.s32.totalorder %v3254_v28, 2  ;;  %vm3256_vm3 = vcmp.eq.s32.totalorder %v3254_v28, 0 }
 0x4c2   : > { %v2733_v14 = vadd.s32 3, %v2729_v18  ;;  %v3145_v56 = vsel %vm12203_vm12, 0, %v17208_v48  ;;  %v4171_v42 = vor.u32 %v4170_v12, %v4169_v16  ;;  %v4174_v49 = vshll.u32 %v4173_v63, 23  ;;  %v17214_v48 = vld [vmem:[#allocation27_spill] sm:$0xff] }
 0x4c3   : > { %v13106_v20 = vshrl.u32 %v4261_v37, 30  ;;  %v2737_v1 = vxor.u32 2147483648, %v17210_v27  ;;  %vm3259_vm0 = vcmp.eq.s32.totalorder %v3254_v28, 2  ;;  %v2740_v13 = vxor.u32 2147483648, %v17211_v8 }
 0x4c4   : > { %v2734_v58 = vand.u32 3, %v2733_v14  ;;  %v3149_v33 = vadd.s32 3, %v3145_v56  ;;  %v9687_v32 = vpop.eup %9686  ;;  %v4175_v35 = vor.u32 4788187, %v4174_v49  ;;  %vm2732_vm14 = vweird.f32 %v17212_v9  ;;  %v17215_v49 = vld [vmem:[#allocation24_spill] sm:$0xff]  ;;  %v17234_v9 = vld [vmem:[#allocation18_spill] sm:$0xff] }
 0x4c5   : > { %v4263_v62 = vshll.u32 %v13106_v20, 30  ;;  %v3153_v0 = vxor.u32 2147483648, %v17213_v21  ;;  %v9689_v2 = vpop.eup %9688  ;;  %v4178_v38 = vcvt.s32.f32 %v4171_v42  ;;  %v3260_v47 = vxor.u32 2147483648, %v9687_v32 }
 0x4c6   : > { %vm2736_vm12 = vcmp.eq.s32.totalorder %v2734_v58, 0  ;;  %vm2739_vm1 = vcmp.eq.s32.totalorder %v2734_v58, 2  ;;  %v4176_v3 = vand.u32 2147483647, %v4175_v35  ;;  %v3257_v16 = vxor.u32 2147483648, %v9689_v2 }
 0x4c7   : > { %v13113_v18 = vsub.s32 %v4260_v46, %v4263_v62  ;;  %v2738_v12 = vsel %vm2736_vm12, %v17211_v8, %v2737_v1  ;;  %v3261_v63 = vsel %vm3259_vm0, %v3260_v47, %v9689_v2  ;;  %v2741_v37 = vsel %vm2739_vm1, %v2740_v13, %v17210_v27 }
 0x4c8   : > { %v3150_v14 = vand.u32 3, %v3149_v33  ;;  %v3038_v40 = vsub.s32 4, %v17214_v48  ;;  %v3258_v42 = vsel %vm3256_vm3, %v9687_v32, %v3257_v16  ;;  %v3156_v44 = vxor.u32 2147483648, %v17215_v49 }
 0x4c9   : > { %v4266_v56 = vsub.s32 0, %v13113_v18  ;;  %v17216_v35 = vand.u32 2147483647, %v12066_v25  ;;  %vm16880_vm9 = vcmp.lt.s32.totalorder %v12819_v11, 0  ;;  %v4179_v1 = vmul.f32 %v4178_v38, %v4176_v3  ;;  %v17222_v3 = vld [vmem:[#allocation23_spill] sm:$0xff] }
 0x4ca   : > { %v3262_v27 = vsel %vm3255_vm6, %v3258_v42, %v3261_v63  ;;  %vm2735_vm0 = vcmp.lt.s32.totalorder %v2734_v58, 2  ;;  %vm3152_vm12 = vcmp.eq.s32.totalorder %v3150_v14, 0  ;;  %vm3155_vm3 = vcmp.eq.s32.totalorder %v3150_v14, 2 }
 0x4cb   : > { %vm13124_vm7 = vcmp.le.f32.partialorder %v17216_v35, 0.7853982  ;;  %v8974_v8 = vmin.u32 %v4266_v56, %v13113_v18  ;;  %v3263_v13 = vsel %vm3252_vm2, nan, %v3262_v27  ;;  %v2742_v33 = vsel %vm2735_vm0, %v2738_v12, %v2741_v37 }
 0x4cc   : > { %v3154_v32 = vsel %vm3152_vm12, %v17215_v49, %v3153_v0  ;;  %v9176_v62 = vpack.c.bf16 %v3263_v13, %v2847_v39  ;;  %v3039_v2 = vsel %vm2954_vm10, %v3038_v40, %v17214_v48  ;;  %v3040_v28 = vsel %vm13124_vm7, %v12066_v25, %v12642_v43  ;;  %v17227_v40 = vld [vmem:[#allocation17_spill] sm:$0xff] }
 0x4cd   : > { %v17219_v58 = vand.u32 2147483647, %v12819_v11  ;;  %v4268_v45 = vclz %v8974_v8  ;;  %vm3151_vm2 = vcmp.lt.s32.totalorder %v3150_v14, 2  ;;  %v3157_v39 = vsel %vm3155_vm3, %v3156_v44, %v17213_v21 }
 0x4ce   : > { %v3041_v0 = vsel %vm13124_vm7, 0, %v3039_v2  ;;  %9177 = vmatprep.subr.bf16.mxu0 %v9176_v62  ;;  %v2743_v47 = vsel %vm2732_vm14, nan, %v2742_v33  ;;  %vm3148_vm10 = vweird.f32 %v17222_v3  ;;  %v3158_v43 = vsel %vm3151_vm2, %v3154_v32, %v3157_v39 }
 0x4cf   : > { %vm13143_vm6 = vcmp.le.f32.partialorder %v17219_v58, 0.7853982  ;;  %9690 = vcosq.f32 %v3040_v28  ;;  %v4180_v16 = vxor.u32 2147483648, %v4179_v1  ;;  %v8975_v12 = vadd.s32 4294967294, %v4268_v45 }
 0x4d0   : > { %v3159_v63 = vsel %vm3148_vm10, nan, %v3158_v43  ;;  %v3045_v37 = vadd.s32 3, %v3041_v0  ;;  %v17223_v14 = vcvt.s32.f32 %v13054_v30  ;;  %v17224_v48 = vand.u32 2147483647, %v12149_v15 }
 0x4d1   : > { %v9178_v21 = vpack.c.bf16 %v3159_v63, %v2743_v47  ;;  %v3454_v56 = vsub.s32 4, %v17227_v40  ;;  %v4182_v42 = vsub.s32 4, %v13032_v24  ;;  %vm8976_vm14 = vcmp.lt.s32.totalorder %v8975_v12, 0  ;;  %v17233_v63 = vld [vmem:[#allocation31_spill] sm:$0xff] }
 0x4d2   : > { %v13157_v44 = vmul.f32 %v17223_v14, %v3864_v17  ;;  %vm13161_vm1 = vcmp.le.f32.partialorder %v17224_v48, 0.7853982  ;;  %9692 = vsinq.f32 %v3040_v28  ;;  %v4271_v36 = vsel %vm8976_vm14, 0, %v8975_v12  ;;  %v17229_v28 = vld [vmem:[#allocation30_spill] sm:$0xff] }
 0x4d3   : > { %v3456_v30 = vsel %vm13161_vm1, %v12149_v15, %v12799_v54  ;;  %9179 = vmatpush1.bf16.msra.mxu0 %v9178_v21  ;;  %v13171_v17 = vand.u32 3, %v3045_v37  ;;  %vm17228_vm7 = vcmp.lt.s32.totalorder %v12149_v15, 0  ;;  %v4181_v35 = vsel %vm16880_vm9, %v4180_v16, %v4179_v1 }
 0x4d4   : > { %v3455_v49 = vsel %vm17228_vm7, %v3454_v56, %v17227_v40  ;;  %9694 = vcosq.f32 %v3456_v30  ;;  %v4256_v46 = vadd.s32 %v13065_v50, %v13072_v51  ;;  %v4272_v27 = vsub.s32 32, %v4271_v36  ;;  %v17235_v40 = vld [vmem:[#allocation14_spill] sm:$0xff] }
 0x4d5   : > { %v4276_v8 = vsub.s32 4294967266, %v4271_v36  ;;  %v3868_v13 = vxor.u32 2147483648, %v13157_v44  ;;  %v4273_v54 = vshll.u32 %v13113_v18, %v4271_v36  ;;  %v3457_v33 = vsel %vm13161_vm1, 0, %v3455_v49  ;;  %v17231_v18 = vld [vmem:[#allocation13_spill] sm:$0xff] }
 0x4d6   : > { %9696 = vsinq.f32 %v3456_v30  ;;  %v4274_v32 = vshrl.u32 %v4256_v46, %v4272_v27  ;;  %v3461_v2 = vadd.s32 3, %v3457_v33  ;;  %v2937_v1 = vsel %vm12238_vm15, 0, %v17229_v28  ;;  %v17237_v33 = vld [vmem:[#allocation34_spill] sm:$0xff] }
 0x4d7   : > { %v4277_v62 = vadd.s32 127, %v4276_v8  ;;  %v13190_v50 = vsel %vm13143_vm6, %v12819_v11, %v4181_v35  ;;  %vm3048_vm0 = vcmp.eq.s32.totalorder %v13171_v17, 0  ;;  %v2941_v51 = vadd.s32 3, %v2937_v1 }
 0x4d8   : > { %v2945_v45 = vxor.u32 2147483648, %v17231_v18  ;;  %v4275_v39 = vor.u32 %v4274_v32, %v4273_v54  ;;  %vm3047_vm12 = vcmp.lt.s32.totalorder %v13171_v17, 2  ;;  %v3462_v47 = vand.u32 3, %v3461_v2 }
 0x4d9   : > { %v4278_v0 = vshll.u32 %v4277_v62, 23  ;;  %v3353_v43 = vsel %vm12456_vm5, 0, %v12613_v6  ;;  %v9691_v16 = vpop.eup %9690  ;;  %vm3051_vm15 = vcmp.eq.s32.totalorder %v13171_v17, 2  ;;  %v2942_v12 = vand.u32 3, %v2941_v51  ;;  %v17236_v6 = vld [vmem:[#allocation39_spill] sm:$0xff] }
 0x4da   : > { %v2948_v37 = vxor.u32 2147483648, %v17233_v63  ;;  %v3357_v14 = vadd.s32 3, %v3353_v43  ;;  %v3052_v48 = vxor.u32 2147483648, %v9691_v16  ;;  %vm2940_vm3 = vweird.f32 %v17234_v9 }
 0x4db   : > { %v4279_v21 = vor.u32 4788187, %v4278_v0  ;;  %v4282_v56 = vcvt.s32.f32 %v4275_v39  ;;  %vm3463_vm14 = vcmp.lt.s32.totalorder %v3462_v47, 2  ;;  %vm2944_vm5 = vcmp.eq.s32.totalorder %v2942_v12, 0 }
 0x4dc   : > { %v3361_v30 = vxor.u32 2147483648, %v17236_v6  ;;  %v9693_v36 = vpop.eup %9692  ;;  %v2946_v35 = vsel %vm2944_vm5, %v17233_v63, %v2945_v45  ;;  %vm2947_vm7 = vcmp.eq.s32.totalorder %v2942_v12, 2  ;;  %v3358_v46 = vand.u32 3, %v3357_v14 }
 0x4dd   : > { %v4280_v49 = vand.u32 2147483647, %v4279_v21  ;;  %v3049_v8 = vxor.u32 2147483648, %v9693_v36  ;;  %vm2943_vm9 = vcmp.lt.s32.totalorder %v2942_v12, 2  ;;  %v2949_v54 = vsel %vm2947_vm7, %v2948_v37, %v17231_v18  ;;  %v17239_v37 = vld [vmem:[#allocation33_spill] sm:$0xff] }
 0x4de   : > { %v9695_v27 = vpop.eup %9694  ;;  %v3364_v32 = vxor.u32 2147483648, %v17237_v33  ;;  %v3053_v62 = vsel %vm3051_vm15, %v3052_v48, %v9693_v36  ;;  %vm3464_vm8 = vcmp.eq.s32.totalorder %v3462_v47, 0  ;;  %v2950_v28 = vsel %vm2943_vm9, %v2946_v35, %v2949_v54 }
 0x4df   : > { %v3468_v2 = vxor.u32 2147483648, %v9695_v27  ;;  %v4283_v1 = vmul.f32 %v4282_v56, %v4280_v49  ;;  %v3050_v51 = vsel %vm3048_vm0, %v9691_v16, %v3049_v8  ;;  %vm3467_vm5 = vcmp.eq.s32.totalorder %v3462_v47, 2 }
 0x4e0   : > { %v9697_v58 = vpop.eup %9696  ;;  %vm3359_vm1 = vcmp.lt.s32.totalorder %v3358_v46, 2  ;;  %vm3360_vm10 = vcmp.eq.s32.totalorder %v3358_v46, 0  ;;  %vm3363_vm2 = vcmp.eq.s32.totalorder %v3358_v46, 2  ;;  %vm3786_vm7 = vcmp.lt.s32.totalorder %v12731_v61, 0 }
 0x4e1   : > { %v3465_v45 = vxor.u32 2147483648, %v9697_v58  ;;  %v3469_v39 = vsel %vm3467_vm5, %v3468_v2, %v9697_v58  ;;  %v3054_v18 = vsel %vm3047_vm12, %v3050_v51, %v3053_v62  ;;  %v2951_v0 = vsel %vm2940_vm3, nan, %v2950_v28  ;;  %v17253_v51 = vld [vmem:[#allocation38_spill] sm:$0xff] }
 0x4e2   : > { %v3362_v3 = vsel %vm3360_vm10, %v17237_v33, %v3361_v30  ;;  %v3365_v43 = vsel %vm3363_vm2, %v3364_v32, %v17236_v6  ;;  %v17238_v63 = vand.u32 2147483647, %v12389_v59  ;;  %v3662_v14 = vsub.s32 4, %v17239_v37 }
 0x4e3   : > { %v3466_v16 = vsel %vm3464_vm8, %v9695_v27, %v3465_v45  ;;  %v3366_v12 = vsel %vm3359_vm1, %v3362_v3, %v3365_v43  ;;  %v4284_v21 = vxor.u32 2147483648, %v4283_v1  ;;  %vm17240_vm0 = vweird.f32 %v17235_v40  ;;  %v17257_v43 = vld [vmem:[#allocation12_spill] sm:$0xff] }
 0x4e4   : > { %vm3577_vm9 = vcmp.le.f32.partialorder %v17238_v63, 0.7853982  ;;  %v3470_v48 = vsel %vm3463_vm14, %v3466_v16, %v3469_v39  ;;  %v3367_v17 = vsel %vm17240_vm0, nan, %v3366_v12  ;;  %vm17241_vm12 = vweird.f32 %v12066_v25 }
 0x4e5   : > { %v3664_v9 = vsel %vm3577_vm9, %v12389_v59, %v12830_v22  ;;  %v3055_v56 = vsel %vm17241_vm12, nan, %v3054_v18  ;;  %vm17242_vm8 = vweird.f32 %v12149_v15  ;;  %vm17243_vm15 = vcmp.lt.s32.totalorder %v12389_v59, 0 }
 0x4e6   : > { %v3471_v6 = vsel %vm17242_vm8, nan, %v3470_v48  ;;  %v3663_v30 = vsel %vm17243_vm15, %v3662_v14, %v17239_v37  ;;  %9698 = vcosq.f32 %v3664_v9  ;;  %v17244_v40 = vand.u32 2147483647, %v12625_v31 }
 0x4e7   : > { %v9184_v36 = vpack.c.bf16 %v3471_v6, %v3055_v56  ;;  %v3665_v47 = vsel %vm3577_vm9, 0, %v3663_v30  ;;  %9700 = vsinq.f32 %v3664_v9  ;;  %v9186_v22 = vpack.c.bf16 %v3367_v17, %v2951_v0 }
 0x4e8   : > { %vm13237_vm3 = vcmp.le.f32.partialorder %v17244_v40, 0.7853982  ;;  %v3669_v25 = vadd.s32 3, %v3665_v47  ;;  %v4078_v35 = vsub.s32 4, %v12841_v57  ;;  %v17247_v46 = vsub.s32 4, %v12748_v52 }
 0x4e9   : > { %v4080_v15 = vsel %vm13237_vm3, %v12625_v31, %v13089_v23  ;;  %vm17248_vm2 = vcmp.lt.s32.totalorder %v12498_v53, 0  ;;  %vm16882_vm10 = vcmp.lt.s32.totalorder %v12884_v41, 0  ;;  %9185 = vmatprep.subr.bf16.mxu1 %v9184_v36  ;;  %v3561_v8 = vsel %vm12679_vm13, 0, %v12717_v26 }
 0x4ea   : > { %v13251_v27 = vsel %vm17248_vm2, %v17247_v46, %v12748_v52  ;;  %9702 = vcosq.f32 %v4080_v15  ;;  %9187 = vmatpush1.bf16.msra.mxu1 %v9186_v22  ;;  %v3670_v54 = vand.u32 3, %v3669_v25  ;;  %vm17249_vm1 = vcmp.lt.s32.totalorder %v12625_v31, 0 }
 0x4eb   : > { %v4079_v23 = vsel %vm17249_vm1, %v4078_v35, %v12841_v57  ;;  %9704 = vsinq.f32 %v4080_v15  ;;  %v3565_v33 = vadd.s32 3, %v3561_v8  ;;  %vm17250_vm14 = vcmp.lt.s32.totalorder %v12819_v11, 0 }
 0x4ec   : > { %v13265_v52 = vsel %vm17250_vm14, %v4182_v42, %v13032_v24  ;;  %9706 = vcosq.f32 %v13190_v50  ;;  %v4081_v55 = vsel %vm13237_vm3, 0, %v4079_v23  ;;  %v3977_v26 = vsel %vm12771_vm11, 0, %v12807_v34  ;;  %v17251_v34 = vld [vmem:[#allocation36_spill] sm:$0xff] }
 0x4ed   : > { %v3869_v57 = vsel %vm3786_vm7, %v3868_v13, %v13157_v44  ;;  %9708 = vsinq.f32 %v13190_v50  ;;  %v4285_v24 = vsel %vm16882_vm10, %v4284_v21, %v4283_v1  ;;  %v4085_v42 = vadd.s32 3, %v4081_v55  ;;  %v17252_v13 = vld [vmem:[#allocation37_spill] sm:$0xff] }
 0x4ee   : > { %v3566_v32 = vand.u32 3, %v3565_v33  ;;  %v3569_v62 = vxor.u32 2147483648, %v12846_v10  ;;  %v3572_v2 = vxor.u32 2147483648, %v12761_v29  ;;  %v3981_v28 = vadd.s32 3, %v3977_v26 }
 0x4ef   : > { %vm3671_vm13 = vcmp.lt.s32.totalorder %v3670_v54, 2  ;;  %vm3672_vm11 = vcmp.eq.s32.totalorder %v3670_v54, 0  ;;  %v4086_v4 = vand.u32 3, %v4085_v42  ;;  %vm3980_vm5 = vweird.f32 %v17251_v34 }
 0x4f0   : > { %v3985_v58 = vxor.u32 2147483648, %v12950_v5  ;;  %vm3675_vm9 = vcmp.eq.s32.totalorder %v3670_v54, 2  ;;  %v3982_v44 = vand.u32 3, %v3981_v28  ;;  %v3988_v50 = vxor.u32 2147483648, %v17252_v13  ;;  %v9699_v45 = vpop.eup %9698 }
 0x4f1   : > { %v3870_v1 = vsub.s32 4, %v17253_v51  ;;  %vm3567_vm8 = vcmp.lt.s32.totalorder %v3566_v32, 2  ;;  %vm3568_vm15 = vcmp.eq.s32.totalorder %v3566_v32, 0  ;;  %vm3571_vm3 = vcmp.eq.s32.totalorder %v3566_v32, 2  ;;  %v9701_v0 = vpop.eup %9700 }
 0x4f2   : > { %v17254_v39 = vand.u32 2147483647, %v12731_v61  ;;  %v3676_v3 = vxor.u32 2147483648, %v9699_v45  ;;  %vm4087_vm1 = vcmp.lt.s32.totalorder %v4086_v4, 2  ;;  %vm3564_vm14 = vweird.f32 %v17257_v43 }
 0x4f3   : > { %v3570_v16 = vsel %vm3568_vm15, %v12761_v29, %v3569_v62  ;;  %vm3984_vm10 = vcmp.eq.s32.totalorder %v3982_v44, 0  ;;  %v3673_v12 = vxor.u32 2147483648, %v9701_v0  ;;  %v3573_v63 = vsel %vm3571_vm3, %v3572_v2, %v12846_v10 }
 0x4f4   : > { %vm13291_vm2 = vcmp.le.f32.partialorder %v17254_v39, 0.7853982  ;;  %v3986_v37 = vsel %vm3984_vm10, %v17252_v13, %v3985_v58  ;;  %vm3987_vm12 = vcmp.eq.s32.totalorder %v3982_v44, 2  ;;  %v9703_v14 = vpop.eup %9702  ;;  %v3677_v21 = vsel %vm3675_vm9, %v3676_v3, %v9701_v0 }
 0x4f5   : > { %vm3983_vm0 = vcmp.lt.s32.totalorder %v3982_v44, 2  ;;  %v3989_v48 = vsel %vm3987_vm12, %v3988_v50, %v12950_v5  ;;  %v3871_v17 = vsel %vm3786_vm7, %v3870_v1, %v17253_v51  ;;  %v9705_v9 = vpop.eup %9704  ;;  %v3674_v29 = vsel %vm3672_vm11, %v9699_v45, %v3673_v12 }
 0x4f6   : > { %v4092_v56 = vxor.u32 2147483648, %v9703_v14  ;;  %v3990_v6 = vsel %vm3983_vm0, %v3986_v37, %v3989_v48  ;;  %v3872_v10 = vsel %vm13291_vm2, %v12731_v61, %v3869_v57  ;;  %v13308_v30 = vpop.eup %9706  ;;  %vm4088_vm10 = vcmp.eq.s32.totalorder %v4086_v4, 0  ;;  %v9585_v48 = vld [vmem:[%s16736_s4 + $0x18] sm:$0xff]  }
 0x4f7   : > { %v4089_v36 = vxor.u32 2147483648, %v9705_v9  ;;  %vm4091_vm9 = vcmp.eq.s32.totalorder %v4086_v4, 2  ;;  %v3873_v5 = vsel %vm13291_vm2, 0, %v3871_v17  ;;  %v13312_v47 = vpop.eup %9708  ;;  %v3678_v40 = vsel %vm3671_vm13, %v3674_v29, %v3677_v21 }
 0x4f8   : > { %v4093_v49 = vsel %vm4091_vm9, %v4092_v56, %v9705_v9  ;;  %v3574_v22 = vsel %vm3567_vm8, %v3570_v16, %v3573_v63  ;;  %9710 = vcosq.f32 %v3872_v10  ;;  %v3991_v35 = vsel %vm3980_vm5, nan, %v3990_v6 }
 0x4f9   : > { %v4090_v25 = vsel %vm4088_vm10, %v9703_v14, %v4089_v36  ;;  %9712 = vsinq.f32 %v3872_v10  ;;  %v17258_v15 = vand.u32 2147483647, %v12884_v41  ;;  %v3877_v23 = vadd.s32 3, %v3873_v5 }
 0x4fa   : > { %v4094_v8 = vsel %vm4087_vm1, %v4090_v25, %v4093_v49  ;;  %v4286_v54 = vsub.s32 4, %v13106_v20  ;;  %vm17261_vm13 = vweird.f32 %v12389_v59  ;;  %vm17262_vm11 = vweird.f32 %v12625_v31 }
 0x4fb   : > { %vm13320_vm7 = vcmp.le.f32.partialorder %v17258_v15, 0.7853982  ;;  %v3679_v55 = vsel %vm17261_vm13, nan, %v3678_v40  ;;  %v4095_v26 = vsel %vm17262_vm11, nan, %v4094_v8  ;;  %v3769_v42 = vsel %vm12888_vm4, 0, %v13251_v27  ;;  %v9584_v27 = vld [vmem:[%s16736_s4 + $0x10] sm:$0xff]  }
 0x4fc   : > { %v4288_v33 = vsel %vm13320_vm7, %v12884_v41, %v4285_v24  ;;  %v9180_v32 = vpack.c.bf16 %v4095_v26, %v3679_v55  ;;  %v3575_v62 = vsel %vm3564_vm14, nan, %v3574_v22  ;;  %vm17264_vm5 = vcmp.lt.s32.totalorder %v12884_v41, 0 }
 0x4fd   : > { %9714 = vcosq.f32 %v4288_v33  ;;  %v4287_v2 = vsel %vm17264_vm5, %v4286_v54, %v13106_v20  ;;  %v9182_v24 = vpack.c.bf16 %v3991_v35, %v3575_v62  ;;  %v3878_v31 = vand.u32 3, %v3877_v23 }
 0x4fe   : > { %9716 = vsinq.f32 %v4288_v33  ;;  %v4289_v59 = vsel %vm13320_vm7, 0, %v4287_v2  ;;  %9181 = vmatprep.subr.bf16.mxu0 %v9180_v32  ;;  %v3773_v4 = vadd.s32 3, %v3769_v42  ;;  %v4185_v34 = vsel %vm13143_vm6, 0, %v13265_v52 }
 0x4ff   : > { %v4293_v28 = vadd.s32 3, %v4289_v59  ;;  %9183 = vmatpush1.bf16.msra.mxu0 %v9182_v24  ;;  %v4189_v44 = vadd.s32 3, %v4185_v34  ;;  %v3777_v13 = vxor.u32 2147483648, %v13040_v7  ;;  %vm3879_vm4 = vcmp.lt.s32.totalorder %v3878_v31, 2 }
 0x500   : > { %v3774_v20 = vand.u32 3, %v3773_v4  ;;  %vm3880_vm0 = vcmp.eq.s32.totalorder %v3878_v31, 0  ;;  %v3780_v51 = vxor.u32 2147483648, %v13035_v19  ;;  %v4193_v1 = vxor.u32 2147483648, %v13312_v47 }
 0x501   : > { %v4294_v58 = vand.u32 3, %v4293_v28  ;;  %vm17265_vm12 = vcmask 261120   ;;  %vm3883_vm8 = vcmp.eq.s32.totalorder %v3878_v31, 2  ;;  %vm4188_vm15 = vweird.f32 %v12819_v11  ;;  %v13379_v11 = vpop.permute.xlu1 %4507 }
 0x502   : > { %v9711_v50 = vpop.eup %9710  ;;  %8983 = vmatmul.mubr.msk.bf16.vlgmr.msra.gmra.mrb[16].mxu0 %vm17265_vm12, %v9584_v27  ;;  %v4190_v38 = vand.u32 3, %v4189_v44  ;;  %v17266_v52 = vmov 0   ;;  %vm3776_vm3 = vcmp.eq.s32.totalorder %v3774_v20, 0  ;;  %v4196_v0 = vxor.u32 2147483648, %v13308_v30 }
 0x503   : > { %v9713_v45 = vpop.eup %9712  ;;  %v3884_v39 = vxor.u32 2147483648, %v9711_v50  ;;  %4399 = vmatprep.mubr.bf16.mxu0 %v17266_v52  ;;  %vm4296_vm6 = vcmp.eq.s32.totalorder %v4294_v58, 0  ;;  %v3778_v16 = vsel %vm3776_vm3, %v13035_v19, %v3777_v13  ;;  %vm3779_vm2 = vcmp.eq.s32.totalorder %v3774_v20, 2 }
 0x504   : > { %v3881_v18 = vxor.u32 2147483648, %v9713_v45  ;;  %vm4192_vm1 = vcmp.eq.s32.totalorder %v4190_v38, 0  ;;  %v3781_v14 = vsel %vm3779_vm2, %v3780_v51, %v13040_v7  ;;  %vm4299_vm14 = vcmp.eq.s32.totalorder %v4294_v58, 2 }
 0x505   : > { %v3885_v43 = vsel %vm3883_vm8, %v3884_v39, %v9713_v45  ;;  %v4194_v21 = vsel %vm4192_vm1, %v13308_v30, %v4193_v1  ;;  %vm3775_vm10 = vcmp.lt.s32.totalorder %v3774_v20, 2  ;;  %vm4195_vm9 = vcmp.eq.s32.totalorder %v4190_v38, 2  ;;  %v13389_v54 = vpop.permute.xlu1 %4548 }
 0x506   : > { %v3882_v63 = vsel %vm3880_vm0, %v9711_v50, %v3881_v18  ;;  %vm4191_vm7 = vcmp.lt.s32.totalorder %v4190_v38, 2  ;;  %v4197_v29 = vsel %vm4195_vm9, %v4196_v0, %v13312_v47  ;;  %vm4295_vm13 = vcmp.lt.s32.totalorder %v4294_v58, 2  ;;  %vm17267_vm0 = vmmov %vm17265_vm12 }
 0x507   : > { %v9715_v3 = vpop.eup %9714  ;;  %v3886_v19 = vsel %vm3879_vm4, %v3882_v63, %v3885_v43  ;;  %v3782_v7 = vsel %vm3775_vm10, %v3778_v16, %v3781_v14  ;;  %v4198_v6 = vsel %vm4191_vm7, %v4194_v21, %v4197_v29  ;;  %vm3876_vm11 = vweird.f32 %v12731_v61  ;;  %vm17268_vm12 = vmmov %vm17267_vm0  ;;  %v13377_v61 = vpop.permute.xlu0 %4502 }
 0x508   : > { %v9717_v12 = vpop.eup %9716  ;;  %v4300_v37 = vxor.u32 2147483648, %v9715_v3  ;;  %vm4292_vm5 = vweird.f32 %v12884_v41  ;;  %v4199_v30 = vsel %vm4188_vm15, nan, %v4198_v6  ;;  %v3887_v36 = vsel %vm3876_vm11, nan, %v3886_v19  ;;  %vm17269_vm8 = vmmov %vm17267_vm0 }
 0x509   : > { %v4297_v17 = vxor.u32 2147483648, %v9717_v12  ;;  %vm3772_vm4 = vweird.f32 %v12498_v53  ;;  %v17274_v6 = vmov 2102212464  }
 0x50a   : > { %v4301_v9 = vsel %vm4299_vm14, %v4300_v37, %v9717_v12  ;;  %8984 = vmatmul.mubr.msk.bf16.gmra.mrb[20].mxu0 %vm17267_vm0, %v9585_v48  ;;  %v3783_v40 = vsel %vm3772_vm4, nan, %v3782_v7 }
 0x50b   : > { %v4298_v56 = vsel %vm4296_vm6, %v9715_v3, %v4297_v17  ;;  %6319 = vmatprep.mubr.bf16.mxu0 %v17266_v52  ;;  %v9190_v49 = vpack.c.bf16 %v4199_v30, %v3783_v40  ;;  %v13382_v25 = vpop.permute.xlu0 %4543  ;;  %v17272_v17 = vmov 2475754826   ;;  %v17275_v30 = vmov 920167782  }
 0x50c   : > { %v4302_v10 = vsel %vm4295_vm13, %v4298_v56, %v4301_v9  ;;  %v17273_v56 = vmov 2131351028  }
 0x50d   : > { %v4303_v5 = vsel %vm4292_vm5, nan, %v4302_v10 }
 0x50e   : > { %v9188_v47 = vpack.c.bf16 %v4303_v5, %v3887_v36 }
 0x510   : > { %9189 = vmatprep.subr.bf16.mxu1 %v9188_v47 }
 0x511   : > { %9191 = vmatpush1.bf16.msra.mxu1 %v9190_v49 }
 0x514   : > { %8985 = vmatmul.mubr.msk.bf16.vlgmr.msra.gmra.mrb[16].mxu1 %vm17268_vm12, %v9584_v27 }
 0x515   : > { %4484 = vmatprep.mubr.bf16.mxu1 %v17266_v52 }
 0x51c   : > { %8986 = vmatmul.mubr.msk.bf16.gmra.mrb[20].mxu1 %vm17269_vm8, %v9585_v48 }
 0x51d   : > { %6392 = vmatprep.mubr.bf16.mxu1 %v17266_v52 }
 0x5d5   : > { %v4391_v53 = vpop.f32.mrb[16].mxu0 }
 0x5d6   : > { %v4520_v41 = vmul.f32 %v13377_v61, %v4391_v53  ;;  %v4393_v22 = vpop.f32.mrb[17].mxu0 }
 0x5d7   : > { %v4521_v35 = vmul.f32 %v13377_v61, %v4393_v22  ;;  %v4395_v15 = vpop.f32.mrb[18].mxu0 }
 0x5d8   : > { %v13386_v46 = vadd.f32 %v13382_v25, %v4520_v41  ;;  %v4524_v8 = vmul.f32 %v13379_v11, %v4395_v15  ;;  %v4397_v23 = vpop.f32.mrb[19].mxu0 }
 0x5d9   : > { %v13392_v33 = vadd.f32 %v13382_v25, %v4521_v35  ;;  %v4525_v58 = vmul.f32 %v13379_v11, %v4397_v23  ;;  %v17276_v35 = vmov 1326507024  }
 0x5da   : > { %17270 = vst [vmem:[#allocation25_spill] sm:$0xff] %v13386_v46  ;;  %v4577_v55 = vand.u32 2147483647, %v13386_v46  ;;  %v4580_v26 = vand.u32 2139095040, %v13386_v46  ;;  %v13397_v57 = vadd.f32 %v13389_v54, %v4524_v8 }
 0x5db   : > { %v16884_v42 = vand.u32 2147483647, %v13392_v33  ;;  %v4684_v32 = vand.u32 2139095040, %v13392_v33  ;;  %v13415_v38 = vadd.f32 %v13389_v54, %v4525_v58 }
 0x5dc   : > { %17271 = vst [vmem:[#allocation15_spill] sm:$0xff] %v13397_v57  ;;  %v4581_v62 = vshrl.u32 %v4580_v26, 23  ;;  %v4584_v2 = vand.u32 8388607, %v4577_v55  ;;  %v16886_v31 = vand.u32 2147483647, %v13397_v57 }
 0x5dd   : > { %v4685_v24 = vshrl.u32 %v4684_v32, 23  ;;  %v4688_v59 = vand.u32 8388607, %v16884_v42  ;;  %v4996_v28 = vand.u32 2139095040, %v13397_v57  ;;  %v13412_v45 = vpop.f32.mrb[20].mxu0 }
 0x5de   : > { %v8995_v4 = vadd.s32 4294967169, %v4581_v62  ;;  %v4585_v20 = vor.u32 8388608, %v4584_v2  ;;  %v13410_v1 = vand.u32 8388607, %v16886_v31 }
 0x5df   : > { %v8999_v27 = vadd.s32 4294967169, %v4685_v24  ;;  %v4997_v34 = vshrl.u32 %v4996_v28, 23  ;;  %v4689_v13 = vor.u32 8388608, %v4688_v59 }
 0x5e0   : > { %v4587_v44 = vadd.s32 1, %v8995_v4  ;;  %v13417_v3 = vshll.u32 %v4585_v20, 8  ;;  %v5001_v63 = vor.u32 8388608, %v13410_v1 }
 0x5e1   : > { %v4691_v50 = vadd.s32 1, %v8999_v27  ;;  %v9011_v51 = vadd.s32 4294967169, %v4997_v34  ;;  %v13421_v12 = vshll.u32 %v4689_v13, 8 }
 0x5e2   : > { %vm4588_vm15 = vcmp.gt.s32.totalorder %v4587_v44, 0 }
 0x5e3   : > { %v4589_v39 = vsel %vm4588_vm15, %v4587_v44, 0  ;;  %vm4692_vm6 = vcmp.gt.s32.totalorder %v4691_v50, 0  ;;  %v13424_v37 = vadd.s32 1, %v9011_v51 }
 0x5e4   : > { %v4590_v18 = vshrl.u32 %v4589_v39, 5  ;;  %v4591_v0 = vand.u32 31, %v4589_v39  ;;  %v4693_v43 = vsel %vm4692_vm6, %v4691_v50, 0 }
 0x5e5   : > { %v13419_v16 = vshrl.u32 %v4693_v43, 5  ;;  %v4695_v9 = vand.u32 31, %v4693_v43  ;;  %vm5004_vm10 = vcmp.gt.s32.totalorder %v13424_v37, 0 }
 0x5e6   : > { %v4592_v21 = vsub.s32 32, %v4591_v0  ;;  %v4594_v48 = vshll.u32 %v17008_v60, %v4591_v0  ;;  %v4597_v19 = vshll.u32 %v17272_v17, %v4591_v0  ;;  %v4600_v7 = vshll.u32 %v17273_v56, %v4591_v0 }
 0x5e7   : > { %v13426_v14 = vpop.f32.mrb[16].mxu1  ;;  %v4603_v10 = vshll.u32 %v17274_v6, %v4591_v0  ;;  %v4606_v36 = vshll.u32 %v17275_v30, %v4591_v0  ;;  %vm4609_vm3 = vcmp.lt.s32.totalorder %v4590_v18, 1  ;;  %vm4610_vm2 = vcmp.lt.s32.totalorder %v4590_v18, 2 }
 0x5e8   : > { %v13430_v29 = vpop.f32.mrb[17].mxu1  ;;  %v4595_v47 = vshrl.u32 %v17272_v17, %v4592_v21  ;;  %v4598_v40 = vshrl.u32 %v17273_v56, %v4592_v21  ;;  %v4601_v49 = vshrl.u32 %v17274_v6, %v4592_v21  ;;  %v4593_v41 = vshrl.u32 %v17008_v60, %v4592_v21 }
 0x5e9   : > { %v13435_v5 = vpop.f32.mrb[18].mxu1  ;;  %v4604_v22 = vshrl.u32 %v17275_v30, %v4592_v21  ;;  %v4607_v15 = vshrl.u32 %v17276_v35, %v4592_v21  ;;  %vm4611_vm1 = vcmp.lt.s32.totalorder %v4590_v18, 3  ;;  %v4696_v32 = vsub.s32 32, %v4695_v9 }
 0x5ea   : > { %v13440_v53 = vpop.f32.mrb[19].mxu1  ;;  %v4596_v8 = vor.u32 %v4595_v47, %v4594_v48  ;;  %v4599_v23 = vor.u32 %v4598_v40, %v4597_v19  ;;  %v4602_v26 = vor.u32 %v4601_v49, %v4600_v7  ;;  %vm4612_vm14 = vcmp.lt.s32.totalorder %v4590_v18, 4 }
 0x5eb   : > { %v4605_v62 = vor.u32 %v4604_v22, %v4603_v10  ;;  %v4608_v2 = vor.u32 %v4607_v15, %v4606_v36  ;;  %v4698_v24 = vshll.u32 %v17008_v60, %v4695_v9  ;;  %v4701_v44 = vshll.u32 %v17272_v17, %v4695_v9 }
 0x5ec   : > { %v4613_v59 = vsel %vm4609_vm3, %v4593_v41, %v4596_v8  ;;  %v4614_v28 = vsel %vm4612_vm14, %v4602_v26, 2102212464  ;;  %v4617_v4 = vsel %vm4609_vm3, %v4596_v8, %v4599_v23  ;;  %v4621_v27 = vsel %vm4609_vm3, %v4599_v23, %v4602_v26 }
 0x5ed   : > { %v4615_v34 = vsel %vm4611_vm1, %v4599_v23, %v4614_v28  ;;  %v4618_v58 = vsel %vm4612_vm14, %v4605_v62, 920167782  ;;  %v4622_v20 = vsel %vm4612_vm14, %v4608_v2, 1326507024  ;;  %v4697_v51 = vshrl.u32 %v17008_v60, %v4696_v32 }
 0x5ee   : > { %v4619_v13 = vsel %vm4611_vm1, %v4602_v26, %v4618_v58  ;;  %v4623_v50 = vsel %vm4611_vm1, %v4605_v62, %v4622_v20  ;;  %v4699_v39 = vshrl.u32 %v17272_v17, %v4696_v32  ;;  %v4616_v0 = vsel %vm4610_vm2, %v4613_v59, %v4615_v34 }
 0x5ef   : > { %v4620_v43 = vsel %vm4610_vm2, %v4617_v4, %v4619_v13  ;;  %v4624_v21 = vsel %vm4610_vm2, %v4621_v27, %v4623_v50  ;;  %v4702_v48 = vshrl.u32 %v17273_v56, %v4696_v32  ;;  %v4704_v49 = vshll.u32 %v17273_v56, %v4695_v9  ;;  %v13484_v27 = vpop.f32.mrb[21].mxu0 }
 0x5f0   : > { %v13461_v19 = vmul.u32.u64.low %v13417_v3, %v4624_v21  ;;  %v13462_v7 = vmul.u32.u64.high %v13417_v3, %v4624_v21, %v13461_v19  ;;  %v13465_v10 = vmul.u32.u64.low %v13417_v3, %v4620_v43  ;;  %v13466_v36 = vmul.u32.u64.high %v13417_v3, %v4620_v43, %v13465_v10 }
 0x5f1   : > { %v4700_v47 = vor.u32 %v4699_v39, %v4698_v24  ;;  %v4703_v40 = vor.u32 %v4702_v48, %v4701_v44  ;;  %v4705_v41 = vshrl.u32 %v17274_v6, %v4696_v32  ;;  %v4632_v18 = vmul.u32 %v13417_v3, %v4616_v0 }
 0x5f2   : > { %v4707_v22 = vshll.u32 %v17274_v6, %v4695_v9  ;;  %v4708_v15 = vshrl.u32 %v17275_v30, %v4696_v32  ;;  %v4711_v8 = vshrl.u32 %v17276_v35, %v4696_v32  ;;  %v4710_v26 = vshll.u32 %v17275_v30, %v4695_v9 }
 0x5f3   : > { %v4706_v23 = vor.u32 %v4705_v41, %v4704_v49  ;;  %vm4713_vm9 = vcmp.lt.s32.totalorder %v13419_v16, 1  ;;  %vm4714_vm7 = vcmp.lt.s32.totalorder %v13419_v16, 2  ;;  %vm4634_vm13 = vc.u32 %v13462_v7, %v13465_v10 }
 0x5f4   : > { %v4635_v62 = vadd.s32 1, %v13466_v36  ;;  %v4709_v2 = vor.u32 %v4708_v15, %v4707_v22  ;;  %vm4715_vm11 = vcmp.lt.s32.totalorder %v13419_v16, 3  ;;  %v4712_v3 = vor.u32 %v4711_v8, %v4710_v26 }
 0x5f5   : > { %vm4716_vm5 = vcmp.lt.s32.totalorder %v13419_v16, 4  ;;  %v4717_v24 = vsel %vm4713_vm9, %v4697_v51, %v4700_v47  ;;  %v4721_v32 = vsel %vm4713_vm9, %v4700_v47, %v4703_v40  ;;  %v4725_v4 = vsel %vm4713_vm9, %v4703_v40, %v4706_v23 }
 0x5f6   : > { %v4636_v59 = vsel %vm4634_vm13, %v4635_v62, %v13466_v36  ;;  %v4718_v9 = vsel %vm4716_vm5, %v4706_v23, 2102212464  ;;  %v4722_v28 = vsel %vm4716_vm5, %v4709_v2, 920167782  ;;  %v4726_v44 = vsel %vm4716_vm5, %v4712_v3, 1326507024 }
 0x5f7   : > { %v4637_v34 = vadd.s32 %v4636_v59, %v4632_v18  ;;  %v4719_v58 = vsel %vm4715_vm11, %v4703_v40, %v4718_v9  ;;  %v4723_v20 = vsel %vm4715_vm11, %v4706_v23, %v4722_v28  ;;  %v4727_v51 = vsel %vm4715_vm11, %v4709_v2, %v4726_v44 }
 0x5f8   : > { %v4720_v13 = vsel %vm4714_vm7, %v4717_v24, %v4719_v58  ;;  %v4724_v50 = vsel %vm4714_vm7, %v4721_v32, %v4723_v20  ;;  %v5005_v39 = vsel %vm5004_vm10, %v13424_v37, 0  ;;  %v4728_v43 = vsel %vm4714_vm7, %v4725_v4, %v4727_v51 }
 0x5f9   : > { %v4638_v0 = vadd.s32 536870912, %v4637_v34  ;;  %v13502_v21 = vmul.u32.u64.low %v13421_v12, %v4724_v50  ;;  %v13503_v48 = vmul.u32.u64.high %v13421_v12, %v4724_v50, %v13502_v21  ;;  %v13510_v47 = vshrl.u32 %v5005_v39, 5 }
 0x5fa   : > { %v13507_v19 = vmul.u32.u64.low %v13421_v12, %v4728_v43  ;;  %v13508_v36 = vmul.u32.u64.high %v13421_v12, %v4728_v43, %v13507_v19  ;;  %v5007_v49 = vand.u32 31, %v5005_v39  ;;  %v4736_v37 = vmul.u32 %v13421_v12, %v4720_v13 }
 0x5fb   : > { %v13512_v40 = vshrl.u32 %v4638_v0, 30  ;;  %v13517_v16 = vshll.u32 %v5001_v63, 8  ;;  %v4522_v41 = vmul.f32 %v13377_v61, %v13426_v14  ;;  %v5100_v18 = vand.u32 2139095040, %v13415_v38 }
 0x5fc   : > { %v4739_v15 = vadd.s32 1, %v13503_v48  ;;  %v5008_v8 = vsub.s32 32, %v5007_v49  ;;  %vm5025_vm0 = vcmp.lt.s32.totalorder %v13510_v47, 1  ;;  %vm4738_vm4 = vc.u32 %v13508_v36, %v13502_v21 }
 0x5fd   : > { %v4640_v22 = vshll.u32 %v13512_v40, 30  ;;  %v5010_v12 = vshll.u32 %v17008_v60, %v5007_v49  ;;  %vm5026_vm12 = vcmp.lt.s32.totalorder %v13510_v47, 2  ;;  %vm5027_vm8 = vcmp.lt.s32.totalorder %v13510_v47, 3 }
 0x5fe   : > { %v4740_v63 = vsel %vm4738_vm4, %v4739_v15, %v13503_v48  ;;  %v5009_v14 = vshrl.u32 %v17008_v60, %v5008_v8  ;;  %v5013_v23 = vshll.u32 %v17272_v17, %v5007_v49  ;;  %v5011_v62 = vshrl.u32 %v17272_v17, %v5008_v8 }
 0x5ff   : > { %v13530_v1 = vsub.s32 %v4637_v34, %v4640_v22  ;;  %v4741_v26 = vadd.s32 %v4740_v63, %v4736_v37  ;;  %v5014_v2 = vshrl.u32 %v17273_v56, %v5008_v8  ;;  %v5016_v3 = vshll.u32 %v17273_v56, %v5007_v49 }
 0x600   : > { %v5017_v32 = vshrl.u32 %v17274_v6, %v5008_v8  ;;  %v5019_v59 = vshll.u32 %v17274_v6, %v5007_v49  ;;  %v5020_v9 = vshrl.u32 %v17275_v30, %v5008_v8  ;;  %v5012_v4 = vor.u32 %v5011_v62, %v5010_v12 }
 0x601   : > { %v4643_v24 = vsub.s32 0, %v13530_v1  ;;  %v4742_v28 = vadd.s32 536870912, %v4741_v26  ;;  %v5015_v34 = vor.u32 %v5014_v2, %v5013_v23  ;;  %v5022_v58 = vshll.u32 %v17275_v30, %v5007_v49 }
 0x602   : > { %v5018_v44 = vor.u32 %v5017_v32, %v5016_v3  ;;  %v5021_v13 = vor.u32 %v5020_v9, %v5019_v59  ;;  %v5023_v50 = vshrl.u32 %v17276_v35, %v5008_v8  ;;  %vm5028_vm15 = vcmp.lt.s32.totalorder %v13510_v47, 4 }
 0x603   : > { %v8996_v20 = vmin.u32 %v4643_v24, %v13530_v1  ;;  %v13545_v51 = vshrl.u32 %v4742_v28, 30  ;;  %v5029_v39 = vsel %vm5025_vm0, %v5009_v14, %v5012_v4  ;;  %v5033_v0 = vsel %vm5025_vm0, %v5012_v4, %v5015_v34 }
 0x604   : > { %v5024_v48 = vor.u32 %v5023_v50, %v5022_v58  ;;  %v5030_v19 = vsel %vm5028_vm15, %v5018_v44, 2102212464  ;;  %v5034_v49 = vsel %vm5028_vm15, %v5021_v13, 920167782  ;;  %v5037_v15 = vsel %vm5025_vm0, %v5015_v34, %v5018_v44 }
 0x605   : > { %v4645_v43 = vclz %v8996_v20  ;;  %v4744_v37 = vshll.u32 %v13545_v51, 30  ;;  %v5035_v22 = vsel %vm5027_vm8, %v5018_v44, %v5034_v49  ;;  %v13558_v8 = vadd.f32 %v13382_v25, %v4522_v41 }
 0x606   : > { %v5031_v63 = vsel %vm5027_vm8, %v5015_v34, %v5030_v19  ;;  %v5036_v14 = vsel %vm5026_vm12, %v5033_v0, %v5035_v22  ;;  %v5038_v23 = vsel %vm5028_vm15, %v5024_v48, 1326507024  ;;  %v5101_v32 = vshrl.u32 %v5100_v18, 23 }
 0x607   : > { %17277 = vst [vmem:[#allocation32_spill] sm:$0xff] %v13558_v8  ;;  %v8997_v12 = vadd.s32 4294967294, %v4645_v43  ;;  %v13564_v62 = vsub.s32 %v4741_v26, %v4744_v37  ;;  %v5039_v2 = vsel %vm5027_vm8, %v5021_v13, %v5038_v23  ;;  %v5032_v34 = vsel %vm5026_vm12, %v5029_v39, %v5031_v63  ;;  %v13586_v43 = vpop.f32.mrb[22].mxu0 }
 0x608   : > { %v13569_v3 = vmul.u32.u64.low %v13517_v16, %v5036_v14  ;;  %v13570_v24 = vmul.u32.u64.high %v13517_v16, %v5036_v14, %v13569_v3  ;;  %v5040_v41 = vsel %vm5026_vm12, %v5037_v15, %v5039_v2  ;;  %v4788_v20 = vand.u32 2139095040, %v13558_v8 }
 0x609   : > { %vm8998_vm6 = vcmp.lt.s32.totalorder %v8997_v12, 0  ;;  %v4747_v9 = vsub.s32 0, %v13564_v62  ;;  %v13576_v28 = vmul.u32.u64.low %v13517_v16, %v5040_v41  ;;  %v13577_v4 = vmul.u32.u64.high %v13517_v16, %v5040_v41, %v13576_v28 }
 0x60a   : > { %v4648_v59 = vsel %vm8998_vm6, 0, %v8997_v12  ;;  %v5051_v58 = vadd.s32 1, %v13570_v24  ;;  %v9015_v13 = vadd.s32 4294967169, %v5101_v32  ;;  %v5048_v18 = vmul.u32 %v13517_v16, %v5032_v34 }
 0x60b   : > { %v4653_v26 = vsub.s32 4294967266, %v4648_v59  ;;  %v9000_v44 = vmin.u32 %v4747_v9, %v13564_v62  ;;  %v4649_v50 = vsub.s32 32, %v4648_v59  ;;  %vm5050_vm3 = vc.u32 %v13577_v4, %v13569_v3 }
 0x60c   : > { %v4789_v0 = vshrl.u32 %v4788_v20, 23  ;;  %v5052_v19 = vsel %vm5050_vm3, %v5051_v58, %v13570_v24  ;;  %v16885_v47 = vand.u32 2147483647, %v13558_v8  ;;  %v4633_v39 = vadd.s32 %v13465_v10, %v13462_v7 }
 0x60d   : > { %v4654_v48 = vadd.s32 127, %v4653_v26  ;;  %v5053_v49 = vadd.s32 %v5052_v19, %v5048_v18  ;;  %v4749_v22 = vclz %v9000_v44  ;;  %v16883_v15 = vand.u32 2147483647, %v13415_v38 }
 0x60e   : > { %v9003_v37 = vadd.s32 4294967169, %v4789_v0  ;;  %v5107_v12 = vadd.s32 1, %v9015_v13  ;;  %v4651_v16 = vshrl.u32 %v4633_v39, %v4649_v50  ;;  %v4792_v2 = vand.u32 8388607, %v16885_v47 }
 0x60f   : > { %v5054_v63 = vadd.s32 536870912, %v5053_v49  ;;  %v4655_v23 = vshll.u32 %v4654_v48, 23  ;;  %v4650_v24 = vshll.u32 %v13530_v1, %v4648_v59  ;;  %v9001_v32 = vadd.s32 4294967294, %v4749_v22 }
 0x610   : > { %v4795_v14 = vadd.s32 1, %v9003_v37  ;;  %v13600_v7 = vand.u32 8388607, %v16883_v15  ;;  %vm5108_vm1 = vcmp.gt.s32.totalorder %v5107_v12, 0  ;;  %v4793_v26 = vor.u32 8388608, %v4792_v2 }
 0x611   : > { %v13596_v41 = vshrl.u32 %v5054_v63, 30  ;;  %v4652_v10 = vor.u32 %v4651_v16, %v4650_v24  ;;  %v4656_v28 = vor.u32 4788187, %v4655_v23  ;;  %v5109_v20 = vsel %vm5108_vm1, %v5107_v12, 0  ;;  %v13630_v24 = vpop.f32.mrb[20].mxu1 }
 0x612   : > { %vm4796_vm2 = vcmp.gt.s32.totalorder %v4795_v14, 0  ;;  %vm9002_vm14 = vcmp.lt.s32.totalorder %v9001_v32, 0  ;;  %v13609_v50 = vadd.s32 %v13502_v21, %v13508_v36  ;;  %v13612_v18 = vadd.s32 %v13569_v3, %v13577_v4 }
 0x613   : > { %v5056_v9 = vshll.u32 %v13596_v41, 30  ;;  %v4797_v34 = vsel %vm4796_vm2, %v4795_v14, 0  ;;  %v4659_v13 = vcvt.s32.f32 %v4652_v10  ;;  %v4657_v48 = vand.u32 2147483647, %v4656_v28 }
 0x614   : > { %v4799_v59 = vand.u32 31, %v4797_v34  ;;  %v13615_v39 = vshll.u32 %v4793_v26, 8  ;;  %v13619_v37 = vsel %vm9002_vm14, 0, %v9001_v32  ;;  %v4798_v14 = vshrl.u32 %v4797_v34, 5 }
 0x615   : > { %v13603_v58 = vsub.s32 %v5053_v49, %v5056_v9  ;;  %v13617_v49 = vand.u32 31, %v5109_v20  ;;  %v13635_v47 = vmul.f32 %v4659_v13, %v4657_v48  ;;  %v13639_v31 = vshrl.u32 %v5109_v20, 5 }
 0x616   : > { %v4800_v19 = vsub.s32 32, %v4799_v59  ;;  %v4802_v12 = vshll.u32 %v17008_v60, %v4799_v59  ;;  %v4805_v21 = vshll.u32 %v17272_v17, %v4799_v59  ;;  %v4808_v4 = vshll.u32 %v17273_v56, %v4799_v59 }
 0x617   : > { %v5059_v0 = vsub.s32 0, %v13603_v58  ;;  %v4811_v23 = vshll.u32 %v17274_v6, %v4799_v59  ;;  %v5112_v28 = vsub.s32 32, %v13617_v49  ;;  %v4814_v15 = vshll.u32 %v17275_v30, %v4799_v59 }
 0x618   : > { %v4803_v36 = vshrl.u32 %v17272_v17, %v4800_v19  ;;  %v4806_v3 = vshrl.u32 %v17273_v56, %v4800_v19  ;;  %v4809_v16 = vshrl.u32 %v17274_v6, %v4800_v19  ;;  %v4812_v2 = vshrl.u32 %v17275_v30, %v4800_v19 }
 0x619   : > { %v9012_v22 = vmin.u32 %v5059_v0, %v13603_v58  ;;  %v4815_v42 = vshrl.u32 %v17276_v35, %v4800_v19  ;;  %vm4817_vm9 = vcmp.lt.s32.totalorder %v4798_v14, 1  ;;  %vm4820_vm7 = vcmp.lt.s32.totalorder %v4798_v14, 4 }
 0x61a   : > { %v4804_v32 = vor.u32 %v4803_v36, %v4802_v12  ;;  %v4807_v10 = vor.u32 %v4806_v3, %v4805_v21  ;;  %v4810_v9 = vor.u32 %v4809_v16, %v4808_v4  ;;  %v4813_v0 = vor.u32 %v4812_v2, %v4811_v23 }
 0x61b   : > { %v5061_v63 = vclz %v9012_v22  ;;  %v4757_v22 = vsub.s32 4294967266, %v13619_v37  ;;  %v4816_v12 = vor.u32 %v4815_v42, %v4814_v15  ;;  %v5114_v59 = vshll.u32 %v17008_v60, %v13617_v49 }
 0x61c   : > { %v4822_v21 = vsel %vm4820_vm7, %v4810_v9, 2102212464  ;;  %v4825_v36 = vsel %vm4817_vm9, %v4804_v32, %v4807_v10  ;;  %v4826_v3 = vsel %vm4820_vm7, %v4813_v0, 920167782  ;;  %v4801_v13 = vshrl.u32 %v17008_v60, %v4800_v19 }
 0x61d   : > { %v9013_v26 = vadd.s32 4294967294, %v5061_v63  ;;  %vm4819_vm13 = vcmp.lt.s32.totalorder %v4798_v14, 3  ;;  %v5115_v48 = vshrl.u32 %v17272_v17, %v5112_v28  ;;  %vm4818_vm11 = vcmp.lt.s32.totalorder %v4798_v14, 2 }
 0x61e   : > { %v4827_v20 = vsel %vm4819_vm13, %v4810_v9, %v4826_v3  ;;  %v4829_v16 = vsel %vm4817_vm9, %v4807_v10, %v4810_v9  ;;  %v4830_v63 = vsel %vm4820_vm7, %v4816_v12, 1326507024  ;;  %v4821_v42 = vsel %vm4817_vm9, %v4801_v13, %v4804_v32 }
 0x61f   : > { %vm9014_vm10 = vcmp.lt.s32.totalorder %v9013_v26, 0  ;;  %v4823_v15 = vsel %vm4819_vm13, %v4807_v10, %v4822_v21  ;;  %v4828_v23 = vsel %vm4818_vm11, %v4825_v36, %v4827_v20  ;;  %v4831_v2 = vsel %vm4819_vm13, %v4813_v0, %v4830_v63 }
 0x620   : > { %v13643_v4 = vsel %vm9014_vm10, 0, %v9013_v26  ;;  %vm5129_vm5 = vcmp.lt.s32.totalorder %v13639_v31, 1  ;;  %v4832_v26 = vsel %vm4818_vm11, %v4829_v16, %v4831_v2  ;;  %v13657_v9 = vadd.s32 127, %v4757_v22 }
 0x621   : > { %v5069_v1 = vsub.s32 4294967266, %v13643_v4  ;;  %v13652_v19 = vmul.u32.u64.low %v13615_v39, %v4828_v23  ;;  %v13653_v34 = vmul.u32.u64.high %v13615_v39, %v4828_v23, %v13652_v19  ;;  %vm5130_vm0 = vcmp.lt.s32.totalorder %v13639_v31, 2 }
 0x622   : > { %v13660_v32 = vmul.u32.u64.low %v13615_v39, %v4832_v26  ;;  %v13661_v10 = vmul.u32.u64.high %v13615_v39, %v4832_v26, %v13660_v32  ;;  %v4824_v0 = vsel %vm4818_vm11, %v4821_v42, %v4823_v15  ;;  %v5117_v12 = vshll.u32 %v17272_v17, %v13617_v49 }
 0x623   : > { %v5118_v21 = vshrl.u32 %v17273_v56, %v5112_v28  ;;  %v5121_v36 = vshrl.u32 %v17274_v6, %v5112_v28  ;;  %v5065_v13 = vsub.s32 32, %v13643_v4  ;;  %v5120_v22 = vshll.u32 %v17273_v56, %v13617_v49 }
 0x624   : > { %v5123_v20 = vshll.u32 %v17274_v6, %v13617_v49  ;;  %v5124_v16 = vshrl.u32 %v17275_v30, %v5112_v28  ;;  %v5070_v63 = vadd.s32 127, %v5069_v1  ;;  %v4843_v14 = vadd.s32 1, %v13653_v34 }
 0x625   : > { %v5116_v42 = vor.u32 %v5115_v48, %v5114_v59  ;;  %v5119_v15 = vor.u32 %v5118_v21, %v5117_v12  ;;  %v4840_v23 = vmul.u32 %v13615_v39, %v4824_v0  ;;  %vm4842_vm4 = vc.u32 %v13661_v10, %v13652_v19 }
 0x626   : > { %v5122_v2 = vor.u32 %v5121_v36, %v5120_v22  ;;  %v5125_v26 = vor.u32 %v5124_v16, %v5123_v20  ;;  %v4844_v32 = vsel %vm4842_vm4, %v4843_v14, %v13653_v34  ;;  %v5113_v3 = vshrl.u32 %v17008_v60, %v5112_v28 }
 0x627   : > { %v5126_v44 = vshll.u32 %v17275_v30, %v13617_v49  ;;  %v5127_v1 = vshrl.u32 %v17276_v35, %v5112_v28  ;;  %vm4579_vm12 = vcmp.lt.s32.totalorder %v13386_v46, 0  ;;  %v4759_v59 = vshll.u32 %v13657_v9, 23 }
 0x628   : > { %v5067_v39 = vshrl.u32 %v13612_v18, %v5065_v13  ;;  %v4845_v48 = vadd.s32 %v4844_v32, %v4840_v23  ;;  %vm5132_vm8 = vcmp.lt.s32.totalorder %v13639_v31, 4  ;;  %vm5131_vm15 = vcmp.lt.s32.totalorder %v13639_v31, 3 }
 0x629   : > { %v5128_v0 = vor.u32 %v5127_v1, %v5126_v44  ;;  %v5137_v34 = vsel %vm5129_vm5, %v5116_v42, %v5119_v15  ;;  %v5138_v12 = vsel %vm5132_vm8, %v5125_v26, 920167782  ;;  %v5071_v21 = vshll.u32 %v5070_v63, 23 }
 0x62a   : > { %v4846_v49 = vadd.s32 536870912, %v4845_v48  ;;  %v5134_v36 = vsel %vm5132_vm8, %v5122_v2, 2102212464  ;;  %v5139_v28 = vsel %vm5131_vm15, %v5122_v2, %v5138_v12  ;;  %vm13695_vm6 = vcmp.le.f32.partialorder %v4577_v55, 0.7853982  ;;  %v13735_v12 = vpop.f32.mrb[23].mxu0 }
 0x62b   : > { %v17278_v18 = vmov 0  ;;  %v5140_v44 = vsel %vm5130_vm0, %v5137_v34, %v5139_v28  ;;  %v5141_v9 = vsel %vm5129_vm5, %v5119_v15, %v5122_v2  ;;  %v5142_v13 = vsel %vm5132_vm8, %v5128_v0, 1326507024 }
 0x62c   : > { %v17279_v18 = vsel %vm13695_vm6, 4294967295, %v17278_v18  ;;  %v17281_v22 = vor.u32 8388608, %v13600_v7  ;;  %v13705_v16 = vshrl.u32 %v4846_v49, 30  ;;  %v5133_v63 = vsel %vm5129_vm5, %v5113_v3, %v5116_v42 }
 0x62d   : > { %17280 = vst [vmem:[#allocation21_spill] sm:$0xff] %v17279_v18  ;;  %v5143_v55 = vsel %vm5131_vm15, %v5125_v26, %v5142_v13  ;;  %v4523_v14 = vmul.f32 %v13377_v61, %v13430_v29  ;;  %v5135_v23 = vsel %vm5131_vm15, %v5119_v15, %v5134_v36  ;;  %v4754_v1 = vshll.u32 %v13564_v62, %v13619_v37 }
 0x62e   : > { %v5145_v20 = vshll.u32 %v17281_v22, 8  ;;  %v5144_v2 = vsel %vm5130_vm0, %v5141_v9, %v5143_v55  ;;  %v5066_v3 = vshll.u32 %v13603_v58, %v13643_v4  ;;  %v5072_v42 = vor.u32 4788187, %v5071_v21 }
 0x62f   : > { %v4848_v26 = vshll.u32 %v13705_v16, 30  ;;  %v17282_v61 = vsub.s32 32, %v13619_v37  ;;  %v13733_v34 = vadd.f32 %v13382_v25, %v4523_v14  ;;  %v5136_v58 = vsel %vm5130_vm0, %v5133_v63, %v5135_v23 }
 0x630   : > { %v13717_v32 = vmul.u32.u64.low %v5145_v20, %v5140_v44  ;;  %v13718_v7 = vmul.u32.u64.high %v5145_v20, %v5140_v44, %v13717_v32  ;;  %v13729_v15 = vmul.u32.u64.low %v5145_v20, %v5144_v2  ;;  %v13730_v0 = vmul.u32.u64.high %v5145_v20, %v5144_v2, %v13729_v15 }
 0x631   : > { %v4755_v29 = vshrl.u32 %v13609_v50, %v17282_v61  ;;  %17283 = vst [vmem:[#allocation16_spill] sm:$0xff] %v13733_v34  ;;  %v5068_v49 = vor.u32 %v5067_v39, %v5066_v3  ;;  %v13737_v62 = vsub.s32 %v4845_v48, %v4848_v26  ;;  %v4526_v4 = vmul.f32 %v13379_v11, %v13435_v5 }
 0x632   : > { %v17284_v50 = vxor.u32 2147483648, %v13635_v47  ;;  %v4760_v21 = vor.u32 4788187, %v4759_v59  ;;  %v5155_v25 = vadd.s32 1, %v13718_v7  ;;  %v4892_v36 = vand.u32 2139095040, %v13733_v34 }
 0x633   : > { %v5073_v39 = vand.u32 2147483647, %v5072_v42  ;;  %v5079_v48 = vsub.s32 4, %v13596_v41  ;;  %v4851_v31 = vsub.s32 0, %v13737_v62  ;;  %v13753_v28 = vadd.f32 %v13389_v54, %v4526_v4 }
 0x634   : > { %v4662_v37 = vsel %vm4579_vm12, %v17284_v50, %v13635_v47  ;;  %v4756_v5 = vor.u32 %v4755_v29, %v4754_v1  ;;  %v5152_v44 = vmul.u32 %v5145_v20, %v5136_v58  ;;  %vm5154_vm3 = vc.u32 %v13730_v0, %v13717_v32  ;;  %v13815_v50 = vpop.f32.mrb[21].mxu1 }
 0x635   : > { %17285 = vst [vmem:[#allocation19_spill] sm:$0xff] %v13753_v28  ;;  %v4893_v9 = vshrl.u32 %v4892_v36, 23  ;;  %v13760_v47 = vsel %vm13695_vm6, %v13386_v46, %v4662_v37  ;;  %v5075_v59 = vcvt.s32.f32 %v5068_v49  ;;  %v9004_v13 = vmin.u32 %v4851_v31, %v13737_v62 }
 0x636   : > { %v5156_v22 = vsel %vm5154_vm3, %v5155_v25, %v13718_v7  ;;  %v4761_v63 = vand.u32 2147483647, %v4760_v21  ;;  %v5204_v23 = vand.u32 2139095040, %v13753_v28  ;;  %v17286_v20 = vsub.s32 4, %v13512_v40 }
 0x637   : > { %v5157_v55 = vadd.s32 %v5156_v22, %v5152_v44  ;;  %v9007_v14 = vadd.s32 4294967169, %v4893_v9  ;;  %vm4995_vm2 = vcmp.lt.s32.totalorder %v13397_v57, 0  ;;  %v13773_v1 = vmul.f32 %v5075_v59, %v5073_v39 }
 0x638   : > { %v13770_v2 = vsel %vm4579_vm12, %v17286_v20, %v13512_v40  ;;  %v4853_v3 = vclz %v9004_v13  ;;  %v4763_v42 = vcvt.s32.f32 %v4756_v5  ;;  %v16887_v7 = vand.u32 2147483647, %v13733_v34 }
 0x639   : > { %17287 = vst [vmem:[#allocation22_spill] sm:$0xff] %v13770_v2  ;;  %v5158_v26 = vadd.s32 536870912, %v5157_v55  ;;  %v4899_v61 = vadd.s32 1, %v9007_v14  ;;  %9718 = vcosq.f32 %v13760_v47  ;;  %v13780_v29 = vsel %vm4995_vm2, %v5079_v48, %v13596_v41 }
 0x63a   : > { %17288 = vst [vmem:[#allocation28_spill] sm:$0xff] %v13780_v29  ;;  %v9005_v15 = vadd.s32 4294967294, %v4853_v3  ;;  %v5205_v40 = vshrl.u32 %v5204_v23, 23  ;;  %v13782_v49 = vmul.f32 %v4763_v42, %v4761_v63  ;;  %v4841_v58 = vadd.s32 %v13652_v19, %v13661_v10 }
 0x63b   : > { %v13786_v4 = vshrl.u32 %v5158_v26, 30  ;;  %vm4900_vm1 = vcmp.gt.s32.totalorder %v4899_v61, 0  ;;  %v4527_v21 = vmul.f32 %v13379_v11, %v13440_v53  ;;  %v4896_v36 = vand.u32 8388607, %v16887_v7 }
 0x63c   : > { %vm9006_vm14 = vcmp.lt.s32.totalorder %v9005_v15, 0  ;;  %v4901_v37 = vsel %vm4900_vm1, %v4899_v61, 0  ;;  %v16888_v19 = vand.u32 2147483647, %v13753_v28  ;;  %v9019_v10 = vadd.s32 4294967169, %v5205_v40 }
 0x63d   : > { %17289 = vst [vmem:[#allocation10_spill] sm:$0xff] %v13786_v4  ;;  %v4856_v25 = vsel %vm9006_vm14, 0, %v9005_v15  ;;  %v5160_v41 = vshll.u32 %v13786_v4, 30  ;;  %v4903_v39 = vand.u32 31, %v4901_v37  ;;  %v4902_v61 = vshrl.u32 %v4901_v37, 5 }
 0x63e   : > { %v4857_v48 = vsub.s32 32, %v4856_v25  ;;  %v4861_v31 = vsub.s32 4294967266, %v4856_v25  ;;  %v4858_v5 = vshll.u32 %v13737_v62, %v4856_v25  ;;  %v13809_v40 = vadd.f32 %v13389_v54, %v4527_v21 }
 0x63f   : > { %v13796_v44 = vsub.s32 %v5157_v55, %v5160_v41  ;;  %v4904_v9 = vsub.s32 32, %v4903_v39  ;;  %v4906_v59 = vshll.u32 %v17008_v60, %v4903_v39  ;;  %v4909_v13 = vshll.u32 %v17272_v17, %v4903_v39 }
 0x640   : > { %v4859_v11 = vshrl.u32 %v4841_v58, %v4857_v48  ;;  %v4862_v53 = vadd.s32 127, %v4861_v31  ;;  %v4912_v22 = vshll.u32 %v17273_v56, %v4903_v39  ;;  %v4915_v20 = vshll.u32 %v17274_v6, %v4903_v39 }
 0x641   : > { %v5163_v63 = vsub.s32 0, %v13796_v44  ;;  %v4907_v14 = vshrl.u32 %v17272_v17, %v4904_v9  ;;  %v4910_v23 = vshrl.u32 %v17273_v56, %v4904_v9  ;;  %v4913_v3 = vshrl.u32 %v17274_v6, %v4904_v9 }
 0x642   : > { %v4860_v62 = vor.u32 %v4859_v11, %v4858_v5  ;;  %v4863_v55 = vshll.u32 %v4862_v53, 23  ;;  %v4916_v42 = vshrl.u32 %v17275_v30, %v4904_v9  ;;  %v4897_v5 = vor.u32 8388608, %v4896_v36 }
 0x643   : > { %v9016_v26 = vmin.u32 %v5163_v63, %v13796_v44  ;;  %v4908_v15 = vor.u32 %v4907_v14, %v4906_v59  ;;  %v13811_v58 = vpop.eup %9718  ;;  %v4911_v41 = vor.u32 %v4910_v23, %v4909_v13  ;;  %v4914_v48 = vor.u32 %v4913_v3, %v4912_v22 }
 0x644   : > { %17290 = vst [vmem:[#allocation11_spill] sm:$0xff] %v13811_v58  ;;  %v4864_v25 = vor.u32 4788187, %v4863_v55  ;;  %v4917_v31 = vor.u32 %v4916_v42, %v4915_v20  ;;  %v4918_v11 = vshll.u32 %v17275_v30, %v4903_v39  ;;  %v4919_v53 = vshrl.u32 %v17276_v35, %v4904_v9 }
 0x645   : > { %v5165_v7 = vclz %v9016_v26  ;;  %v4867_v37 = vcvt.s32.f32 %v4860_v62  ;;  %v5208_v54 = vand.u32 8388607, %v16888_v19  ;;  %v5211_v21 = vadd.s32 1, %v9019_v10 }
 0x646   : > { %v4865_v63 = vand.u32 2147483647, %v4864_v25  ;;  %v17291_v59 = vand.u32 2147483647, %v13397_v57  ;;  %v17292_v13 = vmov 0  ;;  %v4920_v36 = vor.u32 %v4919_v53, %v4918_v11 }
 0x647   : > { %v9017_v22 = vadd.s32 4294967294, %v5165_v7  ;;  %vm4921_vm9 = vcmp.lt.s32.totalorder %v4902_v61, 1  ;;  %vm4924_vm7 = vcmp.lt.s32.totalorder %v4902_v61, 4  ;;  %vm4923_vm13 = vcmp.lt.s32.totalorder %v4902_v61, 3 }
 0x648   : > { %vm13821_vm10 = vcmp.le.f32.partialorder %v17291_v59, 0.7853982  ;;  %v4929_v39 = vsel %vm4921_vm9, %v4908_v15, %v4911_v41  ;;  %v4930_v14 = vsel %vm4924_vm7, %v4917_v31, 920167782  ;;  %v4933_v23 = vsel %vm4921_vm9, %v4911_v41, %v4914_v48 }
 0x649   : > { %v17293_v13 = vsel %vm13821_vm10, 4294967295, %v17292_v13  ;;  %vm4787_vm11 = vcmp.lt.s32.totalorder %v13558_v8, 0  ;;  %v4868_v20 = vmul.f32 %v4867_v37, %v4865_v63  ;;  %v4926_v10 = vsel %vm4924_vm7, %v4914_v48, 2102212464 }
 0x64a   : > { %17294 = vst [vmem:[#allocation26_spill] sm:$0xff] %v17293_v13  ;;  %v4931_v62 = vsel %vm4923_vm13, %v4914_v48, %v4930_v14  ;;  %v4934_v55 = vsel %vm4924_vm7, %v4920_v36, 1326507024  ;;  %v4905_v3 = vshrl.u32 %v17008_v60, %v4904_v9  ;;  %vm4922_vm5 = vcmp.lt.s32.totalorder %v4902_v61, 2 }
 0x64b   : > { %v4935_v7 = vsel %vm4923_vm13, %v4917_v31, %v4934_v55  ;;  %v4937_v42 = vshll.u32 %v4897_v5, 8  ;;  %vm9018_vm0 = vcmp.lt.s32.totalorder %v9017_v22, 0  ;;  %v4932_v26 = vsel %vm4922_vm5, %v4929_v39, %v4931_v62 }
 0x64c   : > { %v4936_v25 = vsel %vm4922_vm5, %v4933_v23, %v4935_v7  ;;  %v5308_v11 = vand.u32 2139095040, %v13809_v40  ;;  %v4925_v53 = vsel %vm4921_vm9, %v4905_v3, %v4908_v15  ;;  %v4927_v63 = vsel %vm4923_vm13, %v4911_v41, %v4926_v10 }
 0x64d   : > { %v13836_v37 = vmul.u32.u64.low %v4937_v42, %v4936_v25  ;;  %v13837_v48 = vmul.u32.u64.high %v4937_v42, %v4936_v25, %v13836_v37  ;;  %v17295_v9 = vxor.u32 2147483648, %v13773_v1  ;;  %v4869_v5 = vxor.u32 2147483648, %v4868_v20 }
 0x64e   : > { %v5209_v59 = vor.u32 8388608, %v5208_v54  ;;  %vm5212_vm4 = vcmp.gt.s32.totalorder %v5211_v21, 0  ;;  %v13844_v36 = vsel %vm9018_vm0, 0, %v9017_v22  ;;  %9720 = vsinq.f32 %v13760_v47 }
 0x64f   : > { %v5078_v31 = vsel %vm4995_vm2, %v17295_v9, %v13773_v1  ;;  %v13846_v39 = vmul.u32.u64.low %v4937_v42, %v4932_v26  ;;  %v13847_v14 = vmul.u32.u64.high %v4937_v42, %v4932_v26, %v13846_v39  ;;  %v5213_v15 = vsel %vm5212_vm4, %v5211_v21, 0 }
 0x650   : > { %v4928_v41 = vsel %vm4922_vm5, %v4925_v53, %v4927_v63  ;;  %v13852_v23 = vshrl.u32 %v5213_v15, 5  ;;  %v5309_v10 = vshrl.u32 %v5308_v11, 23  ;;  %v13858_v1 = vsel %vm13821_vm10, %v13397_v57, %v5078_v31 }
 0x651   : > { %v5215_v54 = vand.u32 31, %v5213_v15  ;;  %v5173_v21 = vsub.s32 4294967266, %v13844_v36  ;;  %vm4946_vm12 = vc.u32 %v13837_v48, %v13846_v39  ;;  %v13865_v47 = vshll.u32 %v5209_v59, 8 }
 0x652   : > { %v4870_v61 = vsel %vm4787_vm11, %v4869_v5, %v4868_v20  ;;  %v4944_v3 = vmul.u32 %v4937_v42, %v4928_v41  ;;  %v4947_v7 = vadd.s32 1, %v13847_v14  ;;  %vm5233_vm8 = vcmp.lt.s32.totalorder %v13852_v23, 1 }
 0x653   : > { %v5216_v26 = vsub.s32 32, %v5215_v54  ;;  %v5218_v25 = vshll.u32 %v17008_v60, %v5215_v54  ;;  %v5221_v11 = vshll.u32 %v17272_v17, %v5215_v54  ;;  %v9023_v53 = vadd.s32 4294967169, %v5309_v10 }
 0x654   : > { %v4948_v63 = vsel %vm4946_vm12, %v4947_v7, %v13847_v14  ;;  %v5224_v31 = vshll.u32 %v17273_v56, %v5215_v54  ;;  %v5227_v5 = vshll.u32 %v17274_v6, %v5215_v54  ;;  %v17296_v15 = vand.u32 2147483647, %v13558_v8 }
 0x655   : > { %v5219_v37 = vshrl.u32 %v17272_v17, %v5216_v26  ;;  %v5222_v9 = vshrl.u32 %v17273_v56, %v5216_v26  ;;  %v4949_v20 = vadd.s32 %v4948_v63, %v4944_v3  ;;  %v5225_v42 = vshrl.u32 %v17274_v6, %v5216_v26 }
 0x656   : > { %v5228_v59 = vshrl.u32 %v17275_v30, %v5216_v26  ;;  %vm13882_vm15 = vcmp.le.f32.partialorder %v17296_v15, 0.7853982  ;;  %v17297_v41 = vmov 0  ;;  %v5230_v7 = vshll.u32 %v17275_v30, %v5215_v54 }
 0x657   : > { %v17298_v41 = vsel %vm13882_vm15, 4294967295, %v17297_v41  ;;  %v5220_v14 = vor.u32 %v5219_v37, %v5218_v25  ;;  %v5223_v10 = vor.u32 %v5222_v9, %v5221_v11  ;;  %v5231_v19 = vshrl.u32 %v17276_v35, %v5216_v26 }
 0x658   : > { %17299 = vst [vmem:[#allocation27_spill] sm:$0xff] %v17298_v41  ;;  %v4950_v62 = vadd.s32 536870912, %v4949_v20  ;;  %v5226_v3 = vor.u32 %v5225_v42, %v5224_v31  ;;  %v5229_v63 = vor.u32 %v5228_v59, %v5227_v5  ;;  %vm5234_vm3 = vcmp.lt.s32.totalorder %v13852_v23, 2  ;;  %v13893_v52 = vpop.eup %9720  ;;  %v13903_v31 = vpop.permute.xlu0 %4512 }
 0x659   : > { %v5217_v55 = vshrl.u32 %v17008_v60, %v5216_v26  ;;  %v5232_v22 = vor.u32 %v5231_v19, %v5230_v7  ;;  %vm5236_vm2 = vcmp.lt.s32.totalorder %v13852_v23, 4  ;;  %v5241_v15 = vsel %vm5233_vm8, %v5220_v14, %v5223_v10  ;;  %17300 = vst [vmem:[#allocation24_spill] sm:$0xff] %v13893_v52 }
 0x65a   : > { %v13895_v25 = vshrl.u32 %v4950_v62, 30  ;;  %vm5235_vm1 = vcmp.lt.s32.totalorder %v13852_v23, 3  ;;  %v5238_v54 = vsel %vm5236_vm2, %v5226_v3, 2102212464  ;;  %v5242_v11 = vsel %vm5236_vm2, %v5229_v63, 920167782 }
 0x65b   : > { %vm4683_vm14 = vcmp.lt.s32.totalorder %v13392_v33, 0  ;;  %v5237_v37 = vsel %vm5233_vm8, %v5217_v55, %v5220_v14  ;;  %v5243_v26 = vsel %vm5235_vm1, %v5226_v3, %v5242_v11  ;;  %v5245_v19 = vsel %vm5233_vm8, %v5223_v10, %v5226_v3 }
 0x65c   : > { %17301 = vst [vmem:[#allocation23_spill] sm:$0xff] %v13895_v25  ;;  %v5246_v9 = vsel %vm5236_vm2, %v5232_v22, 1326507024  ;;  %v4952_v42 = vshll.u32 %v13895_v25, 30  ;;  %v5239_v62 = vsel %vm5235_vm1, %v5223_v10, %v5238_v54  ;;  %v5244_v5 = vsel %vm5234_vm3, %v5241_v15, %v5243_v26  ;;  %v13922_v54 = vpop.f32.mrb[22].mxu1 }
 0x65d   : > { %v5247_v59 = vsel %vm5235_vm1, %v5229_v63, %v5246_v9  ;;  %v5174_v7 = vadd.s32 127, %v5173_v21  ;;  %v13911_v55 = vmul.u32.u64.low %v13865_v47, %v5244_v5  ;;  %v13912_v14 = vmul.u32.u64.high %v13865_v47, %v5244_v5, %v13911_v55  ;;  %v14017_v2 = vpop.f32.mrb[23].mxu1 }
 0x65e   : > { %v5248_v57 = vsel %vm5234_vm3, %v5245_v19, %v5247_v59  ;;  %9722 = vcosq.f32 %v13858_v1  ;;  %v13916_v22 = vsub.s32 %v4949_v20, %v4952_v42  ;;  %v5153_v21 = vadd.s32 %v13717_v32, %v13730_v0 }
 0x65f   : > { %v13919_v3 = vmul.u32.u64.low %v13865_v47, %v5248_v57  ;;  %v13920_v10 = vmul.u32.u64.high %v13865_v47, %v5248_v57, %v13919_v3  ;;  %v5240_v63 = vsel %vm5234_vm3, %v5237_v37, %v5239_v62  ;;  %v5315_v15 = vadd.s32 1, %v9023_v53 }
 0x660   : > { %v4528_v11 = vmul.f32 %v13903_v31, %v13412_v45  ;;  %v4871_v26 = vsub.s32 4, %v13705_v16  ;;  %v13934_v20 = vsel %vm13882_vm15, %v13558_v8, %v4870_v61  ;;  %v4955_v57 = vsub.s32 0, %v13916_v22  ;;  %v13942_v45 = vpop.permute.xlu0 %4553 }
 0x661   : > { %v17302_v19 = vand.u32 2147483647, %v13809_v40  ;;  %v17303_v32 = vsub.s32 32, %v13844_v36  ;;  %v5175_v23 = vshll.u32 %v5174_v7, 23  ;;  %v5259_v53 = vadd.s32 1, %v13912_v14 }
 0x662   : > { %vm5316_vm9 = vcmp.gt.s32.totalorder %v5315_v15, 0  ;;  %v9008_v37 = vmin.u32 %v4955_v57, %v13916_v22  ;;  %v5256_v42 = vmul.u32 %v13865_v47, %v5240_v63  ;;  %vm5258_vm7 = vc.u32 %v13920_v10, %v13911_v55 }
 0x663   : > { %v5312_v9 = vand.u32 8388607, %v17302_v19  ;;  %v5171_v0 = vshrl.u32 %v5153_v21, %v17303_v32  ;;  %v5317_v61 = vsel %vm5316_vm9, %v5315_v15, 0  ;;  %v5170_v62 = vshll.u32 %v13796_v44, %v13844_v36 }
 0x664   : > { %v5260_v5 = vsel %vm5258_vm7, %v5259_v53, %v13912_v14  ;;  %v5319_v59 = vand.u32 31, %v5317_v61  ;;  %v13952_v7 = vadd.f32 %v13942_v45, %v4528_v11  ;;  %v17305_v3 = vxor.u32 2147483648, %v13782_v49 }
 0x665   : > { %9724 = vsinq.f32 %v13858_v1  ;;  %v4957_v47 = vclz %v9008_v37  ;;  %v5261_v63 = vadd.s32 %v5260_v5, %v5256_v42  ;;  %v13965_v44 = vsel %vm4787_vm11, %v4871_v26, %v13705_v16 }
 0x666   : > { %17304 = vst [vmem:[#allocation17_spill] sm:$0xff] %v13952_v7  ;;  %v13959_v21 = vsel %vm4683_vm14, %v17305_v3, %v13782_v49  ;;  %17306 = vst [vmem:[#allocation30_spill] sm:$0xff] %v13965_v44  ;;  %9726 = vcosq.f32 %v13934_v20  ;;  %v13968_v36 = vor.u32 %v5171_v0, %v5170_v62  ;;  %v5320_v14 = vsub.s32 32, %v5319_v59 }
 0x667   : > { %v13970_v15 = vor.u32 4788187, %v5175_v23  ;;  %v9009_v11 = vadd.s32 4294967294, %v4957_v47  ;;  %v5262_v57 = vadd.s32 536870912, %v5261_v63  ;;  %v5313_v49 = vor.u32 8388608, %v5312_v9 }
 0x668   : > { %v5323_v19 = vshrl.u32 %v17272_v17, %v5320_v14  ;;  %v5326_v1 = vshrl.u32 %v17273_v56, %v5320_v14  ;;  %v5329_v32 = vshrl.u32 %v17274_v6, %v5320_v14  ;;  %v13976_v16 = vpop.eup %9722  ;;  %v5322_v0 = vshll.u32 %v17008_v60, %v5319_v59 }
 0x669   : > { %17307 = vst [vmem:[#allocation20_spill] sm:$0xff] %v13976_v16  ;;  %vm9010_vm13 = vcmp.lt.s32.totalorder %v9009_v11, 0  ;;  %v13978_v26 = vshrl.u32 %v5262_v57, 30  ;;  %v5332_v23 = vshrl.u32 %v17275_v30, %v5320_v14  ;;  %v5325_v37 = vshll.u32 %v17272_v17, %v5319_v59 }
 0x66a   : > { %v5328_v9 = vshll.u32 %v17273_v56, %v5319_v59  ;;  %v5331_v42 = vshll.u32 %v17274_v6, %v5319_v59  ;;  %v5335_v62 = vshrl.u32 %v17276_v35, %v5320_v14  ;;  %v13986_v5 = vsel %vm9010_vm13, 0, %v9009_v11 }
 0x66b   : > { %v5264_v3 = vshll.u32 %v13978_v26, 30  ;;  %v5318_v47 = vshrl.u32 %v5317_v61, 5  ;;  %v5334_v57 = vshll.u32 %v17275_v30, %v5319_v59  ;;  %v5324_v53 = vor.u32 %v5323_v19, %v5322_v0 }
 0x66c   : > { %v5327_v8 = vor.u32 %v5326_v1, %v5325_v37  ;;  %v5330_v41 = vor.u32 %v5329_v32, %v5328_v9  ;;  %v5333_v44 = vor.u32 %v5332_v23, %v5331_v42  ;;  %v5177_v46 = vand.u32 2147483647, %v13970_v15 }
 0x66d   : > { %v5179_v25 = vcvt.s32.f32 %v13968_v36  ;;  %v13992_v16 = vsub.s32 %v5261_v63, %v5264_v3  ;;  %v13994_v58 = vshll.u32 %v5313_v49, 8  ;;  %v5321_v11 = vshrl.u32 %v17008_v60, %v5320_v14 }
 0x66e   : > { %v5336_v52 = vor.u32 %v5335_v62, %v5334_v57  ;;  %v5412_v13 = vand.u32 2139095040, %v13952_v7  ;;  %v17308_v61 = vand.u32 2147483647, %v13952_v7  ;;  %v4961_v1 = vsub.s32 32, %v13986_v5 }
 0x66f   : > { %v14002_v19 = vpop.eup %9724  ;;  %v5267_v15 = vsub.s32 0, %v13992_v16  ;;  %vm5337_vm11 = vcmp.lt.s32.totalorder %v5318_v47, 1  ;;  %vm5340_vm5 = vcmp.lt.s32.totalorder %v5318_v47, 4  ;;  %v4965_v36 = vsub.s32 4294967266, %v13986_v5 }
 0x670   : > { %v14000_v59 = vand.u32 8388607, %v17308_v61  ;;  %17309 = vst [vmem:[#allocation13_spill] sm:$0xff] %v14002_v19  ;;  %v14006_v63 = vpop.eup %9726  ;;  %v5342_v14 = vsel %vm5340_vm5, %v5330_v41, 2102212464  ;;  %v5345_v49 = vsel %vm5337_vm11, %v5324_v53, %v5327_v8  ;;  %vm5338_vm0 = vcmp.lt.s32.totalorder %v5318_v47, 2 }
 0x671   : > { %17310 = vst [vmem:[#allocation35_spill] sm:$0xff] %v14006_v63  ;;  %v5346_v32 = vsel %vm5340_vm5, %v5333_v44, 920167782  ;;  %v9020_v0 = vmin.u32 %v5267_v15, %v13992_v16  ;;  %vm5339_vm4 = vcmp.lt.s32.totalorder %v5318_v47, 3  ;;  %v5349_v23 = vsel %vm5337_vm11, %v5327_v8, %v5330_v41 }
 0x672   : > { %v5341_v37 = vsel %vm5337_vm11, %v5321_v11, %v5324_v53  ;;  %v5347_v9 = vsel %vm5339_vm4, %v5330_v41, %v5346_v32  ;;  %v5350_v42 = vsel %vm5340_vm5, %v5336_v52, 1326507024  ;;  %v5413_v62 = vshrl.u32 %v5412_v13, 23 }
 0x673   : > { %v5269_v3 = vclz %v9020_v0  ;;  %v5343_v57 = vsel %vm5339_vm4, %v5327_v8, %v5342_v14  ;;  %v5348_v61 = vsel %vm5338_vm0, %v5345_v49, %v5347_v9  ;;  %v5351_v19 = vsel %vm5339_vm4, %v5333_v44, %v5350_v42 }
 0x674   : > { %v5352_v63 = vsel %vm5338_vm0, %v5349_v23, %v5351_v19  ;;  %v14013_v29 = vmul.u32.u64.low %v13994_v58, %v5348_v61  ;;  %v14014_v18 = vmul.u32.u64.high %v13994_v58, %v5348_v61, %v14013_v29  ;;  %v9027_v15 = vadd.s32 4294967169, %v5413_v62 }
 0x675   : > { %v4966_v4 = vadd.s32 127, %v4965_v36  ;;  %v9021_v53 = vadd.s32 4294967294, %v5269_v3  ;;  %v14020_v52 = vmul.u32.u64.low %v13994_v58, %v5352_v63  ;;  %v14021_v13 = vmul.u32.u64.high %v13994_v58, %v5352_v63, %v14020_v52 }
 0x676   : > { %v14023_v8 = vmul.f32 %v5179_v25, %v5177_v46  ;;  %v4945_v41 = vadd.s32 %v13846_v39, %v13837_v48  ;;  %v5419_v44 = vadd.s32 1, %v9027_v15  ;;  %v4529_v11 = vmul.f32 %v13903_v31, %v13484_v27 }
 0x677   : > { %v4962_v19 = vshll.u32 %v13916_v22, %v13986_v5  ;;  %v5257_v36 = vadd.s32 %v13911_v55, %v13920_v10  ;;  %vm9022_vm12 = vcmp.lt.s32.totalorder %v9021_v53, 0  ;;  %v5344_v14 = vsel %vm5338_vm0, %v5341_v37, %v5343_v57  ;;  %v14042_v10 = vpop.permute.xlu1 %4517 }
 0x678   : > { %v4963_v63 = vshrl.u32 %v4945_v41, %v4961_v1  ;;  %v5272_v49 = vsel %vm9022_vm12, 0, %v9021_v53  ;;  %v5363_v46 = vadd.s32 1, %v14014_v18  ;;  %vm5420_vm8 = vcmp.gt.s32.totalorder %v5419_v44, 0 }
 0x679   : > { %v4967_v25 = vshll.u32 %v4966_v4, 23  ;;  %v5273_v48 = vsub.s32 32, %v5272_v49  ;;  %v5277_v39 = vsub.s32 4294967266, %v5272_v49  ;;  %v5417_v32 = vor.u32 8388608, %v14000_v59 }
 0x67a   : > { %v5360_v27 = vmul.u32 %v13994_v58, %v5344_v14  ;;  %vm5362_vm3 = vc.u32 %v14021_v13, %v14013_v29  ;;  %v5421_v22 = vsel %vm5420_vm8, %v5419_v44, 0  ;;  %v14040_v55 = vadd.f32 %v13942_v45, %v4529_v11 }
 0x67b   : > { %v5275_v5 = vshrl.u32 %v5257_v36, %v5273_v48  ;;  %v5278_v47 = vadd.s32 127, %v5277_v39  ;;  %v5364_v1 = vsel %vm5362_vm3, %v5363_v46, %v14014_v18  ;;  %v14045_v4 = vshrl.u32 %v5421_v22, 5 }
 0x67c   : > { %v5274_v0 = vshll.u32 %v13992_v16, %v5272_v49  ;;  %v5365_v59 = vadd.s32 %v5364_v1, %v5360_v27  ;;  %v5423_v23 = vand.u32 31, %v5421_v22  ;;  %v4532_v58 = vmul.f32 %v14042_v10, %v13586_v43 }
 0x67d   : > { %v14050_v37 = vor.u32 %v4963_v63, %v4962_v19  ;;  %v14052_v9 = vor.u32 4788187, %v4967_v25  ;;  %v5279_v42 = vshll.u32 %v5278_v47, 23  ;;  %v14054_v62 = vshll.u32 %v5417_v32, 8 }
 0x67e   : > { %v5276_v3 = vor.u32 %v5275_v5, %v5274_v0  ;;  %v5366_v57 = vadd.s32 536870912, %v5365_v59  ;;  %v5424_v61 = vsub.s32 32, %v5423_v23  ;;  %v16906_v18 = vand.u32 2147483647, %v14040_v55 }
 0x67f   : > { %v5280_v15 = vor.u32 4788187, %v5279_v42  ;;  %v5426_v16 = vshll.u32 %v17008_v60, %v5423_v23  ;;  %v5429_v53 = vshll.u32 %v17272_v17, %v5423_v23  ;;  %vm5441_vm2 = vcmp.lt.s32.totalorder %v14045_v4, 1 }
 0x680   : > { %v14060_v43 = vshrl.u32 %v5366_v57, 30  ;;  %v5427_v52 = vshrl.u32 %v17272_v17, %v5424_v61  ;;  %v5430_v41 = vshrl.u32 %v17273_v56, %v5424_v61  ;;  %v5432_v44 = vshll.u32 %v17273_v56, %v5423_v23 }
 0x681   : > { %v5433_v11 = vshrl.u32 %v17274_v6, %v5424_v61  ;;  %v5435_v19 = vshll.u32 %v17274_v6, %v5423_v23  ;;  %v5436_v36 = vshrl.u32 %v17275_v30, %v5424_v61  ;;  %v5438_v14 = vshll.u32 %v17275_v30, %v5423_v23 }
 0x682   : > { %17311 = vst [vmem:[#allocation31_spill] sm:$0xff] %v14060_v43  ;;  %v5368_v63 = vshll.u32 %v14060_v43, 30  ;;  %v5428_v49 = vor.u32 %v5427_v52, %v5426_v16  ;;  %v5431_v46 = vor.u32 %v5430_v41, %v5429_v53  ;;  %v5439_v25 = vshrl.u32 %v17276_v35, %v5424_v61  ;;  %v14089_v52 = vpop.permute.xlu1 %4558 }
 0x683   : > { %v5281_v48 = vand.u32 2147483647, %v5280_v15  ;;  %v5434_v39 = vor.u32 %v5433_v11, %v5432_v44  ;;  %v5437_v32 = vor.u32 %v5436_v36, %v5435_v19  ;;  %vm5442_vm1 = vcmp.lt.s32.totalorder %v14045_v4, 2 }
 0x684   : > { %v5283_v27 = vcvt.s32.f32 %v5276_v3  ;;  %v14072_v22 = vsub.s32 %v5365_v59, %v5368_v63  ;;  %v5440_v5 = vor.u32 %v5439_v25, %v5438_v14  ;;  %vm5444_vm9 = vcmp.lt.s32.totalorder %v14045_v4, 4 }
 0x685   : > { %vm5443_vm7 = vcmp.lt.s32.totalorder %v14045_v4, 3  ;;  %v5446_v47 = vsel %vm5444_vm9, %v5434_v39, 2102212464  ;;  %v5449_v1 = vsel %vm5441_vm2, %v5428_v49, %v5431_v46  ;;  %v5450_v0 = vsel %vm5444_vm9, %v5437_v32, 920167782 }
 0x686   : > { %vm5099_vm13 = vcmp.lt.s32.totalorder %v13415_v38, 0  ;;  %v5371_v23 = vsub.s32 0, %v14072_v22  ;;  %v5425_v42 = vshrl.u32 %v17008_v60, %v5424_v61  ;;  %v5451_v59 = vsel %vm5443_vm7, %v5434_v39, %v5450_v0 }
 0x687   : > { %v5453_v3 = vsel %vm5441_vm2, %v5431_v46, %v5434_v39  ;;  %vm5203_vm11 = vcmp.lt.s32.totalorder %v13753_v28, 0  ;;  %v5284_v57 = vmul.f32 %v5283_v27, %v5281_v48  ;;  %v5452_v15 = vsel %vm5442_vm1, %v5449_v1, %v5451_v59 }
 0x688   : > { %v5454_v16 = vsel %vm5444_vm9, %v5440_v5, 1326507024  ;;  %v5516_v53 = vand.u32 2139095040, %v14040_v55  ;;  %v9024_v41 = vmin.u32 %v5371_v23, %v14072_v22  ;;  %v5445_v61 = vsel %vm5441_vm2, %v5425_v42, %v5428_v49 }
 0x689   : > { %v5447_v44 = vsel %vm5443_vm7, %v5431_v46, %v5446_v47  ;;  %v5455_v11 = vsel %vm5443_vm7, %v5437_v32, %v5454_v16  ;;  %v14101_v36 = vmul.u32.u64.low %v14054_v62, %v5452_v15  ;;  %v14102_v14 = vmul.u32.u64.high %v14054_v62, %v5452_v15, %v14101_v36 }
 0x68a   : > { %v5456_v19 = vsel %vm5442_vm1, %v5453_v3, %v5455_v11  ;;  %v14105_v63 = vadd.f32 %v14089_v52, %v4532_v58  ;;  %v4969_v25 = vand.u32 2147483647, %v14052_v9  ;;  %v17312_v49 = vand.u32 2147483647, %v13753_v28 }
 0x68b   : > { %v17313_v48 = vmov 0  ;;  %v5373_v46 = vclz %v9024_v41  ;;  %v14115_v39 = vmul.u32.u64.low %v14054_v62, %v5456_v19  ;;  %v14116_v32 = vmul.u32.u64.high %v14054_v62, %v5456_v19, %v14115_v39 }
 0x68c   : > { %vm14110_vm5 = vcmp.le.f32.partialorder %v17312_v49, 0.7853982  ;;  %v5181_v27 = vxor.u32 2147483648, %v14023_v8  ;;  %v5448_v5 = vsel %vm5442_vm1, %v5445_v61, %v5447_v44  ;;  %v5517_v58 = vshrl.u32 %v5516_v53, 23 }
 0x68d   : > { %v17314_v48 = vsel %vm14110_vm5, 4294967295, %v17313_v48  ;;  %v4530_v9 = vmul.f32 %v13903_v31, %v13630_v24  ;;  %v4971_v47 = vcvt.s32.f32 %v14050_v37  ;;  %v5285_v1 = vxor.u32 2147483648, %v5284_v57 }
 0x68e   : > { %17315 = vst [vmem:[#allocation18_spill] sm:$0xff] %v17314_v48  ;;  %v9025_v0 = vadd.s32 4294967294, %v5373_v46  ;;  %v5520_v23 = vand.u32 8388607, %v16906_v18  ;;  %9728 = vsinq.f32 %v13934_v20  ;;  %v5467_v42 = vadd.s32 1, %v14102_v14 }
 0x68f   : > { %v9031_v59 = vadd.s32 4294967169, %v5517_v58  ;;  %v5828_v3 = vand.u32 2139095040, %v14105_v63  ;;  %v14129_v4 = vmul.f32 %v4971_v47, %v4969_v25  ;;  %v5464_v15 = vmul.u32 %v14054_v62, %v5448_v5 }
 0x690   : > { %vm9026_vm0 = vcmp.lt.s32.totalorder %v9025_v0, 0  ;;  %vm5466_vm4 = vc.u32 %v14116_v32, %v14101_v36  ;;  %v14136_v24 = vsel %vm5099_vm13, %v5181_v27, %v14023_v8  ;;  %v14140_v16 = vadd.f32 %v13942_v45, %v4530_v9 }
 0x691   : > { %v5468_v37 = vsel %vm5466_vm4, %v5467_v42, %v14102_v14  ;;  %v5523_v20 = vadd.s32 1, %v9031_v59  ;;  %v5286_v53 = vsel %vm5203_vm11, %v5285_v1, %v5284_v57  ;;  %v5521_v61 = vor.u32 8388608, %v5520_v23 }
 0x692   : > { %17316 = vst [vmem:[#allocation14_spill] sm:$0xff] %v14140_v16  ;;  %v5469_v41 = vadd.s32 %v5468_v37, %v5464_v15  ;;  %v14146_v62 = vmul.f32 %v14042_v10, %v13735_v12  ;;  %v14149_v11 = vsel %vm9026_vm0, 0, %v9025_v0  ;;  %v5829_v8 = vshrl.u32 %v5828_v3, 23 }
 0x693   : > { %vm5524_vm12 = vcmp.gt.s32.totalorder %v5523_v20, 0  ;;  %v5361_v14 = vadd.s32 %v14013_v29, %v14021_v13  ;;  %v14157_v57 = vsel %vm14110_vm5, %v13753_v28, %v5286_v53  ;;  %v16907_v46 = vand.u32 2147483647, %v14105_v63 }
 0x694   : > { %v5470_v25 = vadd.s32 536870912, %v5469_v41  ;;  %v5525_v49 = vsel %vm5524_vm12, %v5523_v20, 0  ;;  %v5377_v27 = vsub.s32 32, %v14149_v11  ;;  %v14163_v5 = vadd.s32 %v14101_v36, %v14116_v32 }
 0x695   : > { %v5527_v12 = vand.u32 31, %v5525_v49  ;;  %v14167_v29 = vshll.u32 %v5521_v61, 8  ;;  %v5378_v13 = vshll.u32 %v14072_v22, %v14149_v11  ;;  %v5381_v9 = vsub.s32 4294967266, %v14149_v11 }
 0x696   : > { %v14165_v58 = vshrl.u32 %v5470_v25, 30  ;;  %v9043_v1 = vadd.s32 4294967169, %v5829_v8  ;;  %v5526_v23 = vshrl.u32 %v5525_v49, 5  ;;  %v5379_v37 = vshrl.u32 %v5361_v14, %v5377_v27 }
 0x697   : > { %v5528_v47 = vsub.s32 32, %v5527_v12  ;;  %v5530_v42 = vshll.u32 %v17008_v60, %v5527_v12  ;;  %v5533_v59 = vshll.u32 %v17272_v17, %v5527_v12  ;;  %v5536_v15 = vshll.u32 %v17273_v56, %v5527_v12 }
 0x698   : > { %v5472_v0 = vshll.u32 %v14165_v58, 30  ;;  %v14175_v36 = vpop.eup %9728  ;;  %v5539_v53 = vshll.u32 %v17274_v6, %v5527_v12  ;;  %v5832_v61 = vand.u32 8388607, %v16907_v46  ;;  %v5382_v18 = vadd.s32 127, %v5381_v9 }
 0x699   : > { %17317 = vst [vmem:[#allocation39_spill] sm:$0xff] %v14175_v36  ;;  %v5531_v32 = vshrl.u32 %v17272_v17, %v5528_v47  ;;  %v5534_v3 = vshrl.u32 %v17273_v56, %v5528_v47  ;;  %v5537_v22 = vshrl.u32 %v17274_v6, %v5528_v47  ;;  %v5540_v49 = vshrl.u32 %v17275_v30, %v5528_v47 }
 0x69a   : > { %v14181_v20 = vsub.s32 %v5469_v41, %v5472_v0  ;;  %v5542_v19 = vshll.u32 %v17275_v30, %v5527_v12  ;;  %v5543_v44 = vshrl.u32 %v17276_v35, %v5528_v47  ;;  %v5529_v41 = vshrl.u32 %v17008_v60, %v5528_v47 }
 0x69b   : > { %v5532_v11 = vor.u32 %v5531_v32, %v5530_v42  ;;  %v5535_v8 = vor.u32 %v5534_v3, %v5533_v59  ;;  %v5538_v25 = vor.u32 %v5537_v22, %v5536_v15  ;;  %v5541_v14 = vor.u32 %v5540_v49, %v5539_v53 }
 0x69c   : > { %v5475_v39 = vsub.s32 0, %v14181_v20  ;;  %vm5545_vm8 = vcmp.lt.s32.totalorder %v5526_v23, 1  ;;  %v5835_v27 = vadd.s32 1, %v9043_v1  ;;  %v5544_v46 = vor.u32 %v5543_v44, %v5542_v19 }
 0x69d   : > { %vm5546_vm3 = vcmp.lt.s32.totalorder %v5526_v23, 2  ;;  %vm5548_vm2 = vcmp.lt.s32.totalorder %v5526_v23, 4  ;;  %vm5547_vm1 = vcmp.lt.s32.totalorder %v5526_v23, 3  ;;  %v5553_v9 = vsel %vm5545_vm8, %v5532_v11, %v5535_v8 }
 0x69e   : > { %v9028_v0 = vmin.u32 %v5475_v39, %v14181_v20  ;;  %v5550_v42 = vsel %vm5548_vm2, %v5538_v25, 2102212464  ;;  %v5554_v59 = vsel %vm5548_vm2, %v5541_v14, 920167782  ;;  %v5549_v12 = vsel %vm5545_vm8, %v5529_v41, %v5532_v11 }
 0x69f   : > { %v5551_v3 = vsel %vm5547_vm1, %v5535_v8, %v5550_v42  ;;  %v5555_v15 = vsel %vm5547_vm1, %v5538_v25, %v5554_v59  ;;  %v5383_v22 = vshll.u32 %v5382_v18, 23  ;;  %v5557_v1 = vsel %vm5545_vm8, %v5535_v8, %v5538_v25 }
 0x6a0   : > { %v5477_v32 = vclz %v9028_v0  ;;  %v5556_v47 = vsel %vm5546_vm3, %v5553_v9, %v5555_v15  ;;  %v5558_v53 = vsel %vm5548_vm2, %v5544_v46, 1326507024  ;;  %v5552_v48 = vsel %vm5546_vm3, %v5549_v12, %v5551_v3 }
 0x6a1   : > { %v5559_v44 = vsel %vm5547_vm1, %v5541_v14, %v5558_v53  ;;  %v14197_v19 = vmul.u32.u64.low %v14167_v29, %v5556_v47  ;;  %v14198_v49 = vmul.u32.u64.high %v14167_v29, %v5556_v47, %v14197_v19  ;;  %v5833_v11 = vor.u32 8388608, %v5832_v61 }
 0x6a2   : > { %v9029_v39 = vadd.s32 4294967294, %v5477_v32  ;;  %v5560_v0 = vsel %vm5546_vm3, %v5557_v1, %v5559_v44  ;;  %vm5836_vm9 = vcmp.gt.s32.totalorder %v5835_v27, 0  ;;  %v14207_v46 = vor.u32 %v5379_v37, %v5378_v13 }
 0x6a3   : > { %v14204_v18 = vmul.u32.u64.low %v14167_v29, %v5560_v0  ;;  %v14205_v41 = vmul.u32.u64.high %v14167_v29, %v5560_v0, %v14204_v18  ;;  %v5837_v8 = vsel %vm5836_vm9, %v5835_v27, 0  ;;  %v5620_v42 = vand.u32 2139095040, %v14140_v16 }
 0x6a4   : > { %vm9030_vm7 = vcmp.lt.s32.totalorder %v9029_v39, 0  ;;  %v5839_v14 = vand.u32 31, %v5837_v8  ;;  %v14210_v9 = vor.u32 4788187, %v5383_v22  ;;  %v5571_v23 = vadd.s32 1, %v14198_v49 }
 0x6a5   : > { %v5480_v25 = vsel %vm9030_vm7, 0, %v9029_v39  ;;  %v5568_v61 = vmul.u32 %v14167_v29, %v5552_v48  ;;  %v14214_v12 = vshrl.u32 %v5837_v8, 5  ;;  %v14216_v15 = vshll.u32 %v5833_v11, 8 }
 0x6a6   : > { %v5481_v59 = vsub.s32 32, %v5480_v25  ;;  %v5485_v32 = vsub.s32 4294967266, %v5480_v25  ;;  %v5840_v3 = vsub.s32 32, %v5839_v14  ;;  %vm5570_vm0 = vc.u32 %v14205_v41, %v14197_v19 }
 0x6a7   : > { %v5842_v13 = vshll.u32 %v17008_v60, %v5839_v14  ;;  %v5845_v37 = vshll.u32 %v17272_v17, %v5839_v14  ;;  %v5572_v22 = vsel %vm5570_vm0, %v5571_v23, %v14198_v49  ;;  %v5848_v48 = vshll.u32 %v17273_v56, %v5839_v14 }
 0x6a8   : > { %v5486_v27 = vadd.s32 127, %v5485_v32  ;;  %v5843_v47 = vshrl.u32 %v17272_v17, %v5840_v3  ;;  %v5846_v1 = vshrl.u32 %v17273_v56, %v5840_v3  ;;  %v5483_v29 = vshrl.u32 %v14163_v5, %v5481_v59 }
 0x6a9   : > { %v5573_v39 = vadd.s32 %v5572_v22, %v5568_v61  ;;  %v5849_v44 = vshrl.u32 %v17274_v6, %v5840_v3  ;;  %v5851_v18 = vshll.u32 %v17274_v6, %v5839_v14  ;;  %v5852_v8 = vshrl.u32 %v17275_v30, %v5840_v3 }
 0x6aa   : > { %v5487_v53 = vshll.u32 %v5486_v27, 23  ;;  %v5844_v0 = vor.u32 %v5843_v47, %v5842_v13  ;;  %v5847_v11 = vor.u32 %v5846_v1, %v5845_v37  ;;  %v5482_v49 = vshll.u32 %v14181_v20, %v5480_v25 }
 0x6ab   : > { %v5574_v23 = vadd.s32 536870912, %v5573_v39  ;;  %v5850_v36 = vor.u32 %v5849_v44, %v5848_v48  ;;  %vm4891_vm4 = vcmp.lt.s32.totalorder %v13733_v34, 0  ;;  %v5853_v43 = vor.u32 %v5852_v8, %v5851_v18 }
 0x6ac   : > { %v5488_v32 = vor.u32 4788187, %v5487_v53  ;;  %v5854_v5 = vshll.u32 %v17275_v30, %v5839_v14  ;;  %v5855_v59 = vshrl.u32 %v17276_v35, %v5840_v3  ;;  %v5621_v61 = vshrl.u32 %v5620_v42, 23 }
 0x6ad   : > { %v5484_v27 = vor.u32 %v5483_v29, %v5482_v49  ;;  %v14234_v13 = vshrl.u32 %v5574_v23, 30  ;;  %v5841_v37 = vshrl.u32 %v17008_v60, %v5840_v3  ;;  %vm5857_vm12 = vcmp.lt.s32.totalorder %v14214_v12, 1 }
 0x6ae   : > { %v5489_v22 = vand.u32 2147483647, %v5488_v32  ;;  %v5856_v20 = vor.u32 %v5855_v59, %v5854_v5  ;;  %vm5860_vm8 = vcmp.lt.s32.totalorder %v14214_v12, 4  ;;  %v5865_v25 = vsel %vm5857_vm12, %v5844_v0, %v5847_v11 }
 0x6af   : > { %17318 = vst [vmem:[#allocation34_spill] sm:$0xff] %v14234_v13  ;;  %v5576_v47 = vshll.u32 %v14234_v13, 30  ;;  %vm5859_vm3 = vcmp.lt.s32.totalorder %v14214_v12, 3  ;;  %v5862_v14 = vsel %vm5860_vm8, %v5850_v36, 2102212464  ;;  %vm5858_vm2 = vcmp.lt.s32.totalorder %v14214_v12, 2 }
 0x6b0   : > { %v5866_v1 = vsel %vm5860_vm8, %v5853_v43, 920167782  ;;  %v5869_v48 = vsel %vm5857_vm12, %v5847_v11, %v5850_v36  ;;  %v5870_v29 = vsel %vm5860_vm8, %v5856_v20, 1326507024  ;;  %v5491_v53 = vcvt.s32.f32 %v5484_v27 }
 0x6b1   : > { %v5867_v42 = vsel %vm5859_vm3, %v5850_v36, %v5866_v1  ;;  %v14242_v3 = vsub.s32 %v5573_v39, %v5576_v47  ;;  %v5861_v44 = vsel %vm5857_vm12, %v5841_v37, %v5844_v0  ;;  %vm5411_vm1 = vcmp.lt.s32.totalorder %v13952_v7, 0 }
 0x6b2   : > { %v5868_v18 = vsel %vm5858_vm2, %v5865_v25, %v5867_v42  ;;  %v5863_v8 = vsel %vm5859_vm3, %v5847_v11, %v5862_v14  ;;  %v5871_v49 = vsel %vm5859_vm3, %v5853_v43, %v5870_v29  ;;  %v5492_v5 = vmul.f32 %v5491_v53, %v5489_v22 }
 0x6b3   : > { %v14248_v32 = vmul.u32.u64.low %v14216_v15, %v5868_v18  ;;  %v14249_v23 = vmul.u32.u64.high %v14216_v15, %v5868_v18, %v14248_v32  ;;  %v5579_v36 = vsub.s32 0, %v14242_v3  ;;  %v5872_v39 = vsel %vm5858_vm2, %v5869_v48, %v5871_v49 }
 0x6b4   : > { %v9035_v59 = vadd.s32 4294967169, %v5621_v61  ;;  %v17319_v0 = vsub.s32 4, %v13978_v26  ;;  %v14263_v43 = vmul.u32.u64.low %v14216_v15, %v5872_v39  ;;  %v14264_v11 = vmul.u32.u64.high %v14216_v15, %v5872_v39, %v14263_v43 }
 0x6b5   : > { %v14268_v37 = vadd.f32 %v14089_v52, %v14146_v62  ;;  %v17321_v22 = vxor.u32 2147483648, %v14129_v4  ;;  %v9032_v20 = vmin.u32 %v5579_v36, %v14242_v3  ;;  %9730 = vcosq.f32 %v14157_v57 }
 0x6b6   : > { %v14260_v27 = vsel %vm5203_vm11, %v17319_v0, %v13978_v26  ;;  %v5864_v26 = vsel %vm5858_vm2, %v5861_v44, %v5863_v8  ;;  %v5627_v25 = vadd.s32 1, %v9035_v59  ;;  %v5385_v47 = vand.u32 2147483647, %v14210_v9 }
 0x6b7   : > { %17320 = vst [vmem:[#allocation33_spill] sm:$0xff] %v14260_v27  ;;  %v14275_v61 = vsel %vm4891_vm4, %v17321_v22, %v14129_v4  ;;  %v5387_v62 = vcvt.s32.f32 %v14207_v46  ;;  %v5883_v14 = vadd.s32 1, %v14249_v23  ;;  %v5493_v1 = vxor.u32 2147483648, %v5492_v5 }
 0x6b8   : > { %17322 = vst [vmem:[#allocation36_spill] sm:$0xff] %v14275_v61  ;;  %v5581_v42 = vclz %v9032_v20  ;;  %v17323_v48 = vand.u32 2147483647, %v14140_v16  ;;  %vm5628_vm11 = vcmp.gt.s32.totalorder %v5627_v25, 0  ;;  %v5880_v29 = vmul.u32 %v14216_v15, %v5864_v26 }
 0x6b9   : > { %vm5882_vm9 = vc.u32 %v14264_v11, %v14248_v32  ;;  %v5629_v12 = vsel %vm5628_vm11, %v5627_v25, 0  ;;  %v16912_v53 = vand.u32 2147483647, %v14268_v37  ;;  %9732 = vsinq.f32 %v14157_v57 }
 0x6ba   : > { %v5624_v4 = vand.u32 8388607, %v17323_v48  ;;  %v9033_v9 = vadd.s32 4294967294, %v5581_v42  ;;  %v5884_v46 = vsel %vm5882_vm9, %v5883_v14, %v14249_v23  ;;  %v5631_v44 = vand.u32 31, %v5629_v12 }
 0x6bb   : > { %v14292_v18 = vmul.f32 %v5387_v62, %v5385_v47  ;;  %v5569_v49 = vadd.s32 %v14197_v19, %v14205_v41  ;;  %v5885_v15 = vadd.s32 %v5884_v46, %v5880_v29  ;;  %v14299_v36 = vsel %vm5411_vm1, %v5493_v1, %v5492_v5 }
 0x6bc   : > { %vm9034_vm7 = vcmp.lt.s32.totalorder %v9033_v9, 0  ;;  %v5625_v39 = vor.u32 8388608, %v5624_v4  ;;  %v5632_v59 = vsub.s32 32, %v5631_v44  ;;  %v5932_v23 = vand.u32 2139095040, %v14268_v37 }
 0x6bd   : > { %v5584_v57 = vsel %vm9034_vm7, 0, %v9033_v9  ;;  %v5886_v0 = vadd.s32 536870912, %v5885_v15  ;;  %v14304_v43 = vand.u32 8388607, %v16912_v53  ;;  %v14306_v20 = vshrl.u32 %v5629_v12, 5 }
 0x6be   : > { %v5589_v22 = vsub.s32 4294967266, %v5584_v57  ;;  %v5634_v19 = vshll.u32 %v17008_v60, %v5631_v44  ;;  %v5637_v41 = vshll.u32 %v17272_v17, %v5631_v44  ;;  %v5635_v26 = vshrl.u32 %v17272_v17, %v5632_v59 }
 0x6bf   : > { %v14310_v5 = vshrl.u32 %v5886_v0, 30  ;;  %v5638_v25 = vshrl.u32 %v17273_v56, %v5632_v59  ;;  %v5641_v47 = vshrl.u32 %v17274_v6, %v5632_v59  ;;  %v5585_v62 = vsub.s32 32, %v5584_v57  ;;  %v14317_v48 = vpop.eup %9730 }
 0x6c0   : > { %v5590_v14 = vadd.s32 127, %v5589_v22  ;;  %v5643_v1 = vshll.u32 %v17274_v6, %v5631_v44  ;;  %v5644_v42 = vshrl.u32 %v17275_v30, %v5632_v59  ;;  %17324 = vst [vmem:[#allocation37_spill] sm:$0xff] %v14317_v48  ;;  %v5640_v29 = vshll.u32 %v17273_v56, %v5631_v44 }
 0x6c1   : > { %v5888_v4 = vshll.u32 %v14310_v5, 30  ;;  %v14321_v12 = vshll.u32 %v5625_v39, 8  ;;  %v5933_v9 = vshrl.u32 %v5932_v23, 23  ;;  %v5636_v0 = vor.u32 %v5635_v26, %v5634_v19 }
 0x6c2   : > { %v5591_v46 = vshll.u32 %v5590_v14, 23  ;;  %v5639_v53 = vor.u32 %v5638_v25, %v5637_v41  ;;  %v5645_v8 = vor.u32 %v5644_v42, %v5643_v1  ;;  %v5642_v22 = vor.u32 %v5641_v47, %v5640_v29 }
 0x6c3   : > { %v14323_v13 = vsub.s32 %v5885_v15, %v5888_v4  ;;  %v5646_v28 = vshll.u32 %v17275_v30, %v5631_v44  ;;  %v5647_v27 = vshrl.u32 %v17276_v35, %v5632_v59  ;;  %v14327_v61 = vpop.eup %9732  ;;  %v17325_v48 = vand.u32 2147483647, %v13952_v7 }
 0x6c4   : > { %v5586_v39 = vshll.u32 %v14242_v3, %v5584_v57  ;;  %v5587_v23 = vshrl.u32 %v5569_v49, %v5585_v62  ;;  %v5633_v19 = vshrl.u32 %v17008_v60, %v5632_v59  ;;  %vm5649_vm12 = vcmp.lt.s32.totalorder %v14306_v20, 1 }
 0x6c5   : > { %vm14331_vm0 = vcmp.le.f32.partialorder %v17325_v48, 0.7853982  ;;  %v5592_v15 = vor.u32 4788187, %v5591_v46  ;;  %v5891_v44 = vsub.s32 0, %v14323_v13  ;;  %v5648_v41 = vor.u32 %v5647_v27, %v5646_v28 }
 0x6c6   : > { %vm5652_vm8 = vcmp.lt.s32.totalorder %v14306_v20, 4  ;;  %vm5650_vm3 = vcmp.lt.s32.totalorder %v14306_v20, 2  ;;  %vm5651_vm2 = vcmp.lt.s32.totalorder %v14306_v20, 3  ;;  %v5657_v26 = vsel %vm5649_vm12, %v5636_v0, %v5639_v53 }
 0x6c7   : > { %v5658_v25 = vsel %vm5652_vm8, %v5645_v8, 920167782  ;;  %v9044_v47 = vmin.u32 %v5891_v44, %v14323_v13  ;;  %v5654_v3 = vsel %vm5652_vm8, %v5642_v22, 2102212464  ;;  %v5661_v57 = vsel %vm5649_vm12, %v5639_v53, %v5642_v22 }
 0x6c8   : > { %v5659_v49 = vsel %vm5651_vm2, %v5642_v22, %v5658_v25  ;;  %v5588_v59 = vor.u32 %v5587_v23, %v5586_v39  ;;  %v5653_v62 = vsel %vm5649_vm12, %v5633_v19, %v5636_v0  ;;  %v5662_v1 = vsel %vm5652_vm8, %v5648_v41, 1326507024 }
 0x6c9   : > { %v5660_v14 = vsel %vm5650_vm3, %v5657_v26, %v5659_v49  ;;  %v5893_v28 = vclz %v9044_v47  ;;  %v5663_v27 = vsel %vm5651_vm2, %v5645_v8, %v5662_v1  ;;  %v5593_v4 = vand.u32 2147483647, %v5592_v15 }
 0x6ca   : > { %v14346_v42 = vmul.u32.u64.low %v14321_v12, %v5660_v14  ;;  %v14347_v48 = vmul.u32.u64.high %v14321_v12, %v5660_v14, %v14346_v42  ;;  %v5655_v29 = vsel %vm5651_vm2, %v5639_v53, %v5654_v3  ;;  %v5664_v46 = vsel %vm5650_vm3, %v5661_v57, %v5663_v27 }
 0x6cb   : > { %v9047_v44 = vadd.s32 4294967169, %v5933_v9  ;;  %v9045_v22 = vadd.s32 4294967294, %v5893_v28  ;;  %v14353_v0 = vmul.u32.u64.low %v14321_v12, %v5664_v46  ;;  %v14354_v39 = vmul.u32.u64.high %v14321_v12, %v5664_v46, %v14353_v0 }
 0x6cc   : > { %v4531_v23 = vmul.f32 %v13903_v31, %v13815_v50  ;;  %v5389_v8 = vxor.u32 2147483648, %v14292_v18  ;;  %v17328_v19 = vsub.s32 4, %v14165_v58  ;;  %v5595_v15 = vcvt.s32.f32 %v5588_v59 }
 0x6cd   : > { %v5939_v41 = vadd.s32 1, %v9047_v44  ;;  %v14370_v9 = vsel %vm14331_vm0, %v13952_v7, %v14299_v36  ;;  %vm9046_vm11 = vcmp.lt.s32.totalorder %v9045_v22, 0  ;;  %v5656_v50 = vsel %vm5650_vm3, %v5653_v62, %v5655_v29 }
 0x6ce   : > { %v14364_v53 = vsel %vm5411_vm1, %v17328_v19, %v14165_v58  ;;  %v5675_v31 = vadd.s32 1, %v14347_v48  ;;  %v14375_v26 = vmul.f32 %v5595_v15, %v5593_v4  ;;  %v5881_v58 = vadd.s32 %v14248_v32, %v14264_v11 }
 0x6cf   : > { %v5896_v25 = vsel %vm9046_vm11, 0, %v9045_v22  ;;  %vm5940_vm1 = vcmp.gt.s32.totalorder %v5939_v41, 0  ;;  %v5937_v49 = vor.u32 8388608, %v14304_v43  ;;  %v14381_v36 = vadd.f32 %v13942_v45, %v4531_v23 }
 0x6d0   : > { %v5897_v47 = vsub.s32 32, %v5896_v25  ;;  %v5901_v3 = vsub.s32 4294967266, %v5896_v25  ;;  %9734 = vcosq.f32 %v14370_v9  ;;  %v5672_v20 = vmul.u32 %v14321_v12, %v5656_v50 }
 0x6d1   : > { %vm5674_vm9 = vc.u32 %v14354_v39, %v14346_v42  ;;  %v5941_v57 = vsel %vm5940_vm1, %v5939_v41, 0  ;;  %v5898_v59 = vshll.u32 %v14323_v13, %v5896_v25  ;;  %v5911_v43 = vsub.s32 4, %v14310_v5 }
 0x6d2   : > { %v5899_v32 = vshrl.u32 %v5881_v58, %v5897_v47  ;;  %v5902_v11 = vadd.s32 127, %v5901_v3  ;;  %v5676_v62 = vsel %vm5674_vm9, %v5675_v31, %v14347_v48  ;;  %v5943_v1 = vand.u32 31, %v5941_v57 }
 0x6d3   : > { %v5677_v45 = vadd.s32 %v5676_v62, %v5672_v20  ;;  %v14391_v4 = vshll.u32 %v5937_v49, 8  ;;  %v16920_v12 = vand.u32 2147483647, %v14381_v36  ;;  %v5942_v46 = vshrl.u32 %v5941_v57, 5 }
 0x6d4   : > { %v5900_v28 = vor.u32 %v5899_v32, %v5898_v59  ;;  %v5903_v27 = vshll.u32 %v5902_v11, 23  ;;  %v5944_v44 = vsub.s32 32, %v5943_v1  ;;  %v5724_v13 = vand.u32 2139095040, %v14381_v36 }
 0x6d5   : > { %v5678_v29 = vadd.s32 536870912, %v5677_v45  ;;  %v5946_v48 = vshll.u32 %v17008_v60, %v5943_v1  ;;  %v5949_v23 = vshll.u32 %v17272_v17, %v5943_v1  ;;  %v5952_v50 = vshll.u32 %v17273_v56, %v5943_v1 }
 0x6d6   : > { %v5904_v22 = vor.u32 4788187, %v5903_v27  ;;  %v5907_v0 = vcvt.s32.f32 %v5900_v28  ;;  %v5947_v15 = vshrl.u32 %v17272_v17, %v5944_v44  ;;  %v5950_v41 = vshrl.u32 %v17273_v56, %v5944_v44 }
 0x6d7   : > { %v14397_v19 = vshrl.u32 %v5678_v29, 30  ;;  %vm5827_vm7 = vcmp.lt.s32.totalorder %v14105_v63, 0  ;;  %v5953_v58 = vshrl.u32 %v17274_v6, %v5944_v44  ;;  %v5955_v25 = vshll.u32 %v17274_v6, %v5943_v1 }
 0x6d8   : > { %v5905_v31 = vand.u32 2147483647, %v5904_v22  ;;  %v5956_v47 = vshrl.u32 %v17275_v30, %v5944_v44  ;;  %v5948_v49 = vor.u32 %v5947_v15, %v5946_v48  ;;  %v5951_v20 = vor.u32 %v5950_v41, %v5949_v23 }
 0x6d9   : > { %v5680_v3 = vshll.u32 %v14397_v19, 30  ;;  %v5958_v57 = vshll.u32 %v17275_v30, %v5943_v1  ;;  %vm16922_vm12 = vcmp.lt.s32.totalorder %v13809_v40, 0  ;;  %v5954_v32 = vor.u32 %v5953_v58, %v5952_v50 }
 0x6da   : > { %v5908_v59 = vmul.f32 %v5907_v0, %v5905_v31  ;;  %v5957_v11 = vor.u32 %v5956_v47, %v5955_v25  ;;  %v5959_v62 = vshrl.u32 %v17276_v35, %v5944_v44  ;;  %v14410_v28 = vpop.eup %9734  ;;  %vm16921_vm8 = vcmp.lt.s32.totalorder %v14040_v55, 0 }
 0x6db   : > { %v14413_v27 = vsub.s32 %v5677_v45, %v5680_v3  ;;  %vm5961_vm3 = vcmp.lt.s32.totalorder %v5942_v46, 1  ;;  %vm5964_vm2 = vcmp.lt.s32.totalorder %v5942_v46, 4  ;;  %v5725_v29 = vshrl.u32 %v5724_v13, 23 }
 0x6dc   : > { %v17329_v22 = vand.u32 2147483647, %v14105_v63  ;;  %v5945_v0 = vshrl.u32 %v17008_v60, %v5944_v44  ;;  %v5960_v48 = vor.u32 %v5959_v62, %v5958_v57  ;;  %vm5963_vm1 = vcmp.lt.s32.totalorder %v5942_v46, 3 }
 0x6dd   : > { %v5966_v23 = vsel %vm5964_vm2, %v5954_v32, 2102212464  ;;  %v5909_v15 = vxor.u32 2147483648, %v5908_v59  ;;  %v5683_v41 = vsub.s32 0, %v14413_v27  ;;  %v5969_v45 = vsel %vm5961_vm3, %v5948_v49, %v5951_v20 }
 0x6de   : > { %vm14417_vm11 = vcmp.le.f32.partialorder %v17329_v22, 0.7853982  ;;  %v5970_v50 = vsel %vm5964_vm2, %v5957_v11, 920167782  ;;  %vm5962_vm9 = vcmp.lt.s32.totalorder %v5942_v46, 2  ;;  %v5965_v13 = vsel %vm5961_vm3, %v5945_v0, %v5948_v49 }
 0x6df   : > { %v5971_v31 = vsel %vm5963_vm1, %v5954_v32, %v5970_v50  ;;  %v5973_v58 = vsel %vm5961_vm3, %v5951_v20, %v5954_v32  ;;  %v9036_v25 = vmin.u32 %v5683_v41, %v14413_v27  ;;  %v5967_v47 = vsel %vm5963_vm1, %v5951_v20, %v5966_v23 }
 0x6e0   : > { %v5972_v3 = vsel %vm5962_vm9, %v5969_v45, %v5971_v31  ;;  %v5974_v44 = vsel %vm5964_vm2, %v5960_v48, 1326507024  ;;  %v4534_v14 = vmul.f32 %v14042_v10, %v13922_v54  ;;  %v5910_v49 = vsel %vm5827_vm7, %v5909_v15, %v5908_v59 }
 0x6e1   : > { %v5975_v57 = vsel %vm5963_vm1, %v5957_v11, %v5974_v44  ;;  %v14428_v62 = vmul.u32.u64.low %v14391_v4, %v5972_v3  ;;  %v14429_v22 = vmul.u32.u64.high %v14391_v4, %v5972_v3, %v14428_v62  ;;  %v5685_v0 = vclz %v9036_v25 }
 0x6e2   : > { %v5976_v32 = vsel %vm5962_vm9, %v5973_v58, %v5975_v57  ;;  %v5728_v20 = vand.u32 8388607, %v16920_v12  ;;  %v5968_v23 = vsel %vm5962_vm9, %v5965_v13, %v5967_v47  ;;  %v9039_v48 = vadd.s32 4294967169, %v5725_v29 }
 0x6e3   : > { %v14439_v46 = vmul.u32.u64.low %v14391_v4, %v5976_v32  ;;  %v14440_v11 = vmul.u32.u64.high %v14391_v4, %v5976_v32, %v14439_v46  ;;  %v14447_v54 = vsel %vm16922_vm12, %v5389_v8, %v14292_v18  ;;  %9736 = vsinq.f32 %v14370_v9 }
 0x6e4   : > { %v14455_v59 = vsel %vm5827_vm7, %v5911_v43, %v14310_v5  ;;  %v9037_v15 = vadd.s32 4294967294, %v5685_v0  ;;  %v17332_v29 = vxor.u32 2147483648, %v14375_v26  ;;  %v5987_v18 = vadd.s32 1, %v14429_v22 }
 0x6e5   : > { %v5731_v8 = vadd.s32 1, %v9039_v48  ;;  %v4535_v9 = vmul.f32 %v14042_v10, %v14017_v2  ;;  %v14470_v45 = vsel %vm14417_vm11, %v14105_v63, %v5910_v49  ;;  %v5984_v5 = vmul.u32 %v14391_v4, %v5968_v23 }
 0x6e6   : > { %v14462_v41 = vsel %vm16921_vm8, %v17332_v29, %v14375_v26  ;;  %vm9038_vm7 = vcmp.lt.s32.totalorder %v9037_v15, 0  ;;  %v5729_v43 = vor.u32 8388608, %v5728_v20  ;;  %vm5986_vm3 = vc.u32 %v14440_v11, %v14428_v62 }
 0x6e7   : > { %v5688_v50 = vsel %vm9038_vm7, 0, %v9037_v15  ;;  %vm5732_vm2 = vcmp.gt.s32.totalorder %v5731_v8, 0  ;;  %v14476_v26 = vadd.f32 %v14089_v52, %v4534_v14  ;;  %v5673_v2 = vadd.s32 %v14346_v42, %v14354_v39 }
 0x6e8   : > { %v5689_v10 = vsub.s32 32, %v5688_v50  ;;  %v5693_v13 = vsub.s32 4294967266, %v5688_v50  ;;  %v5988_v31 = vsel %vm5986_vm3, %v5987_v18, %v14429_v22  ;;  %9738 = vcosq.f32 %v14470_v45 }
 0x6e9   : > { %v5989_v58 = vadd.s32 %v5988_v31, %v5984_v5  ;;  %v5733_v25 = vsel %vm5732_vm2, %v5731_v8, 0  ;;  %v5690_v47 = vshll.u32 %v14413_v27, %v5688_v50  ;;  %v14484_v49 = vshll.u32 %v5729_v43, 8 }
 0x6ea   : > { %v5691_v3 = vshrl.u32 %v5673_v2, %v5689_v10  ;;  %v5694_v44 = vadd.s32 127, %v5693_v13  ;;  %v5735_v57 = vand.u32 31, %v5733_v25  ;;  %v6036_v42 = vand.u32 2139095040, %v14476_v26 }
 0x6eb   : > { %v5990_v14 = vadd.s32 536870912, %v5989_v58  ;;  %v14488_v39 = vadd.f32 %v14089_v52, %v4535_v9  ;;  %v14490_v32 = vshrl.u32 %v5733_v25, 5  ;;  %vm5619_vm1 = vcmp.lt.s32.totalorder %v14140_v16, 0 }
 0x6ec   : > { %v5692_v22 = vor.u32 %v5691_v3, %v5690_v47  ;;  %v5695_v0 = vshll.u32 %v5694_v44, 23  ;;  %v5736_v20 = vsub.s32 32, %v5735_v57  ;;  %v5738_v27 = vshll.u32 %v17008_v60, %v5735_v57 }
 0x6ed   : > { %v14492_v23 = vshrl.u32 %v5990_v14, 30  ;;  %v5741_v46 = vshll.u32 %v17272_v17, %v5735_v57  ;;  %v5744_v48 = vshll.u32 %v17273_v56, %v5735_v57  ;;  %v14497_v15 = vpop.eup %9736  ;;  %v5747_v8 = vshll.u32 %v17274_v6, %v5735_v57 }
 0x6ee   : > { %v5696_v29 = vor.u32 4788187, %v5695_v0  ;;  %v5699_v18 = vcvt.s32.f32 %v5692_v22  ;;  %v5739_v52 = vshrl.u32 %v17272_v17, %v5736_v20  ;;  %v5742_v5 = vshrl.u32 %v17273_v56, %v5736_v20 }
 0x6ef   : > { %v5992_v9 = vshll.u32 %v14492_v23, 30  ;;  %v5745_v43 = vshrl.u32 %v17274_v6, %v5736_v20  ;;  %v5748_v50 = vshrl.u32 %v17275_v30, %v5736_v20  ;;  %v5750_v13 = vshll.u32 %v17275_v30, %v5735_v57 }
 0x6f0   : > { %v5697_v2 = vand.u32 2147483647, %v5696_v29  ;;  %v5740_v10 = vor.u32 %v5739_v52, %v5738_v27  ;;  %v5751_v31 = vshrl.u32 %v17276_v35, %v5736_v20  ;;  %v5743_v47 = vor.u32 %v5742_v5, %v5741_v46 }
 0x6f1   : > { %v14508_v25 = vsub.s32 %v5989_v58, %v5992_v9  ;;  %v5746_v3 = vor.u32 %v5745_v43, %v5744_v48  ;;  %v5749_v44 = vor.u32 %v5748_v50, %v5747_v8  ;;  %v6037_v12 = vshrl.u32 %v6036_v42, 23 }
 0x6f2   : > { %v5700_v14 = vmul.f32 %v5699_v18, %v5697_v2  ;;  %v5752_v22 = vor.u32 %v5751_v31, %v5750_v13  ;;  %v17333_v4 = vand.u32 2147483647, %v13392_v33  ;;  %v14517_v57 = vpop.eup %9738  ;;  %v5737_v58 = vshrl.u32 %v17008_v60, %v5736_v20 }
 0x6f3   : > { %17336 = vst [vmem:[#allocation38_spill] sm:$0xff] %v14517_v57  ;;  %v5995_v29 = vsub.s32 0, %v14508_v25  ;;  %vm5753_vm7 = vcmp.lt.s32.totalorder %v14490_v32, 1  ;;  %vm5756_vm3 = vcmp.lt.s32.totalorder %v14490_v32, 4  ;;  %v17337_v46 = vand.u32 2147483647, %v14140_v16 }
 0x6f4   : > { %vm14513_vm9 = vcmp.le.f32.partialorder %v17333_v4, 0.7853982  ;;  %v17338_v42 = vmov 0  ;;  %vm5754_vm8 = vcmp.lt.s32.totalorder %v14490_v32, 2  ;;  %vm5755_vm12 = vcmp.lt.s32.totalorder %v14490_v32, 3 }
 0x6f5   : > { %vm14525_vm2 = vcmp.le.f32.partialorder %v17337_v46, 0.7853982  ;;  %v5761_v4 = vsel %vm5753_vm7, %v5740_v10, %v5743_v47  ;;  %v5762_v48 = vsel %vm5756_vm3, %v5749_v44, 920167782  ;;  %v9048_v20 = vmin.u32 %v5995_v29, %v14508_v25 }
 0x6f6   : > { %v17339_v42 = vsel %vm14525_vm2, 4294967295, %v17338_v42  ;;  %v5758_v18 = vsel %vm5756_vm3, %v5746_v3, 2102212464  ;;  %v5763_v52 = vsel %vm5755_vm12, %v5746_v3, %v5762_v48  ;;  %v5765_v8 = vsel %vm5753_vm7, %v5743_v47, %v5746_v3 }
 0x6f7   : > { %17340 = vst [vmem:[#allocation12_spill] sm:$0xff] %v17339_v42  ;;  %v5701_v9 = vxor.u32 2147483648, %v5700_v14  ;;  %v5764_v5 = vsel %vm5754_vm8, %v5761_v4, %v5763_v52  ;;  %v5766_v43 = vsel %vm5756_vm3, %v5752_v22, 1326507024  ;;  %v9051_v50 = vadd.s32 4294967169, %v6037_v12 }
 0x6f8   : > { %9740 = vsinq.f32 %v14470_v45  ;;  %v5997_v2 = vclz %v9048_v20  ;;  %v5757_v13 = vsel %vm5753_vm7, %v5737_v58, %v5740_v10  ;;  %v5767_v31 = vsel %vm5755_vm12, %v5749_v44, %v5766_v43 }
 0x6f9   : > { %v5759_v46 = vsel %vm5755_vm12, %v5743_v47, %v5758_v18  ;;  %v5768_v29 = vsel %vm5754_vm8, %v5765_v8, %v5767_v31  ;;  %v14544_v48 = vmul.u32.u64.low %v14484_v49, %v5764_v5  ;;  %v14545_v3 = vmul.u32.u64.high %v14484_v49, %v5764_v5, %v14544_v48 }
 0x6fa   : > { %v9049_v0 = vadd.s32 4294967294, %v5997_v2  ;;  %v14549_v22 = vmul.u32.u64.low %v14484_v49, %v5768_v29  ;;  %v14550_v12 = vmul.u32.u64.high %v14484_v49, %v5768_v29, %v14549_v22  ;;  %v17341_v45 = vand.u32 2147483647, %v14476_v26 }
 0x6fb   : > { %v5702_v10 = vsel %vm5619_vm1, %v5701_v9, %v5700_v14  ;;  %v6043_v47 = vadd.s32 1, %v9051_v50  ;;  %v6140_v44 = vand.u32 2139095040, %v14488_v39  ;;  %v4767_v58 = vsub.s32 4, %v13545_v51 }
 0x6fc   : > { %v6040_v4 = vand.u32 8388607, %v17341_v45  ;;  %v5985_v20 = vadd.s32 %v14428_v62, %v14440_v11  ;;  %vm9050_vm12 = vcmp.lt.s32.totalorder %v9049_v0, 0  ;;  %v5760_v18 = vsel %vm5754_vm8, %v5757_v13, %v5759_v46 }
 0x6fd   : > { %v14566_v52 = vsel %vm14513_vm9, %v13392_v33, %v13959_v21  ;;  %v6000_v8 = vsel %vm9050_vm12, 0, %v9049_v0  ;;  %v5779_v14 = vadd.s32 1, %v14545_v3  ;;  %vm6044_vm7 = vcmp.gt.s32.totalorder %v6043_v47, 0 }
 0x6fe   : > { %v16923_v9 = vand.u32 2147483647, %v14488_v39  ;;  %v14573_v62 = vsel %vm14525_vm2, %v14140_v16, %v5702_v10  ;;  %v6001_v11 = vsub.s32 32, %v6000_v8  ;;  %v6005_v32 = vsub.s32 4294967266, %v6000_v8 }
 0x6ff   : > { %v6041_v5 = vor.u32 8388608, %v6040_v4  ;;  %v5776_v43 = vmul.u32 %v14484_v49, %v5760_v18  ;;  %vm5778_vm8 = vc.u32 %v14550_v12, %v14544_v48  ;;  %v6045_v21 = vsel %vm6044_vm7, %v6043_v47, 0 }
 0x700   : > { %v6141_v0 = vshrl.u32 %v6140_v44, 23  ;;  %v6003_v50 = vshrl.u32 %v5985_v20, %v6001_v11  ;;  %v6006_v2 = vadd.s32 127, %v6005_v32  ;;  %v5780_v13 = vsel %vm5778_vm8, %v5779_v14, %v14545_v3 }
 0x701   : > { %v14579_v31 = vshrl.u32 %v6045_v21, 5  ;;  %v6002_v46 = vshll.u32 %v14508_v25, %v6000_v8  ;;  %v5781_v29 = vadd.s32 %v5780_v13, %v5776_v43  ;;  %v6047_v22 = vand.u32 31, %v6045_v21 }
 0x702   : > { %v14584_v45 = vand.u32 8388607, %v16923_v9  ;;  %v14586_v49 = vpop.eup %9740  ;;  %v6007_v4 = vshll.u32 %v6006_v2, 23  ;;  %v14588_v10 = vshll.u32 %v6041_v5, 8  ;;  %v14593_v47 = vsel %vm4683_vm14, %v4767_v58, %v13545_v51 }
 0x703   : > { %9742 = vcosq.f32 %v14566_v52  ;;  %v6004_v3 = vor.u32 %v6003_v50, %v6002_v46  ;;  %v5782_v25 = vadd.s32 536870912, %v5781_v29  ;;  %v6048_v44 = vsub.s32 32, %v6047_v22 }
 0x704   : > { %v9055_v20 = vadd.s32 4294967169, %v6141_v0  ;;  %v6008_v18 = vor.u32 4788187, %v6007_v4  ;;  %v6050_v8 = vshll.u32 %v17008_v60, %v6047_v22  ;;  %v6053_v14 = vshll.u32 %v17272_v17, %v6047_v22 }
 0x705   : > { %vm6065_vm3 = vcmp.lt.s32.totalorder %v14579_v31, 1  ;;  %v14599_v11 = vshrl.u32 %v5782_v25, 30  ;;  %v6051_v32 = vshrl.u32 %v17272_v17, %v6048_v44  ;;  %v6054_v51 = vshrl.u32 %v17273_v56, %v6048_v44 }
 0x706   : > { %v6056_v58 = vshll.u32 %v17273_v56, %v6047_v22  ;;  %v6057_v5 = vshrl.u32 %v17274_v6, %v6048_v44  ;;  %v6059_v43 = vshll.u32 %v17274_v6, %v6047_v22  ;;  %v6060_v21 = vshrl.u32 %v17275_v30, %v6048_v44 }
 0x707   : > { %v6062_v0 = vshll.u32 %v17275_v30, %v6047_v22  ;;  %v5784_v50 = vshll.u32 %v14599_v11, 30  ;;  %v6052_v2 = vor.u32 %v6051_v32, %v6050_v8  ;;  %v6055_v13 = vor.u32 %v6054_v51, %v6053_v14 }
 0x708   : > { %v6063_v46 = vshrl.u32 %v17276_v35, %v6048_v44  ;;  %v6049_v4 = vshrl.u32 %v17008_v60, %v6048_v44  ;;  %v6058_v25 = vor.u32 %v6057_v5, %v6056_v58  ;;  %v6061_v9 = vor.u32 %v6060_v21, %v6059_v43 }
 0x709   : > { %vm6066_vm14 = vcmp.lt.s32.totalorder %v14579_v31, 2  ;;  %v6009_v42 = vand.u32 2147483647, %v6008_v18  ;;  %v14612_v7 = vsub.s32 %v5781_v29, %v5784_v50  ;;  %vm6068_vm12 = vcmp.lt.s32.totalorder %v14579_v31, 4 }
 0x70a   : > { %v6064_v57 = vor.u32 %v6063_v46, %v6062_v0  ;;  %vm6067_vm7 = vcmp.lt.s32.totalorder %v14579_v31, 3  ;;  %v6070_v22 = vsel %vm6068_vm12, %v6058_v25, 2102212464  ;;  %v6073_v8 = vsel %vm6065_vm3, %v6052_v2, %v6055_v13 }
 0x70b   : > { %v6074_v14 = vsel %vm6068_vm12, %v6061_v9, 920167782  ;;  %v6011_v32 = vcvt.s32.f32 %v6004_v3  ;;  %v5787_v44 = vsub.s32 0, %v14612_v7  ;;  %v6077_v58 = vsel %vm6065_vm3, %v6055_v13, %v6058_v25 }
 0x70c   : > { %v6075_v51 = vsel %vm6067_vm7, %v6058_v25, %v6074_v14  ;;  %v6069_v29 = vsel %vm6065_vm3, %v6049_v4, %v6052_v2  ;;  %v6071_v5 = vsel %vm6067_vm7, %v6055_v13, %v6070_v22  ;;  %v6078_v21 = vsel %vm6068_vm12, %v6064_v57, 1326507024 }
 0x70d   : > { %v14621_v18 = vpop.eup %9742  ;;  %v6076_v43 = vsel %vm6066_vm14, %v6073_v8, %v6075_v51  ;;  %v9040_v0 = vmin.u32 %v5787_v44, %v14612_v7  ;;  %v6079_v50 = vsel %vm6067_vm7, %v6061_v9, %v6078_v21  ;;  %v14633_v14 = vmul.f32 %v6011_v32, %v6009_v42 }
 0x70e   : > { %v14629_v3 = vmul.u32.u64.low %v14588_v10, %v6076_v43  ;;  %v14630_v46 = vmul.u32.u64.high %v14588_v10, %v6076_v43, %v14629_v3  ;;  %v6080_v25 = vsel %vm6066_vm14, %v6077_v58, %v6079_v50  ;;  %v6145_v2 = vor.u32 8388608, %v14584_v45 }
 0x70f   : > { %v6147_v13 = vadd.s32 1, %v9055_v20  ;;  %9744 = vcosq.f32 %v14573_v62  ;;  %v5789_v4 = vclz %v9040_v0  ;;  %v17342_v9 = vsub.s32 4, %v14397_v19 }
 0x710   : > { %v14640_v57 = vmul.u32.u64.low %v14588_v10, %v6080_v25  ;;  %v14641_v22 = vmul.u32.u64.high %v14588_v10, %v6080_v25, %v14640_v57  ;;  %9746 = vsinq.f32 %v14573_v62  ;;  %v6072_v45 = vsel %vm6066_vm14, %v6069_v29, %v6071_v5  ;;  %v17346_v25 = vld [vmem:[#allocation10_spill] sm:$0xff] }
 0x711   : > { %v14648_v42 = vsel %vm5619_vm1, %v17342_v9, %v14397_v19  ;;  %vm6148_vm8 = vcmp.gt.s32.totalorder %v6147_v13, 0  ;;  %v9041_v20 = vadd.s32 4294967294, %v5789_v4  ;;  %v6091_v8 = vadd.s32 1, %v14630_v46 }
 0x712   : > { %v6149_v32 = vsel %vm6148_vm8, %v6147_v13, 0  ;;  %v4770_v44 = vsel %vm14513_vm9, 0, %v14593_v47  ;;  %v5777_v19 = vadd.s32 %v14544_v48, %v14550_v12  ;;  %v14660_v43 = vshll.u32 %v6145_v2, 8 }
 0x713   : > { %v6151_v58 = vand.u32 31, %v6149_v32  ;;  %vm9042_vm1 = vcmp.lt.s32.totalorder %v9041_v20, 0  ;;  %v6088_v62 = vmul.u32 %v14588_v10, %v6072_v45  ;;  %vm6090_vm3 = vc.u32 %v14641_v22, %v14629_v3 }
 0x714   : > { %9748 = vsinq.f32 %v14566_v52  ;;  %v5792_v31 = vsel %vm9042_vm1, 0, %v9041_v20  ;;  %v6092_v27 = vsel %vm6090_vm3, %v6091_v8, %v14630_v46  ;;  %v4774_v29 = vadd.s32 3, %v4770_v44 }
 0x715   : > { %v6152_v47 = vsub.s32 32, %v6151_v58  ;;  %v5797_v5 = vsub.s32 4294967266, %v5792_v31  ;;  %v6093_v21 = vadd.s32 %v6092_v27, %v6088_v62  ;;  %v17343_v12 = vand.u32 2147483647, %v13415_v38 }
 0x716   : > { %v6154_v10 = vshll.u32 %v17008_v60, %v6151_v58  ;;  %v5183_v46 = vsub.s32 4, %v17346_v25  ;;  %v6150_v4 = vshrl.u32 %v6149_v32, 5  ;;  %v6157_v57 = vshll.u32 %v17272_v17, %v6151_v58 }
 0x717   : > { %vm14670_vm9 = vcmp.le.f32.partialorder %v17343_v12, 0.7853982  ;;  %v6155_v50 = vshrl.u32 %v17272_v17, %v6152_v47  ;;  %v6158_v52 = vshrl.u32 %v17273_v56, %v6152_v47  ;;  %v5798_v2 = vadd.s32 127, %v5797_v5 }
 0x718   : > { %v6094_v13 = vadd.s32 536870912, %v6093_v21  ;;  %v5793_v9 = vsub.s32 32, %v5792_v31  ;;  %v6160_v20 = vshll.u32 %v17273_v56, %v6151_v58  ;;  %v6161_v8 = vshrl.u32 %v17274_v6, %v6152_v47 }
 0x719   : > { %v6156_v45 = vor.u32 %v6155_v50, %v6154_v10  ;;  %v14681_v44 = vpop.eup %9744  ;;  %v5799_v62 = vshll.u32 %v5798_v2, 23  ;;  %v6159_v12 = vor.u32 %v6158_v52, %v6157_v57  ;;  %v6164_v51 = vshrl.u32 %v17275_v30, %v6152_v47 }
 0x71a   : > { %v14683_v27 = vshrl.u32 %v6094_v13, 30  ;;  %v14686_v48 = vpop.eup %9746  ;;  %v6162_v5 = vor.u32 %v6161_v8, %v6160_v20  ;;  %v6163_v32 = vshll.u32 %v17274_v6, %v6151_v58  ;;  %v6166_v17 = vshll.u32 %v17275_v30, %v6151_v58 }
 0x71b   : > { %v6167_v10 = vshrl.u32 %v17276_v35, %v6152_v47  ;;  %v5794_v50 = vshll.u32 %v14612_v7, %v5792_v31  ;;  %v4775_v16 = vand.u32 3, %v4774_v29  ;;  %v5185_v52 = vsel %vm14670_vm9, %v13415_v38, %v14136_v24 }
 0x71c   : > { %v6096_v56 = vshll.u32 %v14683_v27, 30  ;;  %v5795_v2 = vshrl.u32 %v5777_v19, %v5793_v9  ;;  %v6153_v13 = vshrl.u32 %v17008_v60, %v6152_v47  ;;  %v6165_v57 = vor.u32 %v6164_v51, %v6163_v32 }
 0x71d   : > { %v6168_v20 = vor.u32 %v6167_v10, %v6166_v17  ;;  %v5800_v6 = vor.u32 4788187, %v5799_v62  ;;  %vm6169_vm14 = vcmp.lt.s32.totalorder %v6150_v4, 1  ;;  %vm6172_vm12 = vcmp.lt.s32.totalorder %v6150_v4, 4 }
 0x71e   : > { %v9749_v8 = vpop.eup %9748  ;;  %v14698_v58 = vsub.s32 %v6093_v21, %v6096_v56  ;;  %vm6171_vm7 = vcmp.lt.s32.totalorder %v6150_v4, 3  ;;  %v6174_v7 = vsel %vm6172_vm12, %v6162_v5, 2102212464  ;;  %v6177_v31 = vsel %vm6169_vm14, %v6156_v45, %v6159_v12 }
 0x71f   : > { %v6178_v29 = vsel %vm6172_vm12, %v6165_v57, 920167782  ;;  %vm6170_vm8 = vcmp.lt.s32.totalorder %v6150_v4, 2  ;;  %v6173_v30 = vsel %vm6169_vm14, %v6153_v13, %v6156_v45  ;;  %v6175_v19 = vsel %vm6171_vm7, %v6159_v12, %v6174_v7 }
 0x720   : > { %v6099_v35 = vsub.s32 0, %v14698_v58  ;;  %v6179_v24 = vsel %vm6171_vm7, %v6162_v5, %v6178_v29  ;;  %v6181_v51 = vsel %vm6169_vm14, %v6159_v12, %v6162_v5  ;;  %v6182_v17 = vsel %vm6172_vm12, %v6168_v20, 1326507024 }
 0x721   : > { %v6180_v47 = vsel %vm6170_vm8, %v6177_v31, %v6179_v24  ;;  %vm16934_vm1 = vcmp.lt.s32.totalorder %v14268_v37, 0  ;;  %v5796_v56 = vor.u32 %v5795_v2, %v5794_v50  ;;  %v6183_v9 = vsel %vm6171_vm7, %v6165_v57, %v6182_v17 }
 0x722   : > { %v9052_v21 = vmin.u32 %v6099_v35, %v14698_v58  ;;  %vm4773_vm3 = vweird.f32 %v13392_v33  ;;  %v5184_v62 = vsel %vm5099_vm13, %v5183_v46, %v17346_v25  ;;  %v5801_v32 = vand.u32 2147483647, %v5800_v6 }
 0x723   : > { %v6184_v45 = vsel %vm6170_vm8, %v6181_v51, %v6183_v9  ;;  %v14710_v10 = vmul.u32.u64.low %v14660_v43, %v6180_v47  ;;  %v14711_v13 = vmul.u32.u64.high %v14660_v43, %v6180_v47, %v14710_v10  ;;  %v6176_v5 = vsel %vm6170_vm8, %v6173_v30, %v6175_v19 }
 0x724   : > { %v6101_v12 = vclz %v9052_v21  ;;  %v14716_v35 = vmul.u32.u64.low %v14660_v43, %v6184_v45  ;;  %v14717_v50 = vmul.u32.u64.high %v14660_v43, %v6184_v45, %v14716_v35  ;;  %vm4776_vm14 = vcmp.lt.s32.totalorder %v4775_v16, 2 }
 0x725   : > { %v4778_v2 = vxor.u32 2147483648, %v9749_v8  ;;  %vm4780_vm12 = vcmp.eq.s32.totalorder %v4775_v16, 2  ;;  %v5186_v6 = vsel %vm14670_vm9, 0, %v5184_v62  ;;  %vm4777_vm13 = vcmp.eq.s32.totalorder %v4775_v16, 0 }
 0x726   : > { %v9053_v25 = vadd.s32 4294967294, %v6101_v12  ;;  %v17347_v46 = vxor.u32 2147483648, %v14621_v18  ;;  %9750 = vcosq.f32 %v5185_v52  ;;  %v6195_v20 = vadd.s32 1, %v14711_v13 }
 0x727   : > { %v4779_v30 = vsel %vm4777_vm13, %v14621_v18, %v4778_v2  ;;  %9752 = vsinq.f32 %v5185_v52  ;;  %v5190_v4 = vadd.s32 3, %v5186_v6  ;;  %v6192_v7 = vmul.u32 %v14660_v43, %v6176_v5  ;;  %v17353_v2 = vld [vmem:[#allocation24_spill] sm:$0xff] }
 0x728   : > { %v4782_v57 = vsel %vm4780_vm12, %v17347_v46, %v9749_v8  ;;  %vm9054_vm7 = vcmp.lt.s32.totalorder %v9053_v25, 0  ;;  %vm6194_vm8 = vc.u32 %v14717_v50, %v14710_v10  ;;  %v5803_v31 = vcvt.s32.f32 %v5796_v56  ;;  %v17349_v56 = vld [vmem:[#allocation22_spill] sm:$0xff] }
 0x729   : > { %v4783_v0 = vsel %vm4776_vm14, %v4779_v30, %v4782_v57  ;;  %v6104_v29 = vsel %vm9054_vm7, 0, %v9053_v25  ;;  %v6196_v24 = vsel %vm6194_vm8, %v6195_v20, %v14711_v13  ;;  %v5191_v8 = vand.u32 3, %v5190_v4  ;;  %v17351_v13 = vld [vmem:[#allocation28_spill] sm:$0xff]  ;;  %v17354_v25 = vld [vmem:[#allocation11_spill] sm:$0xff] }
 0x72a   : > { %v6089_v19 = vadd.s32 %v14629_v3, %v14641_v22  ;;  %v6105_v47 = vsub.s32 32, %v6104_v29  ;;  %v6109_v18 = vsub.s32 4294967266, %v6104_v29  ;;  %v6197_v52 = vadd.s32 %v6196_v24, %v6192_v7  ;;  %v17355_v7 = vld [vmem:[#allocation13_spill] sm:$0xff] }
 0x72b   : > { %v17348_v51 = vxor.u32 2147483648, %v14633_v14  ;;  %v14739_v16 = vmul.f32 %v5803_v31, %v5801_v32  ;;  %v4784_v17 = vsel %vm4773_vm3, nan, %v4783_v0  ;;  %v4666_v9 = vsel %vm13695_vm6, 0, %v17349_v56  ;;  %v17356_v31 = vld [vmem:[#allocation20_spill] sm:$0xff] }
 0x72c   : > { %v6106_v3 = vshll.u32 %v14698_v58, %v6104_v29  ;;  %v6107_v22 = vshrl.u32 %v6089_v19, %v6105_v47  ;;  %v6110_v62 = vadd.s32 127, %v6109_v18  ;;  %v6198_v45 = vadd.s32 536870912, %v6197_v52 }
 0x72d   : > { %v14737_v43 = vsel %vm16934_vm1, %v17348_v51, %v14633_v14  ;;  %vm5189_vm9 = vweird.f32 %v13415_v38  ;;  %vm5192_vm14 = vcmp.lt.s32.totalorder %v5191_v8, 2  ;;  %vm5193_vm12 = vcmp.eq.s32.totalorder %v5191_v8, 0 }
 0x72e   : > { %v4670_v14 = vadd.s32 3, %v4666_v9  ;;  %v5082_v12 = vsel %vm13821_vm10, 0, %v17351_v13  ;;  %v6108_v33 = vor.u32 %v6107_v22, %v6106_v3  ;;  %v6111_v5 = vshll.u32 %v6110_v62, 23  ;;  %v17357_v62 = vld [vmem:[#allocation23_spill] sm:$0xff] }
 0x72f   : > { %v14751_v35 = vshrl.u32 %v6198_v45, 30  ;;  %v4674_v6 = vxor.u32 2147483648, %v17353_v2  ;;  %vm5196_vm6 = vcmp.eq.s32.totalorder %v5191_v8, 2  ;;  %v4677_v46 = vxor.u32 2147483648, %v17354_v25 }
 0x730   : > { %v4671_v58 = vand.u32 3, %v4670_v14  ;;  %v5086_v57 = vadd.s32 3, %v5082_v12  ;;  %v9751_v20 = vpop.eup %9750  ;;  %v6112_v30 = vor.u32 4788187, %v6111_v5  ;;  %v5090_v0 = vxor.u32 2147483648, %v17355_v7 }
 0x731   : > { %v6200_v4 = vshll.u32 %v14751_v35, 30  ;;  %v5093_v29 = vxor.u32 2147483648, %v17356_v31  ;;  %v9753_v24 = vpop.eup %9752  ;;  %v6115_v19 = vcvt.s32.f32 %v6108_v33  ;;  %v5197_v47 = vxor.u32 2147483648, %v9751_v20 }
 0x732   : > { %vm4673_vm10 = vcmp.eq.s32.totalorder %v4671_v58, 0  ;;  %vm4676_vm3 = vcmp.eq.s32.totalorder %v4671_v58, 2  ;;  %vm16935_vm13 = vcmp.lt.s32.totalorder %v14476_v26, 0  ;;  %v6113_v18 = vand.u32 2147483647, %v6112_v30 }
 0x733   : > { %v14759_v51 = vsub.s32 %v6197_v52, %v6200_v4  ;;  %v5194_v56 = vxor.u32 2147483648, %v9753_v24  ;;  %v4675_v21 = vsel %vm4673_vm10, %v17354_v25, %v4674_v6  ;;  %v5198_v9 = vsel %vm5196_vm6, %v5197_v47, %v9753_v24  ;;  %v17365_v4 = vld [vmem:[#allocation36_spill] sm:$0xff] }
 0x734   : > { %v4678_v3 = vsel %vm4676_vm3, %v4677_v46, %v17353_v2  ;;  %v5087_v22 = vand.u32 3, %v5086_v57  ;;  %v4975_v45 = vsub.s32 4, %v17357_v62  ;;  %v6116_v14 = vmul.f32 %v6115_v19, %v6113_v18  ;;  %v17361_v2 = vld [vmem:[#allocation16_spill] sm:$0xff] }
 0x735   : > { %v6203_v13 = vsub.s32 0, %v14759_v51  ;;  %v5195_v32 = vsel %vm5193_vm12, %v9751_v20, %v5194_v56  ;;  %vm4672_vm7 = vcmp.lt.s32.totalorder %v4671_v58, 2  ;;  %v17358_v12 = vand.u32 2147483647, %v14476_v26 }
 0x736   : > { %v5199_v33 = vsel %vm5192_vm14, %v5195_v32, %v5198_v9  ;;  %v4679_v5 = vsel %vm4672_vm7, %v4675_v21, %v4678_v3  ;;  %vm5089_vm6 = vcmp.eq.s32.totalorder %v5087_v22, 0  ;;  %v17362_v6 = vand.u32 2147483647, %v17361_v2 }
 0x737   : > { %vm14769_vm8 = vcmp.le.f32.partialorder %v17358_v12, 0.7853982  ;;  %v6117_v46 = vxor.u32 2147483648, %v6116_v14  ;;  %v9056_v57 = vmin.u32 %v6203_v13, %v14759_v51  ;;  %v5200_v58 = vsel %vm5189_vm9, nan, %v5199_v33 }
 0x738   : > { %vm14776_vm10 = vcmp.le.f32.partialorder %v17362_v6, 0.7853982  ;;  %v5091_v20 = vsel %vm5089_vm6, %v17356_v31, %v5090_v0  ;;  %v14784_v30 = vpack.c.bf16 %v5200_v58, %v4784_v17  ;;  %vm5092_vm12 = vcmp.eq.s32.totalorder %v5087_v22, 2  ;;  %v17366_v17 = vld [vmem:[#allocation25_spill] sm:$0xff]  ;;  %v17367_v0 = vld [vmem:[#allocation15_spill] sm:$0xff] }
 0x739   : > { %v4976_v8 = vsel %vm4891_vm4, %v4975_v45, %v17357_v62  ;;  %v4977_v24 = vsel %vm14776_vm10, %v17361_v2, %v17365_v4  ;;  %v6205_v19 = vclz %v9056_v57  ;;  %vm5088_vm14 = vcmp.lt.s32.totalorder %v5087_v22, 2  ;;  %v17371_v62 = vld [vmem:[#allocation31_spill] sm:$0xff] }
 0x73a   : > { %v5094_v47 = vsel %vm5092_vm12, %v5093_v29, %v17355_v7  ;;  %v4978_v38 = vsel %vm14776_vm10, 0, %v4976_v8  ;;  %9193 = vmatprep.subr.bf16.mxu0 %v14784_v30  ;;  %vm4669_vm9 = vweird.f32 %v17366_v17  ;;  %vm5085_vm3 = vweird.f32 %v17367_v0 }
 0x73b   : > { %v5095_v31 = vsel %vm5088_vm14, %v5091_v20, %v5094_v47  ;;  %9754 = vcosq.f32 %v4977_v24  ;;  %v9057_v18 = vadd.s32 4294967294, %v6205_v19  ;;  %v4680_v56 = vsel %vm4669_vm9, nan, %v4679_v5 }
 0x73c   : > { %v5096_v21 = vsel %vm5085_vm3, nan, %v5095_v31  ;;  %v4982_v9 = vadd.s32 3, %v4978_v38  ;;  %v6118_v3 = vsel %vm16935_vm13, %v6117_v46, %v6116_v14  ;;  %v17368_v7 = vand.u32 2147483647, %v13809_v40  ;;  %v17376_v31 = vld [vmem:[#allocation33_spill] sm:$0xff] }
 0x73d   : > { %v14801_v22 = vpack.c.bf16 %v5096_v21, %v4680_v56  ;;  %v5391_v45 = vsub.s32 4, %v17371_v62  ;;  %v6119_v13 = vsub.s32 4, %v14683_v27  ;;  %vm9058_vm7 = vcmp.lt.s32.totalorder %v9057_v18, 0 }
 0x73e   : > { %vm14805_vm4 = vcmp.le.f32.partialorder %v17368_v7, 0.7853982  ;;  %9756 = vsinq.f32 %v4977_v24  ;;  %v6208_v14 = vsel %vm9058_vm7, 0, %v9057_v18  ;;  %v14816_v12 = vand.u32 3, %v4982_v9  ;;  %v17373_v24 = vld [vmem:[#allocation30_spill] sm:$0xff] }
 0x73f   : > { %v5393_v32 = vsel %vm14805_vm4, %v13809_v40, %v14447_v54  ;;  %9195 = vmatpush1.bf16.msra.mxu0 %v14801_v22  ;;  %vm17372_vm6 = vcmp.lt.s32.totalorder %v13809_v40, 0  ;;  %v14824_v5 = vsel %vm14769_vm8, %v14476_v26, %v6118_v3  ;;  %v6193_v6 = vadd.s32 %v14710_v10, %v14717_v50  ;;  %v17375_v50 = vld [vmem:[#allocation39_spill] sm:$0xff] }
 0x740   : > { %v5392_v33 = vsel %vm17372_vm6, %v5391_v45, %v17371_v62  ;;  %9758 = vcosq.f32 %v5393_v32  ;;  %v6209_v25 = vsub.s32 32, %v6208_v14  ;;  %v6213_v54 = vsub.s32 4294967266, %v6208_v14  ;;  %v17378_v3 = vld [vmem:[#allocation35_spill] sm:$0xff] }
 0x741   : > { %v5805_v46 = vxor.u32 2147483648, %v14739_v16  ;;  %v6210_v57 = vshll.u32 %v14759_v51, %v6208_v14  ;;  %v5394_v58 = vsel %vm14805_vm4, 0, %v5392_v33  ;;  %9760 = vsinq.f32 %v5393_v32  ;;  %v17379_v32 = vld [vmem:[#allocation32_spill] sm:$0xff]  ;;  %v17380_v14 = vld [vmem:[#allocation19_spill] sm:$0xff] }
 0x742   : > { %v6211_v20 = vshrl.u32 %v6193_v6, %v6209_v25  ;;  %v6214_v8 = vadd.s32 127, %v6213_v54  ;;  %v5398_v4 = vadd.s32 3, %v5394_v58  ;;  %v4874_v47 = vsel %vm13882_vm15, 0, %v17373_v24  ;;  %v17381_v24 = vld [vmem:[#allocation37_spill] sm:$0xff] }
 0x743   : > { %9762 = vcosq.f32 %v14824_v5  ;;  %vm4985_vm10 = vcmp.eq.s32.totalorder %v14816_v12, 0  ;;  %v4878_v10 = vadd.s32 3, %v4874_v47  ;;  %v4882_v38 = vxor.u32 2147483648, %v17375_v50 }
 0x744   : > { %v6212_v17 = vor.u32 %v6211_v20, %v6210_v57  ;;  %v6215_v51 = vshll.u32 %v6214_v8, 23  ;;  %vm4984_vm12 = vcmp.lt.s32.totalorder %v14816_v12, 2  ;;  %v5399_v0 = vand.u32 3, %v5398_v4 }
 0x745   : > { %v5290_v56 = vsel %vm14110_vm5, 0, %v17376_v31  ;;  %v9755_v21 = vpop.eup %9754  ;;  %vm4988_vm14 = vcmp.eq.s32.totalorder %v14816_v12, 2  ;;  %v4879_v9 = vand.u32 3, %v4878_v10  ;;  %v4885_v7 = vxor.u32 2147483648, %v17378_v3 }
 0x746   : > { %v5294_v29 = vadd.s32 3, %v5290_v56  ;;  %v6216_v62 = vor.u32 4788187, %v6215_v51  ;;  %v4989_v45 = vxor.u32 2147483648, %v9755_v21  ;;  %vm4877_vm15 = vweird.f32 %v17379_v32 }
 0x747   : > { %v6219_v33 = vcvt.s32.f32 %v6212_v17  ;;  %vm5400_vm7 = vcmp.lt.s32.totalorder %v5399_v0, 2  ;;  %vm4881_vm5 = vcmp.eq.s32.totalorder %v4879_v9, 0  ;;  %v5298_v6 = vxor.u32 2147483648, %v14327_v61 }
 0x748   : > { %v9757_v25 = vpop.eup %9756  ;;  %v6217_v54 = vand.u32 2147483647, %v6216_v62  ;;  %v4883_v57 = vsel %vm4881_vm5, %v17378_v3, %v4882_v38  ;;  %vm4884_vm6 = vcmp.eq.s32.totalorder %v4879_v9, 2  ;;  %v5295_v58 = vand.u32 3, %v5294_v29 }
 0x749   : > { %v4986_v8 = vxor.u32 2147483648, %v9757_v25  ;;  %vm4880_vm1 = vcmp.lt.s32.totalorder %v4879_v9, 2  ;;  %v4886_v4 = vsel %vm4884_vm6, %v4885_v7, %v17375_v50  ;;  %v5301_v19 = vxor.u32 2147483648, %v17381_v24 }
 0x74a   : > { %v9759_v20 = vpop.eup %9758  ;;  %v4990_v47 = vsel %vm4988_vm14, %v4989_v45, %v9757_v25  ;;  %vm5401_vm13 = vcmp.eq.s32.totalorder %v5399_v0, 0  ;;  %v4887_v17 = vsel %vm4880_vm1, %v4883_v57, %v4886_v4  ;;  %v6220_v31 = vmul.f32 %v6219_v33, %v6217_v54  ;;  %v17383_v33 = vld [vmem:[#allocation34_spill] sm:$0xff] }
 0x74b   : > { %v5405_v10 = vxor.u32 2147483648, %v9759_v20  ;;  %v9761_v51 = vpop.eup %9760  ;;  %v4987_v38 = vsel %vm4985_vm10, %v9755_v21, %v4986_v8  ;;  %vm5404_vm5 = vcmp.eq.s32.totalorder %v5399_v0, 2  ;;  %vm5296_vm4 = vcmp.lt.s32.totalorder %v5295_v58, 2 }
 0x74c   : > { %vm5723_vm3 = vcmp.lt.s32.totalorder %v14381_v36, 0  ;;  %v5402_v18 = vxor.u32 2147483648, %v9761_v51  ;;  %vm5297_vm6 = vcmp.eq.s32.totalorder %v5295_v58, 0  ;;  %vm5300_vm9 = vcmp.eq.s32.totalorder %v5295_v58, 2 }
 0x74d   : > { %v5406_v56 = vsel %vm5404_vm5, %v5405_v10, %v9761_v51  ;;  %v14857_v50 = vpop.eup %9762  ;;  %v4991_v9 = vsel %vm4984_vm12, %v4987_v38, %v4990_v47  ;;  %v4888_v3 = vsel %vm4877_vm15, nan, %v4887_v17  ;;  %v5299_v7 = vsel %vm5297_vm6, %v17381_v24, %v5298_v6 }
 0x74e   : > { %v5302_v21 = vsel %vm5300_vm9, %v5301_v19, %v14327_v61  ;;  %v5403_v29 = vsel %vm5401_vm13, %v9759_v20, %v5402_v18  ;;  %v17382_v45 = vand.u32 2147483647, %v14040_v55  ;;  %v5599_v25 = vsub.s32 4, %v17383_v33 }
 0x74f   : > { %v5303_v62 = vsel %vm5296_vm4, %v5299_v7, %v5302_v21  ;;  %v6221_v54 = vxor.u32 2147483648, %v6220_v31  ;;  %v5407_v57 = vsel %vm5400_vm7, %v5403_v29, %v5406_v56  ;;  %vm17384_vm10 = vweird.f32 %v17380_v14  ;;  %v17397_v29 = vld [vmem:[#allocation17_spill] sm:$0xff] }
 0x750   : > { %vm5514_vm1 = vcmp.le.f32.partialorder %v17382_v45, 0.7853982  ;;  %v5304_v12 = vsel %vm17384_vm10, nan, %v5303_v62  ;;  %vm17385_vm12 = vweird.f32 %v17361_v2  ;;  %vm17386_vm13 = vweird.f32 %v13809_v40 }
 0x751   : > { %v5601_v32 = vsel %vm5514_vm1, %v14040_v55, %v14462_v41  ;;  %v4992_v61 = vsel %vm17385_vm12, nan, %v4991_v9  ;;  %v5408_v6 = vsel %vm17386_vm13, nan, %v5407_v57  ;;  %vm17387_vm14 = vcmp.lt.s32.totalorder %v14040_v55, 0 }
 0x752   : > { %v5600_v58 = vsel %vm17387_vm14, %v5599_v25, %v17383_v33  ;;  %9764 = vcosq.f32 %v5601_v32  ;;  %v14881_v20 = vpack.c.bf16 %v5408_v6, %v4992_v61  ;;  %v17388_v14 = vand.u32 2147483647, %v14268_v37 }
 0x753   : > { %v5602_v0 = vsel %vm5514_vm1, 0, %v5600_v58  ;;  %9766 = vsinq.f32 %v5601_v32  ;;  %v14889_v41 = vpack.c.bf16 %v5304_v12, %v4888_v3  ;;  %v6015_v40 = vsub.s32 4, %v14492_v23 }
 0x754   : > { %vm14885_vm15 = vcmp.le.f32.partialorder %v17388_v14, 0.7853982  ;;  %v5606_v2 = vadd.s32 3, %v5602_v0  ;;  %vm17391_vm9 = vcmp.lt.s32.totalorder %v14476_v26, 0  ;;  %vm16936_vm4 = vcmp.lt.s32.totalorder %v14488_v39, 0  ;;  %9201 = vmatprep.subr.bf16.mxu1 %v14881_v20 }
 0x755   : > { %v6017_v4 = vsel %vm14885_vm15, %v14268_v37, %v14737_v43  ;;  %v14901_v24 = vsel %vm17391_vm9, %v6119_v13, %v14683_v27  ;;  %v5498_v19 = vsel %vm14331_vm0, 0, %v14364_v53  ;;  %9203 = vmatpush1.bf16.msra.mxu1 %v14889_v41  ;;  %vm17392_vm7 = vcmp.lt.s32.totalorder %v14268_v37, 0 }
 0x756   : > { %9768 = vcosq.f32 %v6017_v4  ;;  %v5607_v47 = vand.u32 3, %v5606_v2  ;;  %v6016_v43 = vsel %vm17392_vm7, %v6015_v40, %v14492_v23  ;;  %v5502_v10 = vadd.s32 3, %v5498_v19 }
 0x757   : > { %9770 = vsinq.f32 %v6017_v4  ;;  %v5806_v27 = vsel %vm5723_vm3, %v5805_v46, %v14739_v16  ;;  %v6018_v34 = vsel %vm14885_vm15, 0, %v6016_v43  ;;  %v5914_v53 = vsel %vm14417_vm11, 0, %v14455_v59  ;;  %v17393_v59 = vld [vmem:[#allocation38_spill] sm:$0xff] }
 0x758   : > { %9772 = vsinq.f32 %v14824_v5  ;;  %v6222_v23 = vsel %vm16936_vm4, %v6221_v54, %v6220_v31  ;;  %v6022_v13 = vadd.s32 3, %v6018_v34  ;;  %v5506_v17 = vxor.u32 2147483648, %v14497_v15 }
 0x759   : > { %v5509_v51 = vxor.u32 2147483648, %v14410_v28  ;;  %vm5608_vm0 = vcmp.lt.s32.totalorder %v5607_v47, 2  ;;  %v5503_v38 = vand.u32 3, %v5502_v10  ;;  %v5918_v16 = vadd.s32 3, %v5914_v53  ;;  %v8828_v53 = vld [vmem:[%s10082_s18 + $0x8] sm:$0xff]  ;;  %s9866_s18 = sshll.u32 %s9951_s17, 4  ;;  %s9867_s18 = int_to_ptr.vmem [resolvable:$false] %s9866_s18 }
 0x75a   : > { %vm5609_vm6 = vcmp.eq.s32.totalorder %v5607_v47, 0  ;;  %vm5612_vm1 = vcmp.eq.s32.totalorder %v5607_v47, 2  ;;  %v6023_v5 = vand.u32 3, %v6022_v13  ;;  %v5922_v46 = vxor.u32 2147483648, %v14586_v49  ;;  %s9868_s25 = scalar_lea.vmem %s9867_s18, 512  ;;  %p9869_p1 = scmp.lt.s32.totalorder %s16685_s29, %s9867_s18 }
 0x75b   : > { %v5919_v1 = vand.u32 3, %v5918_v16  ;;  %v5925_v31 = vxor.u32 2147483648, %v17393_v59  ;;  %v17394_v18 = vand.u32 2147483647, %v14381_v36  ;;  %v5807_v9 = vsub.s32 4, %v14599_v11  ;;  %p9870_p2 = scmp.lt.s32.totalorder %s9868_s25, %s9862_s22 }
 0x75c   : > { %v9765_v3 = vpop.eup %9764  ;;  %vm6024_vm13 = vcmp.lt.s32.totalorder %v6023_v5, 2  ;;  %vm5504_vm14 = vcmp.lt.s32.totalorder %v5503_v38, 2  ;;  %vm5505_vm15 = vcmp.eq.s32.totalorder %v5503_v38, 0  ;;  %vm5508_vm9 = vcmp.eq.s32.totalorder %v5503_v38, 2 }
 0x75d   : > { %vm14933_vm10 = vcmp.le.f32.partialorder %v17394_v18, 0.7853982  ;;  %v9767_v7 = vpop.eup %9766  ;;  %v5613_v21 = vxor.u32 2147483648, %v9765_v3  ;;  %vm6025_vm7 = vcmp.eq.s32.totalorder %v6023_v5, 0  ;;  %vm5501_vm4 = vweird.f32 %v17397_v29  ;;  %p9871_p3 = por %p9870_p2, %p9869_p1 }
 0x75e   : > { %v5507_v62 = vsel %vm5505_vm15, %v14410_v28, %v5506_v17  ;;  %vm5921_vm11 = vcmp.eq.s32.totalorder %v5919_v1, 0  ;;  %v5610_v45 = vxor.u32 2147483648, %v9767_v7  ;;  %v5510_v33 = vsel %vm5508_vm9, %v5509_v51, %v14497_v15 }
 0x75f   : > { %v5923_v25 = vsel %vm5921_vm11, %v17393_v59, %v5922_v46  ;;  %vm5924_vm5 = vcmp.eq.s32.totalorder %v5919_v1, 2  ;;  %v5614_v57 = vsel %vm5612_vm1, %v5613_v21, %v9767_v7  ;;  %vm5920_vm12 = vcmp.lt.s32.totalorder %v5919_v1, 2  ;;  %p9872_p5 = pnand %p9871_p3, %p9865_p0 }
 0x760   : > { %v9769_v54 = vpop.eup %9768  ;;  %v5926_v12 = vsel %vm5924_vm5, %v5925_v31, %v14586_v49  ;;  %v5808_v32 = vsel %vm5723_vm3, %v5807_v9, %v14599_v11  ;;  %v5611_v28 = vsel %vm5609_vm6, %v9765_v3, %v5610_v45  ;;  %v5809_v15 = vsel %vm14933_vm10, %v14381_v36, %v5806_v27  ;;  %v17406_v9 = vld [vmem:[#allocation8_spill] sm:$0xff] }
 0x761   : > { %v9771_v61 = vpop.eup %9770  ;;  %v6029_v6 = vxor.u32 2147483648, %v9769_v54  ;;  %v5927_v58 = vsel %vm5920_vm12, %v5923_v25, %v5926_v12  ;;  %v5615_v14 = vsel %vm5608_vm0, %v5611_v28, %v5614_v57  ;;  %vm6028_vm5 = vcmp.eq.s32.totalorder %v6023_v5, 2 }
 0x762   : > { %v14952_v0 = vpop.eup %9772  ;;  %v6026_v8 = vxor.u32 2147483648, %v9771_v61  ;;  %v5810_v49 = vsel %vm14933_vm10, 0, %v5808_v32  ;;  %v5511_v2 = vsel %vm5504_vm14, %v5507_v62, %v5510_v33  ;;  %vm17398_vm3 = vweird.f32 %v14105_v63 }
 0x763   : > { %v6030_v11 = vsel %vm6028_vm5, %v6029_v6, %v9771_v61  ;;  %v5928_v40 = vsel %vm17398_vm3, nan, %v5927_v58  ;;  %9774 = vcosq.f32 %v5809_v15  ;;  %v5814_v19 = vadd.s32 3, %v5810_v49 }
 0x764   : > { %v6027_v4 = vsel %vm6025_vm7, %v9769_v54, %v6026_v8  ;;  %9776 = vsinq.f32 %v5809_v15  ;;  %v17399_v47 = vand.u32 2147483647, %v14488_v39  ;;  %vm17402_vm6 = vweird.f32 %v14040_v55 }
 0x765   : > { %v5616_v10 = vsel %vm17402_vm6, nan, %v5615_v14  ;;  %v6031_v27 = vsel %vm6024_vm13, %v6027_v4, %v6030_v11  ;;  %v6223_v34 = vsub.s32 4, %v14751_v35  ;;  %vm17403_vm1 = vweird.f32 %v14268_v37  ;;  %v17409_v11 = vld [vmem:[#allocation9_spill] sm:$0xff] }
 0x766   : > { %vm14963_vm0 = vcmp.le.f32.partialorder %v17399_v47, 0.7853982  ;;  %v6032_v13 = vsel %vm17403_vm1, nan, %v6031_v27  ;;  %v5815_v17 = vand.u32 3, %v5814_v19  ;;  %v5706_v38 = vsel %vm14525_vm2, 0, %v14648_v42 }
 0x767   : > { %v6225_v63 = vsel %vm14963_vm0, %v14488_v39, %v6222_v23  ;;  %v14980_v55 = vpack.c.bf16 %v6032_v13, %v5616_v10  ;;  %v5512_v16 = vsel %vm5501_vm4, nan, %v5511_v2  ;;  %vm17405_vm11 = vcmp.lt.s32.totalorder %v14488_v39, 0  ;;  %v9586_v10 = vld [vmem:[%s16738_s6] sm:$0xff]  }
 0x768   : > { %9778 = vcosq.f32 %v6225_v63  ;;  %v6224_v5 = vsel %vm17405_vm11, %v6223_v34, %v14751_v35  ;;  %v14987_v23 = vpack.c.bf16 %v5928_v40, %v5512_v16  ;;  %v6420_v46 = vcombine.high %v8828_v53, %v8828_v53  ;;  %v14999_v35 = vld [vmem:[%s16739_s7] sm:$0x1] }
 0x769   : > { %9780 = vsinq.f32 %v6225_v63  ;;  %v6226_v37 = vsel %vm14963_vm0, 0, %v6224_v5  ;;  %9197 = vmatprep.subr.bf16.mxu0 %v14980_v55  ;;  %v5710_v42 = vadd.s32 3, %v5706_v38  ;;  %vm5816_vm2 = vcmp.lt.s32.totalorder %v5815_v17, 2 }
 0x76a   : > { %v6230_v1 = vadd.s32 3, %v6226_v37  ;;  %9199 = vmatpush1.bf16.msra.mxu0 %v14987_v23  ;;  %vm5817_vm10 = vcmp.eq.s32.totalorder %v5815_v17, 0  ;;  %v6122_v59 = vsel %vm14769_vm8, 0, %v14901_v24  ;;  %v6427_v3 = vrot.slane %v8828_v53, %v17406_v9  ;;  %v17410_v53 = vld [vmem:[#allocation14_spill] sm:$0xff] }
 0x76b   : > { %v5711_v18 = vand.u32 3, %v5710_v42  ;;  %v6126_v56 = vadd.s32 3, %v6122_v59  ;;  %vm5820_vm4 = vcmp.eq.s32.totalorder %v5815_v17, 2  ;;  %v5714_v7 = vxor.u32 2147483648, %v14686_v48 }
 0x76c   : > { %v6231_v31 = vand.u32 3, %v6230_v1  ;;  %v5717_v21 = vxor.u32 2147483648, %v14681_v44  ;;  %vm6125_vm12 = vweird.f32 %v14476_v26  ;;  %v6130_v52 = vxor.u32 2147483648, %v14952_v0  ;;  %v9587_v26 = vld [vmem:[%s16738_s6 + $0x8] sm:$0xff]   ;;  %v15078_v1 = vpop.permute.xlu1 %6759 }
 0x76d   : > { %v9775_v29 = vpop.eup %9774  ;;  %v6133_v24 = vxor.u32 2147483648, %v14857_v50  ;;  %vm17407_vm8 = vcmask 261120   ;;  %v6434_v62 = vrot.slane %v6420_v46, %v17406_v9  ;;  %v6127_v25 = vand.u32 3, %v6126_v56  ;;  %v15076_v46 = vpop.permute.xlu0 %6754 }
 0x76e   : > { %vm6232_vm13 = vcmp.lt.s32.totalorder %v6231_v31, 2  ;;  %9059 = vmatmul.mubr.msk.bf16.vlgmr.msra.gmra.mrb[24].mxu0 %vm17407_vm8, %v14999_v35  ;;  %v9777_v45 = vpop.eup %9776  ;;  %v5821_v33 = vxor.u32 2147483648, %v9775_v29  ;;  %vm6233_vm14 = vcmp.eq.s32.totalorder %v6231_v31, 0  ;;  %vm6236_vm15 = vcmp.eq.s32.totalorder %v6231_v31, 2 }
 0x76f   : > { %v17408_v54 = vmov 0   ;;  %v5818_v57 = vxor.u32 2147483648, %v9777_v45  ;;  %vm5712_vm9 = vcmp.lt.s32.totalorder %v5711_v18, 2  ;;  %vm5713_vm7 = vcmp.eq.s32.totalorder %v5711_v18, 0 }
 0x770   : > { %6487 = vmatprep.mubr.bf16.mxu0 %v17408_v54  ;;  %v6435_v12 = vcombine.high %v6427_v3, %v6427_v3  ;;  %v5822_v61 = vsel %vm5820_vm4, %v5821_v33, %v9777_v45  ;;  %v5715_v28 = vsel %vm5713_vm7, %v14681_v44, %v5714_v7  ;;  %vm5716_vm5 = vcmp.eq.s32.totalorder %v5711_v18, 2  ;;  %vm17412_vm4 = vmmov %vm17407_vm8 }
 0x771   : > { %vm6129_vm3 = vcmp.eq.s32.totalorder %v6127_v25, 0  ;;  %v5819_v58 = vsel %vm5817_vm10, %v9775_v29, %v5818_v57  ;;  %v5718_v14 = vsel %vm5716_vm5, %v5717_v21, %v14686_v48  ;;  %vm6128_vm0 = vcmp.lt.s32.totalorder %v6127_v25, 2  ;;  %vm17415_vm8 = vmmov %vm17412_vm4  ;;  %v15081_v31 = vpop.permute.xlu0 %6795  ;;  %v15088_v21 = vpop.permute.xlu1 %6800 }
 0x772   : > { %v9779_v32 = vpop.eup %9778  ;;  %v6131_v8 = vsel %vm6129_vm3, %v14857_v50, %v6130_v52  ;;  %vm6132_vm6 = vcmp.eq.s32.totalorder %v6127_v25, 2  ;;  %v6447_v2 = vand.u32 %v6435_v12, %v17409_v11  ;;  %v5823_v40 = vsel %vm5816_vm2, %v5819_v58, %v5822_v61  ;;  %vm17419_vm7 = vmmov %vm17412_vm4 }
 0x773   : > { %v9781_v6 = vpop.eup %9780  ;;  %v6237_v15 = vxor.u32 2147483648, %v9779_v32  ;;  %v6134_v44 = vsel %vm6132_vm6, %v6133_v24, %v14952_v0  ;;  %v6444_v19 = vand.u32 %v6427_v3, %v17409_v11  ;;  %v5719_v43 = vsel %vm5712_vm9, %v5715_v28, %v5718_v14  ;;  %vm17418_vm9 = vmmov %vm17412_vm4 }
 0x774   : > { %v6234_v49 = vxor.u32 2147483648, %v9781_v6  ;;  %v6135_v48 = vsel %vm6128_vm0, %v6131_v8, %v6134_v44  ;;  %6455 = vmatprep.subr.bf16.mxu0 %v6447_v2  ;;  %v6436_v50 = vcombine.high %v6434_v62, %v6434_v62  ;;  %vm5813_vm1 = vweird.f32 %v14381_v36 }
 0x775   : > { %v6238_v4 = vsel %vm6236_vm15, %v6237_v15, %v9781_v6  ;;  %vm6229_vm11 = vweird.f32 %v14488_v39  ;;  %v6136_v0 = vsel %vm6125_vm12, nan, %v6135_v48  ;;  %6456 = vmatpush1.bf16.msra.mxu0 %v6444_v19  ;;  %v5824_v34 = vsel %vm5813_vm1, nan, %v5823_v40  ;;  %v9588_v39 = vld [vmem:[%s16737_s5] sm:$0xff]   ;;  %vm17417_vm15 = vmmov %vm17412_vm4 }
 0x776   : > { %v6235_v47 = vsel %vm6233_vm14, %v9779_v32, %v6234_v49  ;;  %vm5709_vm2 = vweird.f32 %v17410_v53  ;;  %9209 = vmatprep.subr.bf16.mxu0 %v14784_v30  ;;  %v6453_v51 = vand.u32 %v6436_v50, %v17409_v11  ;;  %vm17411_vm10 = vcmask 23552   ;;  %v9589_v30 = vld [vmem:[%s16737_s5 + $0x8] sm:$0xff]  }
 0x777   : > { %v6239_v27 = vsel %vm6232_vm13, %v6235_v47, %v6238_v4  ;;  %v5720_v17 = vsel %vm5709_vm2, nan, %v5719_v43  ;;  %v6450_v36 = vand.u32 %v6434_v62, %v17409_v11  ;;  %vm17413_vm12 = vmmov %vm17411_vm10 }
 0x778   : > { %v6240_v63 = vsel %vm6229_vm11, nan, %v6239_v27  ;;  %v9206_v38 = vpack.c.bf16 %v6136_v0, %v5720_v17  ;;  %9063 = vmatmul.mubr.msk.bf16.vlgmr.msra.gmra.mrb[28].mxu0 %vm17411_vm10, %v9586_v10  ;;  %vm17414_vm13 = vmmov %vm17411_vm10 }
 0x779   : > { %v9204_v13 = vpack.c.bf16 %v6240_v63, %v5824_v34  ;;  %9211 = vmatpush1.bf16.msra.mxu0 %v14801_v22  ;;  %6497 = vmatprep.mubr.bf16.mxu0 %v17408_v54  ;;  %vm17416_vm14 = vmmov %vm17411_vm10 }
 0x77a   : > { %9213 = vmatprep.subr.bf16.mxu0 %v14980_v55 }
 0x77b   : > { %9205 = vmatprep.subr.bf16.mxu1 %v9204_v13 }
 0x77c   : > { %9207 = vmatpush1.bf16.msra.mxu1 %v9206_v38 }
 0x77d   : > { %6508 = vmatprep.subr.bf16.mxu1 %v6453_v51  ;;  %9215 = vmatpush1.bf16.msra.mxu0 %v14987_v23 }
 0x77f   : > { %9060 = vmatmul.mubr.msk.bf16.vlgmr.msra.gmra.mrb[24].mxu1 %vm17412_vm4, %v14999_v35 }
 0x780   : > { %6509 = vmatpush1.bf16.msra.mxu1 %v6450_v36  ;;  %6540 = vmatprep.mubr.bf16.mxu1 %v17408_v54 }
 0x781   : > { %9217 = vmatprep.subr.bf16.mxu1 %v14881_v20  ;;  %9064 = vmatmul.mubr.msk.bf16.gmra.mrb[32].mxu0 %vm17413_vm12, %v9587_v26 }
 0x782   : > { %6641 = vmatprep.mubr.bf16.mxu0 %v17408_v54 }
 0x787   : > { %9065 = vmatmul.mubr.msk.bf16.vlgmr.msra.gmra.mrb[28].mxu1 %vm17414_vm13, %v9586_v10 }
 0x788   : > { %9219 = vmatpush1.bf16.msra.mxu1 %v14889_v41  ;;  %6550 = vmatprep.mubr.bf16.mxu1 %v17408_v54 }
 0x789   : > { %9221 = vmatprep.subr.bf16.mxu1 %v9204_v13  ;;  %9069 = vmatmul.mubr.msk.bf16.vlgmr.msra.gmra.mrb[28].mxu0 %vm17415_vm8, %v9588_v39 }
 0x78a   : > { %6651 = vmatprep.mubr.bf16.mxu0 %v17408_v54 }
 0x78c   : > { %9223 = vmatpush1.bf16.msra.mxu1 %v9206_v38  ;;  %v17426_v38 = vmov 2475754826  }
 0x78f   : > { %9066 = vmatmul.mubr.msk.bf16.gmra.mrb[32].mxu1 %vm17416_vm14, %v9587_v26 }
 0x790   : > { %6726 = vmatprep.mubr.bf16.mxu1 %v17408_v54 }
 0x791   : > { %9070 = vmatmul.mubr.msk.bf16.gmra.mrb[32].mxu0 %vm17417_vm15, %v9589_v30 }
 0x792   : > { %8567 = vmatprep.mubr.bf16.mxu0 %v17408_v54 }
 0x797   : > { %9071 = vmatmul.mubr.msk.bf16.vlgmr.msra.gmra.mrb[28].mxu1 %vm17418_vm9, %v9588_v39  ;;  %v17427_v39 = vmov 2131351028  }
 0x798   : > { %6736 = vmatprep.mubr.bf16.mxu1 %v17408_v54 }
 0x79f   : > { %9072 = vmatmul.mubr.msk.bf16.gmra.mrb[32].mxu1 %vm17419_vm7, %v9589_v30 }
 0x7a0   : > { %8640 = vmatprep.mubr.bf16.mxu1 %v17408_v54 }
 0x841   : > { %v15068_v22 = vpop.f32.mrb[24].mxu0 }
 0x842   : > { %17420 = vst [vmem:[#allocation29_spill] sm:$0xff] %v15068_v22  ;;  %v15070_v20 = vpop.f32.mrb[25].mxu0 }
 0x843   : > { %17421 = vst [vmem:[#allocation10_spill] sm:$0xff] %v15070_v20  ;;  %v6325_v41 = vpop.f32.mrb[26].mxu0 }
 0x844   : > { %v6326_v55 = vpop.f32.mrb[27].mxu0  ;;  %v17428_v41 = vmov 2102212464  }
 0x852   : > { %v15072_v16 = vpop.f32.mrb[24].mxu1 }
 0x853   : > { %17422 = vst [vmem:[#allocation22_spill] sm:$0xff] %v15072_v16  ;;  %v15074_v5 = vpop.f32.mrb[25].mxu1 }
 0x854   : > { %17423 = vst [vmem:[#allocation21_spill] sm:$0xff] %v15074_v5  ;;  %v6398_v23 = vpop.f32.mrb[26].mxu1 }
 0x855   : > { %v6399_v37 = vpop.f32.mrb[27].mxu1  ;;  %v17429_v23 = vmov 920167782  }
 0x85c   : > { %v6643_v42 = vpop.f32.mrb[28].mxu0 }
 0x85d   : > { %v6772_v59 = vmul.f32 %v15076_v46, %v6643_v42  ;;  %v6645_v35 = vpop.f32.mrb[29].mxu0 }
 0x85e   : > { %v6773_v18 = vmul.f32 %v15076_v46, %v6645_v35  ;;  %v6647_v56 = vpop.f32.mrb[30].mxu0 }
 0x85f   : > { %v15085_v9 = vadd.f32 %v15081_v31, %v6772_v59  ;;  %v6776_v3 = vmul.f32 %v15078_v1, %v6647_v56  ;;  %v6649_v7 = vpop.f32.mrb[31].mxu0 }
 0x860   : > { %v15091_v29 = vadd.f32 %v15081_v31, %v6773_v18  ;;  %v15115_v19 = vmul.f32 %v15078_v1, %v6649_v7 }
 0x861   : > { %17424 = vst [vmem:[#allocation28_spill] sm:$0xff] %v15085_v9  ;;  %v16941_v52 = vand.u32 2147483647, %v15085_v9  ;;  %v6832_v24 = vand.u32 2139095040, %v15085_v9  ;;  %v15096_v62 = vadd.f32 %v15088_v21, %v6776_v3  ;;  %v17430_v3 = vmov 1326507024  }
 0x862   : > { %v16938_v45 = vand.u32 2147483647, %v15091_v29  ;;  %v6936_v33 = vand.u32 2139095040, %v15091_v29 }
 0x863   : > { %17425 = vst [vmem:[#allocation26_spill] sm:$0xff] %v15096_v62  ;;  %v6833_v25 = vshrl.u32 %v6832_v24, 23  ;;  %v6836_v54 = vand.u32 8388607, %v16941_v52  ;;  %v16940_v32 = vand.u32 2147483647, %v15096_v62 }
 0x864   : > { %v6937_v57 = vshrl.u32 %v6936_v33, 23  ;;  %v6940_v12 = vand.u32 8388607, %v16938_v45  ;;  %v7248_v61 = vand.u32 2139095040, %v15096_v62  ;;  %v15106_v8 = vpop.f32.mrb[32].mxu0 }
 0x865   : > { %v9081_v28 = vadd.s32 4294967169, %v6833_v25  ;;  %v6837_v15 = vor.u32 8388608, %v6836_v54  ;;  %v15110_v40 = vand.u32 8388607, %v16940_v32 }
 0x866   : > { %v9085_v6 = vadd.s32 4294967169, %v6937_v57  ;;  %v7249_v58 = vshrl.u32 %v7248_v61, 23  ;;  %v6941_v49 = vor.u32 8388608, %v6940_v12 }
 0x867   : > { %v6839_v14 = vadd.s32 1, %v9081_v28  ;;  %v15119_v50 = vshll.u32 %v6837_v15, 8  ;;  %v7253_v63 = vor.u32 8388608, %v15110_v40 }
 0x868   : > { %v6943_v11 = vadd.s32 1, %v9085_v6  ;;  %v9097_v2 = vadd.s32 4294967169, %v7249_v58  ;;  %v15125_v34 = vshll.u32 %v6941_v49, 8 }
 0x869   : > { %vm6840_vm5 = vcmp.gt.s32.totalorder %v6839_v14, 0 }
 0x86a   : > { %v15112_v4 = vpop.f32.mrb[28].mxu1  ;;  %v6841_v44 = vsel %vm6840_vm5, %v6839_v14, 0  ;;  %vm6944_vm3 = vcmp.gt.s32.totalorder %v6943_v11, 0  ;;  %v15128_v53 = vadd.s32 1, %v9097_v2 }
 0x86b   : > { %v15117_v47 = vpop.f32.mrb[29].mxu1  ;;  %v6842_v43 = vshrl.u32 %v6841_v44, 5  ;;  %v6843_v48 = vand.u32 31, %v6841_v44  ;;  %v6945_v10 = vsel %vm6944_vm3, %v6943_v11, 0 }
 0x86c   : > { %v15121_v27 = vpop.f32.mrb[30].mxu1  ;;  %v15123_v0 = vshrl.u32 %v6945_v10, 5  ;;  %v6947_v26 = vand.u32 31, %v6945_v10  ;;  %vm7256_vm2 = vcmp.gt.s32.totalorder %v15128_v53, 0 }
 0x86d   : > { %v15130_v13 = vpop.f32.mrb[31].mxu1  ;;  %v6844_v17 = vsub.s32 32, %v6843_v48  ;;  %v6846_v51 = vshll.u32 %v17008_v60, %v6843_v48  ;;  %v6849_v36 = vshll.u32 %v17426_v38, %v6843_v48  ;;  %v6852_v30 = vshll.u32 %v17427_v39, %v6843_v48 }
 0x86e   : > { %v6855_v55 = vshll.u32 %v17428_v41, %v6843_v48  ;;  %v6858_v37 = vshll.u32 %v17429_v23, %v6843_v48  ;;  %vm6861_vm0 = vcmp.lt.s32.totalorder %v6842_v43, 1  ;;  %vm6862_vm6 = vcmp.lt.s32.totalorder %v6842_v43, 2 }
 0x86f   : > { %v6847_v42 = vshrl.u32 %v17426_v38, %v6844_v17  ;;  %v6850_v59 = vshrl.u32 %v17427_v39, %v6844_v17  ;;  %v6853_v35 = vshrl.u32 %v17428_v41, %v6844_v17  ;;  %v6845_v18 = vshrl.u32 %v17008_v60, %v6844_v17 }
 0x870   : > { %v6856_v56 = vshrl.u32 %v17429_v23, %v6844_v17  ;;  %v6859_v7 = vshrl.u32 %v17430_v3, %v6844_v17  ;;  %vm6863_vm1 = vcmp.lt.s32.totalorder %v6842_v43, 3  ;;  %v6948_v54 = vsub.s32 32, %v6947_v26 }
 0x871   : > { %v6848_v24 = vor.u32 %v6847_v42, %v6846_v51  ;;  %v6851_v33 = vor.u32 %v6850_v59, %v6849_v36  ;;  %v6854_v25 = vor.u32 %v6853_v35, %v6852_v30  ;;  %vm6864_vm11 = vcmp.lt.s32.totalorder %v6842_v43, 4 }
 0x872   : > { %v6857_v57 = vor.u32 %v6856_v56, %v6855_v55  ;;  %v6860_v12 = vor.u32 %v6859_v7, %v6858_v37  ;;  %v6950_v61 = vshll.u32 %v17008_v60, %v6947_v26  ;;  %v6953_v2 = vshll.u32 %v17426_v38, %v6947_v26 }
 0x873   : > { %v6865_v28 = vsel %vm6861_vm0, %v6845_v18, %v6848_v24  ;;  %v6866_v6 = vsel %vm6864_vm11, %v6854_v25, 2102212464  ;;  %v6869_v58 = vsel %vm6861_vm0, %v6848_v24, %v6851_v33  ;;  %v6873_v15 = vsel %vm6861_vm0, %v6851_v33, %v6854_v25 }
 0x874   : > { %v6867_v14 = vsel %vm6863_vm1, %v6851_v33, %v6866_v6  ;;  %v6870_v49 = vsel %vm6864_vm11, %v6857_v57, 920167782  ;;  %v6874_v11 = vsel %vm6864_vm11, %v6860_v12, 1326507024  ;;  %v6949_v10 = vshrl.u32 %v17008_v60, %v6948_v54 }
 0x875   : > { %v6871_v44 = vsel %vm6863_vm1, %v6854_v25, %v6870_v49  ;;  %v6875_v48 = vsel %vm6863_vm1, %v6857_v57, %v6874_v11  ;;  %v6951_v17 = vshrl.u32 %v17426_v38, %v6948_v54  ;;  %v6868_v51 = vsel %vm6862_vm6, %v6865_v28, %v6867_v14  ;;  %v15182_v11 = vpop.f32.mrb[33].mxu0 }
 0x876   : > { %v6872_v36 = vsel %vm6862_vm6, %v6869_v58, %v6871_v44  ;;  %v6876_v30 = vsel %vm6862_vm6, %v6873_v15, %v6875_v48  ;;  %v6954_v55 = vshrl.u32 %v17427_v39, %v6948_v54  ;;  %v6956_v7 = vshll.u32 %v17427_v39, %v6947_v26 }
 0x877   : > { %v15159_v37 = vmul.u32.u64.low %v15119_v50, %v6876_v30  ;;  %v15160_v42 = vmul.u32.u64.high %v15119_v50, %v6876_v30, %v15159_v37  ;;  %v15163_v59 = vmul.u32.u64.low %v15119_v50, %v6872_v36  ;;  %v15164_v35 = vmul.u32.u64.high %v15119_v50, %v6872_v36, %v15163_v59 }
 0x878   : > { %v6952_v18 = vor.u32 %v6951_v17, %v6950_v61  ;;  %v6955_v56 = vor.u32 %v6954_v55, %v6953_v2  ;;  %v6957_v24 = vshrl.u32 %v17428_v41, %v6948_v54  ;;  %v6884_v43 = vmul.u32 %v15119_v50, %v6868_v51 }
 0x879   : > { %v6959_v33 = vshll.u32 %v17428_v41, %v6947_v26  ;;  %v6960_v25 = vshrl.u32 %v17429_v23, %v6948_v54  ;;  %v6963_v57 = vshrl.u32 %v17430_v3, %v6948_v54  ;;  %v6962_v28 = vshll.u32 %v17429_v23, %v6947_v26 }
 0x87a   : > { %v6958_v12 = vor.u32 %v6957_v24, %v6956_v7  ;;  %vm6965_vm10 = vcmp.lt.s32.totalorder %v15123_v0, 1  ;;  %vm6966_vm4 = vcmp.lt.s32.totalorder %v15123_v0, 2  ;;  %vm6886_vm12 = vc.u32 %v15160_v42, %v15163_v59 }
 0x87b   : > { %v6887_v61 = vadd.s32 1, %v15164_v35  ;;  %v6961_v6 = vor.u32 %v6960_v25, %v6959_v33  ;;  %vm6967_vm13 = vcmp.lt.s32.totalorder %v15123_v0, 3  ;;  %v6964_v50 = vor.u32 %v6963_v57, %v6962_v28 }
 0x87c   : > { %vm6968_vm8 = vcmp.lt.s32.totalorder %v15123_v0, 4  ;;  %v6969_v58 = vsel %vm6965_vm10, %v6949_v10, %v6952_v18  ;;  %v6973_v54 = vsel %vm6965_vm10, %v6952_v18, %v6955_v56  ;;  %v6977_v49 = vsel %vm6965_vm10, %v6955_v56, %v6958_v12 }
 0x87d   : > { %v6888_v15 = vsel %vm6886_vm12, %v6887_v61, %v15164_v35  ;;  %v6970_v26 = vsel %vm6968_vm8, %v6958_v12, 2102212464  ;;  %v6974_v14 = vsel %vm6968_vm8, %v6961_v6, 920167782  ;;  %v6978_v17 = vsel %vm6968_vm8, %v6964_v50, 1326507024 }
 0x87e   : > { %v6889_v2 = vadd.s32 %v6888_v15, %v6884_v43  ;;  %v6971_v44 = vsel %vm6967_vm13, %v6955_v56, %v6970_v26  ;;  %v6975_v48 = vsel %vm6967_vm13, %v6958_v12, %v6974_v14  ;;  %v6979_v36 = vsel %vm6967_vm13, %v6961_v6, %v6978_v17 }
 0x87f   : > { %v6976_v51 = vsel %vm6966_vm4, %v6973_v54, %v6975_v48  ;;  %v7257_v10 = vsel %vm7256_vm2, %v15128_v53, 0  ;;  %v6774_v30 = vmul.f32 %v15076_v46, %v15112_v4  ;;  %v6980_v37 = vsel %vm6966_vm4, %v6977_v49, %v6979_v36 }
 0x880   : > { %v6890_v55 = vadd.s32 536870912, %v6889_v2  ;;  %v15194_v35 = vmul.u32.u64.low %v15125_v34, %v6976_v51  ;;  %v15195_v18 = vmul.u32.u64.high %v15125_v34, %v6976_v51, %v15194_v35  ;;  %v6972_v56 = vsel %vm6966_vm4, %v6969_v58, %v6971_v44 }
 0x881   : > { %v15201_v7 = vmul.u32.u64.low %v15125_v34, %v6980_v37  ;;  %v15202_v24 = vmul.u32.u64.high %v15125_v34, %v6980_v37, %v15201_v7  ;;  %v15204_v53 = vshrl.u32 %v7257_v10, 5  ;;  %v7259_v4 = vand.u32 31, %v7257_v10 }
 0x882   : > { %v15206_v43 = vshrl.u32 %v6890_v55, 30  ;;  %v15210_v33 = vshll.u32 %v7253_v63, 8  ;;  %v15213_v25 = vadd.f32 %v15081_v31, %v6774_v30  ;;  %v15217_v0 = vadd.f32 %v15088_v21, %v15115_v19 }
 0x883   : > { %v6988_v12 = vmul.u32 %v15125_v34, %v6972_v56  ;;  %v6991_v28 = vadd.s32 1, %v15195_v18  ;;  %v7260_v61 = vsub.s32 32, %v7259_v4  ;;  %vm6990_vm14 = vc.u32 %v15202_v24, %v15194_v35 }
 0x884   : > { %17431 = vst [vmem:[#allocation24_spill] sm:$0xff] %v15213_v25  ;;  %17432 = vst [vmem:[#allocation11_spill] sm:$0xff] %v15217_v0  ;;  %v6892_v57 = vshll.u32 %v15206_v43, 30  ;;  %vm7277_vm15 = vcmp.lt.s32.totalorder %v15204_v53, 1  ;;  %vm7278_vm9 = vcmp.lt.s32.totalorder %v15204_v53, 2  ;;  %vm7279_vm7 = vcmp.lt.s32.totalorder %v15204_v53, 3 }
 0x885   : > { %v6992_v19 = vsel %vm6990_vm14, %v6991_v28, %v15195_v18  ;;  %v7262_v63 = vshll.u32 %v17008_v60, %v7259_v4  ;;  %v7265_v34 = vshll.u32 %v17426_v38, %v7259_v4  ;;  %v7263_v50 = vshrl.u32 %v17426_v38, %v7260_v61 }
 0x886   : > { %v15227_v40 = vsub.s32 %v6889_v2, %v6892_v57  ;;  %v6993_v6 = vadd.s32 %v6992_v19, %v6988_v12  ;;  %v7266_v58 = vshrl.u32 %v17427_v39, %v7260_v61  ;;  %v7268_v54 = vshll.u32 %v17427_v39, %v7259_v4 }
 0x887   : > { %v7269_v26 = vshrl.u32 %v17428_v41, %v7260_v61  ;;  %v7271_v14 = vshll.u32 %v17428_v41, %v7259_v4  ;;  %v7272_v49 = vshrl.u32 %v17429_v23, %v7260_v61  ;;  %v7264_v44 = vor.u32 %v7263_v50, %v7262_v63 }
 0x888   : > { %v6895_v15 = vsub.s32 0, %v15227_v40  ;;  %v6994_v2 = vadd.s32 536870912, %v6993_v6  ;;  %v7267_v48 = vor.u32 %v7266_v58, %v7265_v34  ;;  %v7274_v17 = vshll.u32 %v17429_v23, %v7259_v4 }
 0x889   : > { %v7270_v36 = vor.u32 %v7269_v26, %v7268_v54  ;;  %v7273_v10 = vor.u32 %v7272_v49, %v7271_v14  ;;  %v7275_v30 = vshrl.u32 %v17430_v3, %v7260_v61  ;;  %v7261_v37 = vshrl.u32 %v17008_v60, %v7260_v61 }
 0x88a   : > { %v9082_v51 = vmin.u32 %v6895_v15, %v15227_v40  ;;  %v15242_v55 = vshrl.u32 %v6994_v2, 30  ;;  %vm7280_vm5 = vcmp.lt.s32.totalorder %v15204_v53, 4  ;;  %v7285_v18 = vsel %vm7277_vm15, %v7264_v44, %v7267_v48 }
 0x88b   : > { %v7276_v7 = vor.u32 %v7275_v30, %v7274_v17  ;;  %v7282_v57 = vsel %vm7280_vm5, %v7270_v36, 2102212464  ;;  %v7286_v12 = vsel %vm7280_vm5, %v7273_v10, 920167782  ;;  %v7281_v28 = vsel %vm7277_vm15, %v7261_v37, %v7264_v44  ;;  %v15271_v44 = vpop.f32.mrb[34].mxu0 }
 0x88c   : > { %v6897_v56 = vclz %v9082_v51  ;;  %v6996_v4 = vshll.u32 %v15242_v55, 30  ;;  %v7287_v19 = vsel %vm7279_vm7, %v7270_v36, %v7286_v12  ;;  %v7289_v61 = vsel %vm7277_vm15, %v7267_v48, %v7270_v36 }
 0x88d   : > { %v7283_v34 = vsel %vm7279_vm7, %v7267_v48, %v7282_v57  ;;  %v7288_v50 = vsel %vm7278_vm9, %v7285_v18, %v7287_v19  ;;  %v7290_v58 = vsel %vm7280_vm5, %v7276_v7, 1326507024  ;;  %v7040_v2 = vand.u32 2139095040, %v15213_v25 }
 0x88e   : > { %v9083_v63 = vadd.s32 4294967294, %v6897_v56  ;;  %v15259_v54 = vsub.s32 %v6993_v6, %v6996_v4  ;;  %v7291_v15 = vsel %vm7279_vm7, %v7273_v10, %v7290_v58  ;;  %v7284_v36 = vsel %vm7278_vm9, %v7281_v28, %v7283_v34 }
 0x88f   : > { %v15264_v26 = vmul.u32.u64.low %v15210_v33, %v7288_v50  ;;  %v15265_v14 = vmul.u32.u64.high %v15210_v33, %v7288_v50, %v15264_v26  ;;  %v7292_v49 = vsel %vm7278_vm9, %v7289_v61, %v7291_v15  ;;  %v7041_v10 = vshrl.u32 %v7040_v2, 23 }
 0x890   : > { %vm9084_vm3 = vcmp.lt.s32.totalorder %v9083_v63, 0  ;;  %v6999_v6 = vsub.s32 0, %v15259_v54  ;;  %v15275_v17 = vmul.u32.u64.low %v15210_v33, %v7292_v49  ;;  %v15276_v51 = vmul.u32.u64.high %v15210_v33, %v7292_v49, %v15275_v17 }
 0x891   : > { %v6900_v48 = vsel %vm9084_vm3, 0, %v9083_v63  ;;  %v7352_v30 = vand.u32 2139095040, %v15217_v0  ;;  %v7303_v56 = vadd.s32 1, %v15265_v14  ;;  %v16939_v7 = vand.u32 2147483647, %v15213_v25 }
 0x892   : > { %v6905_v37 = vsub.s32 4294967266, %v6900_v48  ;;  %v9086_v18 = vmin.u32 %v6999_v6, %v15259_v54  ;;  %v9089_v57 = vadd.s32 4294967169, %v7041_v10  ;;  %v7300_v4 = vmul.u32 %v15210_v33, %v7284_v36 }
 0x893   : > { %vm7302_vm0 = vc.u32 %v15276_v51, %v15264_v26  ;;  %v6901_v19 = vsub.s32 32, %v6900_v48  ;;  %v7353_v61 = vshrl.u32 %v7352_v30, 23  ;;  %v6885_v50 = vadd.s32 %v15163_v59, %v15160_v42 }
 0x894   : > { %v7001_v12 = vclz %v9086_v18  ;;  %v7304_v53 = vsel %vm7302_vm0, %v7303_v56, %v15265_v14  ;;  %v7047_v28 = vadd.s32 1, %v9089_v57  ;;  %v6906_v63 = vadd.s32 127, %v6905_v37 }
 0x895   : > { %v7305_v34 = vadd.s32 %v7304_v53, %v7300_v4  ;;  %v7044_v58 = vand.u32 8388607, %v16939_v7  ;;  %v6903_v2 = vshrl.u32 %v6885_v50, %v6901_v19  ;;  %v9101_v17 = vadd.s32 4294967169, %v7353_v61 }
 0x896   : > { %vm7048_vm6 = vcmp.gt.s32.totalorder %v7047_v28, 0  ;;  %v9087_v15 = vadd.s32 4294967294, %v7001_v12  ;;  %v6907_v36 = vshll.u32 %v6906_v63, 23  ;;  %v6902_v14 = vshll.u32 %v15227_v40, %v6900_v48 }
 0x897   : > { %v7306_v49 = vadd.s32 536870912, %v7305_v34  ;;  %v7049_v33 = vsel %vm7048_vm6, %v7047_v28, 0  ;;  %v7045_v30 = vor.u32 8388608, %v7044_v58  ;;  %v16937_v18 = vand.u32 2147483647, %v15217_v0 }
 0x898   : > { %v7051_v6 = vand.u32 31, %v7049_v33  ;;  %vm9088_vm1 = vcmp.lt.s32.totalorder %v9087_v15, 0  ;;  %v6904_v59 = vor.u32 %v6903_v2, %v6902_v14  ;;  %v7359_v12 = vadd.s32 1, %v9101_v17 }
 0x899   : > { %v15292_v10 = vshrl.u32 %v7306_v49, 30  ;;  %v6908_v4 = vor.u32 4788187, %v6907_v36  ;;  %v6989_v48 = vadd.s32 %v15194_v35, %v15202_v24  ;;  %v7004_v28 = vsel %vm9088_vm1, 0, %v9087_v15 }
 0x89a   : > { %v7052_v37 = vsub.s32 32, %v7051_v6  ;;  %v7054_v53 = vshll.u32 %v17008_v60, %v7051_v6  ;;  %v7057_v40 = vshll.u32 %v17426_v38, %v7051_v6  ;;  %v15305_v61 = vshll.u32 %v7045_v30, 8 }
 0x89b   : > { %v7308_v42 = vshll.u32 %v15292_v10, 30  ;;  %v7356_v63 = vand.u32 8388607, %v16937_v18  ;;  %v7050_v58 = vshrl.u32 %v7049_v33, 5  ;;  %v7063_v36 = vshll.u32 %v17428_v41, %v7051_v6 }
 0x89c   : > { %v7055_v56 = vshrl.u32 %v17426_v38, %v7052_v37  ;;  %v7058_v57 = vshrl.u32 %v17427_v39, %v7052_v37  ;;  %v7061_v17 = vshrl.u32 %v17428_v41, %v7052_v37  ;;  %v7064_v14 = vshrl.u32 %v17429_v23, %v7052_v37 }
 0x89d   : > { %v15299_v19 = vsub.s32 %v7305_v34, %v7308_v42  ;;  %v7060_v34 = vshll.u32 %v17427_v39, %v7051_v6  ;;  %v6909_v35 = vand.u32 2147483647, %v6908_v4  ;;  %v6911_v24 = vcvt.s32.f32 %v6904_v59  ;;  %v15318_v4 = vpop.f32.mrb[32].mxu1 }
 0x89e   : > { %v7056_v49 = vor.u32 %v7055_v56, %v7054_v53  ;;  %v7059_v2 = vor.u32 %v7058_v57, %v7057_v40  ;;  %vm7360_vm11 = vcmp.gt.s32.totalorder %v7359_v12, 0  ;;  %v7065_v42 = vor.u32 %v7064_v14, %v7063_v36 }
 0x89f   : > { %v7311_v50 = vsub.s32 0, %v15299_v19  ;;  %v7062_v30 = vor.u32 %v7061_v17, %v7060_v34  ;;  %v7066_v18 = vshll.u32 %v17429_v23, %v7051_v6  ;;  %v7067_v33 = vshrl.u32 %v17430_v3, %v7052_v37 }
 0x8a0   : > { %v7005_v56 = vsub.s32 32, %v7004_v28  ;;  %v7009_v57 = vsub.s32 4294967266, %v7004_v28  ;;  %vm7069_vm2 = vcmp.lt.s32.totalorder %v7050_v58, 1  ;;  %v7053_v40 = vshrl.u32 %v17008_v60, %v7052_v37 }
 0x8a1   : > { %v9098_v15 = vmin.u32 %v7311_v50, %v15299_v19  ;;  %v7068_v45 = vor.u32 %v7067_v33, %v7066_v18  ;;  %vm7072_vm10 = vcmp.lt.s32.totalorder %v7050_v58, 4  ;;  %v7077_v7 = vsel %vm7069_vm2, %v7056_v49, %v7059_v2 }
 0x8a2   : > { %vm7071_vm4 = vcmp.lt.s32.totalorder %v7050_v58, 3  ;;  %v7074_v50 = vsel %vm7072_vm10, %v7062_v30, 2102212464  ;;  %v7078_v34 = vsel %vm7072_vm10, %v7065_v42, 920167782  ;;  %vm7070_vm12 = vcmp.lt.s32.totalorder %v7050_v58, 2 }
 0x8a3   : > { %v7313_v53 = vclz %v9098_v15  ;;  %v7079_v17 = vsel %vm7071_vm4, %v7062_v30, %v7078_v34  ;;  %v7081_v6 = vsel %vm7069_vm2, %v7059_v2, %v7062_v30  ;;  %v7082_v36 = vsel %vm7072_vm10, %v7068_v45, 1326507024 }
 0x8a4   : > { %v7010_v14 = vadd.s32 127, %v7009_v57  ;;  %v7073_v32 = vsel %vm7069_vm2, %v7053_v40, %v7056_v49  ;;  %v7075_v52 = vsel %vm7071_vm4, %v7059_v2, %v7074_v50  ;;  %v7080_v15 = vsel %vm7070_vm12, %v7077_v7, %v7079_v17 }
 0x8a5   : > { %v9099_v59 = vadd.s32 4294967294, %v7313_v53  ;;  %v7083_v37 = vsel %vm7071_vm4, %v7065_v42, %v7082_v36  ;;  %v15322_v18 = vmul.u32.u64.low %v15305_v61, %v7080_v15  ;;  %v15323_v33 = vmul.u32.u64.high %v15305_v61, %v7080_v15, %v15322_v18 }
 0x8a6   : > { %v15326_v53 = vmul.f32 %v6911_v24, %v6909_v35  ;;  %v7084_v5 = vsel %vm7070_vm12, %v7081_v6, %v7083_v37  ;;  %v7357_v16 = vor.u32 8388608, %v7356_v63  ;;  %v7007_v34 = vshrl.u32 %v6989_v48, %v7005_v56 }
 0x8a7   : > { %vm9100_vm13 = vcmp.lt.s32.totalorder %v9099_v59, 0  ;;  %v15330_v45 = vmul.u32.u64.low %v15305_v61, %v7084_v5  ;;  %v15331_v30 = vmul.u32.u64.high %v15305_v61, %v7084_v5, %v15330_v45  ;;  %v7361_v49 = vsel %vm7360_vm11, %v7359_v12, 0 }
 0x8a8   : > { %v7011_v7 = vshll.u32 %v7010_v14, 23  ;;  %v15334_v2 = vsel %vm9100_vm13, 0, %v9099_v59  ;;  %v7076_v42 = vsel %vm7070_vm12, %v7073_v32, %v7075_v52  ;;  %v7363_v57 = vand.u32 31, %v7361_v49 }
 0x8a9   : > { %v7006_v40 = vshll.u32 %v15259_v54, %v7004_v28  ;;  %v7095_v35 = vadd.s32 1, %v15323_v33  ;;  %v6913_v24 = vxor.u32 2147483648, %v15326_v53  ;;  %v7301_v48 = vadd.s32 %v15264_v26, %v15276_v51 }
 0x8aa   : > { %v7364_v63 = vsub.s32 32, %v7363_v57  ;;  %v15342_v5 = vshll.u32 %v7357_v16, 8  ;;  %v7321_v12 = vsub.s32 4294967266, %v15334_v2  ;;  %v7092_v58 = vmul.u32 %v15305_v61, %v7076_v42 }
 0x8ab   : > { %v15344_v56 = vor.u32 %v7007_v34, %v7006_v40  ;;  %vm7094_vm8 = vc.u32 %v15331_v30, %v15322_v18  ;;  %v15350_v52 = vor.u32 4788187, %v7011_v7  ;;  %v7366_v54 = vshll.u32 %v17008_v60, %v7363_v57 }
 0x8ac   : > { %v7096_v32 = vsel %vm7094_vm8, %v7095_v35, %v15323_v33  ;;  %v7369_v26 = vshll.u32 %v17426_v38, %v7363_v57  ;;  %v7367_v16 = vshrl.u32 %v17426_v38, %v7364_v63  ;;  %v7370_v28 = vshrl.u32 %v17427_v39, %v7364_v63 }
 0x8ad   : > { %v7097_v51 = vadd.s32 %v7096_v32, %v7092_v58  ;;  %v7373_v59 = vshrl.u32 %v17428_v41, %v7364_v63  ;;  %v7362_v50 = vshrl.u32 %v7361_v49, 5  ;;  %v7372_v61 = vshll.u32 %v17427_v39, %v7363_v57 }
 0x8ae   : > { %v7375_v17 = vshll.u32 %v17428_v41, %v7363_v57  ;;  %v7376_v6 = vshrl.u32 %v17429_v23, %v7364_v63  ;;  %v7322_v36 = vadd.s32 127, %v7321_v12  ;;  %v7368_v15 = vor.u32 %v7367_v16, %v7366_v54 }
 0x8af   : > { %v7098_v14 = vadd.s32 536870912, %v7097_v51  ;;  %v7371_v37 = vor.u32 %v7370_v28, %v7369_v26  ;;  %v7374_v33 = vor.u32 %v7373_v59, %v7372_v61  ;;  %v7378_v45 = vshll.u32 %v17429_v23, %v7363_v57 }
 0x8b0   : > { %v7377_v34 = vor.u32 %v7376_v6, %v7375_v17  ;;  %v7379_v7 = vshrl.u32 %v17430_v3, %v7364_v63  ;;  %v7013_v42 = vand.u32 2147483647, %v15350_v52  ;;  %v7317_v49 = vsub.s32 32, %v15334_v2 }
 0x8b1   : > { %v7318_v40 = vshll.u32 %v15299_v19, %v15334_v2  ;;  %v15367_v35 = vshrl.u32 %v7098_v14, 30  ;;  %vm7381_vm14 = vcmp.lt.s32.totalorder %v7362_v50, 1  ;;  %v6775_v12 = vmul.f32 %v15076_v46, %v15117_v47  ;;  %v15379_v47 = vpop.f32.mrb[35].mxu0 }
 0x8b2   : > { %v7380_v58 = vor.u32 %v7379_v7, %v7378_v45  ;;  %v6778_v32 = vmul.f32 %v15078_v1, %v15121_v27  ;;  %v7323_v57 = vshll.u32 %v7322_v36, 23  ;;  %vm7384_vm15 = vcmp.lt.s32.totalorder %v7362_v50, 4 }
 0x8b3   : > { %v7100_v54 = vshll.u32 %v15367_v35, 30  ;;  %v7389_v52 = vsel %vm7381_vm14, %v7368_v15, %v7371_v37  ;;  %v7365_v26 = vshrl.u32 %v17008_v60, %v7364_v63  ;;  %vm7383_vm9 = vcmp.lt.s32.totalorder %v7362_v50, 3 }
 0x8b4   : > { %v7386_v19 = vsel %vm7384_vm15, %v7374_v33, 2102212464  ;;  %v7390_v2 = vsel %vm7384_vm15, %v7377_v34, 920167782  ;;  %vm7382_vm7 = vcmp.lt.s32.totalorder %v7362_v50, 2  ;;  %v7393_v46 = vsel %vm7381_vm14, %v7371_v37, %v7374_v33 }
 0x8b5   : > { %v15376_v16 = vsub.s32 %v7097_v51, %v7100_v54  ;;  %v7391_v28 = vsel %vm7383_vm9, %v7374_v33, %v7390_v2  ;;  %v7319_v27 = vshrl.u32 %v7301_v48, %v7317_v49  ;;  %v7385_v59 = vsel %vm7381_vm14, %v7365_v26, %v7368_v15 }
 0x8b6   : > { %v7392_v61 = vsel %vm7382_vm7, %v7389_v52, %v7391_v28  ;;  %v7394_v17 = vsel %vm7384_vm15, %v7380_v58, 1326507024  ;;  %v7387_v63 = vsel %vm7383_vm9, %v7371_v37, %v7386_v19  ;;  %v15385_v14 = vadd.f32 %v15081_v31, %v6775_v12 }
 0x8b7   : > { %v7103_v6 = vsub.s32 0, %v15376_v16  ;;  %v7395_v36 = vsel %vm7383_vm9, %v7377_v34, %v7394_v17  ;;  %v15389_v45 = vmul.u32.u64.low %v15342_v5, %v7392_v61  ;;  %v15390_v33 = vmul.u32.u64.high %v15342_v5, %v7392_v61, %v15389_v45  ;;  %v15425_v17 = vpop.permute.xlu0 %6764 }
 0x8b8   : > { %v7396_v51 = vsel %vm7382_vm7, %v7393_v46, %v7395_v36  ;;  %v15394_v48 = vadd.f32 %v15088_v21, %v6778_v32  ;;  %v7324_v15 = vor.u32 4788187, %v7323_v57  ;;  %vm6831_vm5 = vcmp.lt.s32.totalorder %v15085_v9, 0 }
 0x8b9   : > { %v9090_v7 = vmin.u32 %v7103_v6, %v15376_v16  ;;  %v15398_v49 = vmul.u32.u64.low %v15342_v5, %v7396_v51  ;;  %v15399_v37 = vmul.u32.u64.high %v15342_v5, %v7396_v51, %v15398_v49  ;;  %v7015_v31 = vcvt.s32.f32 %v15344_v56 }
 0x8ba   : > { %v7388_v34 = vsel %vm7382_vm7, %v7385_v59, %v7387_v63  ;;  %v7144_v58 = vand.u32 2139095040, %v15385_v14  ;;  %vm6935_vm3 = vcmp.lt.s32.totalorder %v15091_v29, 0  ;;  %v7320_v12 = vor.u32 %v7319_v27, %v7318_v40 }
 0x8bb   : > { %v7105_v32 = vclz %v9090_v7  ;;  %v7456_v57 = vand.u32 2139095040, %v15394_v48  ;;  %v6915_v54 = vsub.s32 4, %v15206_v43  ;;  %v7016_v52 = vmul.f32 %v7015_v31, %v7013_v42 }
 0x8bc   : > { %v7407_v26 = vadd.s32 1, %v15390_v33  ;;  %v7145_v19 = vshrl.u32 %v7144_v58, 23  ;;  %v6914_v56 = vsel %vm6831_vm5, %v6913_v24, %v15326_v53  ;;  %v7325_v50 = vand.u32 2147483647, %v7324_v15 }
 0x8bd   : > { %v7404_v2 = vmul.u32 %v15342_v5, %v7388_v34  ;;  %vm7406_vm0 = vc.u32 %v15399_v37, %v15389_v45  ;;  %v7331_v40 = vsub.s32 4, %v15292_v10  ;;  %v7457_v46 = vshrl.u32 %v7456_v57, 23 }
 0x8be   : > { %v7408_v28 = vsel %vm7406_vm0, %v7407_v26, %v15390_v33  ;;  %v9093_v42 = vadd.s32 4294967169, %v7145_v19  ;;  %v17433_v27 = vand.u32 2147483647, %v15085_v9  ;;  %v17434_v59 = vmov 0 }
 0x8bf   : > { %v7327_v61 = vcvt.s32.f32 %v7320_v12  ;;  %v9091_v53 = vadd.s32 4294967294, %v7105_v32  ;;  %v7409_v24 = vadd.s32 %v7408_v28, %v7404_v2  ;;  %v7017_v6 = vxor.u32 2147483648, %v7016_v52 }
 0x8c0   : > { %vm15421_vm6 = vcmp.le.f32.partialorder %v17433_v27, 0.7853982  ;;  %vm7247_vm1 = vcmp.lt.s32.totalorder %v15096_v62, 0  ;;  %v7151_v63 = vadd.s32 1, %v9093_v42  ;;  %v15434_v36 = vsel %vm6831_vm5, %v6915_v54, %v15206_v43 }
 0x8c1   : > { %v17435_v59 = vsel %vm15421_vm6, 4294967295, %v17434_v59  ;;  %v6917_v5 = vsel %vm15421_vm6, %v15085_v9, %v6914_v56  ;;  %17437 = vst [vmem:[#allocation20_spill] sm:$0xff] %v15434_v36  ;;  %v15436_v51 = vmul.f32 %v7327_v61, %v7325_v50  ;;  %v7410_v33 = vadd.s32 536870912, %v7409_v24 }
 0x8c2   : > { %17436 = vst [vmem:[#allocation13_spill] sm:$0xff] %v17435_v59  ;;  %v15440_v15 = vmul.f32 %v15425_v17, %v15106_v8  ;;  %v15445_v7 = vsel %vm7247_vm1, %v7331_v40, %v15292_v10  ;;  %v16942_v49 = vand.u32 2147483647, %v15385_v14  ;;  %vm7152_vm11 = vcmp.gt.s32.totalorder %v7151_v63, 0 }
 0x8c3   : > { %17438 = vst [vmem:[#allocation23_spill] sm:$0xff] %v15445_v7  ;;  %v9105_v31 = vadd.s32 4294967169, %v7457_v46  ;;  %9782 = vcosq.f32 %v6917_v5  ;;  %vm9092_vm2 = vcmp.lt.s32.totalorder %v9091_v53, 0  ;;  %v15448_v43 = vshrl.u32 %v7410_v33, 30 }
 0x8c4   : > { %v7153_v34 = vsel %vm7152_vm11, %v7151_v63, 0  ;;  %9784 = vsinq.f32 %v6917_v5  ;;  %v15452_v58 = vsel %vm6935_vm3, %v7017_v6, %v7016_v52  ;;  %v6779_v12 = vmul.f32 %v15078_v1, %v15130_v13 }
 0x8c5   : > { %17439 = vst [vmem:[#allocation16_spill] sm:$0xff] %v15448_v43  ;;  %v7155_v8 = vand.u32 31, %v7153_v34  ;;  %v7329_v10 = vxor.u32 2147483648, %v15436_v51  ;;  %v15459_v32 = vadd.s32 %v15322_v18, %v15331_v30  ;;  %v7412_v57 = vshll.u32 %v15448_v43, 30 }
 0x8c6   : > { %v16943_v54 = vand.u32 2147483647, %v15394_v48  ;;  %v15463_v26 = vsel %vm9092_vm2, 0, %v9091_v53  ;;  %v7148_v52 = vand.u32 8388607, %v16942_v49  ;;  %v7463_v56 = vadd.s32 1, %v9105_v31 }
 0x8c7   : > { %v7156_v19 = vsub.s32 32, %v7155_v8  ;;  %v15467_v50 = vsub.s32 %v7409_v24, %v7412_v57  ;;  %v7154_v1 = vshrl.u32 %v7153_v34, 5  ;;  %v7158_v13 = vshll.u32 %v17008_v60, %v7155_v8 }
 0x8c8   : > { %v7161_v2 = vshll.u32 %v17426_v38, %v7155_v8  ;;  %v7164_v40 = vshll.u32 %v17427_v39, %v7155_v8  ;;  %v7167_v46 = vshll.u32 %v17428_v41, %v7155_v8  ;;  %v7170_v61 = vshll.u32 %v17429_v23, %v7155_v8 }
 0x8c9   : > { %v7159_v18 = vshrl.u32 %v17426_v38, %v7156_v19  ;;  %v7162_v30 = vshrl.u32 %v17427_v39, %v7156_v19  ;;  %v7165_v28 = vshrl.u32 %v17428_v41, %v7156_v19  ;;  %v7415_v42 = vsub.s32 0, %v15467_v50 }
 0x8ca   : > { %v7168_v27 = vshrl.u32 %v17429_v23, %v7156_v19  ;;  %v7171_v6 = vshrl.u32 %v17430_v3, %v7156_v19  ;;  %v7460_v31 = vand.u32 8388607, %v16943_v54  ;;  %v15484_v34 = vadd.f32 %v15088_v21, %v6779_v12 }
 0x8cb   : > { %v7160_v53 = vor.u32 %v7159_v18, %v7158_v13  ;;  %v7163_v24 = vor.u32 %v7162_v30, %v7161_v2  ;;  %v7166_v5 = vor.u32 %v7165_v28, %v7164_v40  ;;  %v9102_v63 = vmin.u32 %v7415_v42, %v15467_v50 }
 0x8cc   : > { %v7169_v33 = vor.u32 %v7168_v27, %v7167_v46  ;;  %v7149_v57 = vor.u32 8388608, %v7148_v52  ;;  %v7172_v49 = vor.u32 %v7171_v6, %v7170_v61  ;;  %vm7176_vm10 = vcmp.lt.s32.totalorder %v7154_v1, 4  ;;  %v15494_v46 = vpop.f32.mrb[33].mxu1 }
 0x8cd   : > { %vm7464_vm4 = vcmp.gt.s32.totalorder %v7463_v56, 0  ;;  %v15486_v20 = vpop.eup %9782  ;;  %v7113_v8 = vsub.s32 4294967266, %v15463_v26  ;;  %v7157_v13 = vshrl.u32 %v17008_v60, %v7156_v19  ;;  %vm7173_vm12 = vcmp.lt.s32.totalorder %v7154_v1, 1 }
 0x8ce   : > { %17440 = vst [vmem:[#allocation36_spill] sm:$0xff] %v15486_v20  ;;  %v7178_v2 = vsel %vm7176_vm10, %v7166_v5, 2102212464  ;;  %v15491_v18 = vpop.eup %9784  ;;  %v7417_v30 = vclz %v9102_v63  ;;  %vm7175_vm13 = vcmp.lt.s32.totalorder %v7154_v1, 3  ;;  %v7181_v40 = vsel %vm7173_vm12, %v7160_v53, %v7163_v24 }
 0x8cf   : > { %17441 = vst [vmem:[#allocation25_spill] sm:$0xff] %v15491_v18  ;;  %v7182_v21 = vsel %vm7176_vm10, %v7169_v33, 920167782  ;;  %v7185_v52 = vsel %vm7173_vm12, %v7163_v24, %v7166_v5  ;;  %v7461_v28 = vor.u32 8388608, %v7460_v31  ;;  %v7465_v42 = vsel %vm7464_vm4, %v7463_v56, 0 }
 0x8d0   : > { %v7183_v12 = vsel %vm7175_vm13, %v7166_v5, %v7182_v21  ;;  %vm7174_vm8 = vcmp.lt.s32.totalorder %v7154_v1, 2  ;;  %v7177_v27 = vsel %vm7173_vm12, %v7157_v13, %v7160_v53  ;;  %v7179_v61 = vsel %vm7175_vm13, %v7163_v24, %v7178_v2 }
 0x8d1   : > { %v7186_v19 = vsel %vm7176_vm10, %v7172_v49, 1326507024  ;;  %v7109_v6 = vsub.s32 32, %v15463_v26  ;;  %v7184_v54 = vsel %vm7174_vm8, %v7181_v40, %v7183_v12  ;;  %v7189_v63 = vshll.u32 %v7149_v57, 8 }
 0x8d2   : > { %v7187_v22 = vsel %vm7175_vm13, %v7169_v33, %v7186_v19  ;;  %v7114_v9 = vadd.s32 127, %v7113_v8  ;;  %v9103_v20 = vadd.s32 4294967294, %v7417_v30  ;;  %v7467_v7 = vand.u32 31, %v7465_v42 }
 0x8d3   : > { %v7188_v18 = vsel %vm7174_vm8, %v7185_v52, %v7187_v22  ;;  %v15501_v56 = vsel %vm7247_vm1, %v7329_v10, %v15436_v51  ;;  %v7180_v53 = vsel %vm7174_vm8, %v7177_v27, %v7179_v61  ;;  %v7110_v22 = vshll.u32 %v15376_v16, %v15463_v26 }
 0x8d4   : > { %v15505_v49 = vmul.u32.u64.low %v7189_v63, %v7188_v18  ;;  %v15506_v24 = vmul.u32.u64.high %v7189_v63, %v7188_v18, %v15505_v49  ;;  %v15508_v31 = vmul.u32.u64.low %v7189_v63, %v7184_v54  ;;  %v15509_v33 = vmul.u32.u64.high %v7189_v63, %v7184_v54, %v15508_v31 }
 0x8d5   : > { %v7468_v57 = vsub.s32 32, %v7467_v7  ;;  %v15514_v8 = vshll.u32 %v7461_v28, 8  ;;  %v7560_v51 = vand.u32 2139095040, %v15484_v34  ;;  %v7111_v10 = vshrl.u32 %v15459_v32, %v7109_v6 }
 0x8d6   : > { %v7115_v13 = vshll.u32 %v7114_v9, 23  ;;  %vm9104_vm14 = vcmp.lt.s32.totalorder %v9103_v20, 0  ;;  %v7196_v2 = vmul.u32 %v7189_v63, %v7180_v53  ;;  %v7466_v30 = vshrl.u32 %v7465_v42, 5 }
 0x8d7   : > { %v7470_v18 = vshll.u32 %v17008_v60, %v7467_v7  ;;  %v7471_v54 = vshrl.u32 %v17426_v38, %v7468_v57  ;;  %v7473_v40 = vshll.u32 %v17426_v38, %v7467_v7  ;;  %vm7198_vm15 = vc.u32 %v15506_v24, %v15508_v31 }
 0x8d8   : > { %v7199_v16 = vadd.s32 1, %v15509_v33  ;;  %v7474_v26 = vshrl.u32 %v17427_v39, %v7468_v57  ;;  %v7476_v21 = vshll.u32 %v17427_v39, %v7467_v7  ;;  %v7477_v9 = vshrl.u32 %v17428_v41, %v7468_v57 }
 0x8d9   : > { %v7472_v32 = vor.u32 %v7471_v54, %v7470_v18  ;;  %v7479_v12 = vshll.u32 %v17428_v41, %v7467_v7  ;;  %v7482_v52 = vshll.u32 %v17429_v23, %v7467_v7  ;;  %v7480_v27 = vshrl.u32 %v17429_v23, %v7468_v57 }
 0x8da   : > { %v7200_v28 = vsel %vm7198_vm15, %v7199_v16, %v15509_v33  ;;  %v7475_v42 = vor.u32 %v7474_v26, %v7473_v40  ;;  %v7483_v61 = vshrl.u32 %v17430_v3, %v7468_v57  ;;  %v7112_v19 = vor.u32 %v7111_v10, %v7110_v22 }
 0x8db   : > { %v7201_v6 = vadd.s32 %v7200_v28, %v7196_v2  ;;  %v7478_v63 = vor.u32 %v7477_v9, %v7476_v21  ;;  %v7561_v53 = vshrl.u32 %v7560_v51, 23  ;;  %v7116_v49 = vor.u32 4788187, %v7115_v13  ;;  %v15547_v28 = vpop.f32.mrb[34].mxu1 }
 0x8dc   : > { %v15533_v18 = vsel %vm9104_vm14, 0, %v9103_v20  ;;  %v7481_v54 = vor.u32 %v7480_v27, %v7479_v12  ;;  %v7484_v5 = vor.u32 %v7483_v61, %v7482_v52  ;;  %v17442_v1 = vand.u32 2147483647, %v15096_v62 }
 0x8dd   : > { %v17443_v7 = vmov 0  ;;  %v7202_v33 = vadd.s32 536870912, %v7201_v6  ;;  %v7469_v40 = vshrl.u32 %v17008_v60, %v7468_v57  ;;  %vm7485_vm7 = vcmp.lt.s32.totalorder %v7466_v30, 1 }
 0x8de   : > { %vm15537_vm9 = vcmp.le.f32.partialorder %v17442_v1, 0.7853982  ;;  %vm7488_vm5 = vcmp.lt.s32.totalorder %v7466_v30, 4  ;;  %vm7487_vm0 = vcmp.lt.s32.totalorder %v7466_v30, 3  ;;  %v7493_v51 = vsel %vm7485_vm7, %v7472_v32, %v7475_v42 }
 0x8df   : > { %v17444_v7 = vsel %vm15537_vm9, 4294967295, %v17443_v7  ;;  %v7490_v22 = vsel %vm7488_vm5, %v7478_v63, 2102212464  ;;  %v7494_v10 = vsel %vm7488_vm5, %v7481_v54, 920167782  ;;  %v15542_v13 = vshrl.u32 %v7202_v33, 30 }
 0x8e0   : > { %17445 = vst [vmem:[#allocation15_spill] sm:$0xff] %v17444_v7  ;;  %vm7486_vm1 = vcmp.lt.s32.totalorder %v7466_v30, 2  ;;  %v7495_v20 = vsel %vm7487_vm0, %v7478_v63, %v7494_v10  ;;  %v7497_v2 = vsel %vm7485_vm7, %v7475_v42, %v7478_v63  ;;  %v7425_v16 = vsub.s32 4294967266, %v15533_v18 }
 0x8e1   : > { %17446 = vst [vmem:[#allocation31_spill] sm:$0xff] %v15542_v13  ;;  %v7496_v1 = vsel %vm7486_vm1, %v7493_v51, %v7495_v20  ;;  %v7498_v26 = vsel %vm7488_vm5, %v7484_v5, 1326507024  ;;  %v9109_v21 = vadd.s32 4294967169, %v7561_v53  ;;  %v7204_v9 = vshll.u32 %v15542_v13, 30 }
 0x8e2   : > { %v7489_v57 = vsel %vm7485_vm7, %v7469_v40, %v7472_v32  ;;  %v7491_v12 = vsel %vm7487_vm0, %v7475_v42, %v7490_v22  ;;  %v7499_v52 = vsel %vm7487_vm0, %v7481_v54, %v7498_v26  ;;  %v7117_v10 = vand.u32 2147483647, %v7116_v49 }
 0x8e3   : > { %v7500_v27 = vsel %vm7486_vm1, %v7497_v2, %v7499_v52  ;;  %v15551_v61 = vmul.u32.u64.low %v15514_v8, %v7496_v1  ;;  %v15552_v33 = vmul.u32.u64.high %v15514_v8, %v7496_v1, %v15551_v61  ;;  %v7567_v63 = vadd.s32 1, %v9109_v21 }
 0x8e4   : > { %v15555_v59 = vsub.s32 %v7201_v6, %v7204_v9  ;;  %v15558_v5 = vmul.u32.u64.low %v15514_v8, %v7500_v27  ;;  %v15559_v53 = vmul.u32.u64.high %v15514_v8, %v7500_v27, %v15558_v5  ;;  %v7119_v32 = vcvt.s32.f32 %v7112_v19 }
 0x8e5   : > { %v7421_v42 = vsub.s32 32, %v15533_v18  ;;  %v7492_v54 = vsel %vm7486_vm1, %v7489_v57, %v7491_v12  ;;  %vm7568_vm11 = vcmp.gt.s32.totalorder %v7567_v63, 0  ;;  %v7426_v40 = vadd.s32 127, %v7425_v16 }
 0x8e6   : > { %v7207_v22 = vsub.s32 0, %v15555_v59  ;;  %v17447_v51 = vand.u32 2147483647, %v15484_v34  ;;  %v7569_v2 = vsel %vm7568_vm11, %v7567_v63, 0  ;;  %v15570_v6 = vsel %vm15537_vm9, %v15096_v62, %v15501_v56 }
 0x8e7   : > { %v7405_v19 = vadd.s32 %v15389_v45, %v15399_v37  ;;  %v7511_v30 = vadd.s32 1, %v15552_v33  ;;  %v7571_v49 = vand.u32 31, %v7569_v2  ;;  %v15575_v1 = vmul.f32 %v7119_v32, %v7117_v10  ;;  %v15584_v45 = vpop.permute.xlu0 %6805 }
 0x8e8   : > { %v7564_v20 = vand.u32 8388607, %v17447_v51  ;;  %v9094_v16 = vmin.u32 %v7207_v22, %v15555_v59  ;;  %v7508_v26 = vmul.u32 %v15514_v8, %v7492_v54  ;;  %vm7510_vm2 = vc.u32 %v15559_v53, %v15551_v61 }
 0x8e9   : > { %v7422_v21 = vshll.u32 %v15467_v50, %v15533_v18  ;;  %v7423_v56 = vshrl.u32 %v7405_v19, %v7421_v42  ;;  %v7512_v9 = vsel %vm7510_vm2, %v7511_v30, %v15552_v33  ;;  %v7572_v57 = vsub.s32 32, %v7571_v49 }
 0x8ea   : > { %v7427_v37 = vshll.u32 %v7426_v40, 23  ;;  %v7209_v12 = vclz %v9094_v16  ;;  %v7513_v52 = vadd.s32 %v7512_v9, %v7508_v26  ;;  %v7565_v27 = vor.u32 8388608, %v7564_v20 }
 0x8eb   : > { %v7575_v63 = vshrl.u32 %v17426_v38, %v7572_v57  ;;  %v7578_v8 = vshrl.u32 %v17427_v39, %v7572_v57  ;;  %v7581_v10 = vshrl.u32 %v17428_v41, %v7572_v57  ;;  %v15591_v5 = vadd.f32 %v15584_v45, %v15440_v15 }
 0x8ec   : > { %v9095_v50 = vadd.s32 4294967294, %v7209_v12  ;;  %v7514_v18 = vadd.s32 536870912, %v7513_v52  ;;  %v7574_v33 = vshll.u32 %v17008_v60, %v7571_v49  ;;  %v7584_v32 = vshrl.u32 %v17429_v23, %v7572_v57 }
 0x8ed   : > { %17448 = vst [vmem:[#allocation30_spill] sm:$0xff] %v15591_v5  ;;  %v7577_v42 = vshll.u32 %v17426_v38, %v7571_v49  ;;  %v7580_v54 = vshll.u32 %v17427_v39, %v7571_v49  ;;  %v7583_v40 = vshll.u32 %v17428_v41, %v7571_v49  ;;  %v7587_v22 = vshrl.u32 %v17430_v3, %v7572_v57 }
 0x8ee   : > { %v15599_v51 = vshrl.u32 %v7514_v18, 30  ;;  %v7570_v20 = vshrl.u32 %v7569_v2, 5  ;;  %v7576_v19 = vor.u32 %v7575_v63, %v7574_v33  ;;  %v7586_v15 = vshll.u32 %v17429_v23, %v7571_v49 }
 0x8ef   : > { %vm7039_vm10 = vcmp.lt.s32.totalorder %v15213_v25, 0  ;;  %vm9096_vm4 = vcmp.lt.s32.totalorder %v9095_v50, 0  ;;  %v7579_v30 = vor.u32 %v7578_v8, %v7577_v42  ;;  %v7582_v16 = vor.u32 %v7581_v10, %v7580_v54  ;;  %v15614_v8 = vpop.f32.mrb[35].mxu1 }
 0x8f0   : > { %v7585_v26 = vor.u32 %v7584_v32, %v7583_v40  ;;  %9786 = vcosq.f32 %v15570_v6  ;;  %v7121_v9 = vxor.u32 2147483648, %v15575_v1  ;;  %v7424_v12 = vor.u32 %v7423_v56, %v7422_v21 }
 0x8f1   : > { %v7516_v13 = vshll.u32 %v15599_v51, 30  ;;  %v7428_v62 = vor.u32 4788187, %v7427_v37  ;;  %v7588_v18 = vor.u32 %v7587_v22, %v7586_v15  ;;  %v15606_v7 = vshll.u32 %v7565_v27, 8 }
 0x8f2   : > { %v6781_v2 = vmul.f32 %v15425_v17, %v15182_v11  ;;  %v15610_v49 = vsel %vm9096_vm4, 0, %v9095_v50  ;;  %vm7589_vm12 = vcmp.lt.s32.totalorder %v7570_v20, 1  ;;  %vm7592_vm13 = vcmp.lt.s32.totalorder %v7570_v20, 4 }
 0x8f3   : > { %v15612_v63 = vsub.s32 %v7513_v52, %v7516_v13  ;;  %v7594_v10 = vsel %vm7592_vm13, %v7582_v16, 2102212464  ;;  %v7597_v21 = vsel %vm7589_vm12, %v7576_v19, %v7579_v30  ;;  %v7598_v56 = vsel %vm7592_vm13, %v7585_v26, 920167782 }
 0x8f4   : > { %v7573_v33 = vshrl.u32 %v17008_v60, %v7572_v57  ;;  %vm7590_vm8 = vcmp.lt.s32.totalorder %v7570_v20, 2  ;;  %vm7591_vm14 = vcmp.lt.s32.totalorder %v7570_v20, 3  ;;  %v17449_v11 = vand.u32 2147483647, %v15213_v25 }
 0x8f5   : > { %v7519_v27 = vsub.s32 0, %v15612_v63  ;;  %v17450_v13 = vmov 0  ;;  %v7217_v52 = vsub.s32 4294967266, %v15610_v49  ;;  %v7599_v50 = vsel %vm7591_vm14, %v7582_v16, %v7598_v56 }
 0x8f6   : > { %vm15622_vm15 = vcmp.le.f32.partialorder %v17449_v11, 0.7853982  ;;  %v7601_v32 = vsel %vm7589_vm12, %v7579_v30, %v7582_v16  ;;  %v7602_v42 = vsel %vm7592_vm13, %v7588_v18, 1326507024  ;;  %v7593_v40 = vsel %vm7589_vm12, %v7573_v33, %v7576_v19 }
 0x8f7   : > { %v17451_v13 = vsel %vm15622_vm15, 4294967295, %v17450_v13  ;;  %v9106_v54 = vmin.u32 %v7519_v27, %v15612_v63  ;;  %v7595_v22 = vsel %vm7591_vm14, %v7579_v30, %v7594_v10  ;;  %v7600_v57 = vsel %vm7590_vm8, %v7597_v21, %v7599_v50 }
 0x8f8   : > { %17452 = vst [vmem:[#allocation27_spill] sm:$0xff] %v17451_v13  ;;  %v7603_v15 = vsel %vm7591_vm14, %v7585_v26, %v7602_v42  ;;  %v15632_v37 = vmul.u32.u64.low %v15606_v7, %v7600_v57  ;;  %v15633_v11 = vmul.u32.u64.high %v15606_v7, %v7600_v57, %v15632_v37  ;;  %v7664_v36 = vand.u32 2139095040, %v15591_v5 }
 0x8f9   : > { %v7122_v16 = vsel %vm7039_vm10, %v7121_v9, %v15575_v1  ;;  %v7431_v18 = vcvt.s32.f32 %v7424_v12  ;;  %v7521_v56 = vclz %v9106_v54  ;;  %v7604_v27 = vsel %vm7590_vm8, %v7601_v32, %v7603_v15 }
 0x8fa   : > { %v7429_v19 = vand.u32 2147483647, %v7428_v62  ;;  %v15642_v30 = vmul.u32.u64.low %v15606_v7, %v7604_v27  ;;  %v15643_v10 = vmul.u32.u64.high %v15606_v7, %v7604_v27, %v15642_v30  ;;  %v7665_v26 = vshrl.u32 %v7664_v36, 23  ;;  %v15645_v21 = vpop.eup %9786 }
 0x8fb   : > { %17453 = vst [vmem:[#allocation39_spill] sm:$0xff] %v15645_v21  ;;  %v7213_v33 = vsub.s32 32, %v15610_v49  ;;  %v7218_v50 = vadd.s32 127, %v7217_v52  ;;  %v9107_v42 = vadd.s32 4294967294, %v7521_v56  ;;  %v7596_v57 = vsel %vm7590_vm8, %v7593_v40, %v7595_v22  ;;  %v15679_v56 = vpop.permute.xlu1 %6769 }
 0x8fc   : > { %v7615_v1 = vadd.s32 1, %v15633_v11  ;;  %v9113_v9 = vadd.s32 4294967169, %v7665_v26  ;;  %v17454_v12 = vand.u32 2147483647, %v15591_v5  ;;  %v15653_v62 = vadd.f32 %v15584_v45, %v6781_v2 }
 0x8fd   : > { %9788 = vsinq.f32 %v15570_v6  ;;  %v17455_v36 = vsub.s32 4, %v15367_v35  ;;  %v7197_v20 = vadd.s32 %v15508_v31, %v15506_v24  ;;  %vm9108_vm7 = vcmp.lt.s32.totalorder %v9107_v42, 0 }
 0x8fe   : > { %v7668_v32 = vand.u32 8388607, %v17454_v12  ;;  %v15665_v54 = vmul.f32 %v7431_v18, %v7429_v19  ;;  %v15667_v40 = vsel %vm9108_vm7, 0, %v9107_v42  ;;  %vm7614_vm5 = vc.u32 %v15643_v10, %v15632_v37 }
 0x8ff   : > { %v15661_v52 = vsel %vm7039_vm10, %v17455_v36, %v15367_v35  ;;  %v7671_v2 = vadd.s32 1, %v9113_v9  ;;  %v15674_v6 = vsel %vm15622_vm15, %v15213_v25, %v7122_v16  ;;  %v7215_v22 = vshrl.u32 %v7197_v20, %v7213_v33 }
 0x900   : > { %17456 = vst [vmem:[#allocation33_spill] sm:$0xff] %v15661_v52  ;;  %v7219_v35 = vshll.u32 %v7218_v50, 23  ;;  %v7612_v15 = vmul.u32 %v15606_v7, %v7596_v57  ;;  %v7616_v24 = vsel %vm7614_vm5, %v7615_v1, %v15633_v11  ;;  %v7669_v31 = vor.u32 8388608, %v7668_v32 }
 0x901   : > { %vm7672_vm0 = vcmp.gt.s32.totalorder %v7671_v2, 0  ;;  %v7768_v18 = vand.u32 2139095040, %v15653_v62  ;;  %v7214_v27 = vshll.u32 %v15555_v59, %v15610_v49  ;;  %v7529_v19 = vsub.s32 4294967266, %v15667_v40 }
 0x902   : > { %v7617_v30 = vadd.s32 %v7616_v24, %v7612_v15  ;;  %v7673_v16 = vsel %vm7672_vm0, %v7671_v2, 0  ;;  %v7509_v7 = vadd.s32 %v15551_v61, %v15559_v53  ;;  %v15689_v11 = vmul.f32 %v15679_v56, %v15271_v44 }
 0x903   : > { %v7675_v33 = vand.u32 31, %v7673_v16  ;;  %v15691_v50 = vor.u32 %v7215_v22, %v7214_v27  ;;  %v15693_v42 = vor.u32 4788187, %v7219_v35  ;;  %v7525_v49 = vsub.s32 32, %v15667_v40 }
 0x904   : > { %v7618_v57 = vadd.s32 536870912, %v7617_v30  ;;  %v15697_v9 = vshll.u32 %v7669_v31, 8  ;;  %v7769_v12 = vshrl.u32 %v7768_v18, 23  ;;  %v7530_v32 = vadd.s32 127, %v7529_v19 }
 0x905   : > { %v7676_v1 = vsub.s32 32, %v7675_v33  ;;  %v7674_v53 = vshrl.u32 %v7673_v16, 5  ;;  %v7678_v44 = vshll.u32 %v17008_v60, %v7675_v33  ;;  %v7681_v20 = vshll.u32 %v17426_v38, %v7675_v33 }
 0x906   : > { %v15699_v61 = vshrl.u32 %v7618_v57, 30  ;;  %v7684_v24 = vshll.u32 %v17427_v39, %v7675_v33  ;;  %v7687_v31 = vshll.u32 %v17428_v41, %v7675_v33  ;;  %v7690_v16 = vshll.u32 %v17429_v23, %v7675_v33 }
 0x907   : > { %v7679_v36 = vshrl.u32 %v17426_v38, %v7676_v1  ;;  %v7682_v2 = vshrl.u32 %v17427_v39, %v7676_v1  ;;  %v7685_v22 = vshrl.u32 %v17428_v41, %v7676_v1  ;;  %v15706_v35 = vpop.eup %9788  ;;  %v7688_v18 = vshrl.u32 %v17429_v23, %v7676_v1 }
 0x908   : > { %17457 = vst [vmem:[#allocation18_spill] sm:$0xff] %v15699_v61  ;;  %17458 = vst [vmem:[#allocation35_spill] sm:$0xff] %v15706_v35  ;;  %v7620_v15 = vshll.u32 %v15699_v61, 30  ;;  %v7691_v57 = vshrl.u32 %v17430_v3, %v7676_v1  ;;  %v7526_v26 = vshll.u32 %v15612_v63, %v15667_v40  ;;  %v7527_v52 = vshrl.u32 %v7509_v7, %v7525_v49 }
 0x909   : > { %v7680_v27 = vor.u32 %v7679_v36, %v7678_v44  ;;  %v7683_v19 = vor.u32 %v7682_v2, %v7681_v20  ;;  %v7686_v25 = vor.u32 %v7685_v22, %v7684_v24  ;;  %v7689_v13 = vor.u32 %v7688_v18, %v7687_v31 }
 0x90a   : > { %v15716_v59 = vsub.s32 %v7617_v30, %v7620_v15  ;;  %v7531_v61 = vshll.u32 %v7530_v32, 23  ;;  %v7692_v21 = vor.u32 %v7691_v57, %v7690_v16  ;;  %v9117_v35 = vadd.s32 4294967169, %v7769_v12 }
 0x90b   : > { %vm7351_vm1 = vcmp.lt.s32.totalorder %v15217_v0, 0  ;;  %v7677_v36 = vshrl.u32 %v17008_v60, %v7676_v1  ;;  %vm7693_vm11 = vcmp.lt.s32.totalorder %v7674_v53, 1  ;;  %vm7696_vm2 = vcmp.lt.s32.totalorder %v7674_v53, 4 }
 0x90c   : > { %v7623_v44 = vsub.s32 0, %v15716_v59  ;;  %vm7694_vm10 = vcmp.lt.s32.totalorder %v7674_v53, 2  ;;  %vm7695_vm4 = vcmp.lt.s32.totalorder %v7674_v53, 3  ;;  %v7701_v33 = vsel %vm7693_vm11, %v7680_v27, %v7683_v19 }
 0x90d   : > { %v7702_v63 = vsel %vm7696_vm2, %v7689_v13, 920167782  ;;  %v7698_v30 = vsel %vm7696_vm2, %v7686_v25, 2102212464  ;;  %v7705_v7 = vsel %vm7693_vm11, %v7683_v19, %v7686_v25  ;;  %v7528_v49 = vor.u32 %v7527_v52, %v7526_v26 }
 0x90e   : > { %v9110_v40 = vmin.u32 %v7623_v44, %v15716_v59  ;;  %v7703_v20 = vsel %vm7695_vm4, %v7686_v25, %v7702_v63  ;;  %v7532_v32 = vor.u32 4788187, %v7531_v61  ;;  %v7706_v2 = vsel %vm7696_vm2, %v7692_v21, 1326507024  ;;  %v15729_v44 = vpop.permute.xlu1 %6810 }
 0x90f   : > { %v7704_v12 = vsel %vm7694_vm10, %v7701_v33, %v7703_v20  ;;  %v7697_v15 = vsel %vm7693_vm11, %v7677_v36, %v7680_v27  ;;  %v7707_v24 = vsel %vm7695_vm4, %v7689_v13, %v7706_v2  ;;  %v7775_v1 = vadd.s32 1, %v9117_v35 }
 0x910   : > { %v7625_v22 = vclz %v9110_v40  ;;  %v7699_v31 = vsel %vm7695_vm4, %v7683_v19, %v7698_v30  ;;  %v7708_v18 = vsel %vm7694_vm10, %v7705_v7, %v7707_v24  ;;  %9790 = vcosq.f32 %v15674_v6 }
 0x911   : > { %v15725_v16 = vmul.u32.u64.low %v15697_v9, %v7704_v12  ;;  %v15726_v57 = vmul.u32.u64.high %v15697_v9, %v7704_v12, %v15725_v16  ;;  %v15732_v52 = vmul.u32.u64.low %v15697_v9, %v7708_v18  ;;  %v15733_v26 = vmul.u32.u64.high %v15697_v9, %v7708_v18, %v15732_v52 }
 0x912   : > { %v9111_v25 = vadd.s32 4294967294, %v7625_v22  ;;  %vm7776_vm12 = vcmp.gt.s32.totalorder %v7775_v1, 0  ;;  %v17459_v13 = vand.u32 2147483647, %v15653_v62  ;;  %v15740_v35 = vadd.f32 %v15729_v44, %v15689_v11 }
 0x913   : > { %v7777_v61 = vsel %vm7776_vm12, %v7775_v1, 0  ;;  %v7533_v27 = vand.u32 2147483647, %v7532_v32  ;;  %v7700_v19 = vsel %vm7694_vm10, %v7697_v15, %v7699_v31  ;;  %9792 = vsinq.f32 %v15674_v6 }
 0x914   : > { %v7772_v21 = vand.u32 8388607, %v17459_v13  ;;  %vm9112_vm13 = vcmp.lt.s32.totalorder %v9111_v25, 0  ;;  %v7779_v36 = vand.u32 31, %v7777_v61  ;;  %v17460_v33 = vxor.u32 2147483648, %v15665_v54 }
 0x915   : > { %v7719_v40 = vadd.s32 1, %v15726_v57  ;;  %v15754_v11 = vmul.f32 %v15425_v17, %v15318_v4  ;;  %v7535_v20 = vcvt.s32.f32 %v7528_v49  ;;  %v15758_v7 = vsel %vm9112_vm13, 0, %v9111_v25 }
 0x916   : > { %v15749_v63 = vsel %vm7351_vm1, %v17460_v33, %v15665_v54  ;;  %v7613_v6 = vadd.s32 %v15632_v37, %v15643_v10  ;;  %v7716_v32 = vmul.u32 %v15697_v9, %v7700_v19  ;;  %vm7718_vm8 = vc.u32 %v15733_v26, %v15725_v16 }
 0x917   : > { %17461 = vst [vmem:[#allocation32_spill] sm:$0xff] %v15749_v63  ;;  %v7780_v54 = vsub.s32 32, %v7779_v36  ;;  %v15765_v12 = vmul.f32 %v7535_v20, %v7533_v27  ;;  %v7720_v4 = vsel %vm7718_vm8, %v7719_v40, %v15726_v57  ;;  %v7773_v2 = vor.u32 8388608, %v7772_v21 }
 0x918   : > { %v16961_v22 = vand.u32 2147483647, %v15740_v35  ;;  %v7633_v49 = vsub.s32 4294967266, %v15758_v7  ;;  %v7721_v15 = vadd.s32 %v7720_v4, %v7716_v32  ;;  %v7782_v10 = vshll.u32 %v17008_v60, %v7779_v36 }
 0x919   : > { %v7783_v24 = vshrl.u32 %v17426_v38, %v7780_v54  ;;  %v7786_v37 = vshrl.u32 %v17427_v39, %v7780_v54  ;;  %v7785_v9 = vshll.u32 %v17426_v38, %v7779_v36  ;;  %v7788_v1 = vshll.u32 %v17427_v39, %v7779_v36 }
 0x91a   : > { %v7789_v31 = vshrl.u32 %v17428_v41, %v7780_v54  ;;  %v7722_v18 = vadd.s32 536870912, %v7721_v15  ;;  %v7778_v57 = vshrl.u32 %v7777_v61, 5  ;;  %v7791_v25 = vshll.u32 %v17428_v41, %v7779_v36  ;;  %v15779_v33 = vpop.eup %9790 }
 0x91b   : > { %v7792_v52 = vshrl.u32 %v17429_v23, %v7780_v54  ;;  %v7537_v13 = vxor.u32 2147483648, %v15765_v12  ;;  %v7784_v21 = vor.u32 %v7783_v24, %v7782_v10  ;;  %v7787_v27 = vor.u32 %v7786_v37, %v7785_v9  ;;  %17462 = vst [vmem:[#allocation19_spill] sm:$0xff] %v15779_v33 }
 0x91c   : > { %v7790_v19 = vor.u32 %v7789_v31, %v7788_v1  ;;  %v15781_v40 = vshrl.u32 %v7722_v18, 30  ;;  %v7794_v32 = vshll.u32 %v17429_v23, %v7779_v36  ;;  %v7795_v4 = vshrl.u32 %v17430_v3, %v7780_v54 }
 0x91d   : > { %v7793_v20 = vor.u32 %v7792_v52, %v7791_v25  ;;  %v7634_v53 = vadd.s32 127, %v7633_v49  ;;  %v7813_v61 = vshll.u32 %v7773_v2, 8  ;;  %v8080_v30 = vand.u32 2139095040, %v15740_v35  ;;  %v15790_v24 = vpop.eup %9792 }
 0x91e   : > { %v15788_v63 = vand.u32 8388607, %v16961_v22  ;;  %17463 = vst [vmem:[#allocation37_spill] sm:$0xff] %v15790_v24  ;;  %vm7455_vm14 = vcmp.lt.s32.totalorder %v15394_v48, 0  ;;  %v7724_v37 = vshll.u32 %v15781_v40, 30  ;;  %v7796_v10 = vor.u32 %v7795_v4, %v7794_v32 }
 0x91f   : > { %vm7797_vm7 = vcmp.lt.s32.totalorder %v7778_v57, 1  ;;  %vm7800_vm5 = vcmp.lt.s32.totalorder %v7778_v57, 4  ;;  %v7629_v36 = vsub.s32 32, %v15758_v7  ;;  %vm7799_vm0 = vcmp.lt.s32.totalorder %v7778_v57, 3 }
 0x920   : > { %v7805_v2 = vsel %vm7797_vm7, %v7784_v21, %v7787_v27  ;;  %v7806_v49 = vsel %vm7800_vm5, %v7793_v20, 920167782  ;;  %v15796_v9 = vsub.s32 %v7721_v15, %v7724_v37  ;;  %vm7798_vm11 = vcmp.lt.s32.totalorder %v7778_v57, 2 }
 0x921   : > { %v7802_v1 = vsel %vm7800_vm5, %v7790_v19, 2102212464  ;;  %v7807_v31 = vsel %vm7799_vm0, %v7790_v19, %v7806_v49  ;;  %v7635_v18 = vshll.u32 %v7634_v53, 23  ;;  %v7781_v25 = vshrl.u32 %v17008_v60, %v7780_v54 }
 0x922   : > { %v7808_v52 = vsel %vm7798_vm11, %v7805_v2, %v7807_v31  ;;  %v7809_v32 = vsel %vm7797_vm7, %v7787_v27, %v7790_v19  ;;  %v7727_v4 = vsub.s32 0, %v15796_v9  ;;  %v7810_v22 = vsel %vm7800_vm5, %v7796_v10, 1326507024 }
 0x923   : > { %v15803_v33 = vmul.u32.u64.low %v7813_v61, %v7808_v52  ;;  %v15804_v24 = vmul.u32.u64.high %v7813_v61, %v7808_v52, %v15803_v33  ;;  %v7801_v15 = vsel %vm7797_vm7, %v7781_v25, %v7784_v21  ;;  %v7803_v37 = vsel %vm7799_vm0, %v7787_v27, %v7802_v1 }
 0x924   : > { %v7811_v49 = vsel %vm7799_vm0, %v7793_v20, %v7810_v22  ;;  %v8081_v53 = vshrl.u32 %v8080_v30, 23  ;;  %v7631_v43 = vshrl.u32 %v7613_v6, %v7629_v36  ;;  %v9114_v54 = vmin.u32 %v7727_v4, %v15796_v9 }
 0x925   : > { %v7812_v2 = vsel %vm7798_vm11, %v7809_v32, %v7811_v49  ;;  %v15814_v19 = vadd.f32 %v15584_v45, %v15754_v11  ;;  %v15816_v10 = vor.u32 4788187, %v7635_v18  ;;  %v7630_v27 = vshll.u32 %v15716_v59, %v15758_v7 }
 0x926   : > { %v15818_v31 = vmul.u32.u64.low %v7813_v61, %v7812_v2  ;;  %v15819_v52 = vmul.u32.u64.high %v7813_v61, %v7812_v2, %v15818_v31  ;;  %v9129_v21 = vadd.s32 4294967169, %v8081_v53  ;;  %v7729_v22 = vclz %v9114_v54 }
 0x927   : > { %v7804_v30 = vsel %vm7798_vm11, %v7801_v15, %v7803_v37  ;;  %v7823_v6 = vadd.s32 1, %v15804_v24  ;;  %v17464_v20 = vand.u32 2147483647, %v15693_v42  ;;  %v17465_v36 = vcvt.s32.f32 %v15691_v50 }
 0x928   : > { %v15834_v1 = vsel %vm7455_vm14, %v7537_v13, %v15765_v12  ;;  %v8087_v25 = vadd.s32 1, %v9129_v21  ;;  %v15837_v59 = vor.u32 %v7631_v43, %v7630_v27  ;;  %v7717_v7 = vadd.s32 %v15725_v16, %v15733_v26 }
 0x929   : > { %v15829_v11 = vmul.f32 %v17465_v36, %v17464_v20  ;;  %v9115_v57 = vadd.s32 4294967294, %v7729_v22  ;;  %v7872_v42 = vand.u32 2139095040, %v15814_v19  ;;  %v7820_v32 = vmul.u32 %v7813_v61, %v7804_v30 }
 0x92a   : > { %vm7822_vm2 = vc.u32 %v15819_v52, %v15803_v33  ;;  %vm8088_vm10 = vcmp.gt.s32.totalorder %v8087_v25, 0  ;;  %v8085_v13 = vor.u32 8388608, %v15788_v63  ;;  %v16966_v16 = vand.u32 2147483647, %v15814_v19 }
 0x92b   : > { %vm9116_vm4 = vcmp.lt.s32.totalorder %v9115_v57, 0  ;;  %v7824_v12 = vsel %vm7822_vm2, %v7823_v6, %v15804_v24  ;;  %v8089_v43 = vsel %vm8088_vm10, %v8087_v25, 0  ;;  %v7873_v61 = vshrl.u32 %v7872_v42, 23 }
 0x92c   : > { %v7732_v4 = vsel %vm9116_vm4, 0, %v9115_v57  ;;  %v7825_v15 = vadd.s32 %v7824_v12, %v7820_v32  ;;  %v8091_v37 = vand.u32 31, %v8089_v43  ;;  %v15848_v53 = vshrl.u32 %v8089_v43, 5 }
 0x92d   : > { %v7733_v26 = vsub.s32 32, %v7732_v4  ;;  %v7737_v49 = vsub.s32 4294967266, %v7732_v4  ;;  %v7734_v54 = vshll.u32 %v15796_v9, %v7732_v4  ;;  %v8125_v43 = vshll.u32 %v8085_v13, 8 }
 0x92e   : > { %v7826_v2 = vadd.s32 536870912, %v7825_v15  ;;  %v8092_v31 = vsub.s32 32, %v8091_v37  ;;  %v8094_v21 = vshll.u32 %v17008_v60, %v8091_v37  ;;  %v8097_v63 = vshll.u32 %v17426_v38, %v8091_v37 }
 0x92f   : > { %v7735_v24 = vshrl.u32 %v7717_v7, %v7733_v26  ;;  %v7738_v27 = vadd.s32 127, %v7737_v49  ;;  %v8100_v22 = vshll.u32 %v17427_v39, %v8091_v37  ;;  %v8103_v36 = vshll.u32 %v17428_v41, %v8091_v37 }
 0x930   : > { %v15854_v30 = vshrl.u32 %v7826_v2, 30  ;;  %v8095_v6 = vshrl.u32 %v17426_v38, %v8092_v31  ;;  %v8098_v20 = vshrl.u32 %v17427_v39, %v8092_v31  ;;  %v8101_v57 = vshrl.u32 %v17428_v41, %v8092_v31 }
 0x931   : > { %v7736_v25 = vor.u32 %v7735_v24, %v7734_v54  ;;  %v7739_v9 = vshll.u32 %v7738_v27, 23  ;;  %v8104_v42 = vshrl.u32 %v17429_v23, %v8092_v31  ;;  %v15864_v2 = vand.u32 8388607, %v16966_v16 }
 0x932   : > { %17466 = vst [vmem:[#allocation34_spill] sm:$0xff] %v15854_v30  ;;  %v7828_v7 = vshll.u32 %v15854_v30, 30  ;;  %v8096_v32 = vor.u32 %v8095_v6, %v8094_v21  ;;  %v8099_v12 = vor.u32 %v8098_v20, %v8097_v63  ;;  %v8102_v26 = vor.u32 %v8101_v57, %v8100_v22 }
 0x933   : > { %v7740_v4 = vor.u32 4788187, %v7739_v9  ;;  %v8105_v49 = vor.u32 %v8104_v42, %v8103_v36  ;;  %v17467_v50 = vand.u32 2147483647, %v15394_v48  ;;  %v8106_v27 = vshll.u32 %v17429_v23, %v8091_v37 }
 0x934   : > { %v15872_v24 = vsub.s32 %v7825_v15, %v7828_v7  ;;  %v8107_v21 = vshrl.u32 %v17430_v3, %v8092_v31  ;;  %v9121_v13 = vadd.s32 4294967169, %v7873_v61  ;;  %v7743_v63 = vcvt.s32.f32 %v7736_v25 }
 0x935   : > { %vm15868_vm12 = vcmp.le.f32.partialorder %v17467_v50, 0.7853982  ;;  %v8093_v22 = vshrl.u32 %v17008_v60, %v8092_v31  ;;  %vm8109_vm13 = vcmp.lt.s32.totalorder %v15848_v53, 1  ;;  %vm8112_vm8 = vcmp.lt.s32.totalorder %v15848_v53, 4 }
 0x936   : > { %v7831_v6 = vsub.s32 0, %v15872_v24  ;;  %v8108_v50 = vor.u32 %v8107_v21, %v8106_v27  ;;  %v8114_v20 = vsel %vm8112_vm8, %v8102_v26, 2102212464  ;;  %v8117_v36 = vsel %vm8109_vm13, %v8096_v32, %v8099_v12 }
 0x937   : > { %vm16983_vm7 = vcmp.lt.s32.totalorder %v15385_v14, 0  ;;  %v7741_v15 = vand.u32 2147483647, %v7740_v4  ;;  %vm8111_vm5 = vcmp.lt.s32.totalorder %v15848_v53, 3  ;;  %v8118_v37 = vsel %vm8112_vm8, %v8105_v49, 920167782 }
 0x938   : > { %v8121_v9 = vsel %vm8109_vm13, %v8099_v12, %v8102_v26  ;;  %v9118_v61 = vmin.u32 %v7831_v6, %v15872_v24  ;;  %vm8110_vm0 = vcmp.lt.s32.totalorder %v15848_v53, 2  ;;  %v8119_v31 = vsel %vm8111_vm5, %v8102_v26, %v8118_v37 }
 0x939   : > { %v8122_v25 = vsel %vm8112_vm8, %v8108_v50, 1326507024  ;;  %v8113_v57 = vsel %vm8109_vm13, %v8093_v22, %v8096_v32  ;;  %v8115_v42 = vsel %vm8111_vm5, %v8099_v12, %v8114_v20  ;;  %v8120_v7 = vsel %vm8110_vm0, %v8117_v36, %v8119_v31 }
 0x93a   : > { %v8123_v27 = vsel %vm8111_vm5, %v8105_v49, %v8122_v25  ;;  %v7833_v21 = vclz %v9118_v61  ;;  %v15888_v16 = vmul.u32.u64.low %v8125_v43, %v8120_v7  ;;  %v15889_v18 = vmul.u32.u64.high %v8125_v43, %v8120_v7, %v15888_v16 }
 0x93b   : > { %v8124_v4 = vsel %vm8110_vm0, %v8121_v9, %v8123_v27  ;;  %v7744_v30 = vmul.f32 %v7743_v63, %v7741_v15  ;;  %v7879_v26 = vadd.s32 1, %v9121_v13  ;;  %v7225_v32 = vxor.u32 2147483648, %v15829_v11 }
 0x93c   : > { %v15892_v6 = vmul.u32.u64.low %v8125_v43, %v8124_v4  ;;  %v15893_v0 = vmul.u32.u64.high %v8125_v43, %v8124_v4, %v15892_v6  ;;  %v7639_v12 = vcvt.s32.f32 %v15837_v59  ;;  %v9119_v22 = vadd.s32 4294967294, %v7833_v21 }
 0x93d   : > { %v8116_v49 = vsel %vm8110_vm0, %v8113_v57, %v8115_v42  ;;  %v17470_v50 = vsub.s32 4, %v15599_v51  ;;  %v15910_v13 = vsel %vm15868_vm12, %v15394_v48, %v15834_v1  ;;  %vm7663_vm11 = vcmp.lt.s32.totalorder %v15591_v5, 0 }
 0x93e   : > { %vm7880_vm2 = vcmp.gt.s32.totalorder %v7879_v26, 0  ;;  %v17471_v59 = vand.u32 2147483647, %v15816_v10  ;;  %vm9120_vm10 = vcmp.lt.s32.totalorder %v9119_v22, 0  ;;  %v8135_v63 = vadd.s32 1, %v15889_v18 }
 0x93f   : > { %v15904_v20 = vsel %vm7455_vm14, %v17470_v50, %v15599_v51  ;;  %v7881_v36 = vsel %vm7880_vm2, %v7879_v26, 0  ;;  %v7745_v15 = vxor.u32 2147483648, %v7744_v30  ;;  %v8132_v51 = vmul.u32 %v8125_v43, %v8116_v49 }
 0x940   : > { %v15915_v53 = vmul.f32 %v7639_v12, %v17471_v59  ;;  %vm8134_vm14 = vc.u32 %v15893_v0, %v15888_v16  ;;  %v7877_v37 = vor.u32 8388608, %v15864_v2  ;;  %v15924_v1 = vsel %vm16983_vm7, %v7225_v32, %v15829_v11 }
 0x941   : > { %9794 = vcosq.f32 %v15910_v13  ;;  %v8136_v10 = vsel %vm8134_vm14, %v8135_v63, %v15889_v18  ;;  %v6785_v9 = vmul.f32 %v15679_v56, %v15379_v47  ;;  %v7747_v61 = vsub.s32 4, %v15781_v40 }
 0x942   : > { %v15931_v43 = vsel %vm9120_vm10, 0, %v9119_v22  ;;  %v8137_v31 = vadd.s32 %v8136_v10, %v8132_v51  ;;  %v7883_v25 = vand.u32 31, %v7881_v36  ;;  %v7821_v57 = vadd.s32 %v15803_v33, %v15819_v52 }
 0x943   : > { %v6783_v11 = vmul.f32 %v15425_v17, %v15494_v46  ;;  %v15940_v18 = vmul.f32 %v15679_v56, %v15547_v28  ;;  %v15944_v47 = vsel %vm7663_vm11, %v7745_v15, %v7744_v30  ;;  %v15946_v27 = vshll.u32 %v7877_v37, 8 }
 0x944   : > { %v8138_v42 = vadd.s32 536870912, %v8137_v31  ;;  %v7884_v7 = vsub.s32 32, %v7883_v25  ;;  %v7841_v21 = vsub.s32 4294967266, %v15931_v43  ;;  %v7882_v4 = vshrl.u32 %v7881_v36, 5 }
 0x945   : > { %v7886_v33 = vshll.u32 %v17008_v60, %v7883_v25  ;;  %v15951_v52 = vadd.f32 %v15729_v44, %v6785_v9  ;;  %v7889_v28 = vshll.u32 %v17426_v38, %v7883_v25  ;;  %v7892_v6 = vshll.u32 %v17427_v39, %v7883_v25 }
 0x946   : > { %v15953_v17 = vshrl.u32 %v8138_v42, 30  ;;  %v7887_v46 = vshrl.u32 %v17426_v38, %v7884_v7  ;;  %v7890_v30 = vshrl.u32 %v17427_v39, %v7884_v7  ;;  %v7893_v26 = vshrl.u32 %v17428_v41, %v7884_v7 }
 0x947   : > { %v7895_v32 = vshll.u32 %v17428_v41, %v7883_v25  ;;  %v7896_v12 = vshrl.u32 %v17429_v23, %v7884_v7  ;;  %v7837_v22 = vsub.s32 32, %v15931_v43  ;;  %vm7901_vm4 = vcmp.lt.s32.totalorder %v7882_v4, 1 }
 0x948   : > { %v8140_v49 = vshll.u32 %v15953_v17, 30  ;;  %v7888_v50 = vor.u32 %v7887_v46, %v7886_v33  ;;  %v7891_v59 = vor.u32 %v7890_v30, %v7889_v28  ;;  %v7894_v63 = vor.u32 %v7893_v26, %v7892_v6 }
 0x949   : > { %v7897_v36 = vor.u32 %v7896_v12, %v7895_v32  ;;  %vm7902_vm13 = vcmp.lt.s32.totalorder %v7882_v4, 2  ;;  %v17472_v15 = vand.u32 2147483647, %v15591_v5  ;;  %v17473_v51 = vmov 0 }
 0x94a   : > { %v15970_v37 = vsub.s32 %v8137_v31, %v8140_v49  ;;  %v7898_v10 = vshll.u32 %v17429_v23, %v7883_v25  ;;  %v7899_v9 = vshrl.u32 %v17430_v3, %v7884_v7  ;;  %vm7904_vm5 = vcmp.lt.s32.totalorder %v7882_v4, 4 }
 0x94b   : > { %vm15966_vm8 = vcmp.le.f32.partialorder %v17472_v15, 0.7853982  ;;  %v15974_v42 = vpop.eup %9794  ;;  %v7842_v33 = vadd.s32 127, %v7841_v21  ;;  %vm7903_vm0 = vcmp.lt.s32.totalorder %v7882_v4, 3  ;;  %v7909_v46 = vsel %vm7901_vm4, %v7888_v50, %v7891_v59 }
 0x94c   : > { %v17474_v51 = vsel %vm15966_vm8, 4294967295, %v17473_v51  ;;  %v7910_v28 = vsel %vm7904_vm5, %v7897_v36, 920167782  ;;  %v8143_v30 = vsub.s32 0, %v15970_v37  ;;  %v7900_v6 = vor.u32 %v7899_v9, %v7898_v10 }
 0x94d   : > { %17475 = vst [vmem:[#allocation38_spill] sm:$0xff] %v17474_v51  ;;  %v7906_v26 = vsel %vm7904_vm5, %v7894_v63, 2102212464  ;;  %v7911_v31 = vsel %vm7903_vm0, %v7894_v63, %v7910_v28  ;;  %vm16980_vm2 = vcmp.lt.s32.totalorder %v15484_v34, 0  ;;  %v7839_v25 = vshrl.u32 %v7821_v57, %v7837_v22 }
 0x94e   : > { %v7885_v32 = vshrl.u32 %v17008_v60, %v7884_v7  ;;  %v7912_v12 = vsel %vm7902_vm13, %v7909_v46, %v7911_v31  ;;  %v7913_v21 = vsel %vm7901_vm4, %v7891_v59, %v7894_v63  ;;  %v9130_v49 = vmin.u32 %v8143_v30, %v15970_v37 }
 0x94f   : > { %v7914_v15 = vsel %vm7904_vm5, %v7900_v6, 1326507024  ;;  %v15988_v2 = vmul.u32.u64.low %v15946_v27, %v7912_v12  ;;  %v15989_v10 = vmul.u32.u64.high %v15946_v27, %v7912_v12, %v15988_v2  ;;  %v7843_v9 = vshll.u32 %v7842_v33, 23 }
 0x950   : > { %v7905_v28 = vsel %vm7901_vm4, %v7885_v32, %v7888_v50  ;;  %v7907_v57 = vsel %vm7903_vm0, %v7891_v59, %v7906_v26  ;;  %v7915_v7 = vsel %vm7903_vm0, %v7897_v36, %v7914_v15  ;;  %v8145_v22 = vclz %v9130_v49 }
 0x951   : > { %v7916_v46 = vsel %vm7902_vm13, %v7913_v21, %v7915_v7  ;;  %v16972_v63 = vand.u32 2147483647, %v15951_v52  ;;  %v8184_v30 = vand.u32 2139095040, %v15951_v52  ;;  %v7838_v6 = vshll.u32 %v15872_v24, %v15931_v43 }
 0x952   : > { %v16001_v31 = vmul.u32.u64.low %v15946_v27, %v7916_v46  ;;  %v16002_v12 = vmul.u32.u64.high %v15946_v27, %v7916_v46, %v16001_v31  ;;  %v16005_v50 = vadd.f32 %v15584_v45, %v6783_v11  ;;  %v9131_v59 = vadd.s32 4294967294, %v8145_v22 }
 0x953   : > { %v7908_v36 = vsel %vm7902_vm13, %v7905_v28, %v7907_v57  ;;  %v7927_v33 = vadd.s32 1, %v15989_v10  ;;  %v8185_v26 = vshrl.u32 %v8184_v30, 23  ;;  %9796 = vsinq.f32 %v15910_v13 }
 0x954   : > { %17476 = vst [vmem:[#allocation17_spill] sm:$0xff] %v16005_v50  ;;  %v16015_v24 = vsel %vm7663_vm11, %v7747_v61, %v15781_v40  ;;  %v16021_v45 = vsel %vm15966_vm8, %v15591_v5, %v15944_v47  ;;  %v7844_v43 = vor.u32 4788187, %v7843_v9  ;;  %v7840_v11 = vor.u32 %v7839_v25, %v7838_v6 }
 0x955   : > { %17477 = vst [vmem:[#allocation12_spill] sm:$0xff] %v16015_v24  ;;  %vm9132_vm10 = vcmp.lt.s32.totalorder %v9131_v59, 0  ;;  %v9133_v4 = vadd.s32 4294967169, %v8185_v26  ;;  %v8188_v13 = vand.u32 8388607, %v16972_v63  ;;  %v7924_v21 = vmul.u32 %v15946_v27, %v7908_v36 }
 0x956   : > { %v8148_v32 = vsel %vm9132_vm10, 0, %v9131_v59  ;;  %vm7926_vm11 = vc.u32 %v16002_v12, %v15988_v2  ;;  %v16030_v40 = vadd.f32 %v15729_v44, %v15940_v18  ;;  %v17478_v61 = vxor.u32 2147483648, %v15915_v53 }
 0x957   : > { %v8153_v25 = vsub.s32 4294967266, %v8148_v32  ;;  %v7928_v49 = vsel %vm7926_vm11, %v7927_v33, %v15989_v10  ;;  %v7976_v15 = vand.u32 2139095040, %v16005_v50  ;;  %v7845_v27 = vand.u32 2147483647, %v7844_v43 }
 0x958   : > { %v16037_v47 = vsel %vm16980_vm2, %v17478_v61, %v15915_v53  ;;  %v7929_v9 = vadd.s32 %v7928_v49, %v7924_v21  ;;  %v8191_v28 = vadd.s32 1, %v9133_v4  ;;  %v16043_v57 = vmul.f32 %v15679_v56, %v15614_v8 }
 0x959   : > { %9798 = vcosq.f32 %v16021_v45  ;;  %v7847_v18 = vcvt.s32.f32 %v7840_v11  ;;  %v8189_v7 = vor.u32 8388608, %v8188_v13  ;;  %v16971_v22 = vand.u32 2147483647, %v16005_v50 }
 0x95a   : > { %v8149_v53 = vsub.s32 32, %v8148_v32  ;;  %v7930_v46 = vadd.s32 536870912, %v7929_v9  ;;  %vm8192_vm14 = vcmp.gt.s32.totalorder %v8191_v28, 0  ;;  %v8288_v10 = vand.u32 2139095040, %v16030_v40 }
 0x95b   : > { %v8133_v30 = vadd.s32 %v15888_v16, %v15893_v0  ;;  %v8154_v6 = vadd.s32 127, %v8153_v25  ;;  %v8193_v31 = vsel %vm8192_vm14, %v8191_v28, 0  ;;  %v7977_v59 = vshrl.u32 %v7976_v15, 23 }
 0x95c   : > { %v16050_v36 = vmul.f32 %v7847_v18, %v7845_v27  ;;  %v16053_v56 = vshrl.u32 %v7930_v46, 30  ;;  %v8195_v33 = vand.u32 31, %v8193_v31  ;;  %v8150_v26 = vshll.u32 %v15970_v37, %v8148_v32 }
 0x95d   : > { %v16056_v43 = vshll.u32 %v8189_v7, 8  ;;  %v16060_v11 = vand.u32 8388607, %v16971_v22  ;;  %v16063_v16 = vpop.eup %9796  ;;  %v8151_v4 = vshrl.u32 %v8133_v30, %v8149_v53  ;;  %v8289_v61 = vshrl.u32 %v8288_v10, 23 }
 0x95e   : > { %v7932_v13 = vshll.u32 %v16053_v56, 30  ;;  %v8196_v21 = vsub.s32 32, %v8195_v33  ;;  %v8155_v25 = vshll.u32 %v8154_v6, 23  ;;  %v8194_v49 = vshrl.u32 %v8193_v31, 5 }
 0x95f   : > { %v8198_v15 = vshll.u32 %v17008_v60, %v8195_v33  ;;  %v9125_v37 = vadd.s32 4294967169, %v7977_v59  ;;  %v8201_v28 = vshll.u32 %v17426_v38, %v8195_v33  ;;  %v8204_v18 = vshll.u32 %v17427_v39, %v8195_v33 }
 0x960   : > { %v16067_v32 = vsub.s32 %v7929_v9, %v7932_v13  ;;  %v8199_v27 = vshrl.u32 %v17426_v38, %v8196_v21  ;;  %v8202_v7 = vshrl.u32 %v17427_v39, %v8196_v21  ;;  %v8205_v53 = vshrl.u32 %v17428_v41, %v8196_v21 }
 0x961   : > { %v8207_v46 = vshll.u32 %v17428_v41, %v8195_v33  ;;  %v8208_v10 = vshrl.u32 %v17429_v23, %v8196_v21  ;;  %v8152_v30 = vor.u32 %v8151_v4, %v8150_v26  ;;  %v8211_v9 = vshrl.u32 %v17430_v3, %v8196_v21 }
 0x962   : > { %v7935_v6 = vsub.s32 0, %v16067_v32  ;;  %v8200_v31 = vor.u32 %v8199_v27, %v8198_v15  ;;  %v8203_v13 = vor.u32 %v8202_v7, %v8201_v28  ;;  %v8206_v22 = vor.u32 %v8205_v53, %v8204_v18 }
 0x963   : > { %v16078_v59 = vpop.eup %9798  ;;  %v8209_v63 = vor.u32 %v8208_v10, %v8207_v46  ;;  %v8210_v8 = vshll.u32 %v17429_v23, %v8195_v33  ;;  %v7981_v5 = vor.u32 8388608, %v16060_v11  ;;  %v7983_v51 = vadd.s32 1, %v9125_v37 }
 0x964   : > { %17479 = vst [vmem:[#allocation8_spill] sm:$0xff] %v16078_v59  ;;  %v9122_v0 = vmin.u32 %v7935_v6, %v16067_v32  ;;  %v9137_v24 = vadd.s32 4294967169, %v8289_v61  ;;  %v8156_v50 = vor.u32 4788187, %v8155_v25  ;;  %vm8213_vm4 = vcmp.lt.s32.totalorder %v8194_v49, 1 }
 0x965   : > { %v8212_v26 = vor.u32 %v8211_v9, %v8210_v8  ;;  %vm8216_vm13 = vcmp.lt.s32.totalorder %v8194_v49, 4  ;;  %v8197_v15 = vshrl.u32 %v17008_v60, %v8196_v21  ;;  %v8221_v59 = vsel %vm8213_vm4, %v8200_v31, %v8203_v13 }
 0x966   : > { %v7937_v4 = vclz %v9122_v0  ;;  %v8218_v27 = vsel %vm8216_vm13, %v8206_v22, 2102212464  ;;  %v8159_v28 = vcvt.s32.f32 %v8152_v30  ;;  %vm8214_vm5 = vcmp.lt.s32.totalorder %v8194_v49, 2 }
 0x967   : > { %vm8215_vm0 = vcmp.lt.s32.totalorder %v8194_v49, 3  ;;  %v8222_v18 = vsel %vm8216_vm13, %v8209_v63, 920167782  ;;  %v8217_v7 = vsel %vm8213_vm4, %v8197_v15, %v8200_v31  ;;  %v8225_v46 = vsel %vm8213_vm4, %v8203_v13, %v8206_v22 }
 0x968   : > { %v9123_v33 = vadd.s32 4294967294, %v7937_v4  ;;  %v8223_v53 = vsel %vm8215_vm0, %v8206_v22, %v8222_v18  ;;  %v8219_v11 = vsel %vm8215_vm0, %v8203_v13, %v8218_v27  ;;  %v8226_v25 = vsel %vm8216_vm13, %v8212_v26, 1326507024 }
 0x969   : > { %v8224_v61 = vsel %vm8214_vm5, %v8221_v59, %v8223_v53  ;;  %vm7984_vm10 = vcmp.gt.s32.totalorder %v7983_v51, 0  ;;  %v8227_v8 = vsel %vm8215_vm0, %v8209_v63, %v8226_v25  ;;  %v8157_v37 = vand.u32 2147483647, %v8156_v50 }
 0x96a   : > { %vm9124_vm11 = vcmp.lt.s32.totalorder %v9123_v33, 0  ;;  %v16086_v0 = vmul.u32.u64.low %v16056_v43, %v8224_v61  ;;  %v16087_v21 = vmul.u32.u64.high %v16056_v43, %v8224_v61, %v16086_v0  ;;  %v8228_v30 = vsel %vm8214_vm5, %v8225_v46, %v8227_v8 }
 0x96b   : > { %v7940_v10 = vsel %vm9124_vm11, 0, %v9123_v33  ;;  %v7985_v6 = vsel %vm7984_vm10, %v7983_v51, 0  ;;  %v8220_v22 = vsel %vm8214_vm5, %v8217_v7, %v8219_v11  ;;  %v16098_v4 = vadd.s32 1, %v9137_v24 }
 0x96c   : > { %v7941_v31 = vsub.s32 32, %v7940_v10  ;;  %v7945_v9 = vsub.s32 4294967266, %v7940_v10  ;;  %v16092_v13 = vshrl.u32 %v7985_v6, 5  ;;  %v7987_v63 = vand.u32 31, %v7985_v6 }
 0x96d   : > { %v16095_v59 = vmul.u32.u64.low %v16056_v43, %v8228_v30  ;;  %v16096_v26 = vmul.u32.u64.high %v16056_v43, %v8228_v30, %v16095_v59  ;;  %v7849_v15 = vxor.u32 2147483648, %v16050_v36  ;;  %v7925_v50 = vadd.s32 %v15988_v2, %v16002_v12 }
 0x96e   : > { %v8239_v51 = vadd.s32 1, %v16087_v21  ;;  %v16104_v27 = vshll.u32 %v7981_v5, 8  ;;  %v16106_v49 = vmul.f32 %v8159_v28, %v8157_v37  ;;  %v8236_v18 = vmul.u32 %v16056_v43, %v8220_v22 }
 0x96f   : > { %v7988_v33 = vsub.s32 32, %v7987_v63  ;;  %v17480_v7 = vand.u32 2147483647, %v16030_v40  ;;  %v7942_v24 = vshll.u32 %v16067_v32, %v7940_v10  ;;  %v7943_v46 = vshrl.u32 %v7925_v50, %v7941_v31 }
 0x970   : > { %v7946_v11 = vadd.s32 127, %v7945_v9  ;;  %vm8005_vm14 = vcmp.lt.s32.totalorder %v16092_v13, 1  ;;  %vm8238_vm4 = vc.u32 %v16096_v26, %v16086_v0  ;;  %v7990_v5 = vshll.u32 %v17008_v60, %v7987_v63 }
 0x971   : > { %v16111_v53 = vand.u32 8388607, %v17480_v7  ;;  %v7991_v2 = vshrl.u32 %v17426_v38, %v7988_v33  ;;  %v7993_v12 = vshll.u32 %v17426_v38, %v7987_v63  ;;  %vm8296_vm13 = vcmp.gt.s32.totalorder %v16098_v4, 0 }
 0x972   : > { %vm8079_vm5 = vcmp.lt.s32.totalorder %v15740_v35, 0  ;;  %v8240_v43 = vsel %vm8238_vm4, %v8239_v51, %v16087_v21  ;;  %v7994_v32 = vshrl.u32 %v17427_v39, %v7988_v33  ;;  %v7996_v28 = vshll.u32 %v17427_v39, %v7987_v63 }
 0x973   : > { %v7999_v61 = vshll.u32 %v17428_v41, %v7987_v63  ;;  %v8241_v25 = vadd.s32 %v8240_v43, %v8236_v18  ;;  %v7992_v8 = vor.u32 %v7991_v2, %v7990_v5  ;;  %v7997_v37 = vshrl.u32 %v17428_v41, %v7988_v33 }
 0x974   : > { %v8000_v10 = vshrl.u32 %v17429_v23, %v7988_v33  ;;  %vm16979_vm0 = vcmp.lt.s32.totalorder %v15653_v62, 0  ;;  %v16129_v30 = vor.u32 %v7943_v46, %v7942_v24  ;;  %v7995_v6 = vor.u32 %v7994_v32, %v7993_v12 }
 0x975   : > { %v8002_v31 = vshll.u32 %v17429_v23, %v7987_v63  ;;  %v8003_v21 = vshrl.u32 %v17430_v3, %v7988_v33  ;;  %v7947_v9 = vshll.u32 %v7946_v11, 23  ;;  %v8242_v22 = vadd.s32 536870912, %v8241_v25 }
 0x976   : > { %v7998_v59 = vor.u32 %v7997_v37, %v7996_v28  ;;  %v8001_v50 = vor.u32 %v8000_v10, %v7999_v61  ;;  %v7989_v51 = vshrl.u32 %v17008_v60, %v7988_v33  ;;  %vm8007_vm10 = vcmp.lt.s32.totalorder %v16092_v13, 3 }
 0x977   : > { %v8004_v18 = vor.u32 %v8003_v21, %v8002_v31  ;;  %vm8008_vm11 = vcmp.lt.s32.totalorder %v16092_v13, 4  ;;  %v16136_v7 = vshrl.u32 %v8242_v22, 30  ;;  %v8013_v46 = vsel %vm8005_vm14, %v7992_v8, %v7995_v6 }
 0x978   : > { %v8010_v24 = vsel %vm8008_vm11, %v7998_v59, 2102212464  ;;  %v8014_v63 = vsel %vm8008_vm11, %v8001_v50, 920167782  ;;  %vm8006_vm4 = vcmp.lt.s32.totalorder %v16092_v13, 2  ;;  %v8009_v11 = vsel %vm8005_vm14, %v7989_v51, %v7992_v8 }
 0x979   : > { %v8015_v5 = vsel %vm8007_vm10, %v7998_v59, %v8014_v63  ;;  %v8017_v33 = vsel %vm8005_vm14, %v7995_v6, %v7998_v59  ;;  %v8244_v2 = vshll.u32 %v16136_v7, 30  ;;  %v8011_v12 = vsel %vm8007_vm10, %v7995_v6, %v8010_v24 }
 0x97a   : > { %v8016_v43 = vsel %vm8006_vm4, %v8013_v46, %v8015_v5  ;;  %v8018_v32 = vsel %vm8008_vm11, %v8004_v18, 1326507024  ;;  %v7948_v28 = vor.u32 4788187, %v7947_v9  ;;  %9800 = vsinq.f32 %v16021_v45 }
 0x97b   : > { %v8019_v61 = vsel %vm8007_vm10, %v8001_v50, %v8018_v32  ;;  %v16147_v37 = vmul.u32.u64.low %v16104_v27, %v8016_v43  ;;  %v16148_v10 = vmul.u32.u64.high %v16104_v27, %v8016_v43, %v16147_v37  ;;  %v17481_v8 = vsub.s32 4, %v15953_v17 }
 0x97c   : > { %v16159_v31 = vsub.s32 %v8241_v25, %v8244_v2  ;;  %v8020_v6 = vsel %vm8006_vm4, %v8017_v33, %v8019_v61  ;;  %v8012_v21 = vsel %vm8006_vm4, %v8009_v11, %v8011_v12  ;;  %v8297_v59 = vsel %vm8296_vm13, %v16098_v4, 0 }
 0x97d   : > { %v16157_v13 = vsel %vm8079_vm5, %v17481_v8, %v15953_v17  ;;  %v16162_v9 = vmul.u32.u64.low %v16104_v27, %v8020_v6  ;;  %v16163_v22 = vmul.u32.u64.high %v16104_v27, %v8020_v6, %v16162_v9  ;;  %v16173_v45 = vsel %vm16979_vm0, %v7849_v15, %v16050_v36 }
 0x97e   : > { %v8247_v25 = vsub.s32 0, %v16159_v31  ;;  %v8299_v50 = vand.u32 31, %v8297_v59  ;;  %v7949_v51 = vand.u32 2147483647, %v7948_v28  ;;  %v7951_v18 = vcvt.s32.f32 %v16129_v30 }
 0x97f   : > { %v8031_v24 = vadd.s32 1, %v16148_v10  ;;  %v8293_v46 = vor.u32 8388608, %v16111_v53  ;;  %v8028_v63 = vmul.u32 %v16104_v27, %v8012_v21  ;;  %v16182_v11 = vshrl.u32 %v8297_v59, 5 }
 0x980   : > { %v9134_v4 = vmin.u32 %v8247_v25, %v16159_v31  ;;  %v8300_v36 = vsub.s32 32, %v8299_v50  ;;  %vm8030_vm14 = vc.u32 %v16163_v22, %v16147_v37  ;;  %v8302_v15 = vshll.u32 %v17008_v60, %v8299_v50 }
 0x981   : > { %v8305_v5 = vshll.u32 %v17426_v38, %v8299_v50  ;;  %v8308_v30 = vshll.u32 %v17427_v39, %v8299_v50  ;;  %v8032_v2 = vsel %vm8030_vm14, %v8031_v24, %v16148_v10  ;;  %v8311_v12 = vshll.u32 %v17428_v41, %v8299_v50 }
 0x982   : > { %v8249_v33 = vclz %v9134_v4  ;;  %v8303_v53 = vshrl.u32 %v17426_v38, %v8300_v36  ;;  %v8033_v27 = vadd.s32 %v8032_v2, %v8028_v63  ;;  %v8306_v43 = vshrl.u32 %v17427_v39, %v8300_v36 }
 0x983   : > { %v8309_v32 = vshrl.u32 %v17428_v41, %v8300_v36  ;;  %v8312_v28 = vshrl.u32 %v17429_v23, %v8300_v36  ;;  %v8314_v6 = vshll.u32 %v17429_v23, %v8299_v50  ;;  %v8315_v21 = vshrl.u32 %v17430_v3, %v8300_v36 }
 0x984   : > { %v9135_v61 = vadd.s32 4294967294, %v8249_v33  ;;  %v8304_v8 = vor.u32 %v8303_v53, %v8302_v15  ;;  %v8034_v9 = vadd.s32 536870912, %v8033_v27  ;;  %v8307_v59 = vor.u32 %v8306_v43, %v8305_v5  ;;  %v16197_v24 = vpop.eup %9800 }
 0x985   : > { %v8310_v10 = vor.u32 %v8309_v32, %v8308_v30  ;;  %v8313_v25 = vor.u32 %v8312_v28, %v8311_v12  ;;  %v7952_v4 = vmul.f32 %v7951_v18, %v7949_v51  ;;  %v8237_v63 = vadd.s32 %v16086_v0, %v16096_v26 }
 0x986   : > { %vm9136_vm13 = vcmp.lt.s32.totalorder %v9135_v61, 0  ;;  %v16201_v2 = vshll.u32 %v8293_v46, 8  ;;  %v16203_v33 = vshrl.u32 %v8034_v9, 30  ;;  %v8301_v50 = vshrl.u32 %v17008_v60, %v8300_v36 }
 0x987   : > { %v8252_v17 = vsel %vm9136_vm13, 0, %v9135_v61  ;;  %v8316_v15 = vor.u32 %v8315_v21, %v8314_v6  ;;  %v17482_v53 = vand.u32 2147483647, %v15740_v35  ;;  %vm16982_vm11 = vcmp.lt.s32.totalorder %v15814_v19, 0 }
 0x988   : > { %v8257_v51 = vsub.s32 4294967266, %v8252_v17  ;;  %vm8317_vm4 = vcmp.lt.s32.totalorder %v16182_v11, 1  ;;  %vm8319_vm14 = vcmp.lt.s32.totalorder %v16182_v11, 3  ;;  %vm8320_vm13 = vcmp.lt.s32.totalorder %v16182_v11, 4 }
 0x989   : > { %vm16208_vm10 = vcmp.le.f32.partialorder %v17482_v53, 0.7853982  ;;  %v8036_v0 = vshll.u32 %v16203_v33, 30  ;;  %v8322_v26 = vsel %vm8320_vm13, %v8310_v10, 2102212464  ;;  %v8325_v18 = vsel %vm8317_vm4, %v8304_v8, %v8307_v59 }
 0x98a   : > { %v8326_v46 = vsel %vm8320_vm13, %v8313_v25, 920167782  ;;  %v8253_v36 = vsub.s32 32, %v8252_v17  ;;  %v8258_v30 = vadd.s32 127, %v8257_v51  ;;  %vm8318_vm0 = vcmp.lt.s32.totalorder %v16182_v11, 2 }
 0x98b   : > { %v8327_v12 = vsel %vm8319_vm14, %v8310_v10, %v8326_v46  ;;  %v16226_v43 = vsub.s32 %v8033_v27, %v8036_v0  ;;  %v8329_v28 = vsel %vm8317_vm4, %v8307_v59, %v8310_v10  ;;  %v16234_v61 = vadd.f32 %v15729_v44, %v16043_v57  ;;  %v8493_v51 = vld [vmem:[%s16741_s9] sm:$0x3] }
 0x98c   : > { %v8328_v32 = vsel %vm8318_vm0, %v8325_v18, %v8327_v12  ;;  %v7953_v6 = vxor.u32 2147483648, %v7952_v4  ;;  %v8321_v21 = vsel %vm8317_vm4, %v8301_v50, %v8304_v8  ;;  %v8323_v9 = vsel %vm8319_vm14, %v8307_v59, %v8322_v26 }
 0x98d   : > { %v8330_v27 = vsel %vm8320_vm13, %v8316_v15, 1326507024  ;;  %v17485_v53 = vand.u32 2147483647, %v15814_v19  ;;  %v8039_v10 = vsub.s32 0, %v16226_v43  ;;  %v17488_v59 = vxor.u32 2147483648, %v16106_v49 }
 0x98e   : > { %v8331_v44 = vsel %vm8319_vm14, %v8313_v25, %v8330_v27  ;;  %v16252_v57 = vmul.u32.u64.low %v16201_v2, %v8328_v32  ;;  %v16253_v8 = vmul.u32.u64.high %v16201_v2, %v8328_v32, %v16252_v57  ;;  %v8255_v15 = vshrl.u32 %v8237_v63, %v8253_v36 }
 0x98f   : > { %vm16244_vm2 = vcmp.le.f32.partialorder %v17485_v53, 0.7853982  ;;  %v8162_v50 = vsel %vm8079_vm5, %v17488_v59, %v16106_v49  ;;  %v8259_v0 = vshll.u32 %v8258_v30, 23  ;;  %v8332_v26 = vsel %vm8318_vm0, %v8329_v28, %v8331_v44 }
 0x990   : > { %v9126_v18 = vmin.u32 %v8039_v10, %v16226_v43  ;;  %v16264_v46 = vmul.u32.u64.low %v16201_v2, %v8332_v26  ;;  %v16265_v25 = vmul.u32.u64.high %v16201_v2, %v8332_v26, %v16264_v46  ;;  %v16981_v12 = vand.u32 2147483647, %v16234_v61 }
 0x991   : > { %v8254_v32 = vshll.u32 %v16159_v31, %v8252_v17  ;;  %v8324_v27 = vsel %vm8318_vm0, %v8321_v21, %v8323_v9  ;;  %v8392_v49 = vand.u32 2139095040, %v16234_v61  ;;  %v7019_v63 = vsub.s32 4, %v15242_v55 }
 0x992   : > { %v8165_v36 = vsel %vm16208_vm10, %v15740_v35, %v8162_v50  ;;  %v7954_v30 = vsel %vm16982_vm11, %v7953_v6, %v7952_v4  ;;  %v8041_v28 = vclz %v9126_v18  ;;  %v8343_v53 = vadd.s32 1, %v16253_v8 }
 0x993   : > { %v8256_v10 = vor.u32 %v8255_v15, %v8254_v32  ;;  %v8260_v44 = vor.u32 4788187, %v8259_v0  ;;  %v8393_v31 = vshrl.u32 %v8392_v49, 23  ;;  %v7020_v17 = vsel %vm6935_vm3, %v7019_v63, %v15242_v55 }
 0x994   : > { %v9127_v11 = vadd.s32 4294967294, %v8041_v28  ;;  %v8340_v21 = vmul.u32 %v16201_v2, %v8324_v27  ;;  %vm8342_vm5 = vc.u32 %v16265_v25, %v16252_v57  ;;  %v8396_v9 = vand.u32 8388607, %v16981_v12  ;;  %v17492_v12 = vld [vmem:[#allocation11_spill] sm:$0xff] }
 0x995   : > { %v8344_v6 = vsel %vm8342_vm5, %v8343_v53, %v16253_v8  ;;  %v9141_v59 = vadd.s32 4294967169, %v8393_v31  ;;  %v17489_v50 = vand.u32 2147483647, %v15091_v29  ;;  %9802 = vcosq.f32 %v8165_v36 }
 0x996   : > { %vm9128_vm3 = vcmp.lt.s32.totalorder %v9127_v11, 0  ;;  %v8345_v55 = vadd.s32 %v8344_v6, %v8340_v21  ;;  %v7957_v0 = vsel %vm16244_vm2, %v15814_v19, %v7954_v30  ;;  %v8261_v26 = vand.u32 2147483647, %v8260_v44 }
 0x997   : > { %vm16290_vm0 = vcmp.le.f32.partialorder %v17489_v50, 0.7853982  ;;  %v8044_v18 = vsel %vm9128_vm3, 0, %v9127_v11  ;;  %v8399_v8 = vadd.s32 1, %v9141_v59  ;;  %9804 = vsinq.f32 %v8165_v36 }
 0x998   : > { %v7022_v2 = vsel %vm16290_vm0, 0, %v7020_v17  ;;  %v8263_v46 = vcvt.s32.f32 %v8256_v10  ;;  %v8346_v32 = vadd.s32 536870912, %v8345_v55  ;;  %v8397_v27 = vor.u32 8388608, %v8396_v9 }
 0x999   : > { %v8045_v49 = vsub.s32 32, %v8044_v18  ;;  %vm8400_vm4 = vcmp.gt.s32.totalorder %v8399_v8, 0  ;;  %v7021_v63 = vsel %vm16290_vm0, %v15091_v29, %v15452_v58  ;;  %v7026_v28 = vadd.s32 3, %v7022_v2 }
 0x99a   : > { %9806 = vcosq.f32 %v7957_v0  ;;  %v8049_v53 = vsub.s32 4294967266, %v8044_v18  ;;  %v16303_v31 = vshrl.u32 %v8346_v32, 30  ;;  %v8401_v30 = vsel %vm8400_vm4, %v8399_v8, 0 }
 0x99b   : > { %9808 = vsinq.f32 %v7957_v0  ;;  %v16305_v44 = vmul.f32 %v8263_v46, %v8261_v26  ;;  %v8029_v36 = vadd.s32 %v16147_v37, %v16163_v22  ;;  %v8403_v10 = vand.u32 31, %v8401_v30 }
 0x99c   : > { %v16310_v17 = vadd.s32 %v16252_v57, %v16265_v25  ;;  %v8348_v11 = vshll.u32 %v16303_v31, 30  ;;  %v16313_v21 = vshll.u32 %v8397_v27, 8  ;;  %9810 = vsinq.f32 %v7021_v63 }
 0x99d   : > { %v8047_v58 = vshrl.u32 %v8029_v36, %v8045_v49  ;;  %v8404_v9 = vsub.s32 32, %v8403_v10  ;;  %9812 = vcosq.f32 %v7021_v63  ;;  %v16315_v6 = vand.u32 3, %v7026_v28 }
 0x99e   : > { %v8050_v59 = vadd.s32 127, %v8049_v53  ;;  %v16317_v50 = vsub.s32 %v8345_v55, %v8348_v11  ;;  %v8406_v15 = vshll.u32 %v17008_v60, %v8403_v10  ;;  %v8409_v37 = vshll.u32 %v17426_v38, %v8403_v10 }
 0x99f   : > { %v8407_v22 = vshrl.u32 %v17426_v38, %v8404_v9  ;;  %v8410_v57 = vshrl.u32 %v17427_v39, %v8404_v9  ;;  %v8412_v25 = vshll.u32 %v17427_v39, %v8403_v10  ;;  %v8413_v2 = vshrl.u32 %v17428_v41, %v8404_v9  ;;  %v16325_v0 = vpop.eup %9802 }
 0x9a0   : > { %v8351_v26 = vsub.s32 0, %v16317_v50  ;;  %v8402_v8 = vshrl.u32 %v8401_v30, 5  ;;  %v8415_v55 = vshll.u32 %v17428_v41, %v8403_v10  ;;  %v8416_v46 = vshrl.u32 %v17429_v23, %v8404_v9 }
 0x9a1   : > { %v8046_v32 = vshll.u32 %v16226_v43, %v8044_v18  ;;  %v8408_v27 = vor.u32 %v8407_v22, %v8406_v15  ;;  %v8411_v49 = vor.u32 %v8410_v57, %v8409_v37  ;;  %v8414_v38 = vor.u32 %v8413_v2, %v8412_v25  ;;  %v16331_v63 = vpop.eup %9804  ;;  %v17496_v18 = vld [vmem:[#allocation16_spill] sm:$0xff] }
 0x9a2   : > { %v9138_v39 = vmin.u32 %v8351_v26, %v16317_v50  ;;  %v8417_v28 = vor.u32 %v8416_v46, %v8415_v55  ;;  %v8418_v53 = vshll.u32 %v17429_v23, %v8403_v10  ;;  %v8419_v36 = vshrl.u32 %v17430_v3, %v8404_v9 }
 0x9a3   : > { %v16336_v11 = vor.u32 %v8047_v58, %v8046_v32  ;;  %v8051_v30 = vshll.u32 %v8050_v59, 23  ;;  %v8405_v41 = vshrl.u32 %v17008_v60, %v8404_v9  ;;  %v17493_v4 = vand.u32 2147483647, %v17492_v12 }
 0x9a4   : > { %v7435_v15 = vsub.s32 4, %v17496_v18  ;;  %v16346_v37 = vpop.eup %9806  ;;  %v8353_v22 = vclz %v9138_v39  ;;  %v8420_v57 = vor.u32 %v8419_v36, %v8418_v53  ;;  %vm8421_vm13 = vcmp.lt.s32.totalorder %v8402_v8, 1 }
 0x9a5   : > { %vm16341_vm14 = vcmp.le.f32.partialorder %v17493_v4, 0.7853982  ;;  %vm8424_vm5 = vcmp.lt.s32.totalorder %v8402_v8, 4  ;;  %vm7029_vm0 = vcmp.eq.s32.totalorder %v16315_v6, 0  ;;  %v16349_v23 = vpop.eup %9808  ;;  %vm8423_vm3 = vcmp.lt.s32.totalorder %v8402_v8, 3 }
 0x9a6   : > { %v8426_v60 = vsel %vm8424_vm5, %v8414_v38, 2102212464  ;;  %v8429_v3 = vsel %vm8421_vm13, %v8408_v27, %v8411_v49  ;;  %v8430_v4 = vsel %vm8424_vm5, %v8417_v28, 920167782  ;;  %v9811_v10 = vpop.eup %9810  ;;  %v9139_v58 = vadd.s32 4294967294, %v8353_v22 }
 0x9a7   : > { %vm8422_vm4 = vcmp.lt.s32.totalorder %v8402_v8, 2  ;;  %v8431_v9 = vsel %vm8423_vm3, %v8414_v38, %v8430_v4  ;;  %v8433_v59 = vsel %vm8421_vm13, %v8411_v49, %v8414_v38  ;;  %v9813_v25 = vpop.eup %9812  ;;  %v8425_v2 = vsel %vm8421_vm13, %v8405_v41, %v8408_v27 }
 0x9a8   : > { %v8427_v26 = vsel %vm8423_vm3, %v8411_v49, %v8426_v60  ;;  %v8432_v55 = vsel %vm8422_vm4, %v8429_v3, %v8431_v9  ;;  %v8434_v46 = vsel %vm8424_vm5, %v8420_v57, 1326507024  ;;  %vm9140_vm11 = vcmp.lt.s32.totalorder %v9139_v58, 0 }
 0x9a9   : > { %v8435_v32 = vsel %vm8423_vm3, %v8417_v28, %v8434_v46  ;;  %v16356_v39 = vmul.u32.u64.low %v16313_v21, %v8432_v55  ;;  %v16357_v53 = vmul.u32.u64.high %v16313_v21, %v8432_v55, %v16356_v39  ;;  %vm7028_vm7 = vcmp.lt.s32.totalorder %v16315_v6, 2 }
 0x9aa   : > { %v8052_v36 = vor.u32 4788187, %v8051_v30  ;;  %v8356_v22 = vsel %vm9140_vm11, 0, %v9139_v58  ;;  %v8436_v38 = vsel %vm8422_vm4, %v8433_v59, %v8435_v32  ;;  %v7030_v4 = vxor.u32 2147483648, %v9811_v10 }
 0x9ab   : > { %v8357_v27 = vsub.s32 32, %v8356_v22  ;;  %v8358_v49 = vshll.u32 %v16317_v50, %v8356_v22  ;;  %v8361_v41 = vsub.s32 4294967266, %v8356_v22  ;;  %v8428_v57 = vsel %vm8422_vm4, %v8425_v2, %v8427_v26  ;;  %v17497_v50 = vld [vmem:[#allocation32_spill] sm:$0xff] }
 0x9ac   : > { %v16365_v28 = vmul.u32.u64.low %v16313_v21, %v8436_v38  ;;  %v16366_v60 = vmul.u32.u64.high %v16313_v21, %v8436_v38, %v16365_v28  ;;  %vm7025_vm13 = vweird.f32 %v15091_v29  ;;  %v7033_v3 = vxor.u32 2147483648, %v9813_v25 }
 0x9ad   : > { %v7436_v30 = vsel %vm7351_vm1, %v7435_v15, %v17496_v18  ;;  %v8359_v58 = vshrl.u32 %v16310_v17, %v8357_v27  ;;  %v8362_v9 = vadd.s32 127, %v8361_v41  ;;  %v8447_v59 = vadd.s32 1, %v16357_v53 }
 0x9ae   : > { %v7437_v8 = vsel %vm16341_vm14, %v17492_v12, %v17497_v50  ;;  %v7031_v2 = vsel %vm7029_vm0, %v9813_v25, %v7030_v4  ;;  %vm7032_vm11 = vcmp.eq.s32.totalorder %v16315_v6, 2  ;;  %v7438_v26 = vsel %vm16341_vm14, 0, %v7436_v30  ;;  %v17498_v4 = vld [vmem:[#allocation20_spill] sm:$0xff] }
 0x9af   : > { %9814 = vcosq.f32 %v7437_v8  ;;  %v8360_v18 = vor.u32 %v8359_v58, %v8358_v49  ;;  %v8363_v15 = vshll.u32 %v8362_v9, 23  ;;  %v7034_v17 = vsel %vm7032_vm11, %v7033_v3, %v9811_v10  ;;  %v17502_v9 = vld [vmem:[#allocation25_spill] sm:$0xff]  ;;  %v17503_v50 = vld [vmem:[#allocation36_spill] sm:$0xff]  ;;  %v17511_v3 = vld [vmem:[#allocation31_spill] sm:$0xff] }
 0x9b0   : > { %9816 = vsinq.f32 %v7437_v8  ;;  %v8053_v55 = vand.u32 2147483647, %v8052_v36  ;;  %v8444_v46 = vmul.u32 %v16313_v21, %v8428_v57  ;;  %vm8446_vm1 = vc.u32 %v16366_v60, %v16356_v39 }
 0x9b1   : > { %v7442_v32 = vadd.s32 3, %v7438_v26  ;;  %v8055_v22 = vcvt.s32.f32 %v16336_v11  ;;  %v8364_v25 = vor.u32 4788187, %v8363_v15  ;;  %v8448_v38 = vsel %vm8446_vm1, %v8447_v59, %v16357_v53  ;;  %v17500_v11 = vld [vmem:[#allocation23_spill] sm:$0xff] }
 0x9b2   : > { %v6918_v27 = vsel %vm15421_vm6, 0, %v17498_v4  ;;  %vm16984_vm14 = vcmp.lt.s32.totalorder %v16030_v40, 0  ;;  %v8449_v10 = vadd.s32 %v8448_v38, %v8444_v46  ;;  %v7035_v36 = vsel %vm7028_vm7, %v7031_v2, %v7034_v17  ;;  %v17504_v17 = vld [vmem:[#allocation28_spill] sm:$0xff]  ;;  %v17505_v46 = vld [vmem:[#allocation35_spill] sm:$0xff] }
 0x9b3   : > { %v7443_v21 = vand.u32 3, %v7442_v32  ;;  %v6922_v49 = vadd.s32 3, %v6918_v27  ;;  %v8365_v57 = vand.u32 2147483647, %v8364_v25  ;;  %v8367_v28 = vcvt.s32.f32 %v8360_v18 }
 0x9b4   : > { %v7334_v53 = vsel %vm15537_vm9, 0, %v17500_v11  ;;  %v16398_v30 = vmul.f32 %v8055_v22, %v8053_v55  ;;  %v8450_v58 = vadd.s32 536870912, %v8449_v10  ;;  %v6926_v59 = vxor.u32 2147483648, %v17502_v9 }
 0x9b5   : > { %v6929_v8 = vxor.u32 2147483648, %v17503_v50  ;;  %v8368_v26 = vmul.f32 %v8367_v28, %v8365_v57  ;;  %v7036_v6 = vsel %vm7025_vm13, nan, %v7035_v36  ;;  %v6923_v2 = vand.u32 3, %v6922_v49  ;;  %v17509_v57 = vld [vmem:[#allocation26_spill] sm:$0xff]  ;;  %v17510_v28 = vld [vmem:[#allocation39_spill] sm:$0xff] }
 0x9b6   : > { %v7338_v15 = vadd.s32 3, %v7334_v53  ;;  %v16405_v18 = vshrl.u32 %v8450_v58, 30  ;;  %vm7444_vm7 = vcmp.lt.s32.totalorder %v7443_v21, 2  ;;  %vm7445_vm5 = vcmp.eq.s32.totalorder %v7443_v21, 0 }
 0x9b7   : > { %vm7448_vm9 = vcmp.eq.s32.totalorder %v7443_v21, 2  ;;  %v8369_v55 = vxor.u32 2147483648, %v8368_v26  ;;  %vm6925_vm3 = vcmp.eq.s32.totalorder %v6923_v2, 0  ;;  %vm6928_vm4 = vcmp.eq.s32.totalorder %v6923_v2, 2 }
 0x9b8   : > { %v7342_v32 = vxor.u32 2147483648, %v17505_v46  ;;  %v8452_v29 = vshll.u32 %v16405_v18, 30  ;;  %v6927_v25 = vsel %vm6925_vm3, %v17503_v50, %v6926_v59  ;;  %v6930_v38 = vsel %vm6928_vm4, %v6929_v8, %v17502_v9 }
 0x9b9   : > { %v9815_v22 = vpop.eup %9814  ;;  %v7339_v4 = vand.u32 3, %v7338_v15  ;;  %v17506_v27 = vand.u32 2147483647, %v16030_v40  ;;  %v7345_v11 = vxor.u32 2147483648, %v17510_v28  ;;  %v7227_v53 = vsub.s32 4, %v17511_v3 }
 0x9ba   : > { %v9817_v43 = vpop.eup %9816  ;;  %v7449_v49 = vxor.u32 2147483648, %v9815_v22  ;;  %v16422_v58 = vsub.s32 %v8449_v10, %v8452_v29  ;;  %vm6924_vm3 = vcmp.lt.s32.totalorder %v6923_v2, 2  ;;  %v17512_v9 = vand.u32 2147483647, %v15385_v14 }
 0x9bb   : > { %vm16415_vm13 = vcmp.le.f32.partialorder %v17506_v27, 0.7853982  ;;  %v7446_v59 = vxor.u32 2147483648, %v9817_v43  ;;  %v8370_v8 = vsel %vm16984_vm14, %v8369_v55, %v8368_v26  ;;  %v6931_v27 = vsel %vm6924_vm3, %v6927_v25, %v6930_v38 }
 0x9bc   : > { %vm16426_vm4 = vcmp.le.f32.partialorder %v17512_v9, 0.7853982  ;;  %v7450_v15 = vsel %vm7448_vm9, %v7449_v49, %v9817_v43  ;;  %vm7341_vm11 = vcmp.eq.s32.totalorder %v7339_v4, 0  ;;  %v8455_v41 = vsub.s32 0, %v16422_v58 }
 0x9bd   : > { %v7447_v10 = vsel %vm7445_vm5, %v9815_v22, %v7446_v59  ;;  %vm7340_vm1 = vcmp.lt.s32.totalorder %v7339_v4, 2  ;;  %v7343_v2 = vsel %vm7341_vm11, %v17510_v28, %v7342_v32  ;;  %vm7344_vm0 = vcmp.eq.s32.totalorder %v7339_v4, 2  ;;  %v17524_v28 = vld [vmem:[#allocation18_spill] sm:$0xff] }
 0x9be   : > { %v7451_v29 = vsel %vm7444_vm7, %v7447_v10, %v7450_v15  ;;  %vm17515_vm6 = vcmp.lt.s32.totalorder %v15385_v14, 0  ;;  %v7229_v26 = vsel %vm16426_vm4, %v15385_v14, %v15924_v1  ;;  %v9142_v55 = vmin.u32 %v8455_v41, %v16422_v58 }
 0x9bf   : > { %v7228_v9 = vsel %vm17515_vm6, %v7227_v53, %v17511_v3  ;;  %vm17516_vm9 = vweird.f32 %v17492_v12  ;;  %v7346_v25 = vsel %vm7344_vm0, %v7345_v11, %v17505_v46  ;;  %vm17517_vm7 = vweird.f32 %v17504_v17  ;;  %v17525_v53 = vld [vmem:[#allocation33_spill] sm:$0xff] }
 0x9c0   : > { %v7452_v22 = vsel %vm17516_vm9, nan, %v7451_v29  ;;  %v7230_v21 = vsel %vm16426_vm4, 0, %v7228_v9  ;;  %v6932_v38 = vsel %vm17517_vm7, nan, %v6931_v27  ;;  %v7347_v4 = vsel %vm7340_vm1, %v7343_v2, %v7346_v25 }
 0x9c1   : > { %v9224_v32 = vpack.c.bf16 %v7452_v22, %v7036_v6  ;;  %9818 = vcosq.f32 %v7229_v26  ;;  %v8457_v43 = vclz %v9142_v55  ;;  %vm17518_vm6 = vweird.f32 %v17509_v57 }
 0x9c2   : > { %v7348_v1 = vsel %vm17518_vm6, nan, %v7347_v4  ;;  %9820 = vsinq.f32 %v7229_v26  ;;  %v7234_v41 = vadd.s32 3, %v7230_v21  ;;  %v17519_v12 = vxor.u32 2147483648, %v16305_v44 }
 0x9c3   : > { %vm17520_vm5 = vcmp.lt.s32.totalorder %v15951_v52, 0  ;;  %9225 = vmatprep.subr.bf16.mxu0 %v9224_v32  ;;  %v9226_v6 = vpack.c.bf16 %v7348_v1, %v6932_v38  ;;  %v17521_v17 = vand.u32 2147483647, %v15484_v34  ;;  %v7643_v57 = vsub.s32 4, %v17524_v28 }
 0x9c4   : > { %v16459_v46 = vsel %vm17520_vm5, %v17519_v12, %v16305_v44  ;;  %v16471_v11 = vsel %vm16415_vm13, %v16030_v40, %v8370_v8  ;;  %v9143_v3 = vadd.s32 4294967294, %v8457_v43  ;;  %v7126_v50 = vsel %vm15622_vm15, 0, %v17525_v53  ;;  %v17529_v43 = vld [vmem:[#allocation19_spill] sm:$0xff] }
 0x9c5   : > { %vm16463_vm0 = vcmp.le.f32.partialorder %v17521_v17, 0.7853982  ;;  %9227 = vmatpush1.bf16.msra.mxu0 %v9226_v6  ;;  %v16480_v15 = vand.u32 3, %v7234_v41  ;;  %vm17527_vm11 = vcmp.lt.s32.totalorder %v15484_v34, 0  ;;  %v7130_v8 = vadd.s32 3, %v7126_v50 }
 0x9c6   : > { %v7645_v44 = vsel %vm16463_vm0, %v15484_v34, %v16037_v47  ;;  %v7644_v27 = vsel %vm17527_vm11, %v7643_v57, %v17524_v28  ;;  %v8057_v10 = vxor.u32 2147483648, %v16398_v30  ;;  %v8371_v2 = vsub.s32 4, %v16303_v31 }
 0x9c7   : > { %9822 = vcosq.f32 %v7645_v44  ;;  %v8445_v47 = vadd.s32 %v16356_v39, %v16366_v60  ;;  %vm9144_vm1 = vcmp.lt.s32.totalorder %v9143_v3, 0  ;;  %v7646_v9 = vsel %vm16463_vm0, 0, %v7644_v27  ;;  %v17528_v39 = vld [vmem:[#allocation37_spill] sm:$0xff] }
 0x9c8   : > { %v8460_v29 = vsel %vm9144_vm1, 0, %v9143_v3  ;;  %9824 = vsinq.f32 %v7645_v44  ;;  %v7131_v26 = vand.u32 3, %v7130_v8  ;;  %v7650_v25 = vadd.s32 3, %v7646_v9  ;;  %v17530_v3 = vld [vmem:[#allocation24_spill] sm:$0xff] }
 0x9c9   : > { %9826 = vcosq.f32 %v16471_v11  ;;  %v8461_v55 = vsub.s32 32, %v8460_v29  ;;  %v8465_v22 = vsub.s32 4294967266, %v8460_v29  ;;  %v8462_v21 = vshll.u32 %v16422_v58, %v8460_v29 }
 0x9ca   : > { %vm7237_vm3 = vcmp.eq.s32.totalorder %v16480_v15, 0  ;;  %vm7133_vm4 = vcmp.eq.s32.totalorder %v7131_v26, 0  ;;  %v7134_v60 = vxor.u32 2147483648, %v17528_v39  ;;  %v7651_v4 = vand.u32 3, %v7650_v25 }
 0x9cb   : > { %v8463_v32 = vshrl.u32 %v8445_v47, %v8461_v55  ;;  %v8466_v38 = vadd.s32 127, %v8465_v22  ;;  %v7137_v1 = vxor.u32 2147483648, %v17529_v43  ;;  %v9819_v41 = vpop.eup %9818  ;;  %vm7240_vm9 = vcmp.eq.s32.totalorder %v16480_v15, 2 }
 0x9cc   : > { %vm7132_vm7 = vcmp.lt.s32.totalorder %v7131_v26, 2  ;;  %v7135_v12 = vsel %vm7133_vm4, %v17529_v43, %v7134_v60  ;;  %vm7136_vm6 = vcmp.eq.s32.totalorder %v7131_v26, 2  ;;  %v9821_v58 = vpop.eup %9820  ;;  %v7241_v49 = vxor.u32 2147483648, %v9819_v41  ;;  %v17534_v60 = vld [vmem:[#allocation34_spill] sm:$0xff] }
 0x9cd   : > { %v8464_v6 = vor.u32 %v8463_v32, %v8462_v21  ;;  %v8467_v17 = vshll.u32 %v8466_v38, 23  ;;  %v7542_v28 = vsel %vm15868_vm12, 0, %v15904_v20  ;;  %vm7233_vm5 = vweird.f32 %v15385_v14 }
 0x9ce   : > { %v7238_v57 = vxor.u32 2147483648, %v9821_v58  ;;  %vm7649_vm0 = vweird.f32 %v15484_v34  ;;  %vm7652_vm11 = vcmp.lt.s32.totalorder %v7651_v4, 2  ;;  %v7550_v44 = vxor.u32 2147483648, %v16063_v16 }
 0x9cf   : > { %v8468_v53 = vor.u32 4788187, %v8467_v17  ;;  %vm7653_vm4 = vcmp.eq.s32.totalorder %v7651_v4, 0  ;;  %vm7656_vm15 = vcmp.eq.s32.totalorder %v7651_v4, 2  ;;  %v7138_v59 = vsel %vm7136_vm6, %v7137_v1, %v17528_v39  ;;  %v17535_v1 = vld [vmem:[#allocation17_spill] sm:$0xff] }
 0x9d0   : > { %v8471_v20 = vcvt.s32.f32 %v8464_v6  ;;  %v7239_v50 = vsel %vm7237_vm3, %v9819_v41, %v7238_v57  ;;  %v7242_v27 = vsel %vm7240_vm9, %v7241_v49, %v9821_v58  ;;  %v7546_v8 = vadd.s32 3, %v7542_v28 }
 0x9d1   : > { %v9823_v54 = vpop.eup %9822  ;;  %v8469_v47 = vand.u32 2147483647, %v8468_v53  ;;  %v7553_v9 = vxor.u32 2147483648, %v15974_v42  ;;  %v17531_v55 = vand.u32 2147483647, %v15653_v62  ;;  %v7139_v21 = vsel %vm7132_vm7, %v7135_v12, %v7138_v59 }
 0x9d2   : > { %v7657_v29 = vxor.u32 2147483648, %v9823_v54  ;;  %v9825_v25 = vpop.eup %9824  ;;  %v7547_v39 = vand.u32 3, %v7546_v8  ;;  %v7851_v32 = vsub.s32 4, %v17534_v60  ;;  %vm7975_vm3 = vcmp.lt.s32.totalorder %v17535_v1, 0 }
 0x9d3   : > { %vm16516_vm12 = vcmp.le.f32.partialorder %v17531_v55, 0.7853982  ;;  %v16526_v43 = vpop.eup %9826  ;;  %vm17536_vm9 = vcmp.lt.s32.totalorder %v16480_v15, 2  ;;  %v7654_v58 = vxor.u32 2147483648, %v9825_v25  ;;  %v8472_v26 = vmul.f32 %v8471_v20, %v8469_v47 }
 0x9d4   : > { %v7853_v38 = vsel %vm16516_vm12, %v15653_v62, %v16173_v45  ;;  %v7243_v41 = vsel %vm17536_vm9, %v7239_v50, %v7242_v27  ;;  %v7658_v6 = vsel %vm7656_vm15, %v7657_v29, %v9825_v25  ;;  %vm7549_vm7 = vcmp.eq.s32.totalorder %v7547_v39, 0 }
 0x9d5   : > { %9828 = vcosq.f32 %v7853_v38  ;;  %vm7552_vm6 = vcmp.eq.s32.totalorder %v7547_v39, 2  ;;  %vm17537_vm14 = vcmp.lt.s32.totalorder %v15653_v62, 0  ;;  %v7655_v45 = vsel %vm7653_vm4, %v9823_v54, %v7654_v58 }
 0x9d6   : > { %v7852_v12 = vsel %vm17537_vm14, %v7851_v32, %v17534_v60  ;;  %vm7548_vm1 = vcmp.lt.s32.totalorder %v7547_v39, 2  ;;  %v7551_v17 = vsel %vm7549_vm7, %v15974_v42, %v7550_v44  ;;  %v7554_v49 = vsel %vm7552_vm6, %v7553_v9, %v16063_v16 }
 0x9d7   : > { %v7659_v15 = vsel %vm7652_vm11, %v7655_v45, %v7658_v6  ;;  %v7555_v28 = vsel %vm7548_vm1, %v7551_v17, %v7554_v49  ;;  %v7854_v57 = vsel %vm16516_vm12, 0, %v7852_v12  ;;  %9830 = vsinq.f32 %v7853_v38  ;;  %v17550_v45 = vld [vmem:[#allocation30_spill] sm:$0xff] }
 0x9d8   : > { %v7244_v53 = vsel %vm7233_vm5, nan, %v7243_v41  ;;  %v7660_v59 = vsel %vm7649_vm0, nan, %v7659_v15  ;;  %vm17538_vm14 = vweird.f32 %v17530_v3  ;;  %vm17539_vm15 = vweird.f32 %v15394_v48  ;;  %v17543_v3 = vld [vmem:[#allocation12_spill] sm:$0xff] }
 0x9d9   : > { %v7140_v54 = vsel %vm17538_vm14, nan, %v7139_v21  ;;  %v7556_v42 = vsel %vm17539_vm15, nan, %v7555_v28  ;;  %v8473_v16 = vxor.u32 2147483648, %v8472_v26  ;;  %v9232_v4 = vpack.c.bf16 %v7660_v59, %v7244_v53 }
 0x9da   : > { %v7858_v44 = vadd.s32 3, %v7854_v57  ;;  %v17540_v20 = vand.u32 2147483647, %v15951_v52  ;;  %v9234_v14 = vpack.c.bf16 %v7556_v42, %v7140_v54  ;;  %v8267_v27 = vsub.s32 4, %v16136_v7 }
 0x9db   : > { %v7750_v8 = vsel %vm15966_vm8, 0, %v17543_v3  ;;  %v17545_v47 = vsub.s32 4, %v16053_v56  ;;  %vm17546_vm5 = vcmp.lt.s32.totalorder %v15814_v19, 0  ;;  %9233 = vmatprep.subr.bf16.mxu1 %v9232_v4  ;;  %vm17547_vm0 = vcmp.lt.s32.totalorder %v16030_v40, 0 }
 0x9dc   : > { %vm16551_vm11 = vcmp.le.f32.partialorder %v17540_v20, 0.7853982  ;;  %v7859_v9 = vand.u32 3, %v7858_v44  ;;  %v7754_v55 = vadd.s32 3, %v7750_v8  ;;  %vm16985_vm8 = vcmp.lt.s32.totalorder %v16234_v61, 0  ;;  %9235 = vmatpush1.bf16.msra.mxu1 %v9234_v14 }
 0x9dd   : > { %v8269_v34 = vsel %vm16551_vm11, %v15951_v52, %v16459_v46  ;;  %v16568_v29 = vsel %vm17546_vm5, %v17545_v47, %v16053_v56  ;;  %v16575_v46 = vsel %vm17547_vm0, %v8371_v2, %v16303_v31  ;;  %vm17548_vm1 = vcmp.lt.s32.totalorder %v15951_v52, 0 }
 0x9de   : > { %9832 = vcosq.f32 %v8269_v34  ;;  %v8268_v22 = vsel %vm17548_vm1, %v8267_v27, %v16136_v7  ;;  %v8058_v56 = vsel %vm7975_vm3, %v8057_v10, %v16398_v30  ;;  %v8474_v31 = vsel %vm16985_vm8, %v8473_v16, %v8472_v26  ;;  %v17549_v30 = vld [vmem:[#allocation8_spill] sm:$0xff] }
 0x9df   : > { %9834 = vsinq.f32 %v8269_v34  ;;  %v8270_v2 = vsel %vm16551_vm11, 0, %v8268_v22  ;;  %v9829_v25 = vpop.eup %9828  ;;  %v7755_v39 = vand.u32 3, %v7754_v55  ;;  %v7758_v7 = vxor.u32 2147483648, %v16197_v24 }
 0x9e0   : > { %9836 = vsinq.f32 %v16471_v11  ;;  %v8274_v21 = vadd.s32 3, %v8270_v2  ;;  %v8166_v60 = vsel %vm16208_vm10, 0, %v16157_v13  ;;  %vm7860_vm4 = vcmp.lt.s32.totalorder %v7859_v9, 2 }
 0x9e1   : > { %v7865_v32 = vxor.u32 2147483648, %v9829_v25  ;;  %v7761_v10 = vxor.u32 2147483648, %v17549_v30  ;;  %v8170_v11 = vadd.s32 3, %v8166_v60  ;;  %vm7857_vm12 = vweird.f32 %v15653_v62  ;;  %v9831_v58 = vpop.eup %9830 }
 0x9e2   : > { %vm7861_vm9 = vcmp.eq.s32.totalorder %v7859_v9, 0  ;;  %vm7864_vm7 = vcmp.eq.s32.totalorder %v7859_v9, 2  ;;  %v8275_v38 = vand.u32 3, %v8274_v21  ;;  %v8174_v41 = vxor.u32 2147483648, %v16331_v63 }
 0x9e3   : > { %vm7757_vm6 = vcmp.eq.s32.totalorder %v7755_v39, 0  ;;  %vm8169_vm14 = vweird.f32 %v15740_v35  ;;  %v8171_v6 = vand.u32 3, %v8170_v11  ;;  %v8177_v5 = vxor.u32 2147483648, %v16325_v0 }
 0x9e4   : > { %v7862_v13 = vxor.u32 2147483648, %v9831_v58  ;;  %vm7756_vm15 = vcmp.lt.s32.totalorder %v7755_v39, 2  ;;  %v7759_v26 = vsel %vm7757_vm6, %v17549_v30, %v7758_v7  ;;  %vm7760_vm11 = vcmp.eq.s32.totalorder %v7755_v39, 2 }
 0x9e5   : > { %v7866_v12 = vsel %vm7864_vm7, %v7865_v32, %v9831_v58  ;;  %vm7753_vm5 = vweird.f32 %v17550_v45  ;;  %v7762_v17 = vsel %vm7760_vm11, %v7761_v10, %v16197_v24  ;;  %vm8173_vm0 = vcmp.eq.s32.totalorder %v8171_v6, 0 }
 0x9e6   : > { %v17551_v49 = vand.u32 2147483647, %v17535_v1  ;;  %v7863_v28 = vsel %vm7861_vm9, %v9829_v25, %v7862_v13  ;;  %vm8276_vm8 = vcmp.lt.s32.totalorder %v8275_v38, 2  ;;  %v8175_v57 = vsel %vm8173_vm0, %v16325_v0, %v8174_v41 }
 0x9e7   : > { %vm8176_vm10 = vcmp.eq.s32.totalorder %v8171_v6, 2  ;;  %vm8280_vm6 = vcmp.eq.s32.totalorder %v8275_v38, 2  ;;  %v8059_v54 = vsub.s32 4, %v16203_v33  ;;  %v7867_v16 = vsel %vm7860_vm4, %v7863_v28, %v7866_v12 }
 0x9e8   : > { %vm16606_vm1 = vcmp.le.f32.partialorder %v17551_v49, 0.7853982  ;;  %v9833_v53 = vpop.eup %9832  ;;  %v8178_v59 = vsel %vm8176_vm10, %v8177_v5, %v16331_v63  ;;  %vm8172_vm7 = vcmp.lt.s32.totalorder %v8171_v6, 2  ;;  %vm8277_vm9 = vcmp.eq.s32.totalorder %v8275_v38, 0 }
 0x9e9   : > { %v8061_v24 = vsel %vm16606_vm1, %v17535_v1, %v8058_v56  ;;  %v9835_v42 = vpop.eup %9834  ;;  %v8281_v4 = vxor.u32 2147483648, %v9833_v53  ;;  %v8179_v20 = vsel %vm8172_vm7, %v8175_v57, %v8178_v59  ;;  %v8060_v63 = vsel %vm7975_vm3, %v8059_v54, %v16203_v33 }
 0x9ea   : > { %9838 = vcosq.f32 %v8061_v24  ;;  %v16618_v44 = vpop.eup %9836  ;;  %v8278_v0 = vxor.u32 2147483648, %v9835_v42  ;;  %v7763_v14 = vsel %vm7756_vm15, %v7759_v26, %v7762_v17  ;;  %v8062_v27 = vsel %vm16606_vm1, 0, %v8060_v63 }
 0x9eb   : > { %9840 = vsinq.f32 %v8061_v24  ;;  %v8282_v50 = vsel %vm8280_vm6, %v8281_v4, %v9835_v42  ;;  %v7868_v34 = vsel %vm7857_vm12, nan, %v7867_v16  ;;  %v17554_v48 = vand.u32 2147483647, %v16234_v61 }
 0x9ec   : > { %v8279_v3 = vsel %vm8277_vm9, %v9833_v53, %v8278_v0  ;;  %v8475_v8 = vsub.s32 4, %v16405_v18  ;;  %v8180_v33 = vsel %vm8169_vm14, nan, %v8179_v20  ;;  %v8066_v9 = vadd.s32 3, %v8062_v27  ;;  %v8498_v0 = vpop.permute.xlu0 %8497 }
 0x9ed   : > { %vm8390_vm4 = vcmp.le.f32.partialorder %v17554_v48, 0.7853982  ;;  %v8283_v47 = vsel %vm8276_vm8, %v8279_v3, %v8282_v50  ;;  %vm17555_vm3 = vweird.f32 %v15951_v52  ;;  %vm17556_vm12 = vcmp.lt.s32.totalorder %v16234_v61, 0 }
 0x9ee   : > { %v8477_v55 = vsel %vm8390_vm4, %v16234_v61, %v8474_v31  ;;  %v8284_v22 = vsel %vm17555_vm3, nan, %v8283_v47  ;;  %v8476_v62 = vsel %vm17556_vm12, %v8475_v8, %v16405_v18  ;;  %v7958_v56 = vsel %vm16244_vm2, 0, %v16568_v29 }
 0x9ef   : > { %9842 = vcosq.f32 %v8477_v55  ;;  %v9228_v2 = vpack.c.bf16 %v8284_v22, %v7868_v34  ;;  %v7764_v35 = vsel %vm7753_vm5, nan, %v7763_v14  ;;  %v8478_v25 = vsel %vm8390_vm4, 0, %v8476_v62 }
 0x9f0   : > { %9844 = vsinq.f32 %v8477_v55  ;;  %v9230_v21 = vpack.c.bf16 %v8180_v33, %v7764_v35  ;;  %v8482_v31 = vadd.s32 3, %v8478_v25  ;;  %v7962_v52 = vadd.s32 3, %v7958_v56  ;;  %v6246_v25 = vpop.permute.xlu1 %6245 }
 0x9f1   : > { %9229 = vmatprep.subr.bf16.mxu0 %v9228_v2  ;;  %v8374_v39 = vsel %vm16415_vm13, 0, %v16575_v46  ;;  %v8067_v18 = vand.u32 3, %v8066_v9  ;;  %v7966_v11 = vxor.u32 2147483648, %v16349_v23  ;;  %v7969_v41 = vxor.u32 2147483648, %v16346_v37  ;;  %v17559_v2 = vld [vmem:[#allocation7_spill] sm:$0xff] }
 0x9f2   : > { %9231 = vmatpush1.bf16.msra.mxu0 %v9230_v21  ;;  %v8378_v7 = vadd.s32 3, %v8374_v39  ;;  %v8483_v60 = vand.u32 3, %v8482_v31  ;;  %v7963_v32 = vand.u32 3, %v7962_v52  ;;  %v8382_v36 = vxor.u32 2147483648, %v16618_v44  ;;  %v17560_v39 = vld [vmem:[#allocation29_spill] sm:$0xff] }
 0x9f3   : > { %vm17557_vm2 = vcmask 261120   ;;  %vm8068_vm13 = vcmp.lt.s32.totalorder %v8067_v18, 2  ;;  %vm8069_vm8 = vcmp.eq.s32.totalorder %v8067_v18, 0  ;;  %v8385_v58 = vxor.u32 2147483648, %v16526_v43 }
 0x9f4   : > { %v9839_v29 = vpop.eup %9838  ;;  %v8379_v46 = vand.u32 3, %v8378_v7  ;;  %vm8072_vm14 = vcmp.eq.s32.totalorder %v8067_v18, 2  ;;  %vm8485_vm10 = vcmp.eq.s32.totalorder %v8483_v60, 0  ;;  %vm7965_vm15 = vcmp.eq.s32.totalorder %v7963_v32, 0 }
 0x9f5   : > { %v9841_v30 = vpop.eup %9840  ;;  %v8073_v10 = vxor.u32 2147483648, %v9839_v29  ;;  %9145 = vmatmul.mubr.msk.bf16.vlgmr.msra.gmra.mrb[36].mxu0 %vm17557_vm2, %v8493_v51  ;;  %vm7968_vm11 = vcmp.eq.s32.totalorder %v7963_v32, 2  ;;  %v7967_v26 = vsel %vm7965_vm15, %v16346_v37, %v7966_v11  ;;  %vm8488_vm1 = vcmp.eq.s32.totalorder %v8483_v60, 2 }
 0x9f6   : > { %v8070_v38 = vxor.u32 2147483648, %v9841_v30  ;;  %vm8381_vm5 = vcmp.eq.s32.totalorder %v8379_v46, 0  ;;  %v7970_v17 = vsel %vm7968_vm11, %v7969_v41, %v16349_v23  ;;  %vm8384_vm0 = vcmp.eq.s32.totalorder %v8379_v46, 2 }
 0x9f7   : > { %v8074_v13 = vsel %vm8072_vm14, %v8073_v10, %v9841_v30  ;;  %v8383_v49 = vsel %vm8381_vm5, %v16526_v43, %v8382_v36  ;;  %vm8380_vm6 = vcmp.lt.s32.totalorder %v8379_v46, 2  ;;  %v8386_v28 = vsel %vm8384_vm0, %v8385_v58, %v16618_v44 }
 0x9f8   : > { %v8071_v5 = vsel %vm8069_vm8, %v9839_v29, %v8070_v38  ;;  %vm7964_vm7 = vcmp.lt.s32.totalorder %v7963_v32, 2  ;;  %v8387_v59 = vsel %vm8380_vm6, %v8383_v49, %v8386_v28  ;;  %vm8484_vm9 = vcmp.lt.s32.totalorder %v8483_v60, 2 }
 0x9f9   : > { %v9843_v6 = vpop.eup %9842  ;;  %v8075_v57 = vsel %vm8068_vm13, %v8071_v5, %v8074_v13  ;;  %v7971_v54 = vsel %vm7964_vm7, %v7967_v26, %v7970_v17  ;;  %vm8377_vm4 = vweird.f32 %v16030_v40  ;;  %vm8065_vm3 = vweird.f32 %v17535_v1  ;;  %v17565_v26 = vld [vmem:[#allocation21_spill] sm:$0xff] }
 0x9fa   : > { %v9845_v12 = vpop.eup %9844  ;;  %v8489_v45 = vxor.u32 2147483648, %v9843_v6  ;;  %vm8481_vm12 = vweird.f32 %v16234_v61  ;;  %v8388_v43 = vsel %vm8377_vm4, nan, %v8387_v59  ;;  %v8076_v24 = vsel %vm8065_vm3, nan, %v8075_v57 }
 0x9fb   : > { %v8486_v15 = vxor.u32 2147483648, %v9845_v12  ;;  %vm7961_vm2 = vweird.f32 %v15814_v19  ;;  %vm17558_vm13 = vcmask 261120   ;;  %v6250_v35 = vsub.s32 0, %v17559_v2 }
 0x9fc   : > { %v8490_v53 = vsel %vm8488_vm1, %v8489_v45, %v9845_v12  ;;  %v7972_v4 = vsel %vm7961_vm2, nan, %v7971_v54  ;;  %vm17562_vm8 = vcmask 1040384  }
 0x9fd   : > { %v8487_v37 = vsel %vm8485_vm10, %v9843_v6, %v8486_v15  ;;  %v9238_v44 = vpack.c.bf16 %v8388_v43, %v7972_v4  ;;  %v6251_v21 = vrot.slane %v6246_v25, %v6250_v35  ;;  %vm17563_vm14 = vmmov %vm17562_vm8  ;;  %v17564_v6 = vld [vmem:[#allocation22_spill] sm:$0xff] }
 0x9fe   : > { %v8491_v23 = vsel %vm8484_vm9, %v8487_v37, %v8490_v53  ;;  %vm17566_vm10 = vmmov %vm17562_vm8 }
 0x9ff   : > { %v8492_v42 = vsel %vm8481_vm12, nan, %v8491_v23  ;;  %v6322_v18 = vadd.f32 %v17560_v39, %v6251_v21  ;;  %v6395_v5 = vadd.f32 %v17564_v6, %v6251_v21  ;;  %v6397_v12 = vadd.f32 %v17565_v26, %v6251_v21  ;;  %vm17567_vm15 = vmmov %vm17562_vm8 }
 0xa00   : > { %v9236_v16 = vpack.c.bf16 %v8492_v42, %v8076_v24 }
 0xa02   : > { %9237 = vmatprep.subr.bf16.mxu1 %v9236_v16 }
 0xa03   : > { %9239 = vmatpush1.bf16.msra.mxu1 %v9238_v44 }
 0xa06   : > { %9146 = vmatmul.mubr.msk.bf16.vlgmr.msra.gmra.mrb[36].mxu1 %vm17558_vm13, %v8493_v51  ;;  %v17561_v51 = vld [vmem:[#allocation10_spill] sm:$0xff] }
 0xa07   : > { %v6324_v29 = vadd.f32 %v17561_v51, %v6251_v21 }
 0xac8   : > { %v8569_v20 = vpop.f32.mrb[36].mxu0 }
 0xac9   : > { %v8570_v40 = vadd.f32 %v8569_v20, %v8498_v0  ;;  %v8571_v63 = vpop.f32.mrb[37].mxu0 }
 0xaca   : > { %v8572_v1 = vadd.f32 %v8571_v63, %v8498_v0  ;;  %v8573_v50 = vpop.f32.mrb[38].mxu0 }
 0xacb   : > { %v9147_v61 = vmul.f32 -1.442695, %v8570_v40  ;;  %v8574_v14 = vpop.f32.mrb[39].mxu0 }
 0xacc   : > { %v9148_v27 = vmul.f32 -1.442695, %v8572_v1 }
 0xacd   : > { %9846 = vpow2.f32 %v9147_v61 }
 0xace   : > { %9848 = vpow2.f32 %v9148_v27 }
 0xad7   : > { %v9847_v34 = vpop.eup %9846 }
 0xad8   : > { %v9849_v19 = vpop.eup %9848  ;;  %v8661_v3 = vadd.f32 1.0, %v9847_v34 }
 0xad9   : > { %v8642_v48 = vpop.f32.mrb[36].mxu1  ;;  %v8662_v8 = vadd.f32 1.0, %v9849_v19 }
 0xada   : > { %v8643_v47 = vadd.f32 %v8642_v48, %v8498_v0  ;;  %v8644_v33 = vpop.f32.mrb[37].mxu1  ;;  %9850 = vrcp.f32 %v8661_v3 }
 0xadb   : > { %v8645_v9 = vadd.f32 %v8644_v33, %v8498_v0  ;;  %v8646_v55 = vpop.f32.mrb[38].mxu1  ;;  %9852 = vrcp.f32 %v8662_v8 }
 0xadc   : > { %v9149_v22 = vmul.f32 -1.442695, %v8643_v47  ;;  %v8647_v62 = vpop.f32.mrb[39].mxu1 }
 0xadd   : > { %v9150_v56 = vmul.f32 -1.442695, %v8645_v9 }
 0xade   : > { %9854 = vpow2.f32 %v9149_v22 }
 0xadf   : > { %9856 = vpow2.f32 %v9150_v56 }
 0xae4   : > { %v9851_v31 = vpop.eup %9850 }
 0xae5   : > { %v9853_v52 = vpop.eup %9852  ;;  %v8677_v7 = vrot.slane %v9851_v31, 7 }
 0xae6   : > { %v8678_v60 = vrot.slane %v9853_v52, 7 }
 0xae7   : > { %v8685_v30 = vsel %vm17562_vm8, %v6322_v18, %v8677_v7 }
 0xae8   : > { %v9855_v32 = vpop.eup %9854  ;;  %v8686_v38 = vsel %vm17563_vm14, %v6324_v29, %v8678_v60 }
 0xae9   : > { %v9857_v10 = vpop.eup %9856  ;;  %v8663_v11 = vadd.f32 1.0, %v9855_v32  ;;  %v8693_v36 = vcombine.low %v8685_v30, %v8686_v38 }
 0xaea   : > { %v8664_v41 = vadd.f32 1.0, %v9857_v10 }
 0xaeb   : > { %9858 = vrcp.f32 %v8663_v11  ;;  %8697 = vst [vmem:[%s436_s26] sm:$0xff] %v8693_v36 }
 0xaec   : > { %9860 = vrcp.f32 %v8664_v41 }
 0xaf5   : > { %v9859_v46 = vpop.eup %9858 }
 0xaf6   : > { %v9861_v58 = vpop.eup %9860  ;;  %v8679_v13 = vrot.slane %v9859_v46, 7 }
 0xaf7   : > { %v8680_v45 = vrot.slane %v9861_v58, 7 }
 0xaf8   : > { %v8687_v17 = vsel %vm17566_vm10, %v6395_v5, %v8679_v13 }
 0xaf9   : > { %v8688_v49 = vsel %vm17567_vm15, %v6397_v12, %v8680_v45 }
 0xafa   : > { %v8694_v15 = vcombine.low %v8687_v17, %v8688_v49 }
 0xafc   : > { %8698 = vst [vmem:[%s436_s26 + $0x8] sm:$0xff] %v8694_v15 }
 0xafd   : > { %9875 = shalt.err (!%p9872_p5)
}
 0xafe   : > { %s9876_s8 = scalar_lea.hbm %s16683_s15, 256  ;;  %s9880_s13 = scalar_lea.hbm %s16743_s11, 512 }
 0xaff   : > { %p9877_p6 = scmp.ne.s32.totalorder %s16683_s15, %s9876_s8  ;;  %p9881_p10 = scmp.lt.u32.totalorder %s16683_s15, %s16743_s11 }
 0xb00   : > { %p9882_p11 = scmp.lt.u32.totalorder %s9880_s13, %s9876_s8  ;;  %p9884_p13 = scmp.lt.u32.totalorder %s9876_s8, %s16683_s15 }
 0xb01   : > { %p9878_p7 = pnand %p9877_p6, %p10055_p4 }
 0xb02   : > { %p9883_p12 = por %p9882_p11, %p9881_p10 }
 0xb03   : > { %p9879_p9 = pneg %p9878_p7 }
 0xb04   : > { %p9885_p0 = por %p9884_p13, %p9883_p12 }
 0xb06   : > { %p9886_p1 = pnand %p9885_p0, %p9879_p9 }
 0xb08   : > { %9889 = shalt.err (!%p9886_p1)
}
 0xb09   : > { %9512 = dma.vmem_to_hbm [thread:$0]  (%p10055_p4), %s16685_s29, 256, %s16683_s15, %s8700_s16  }
 0xb0a PF: > { %p9518_p2 = scmp.ge.s32.totalorder %s9940_s24, 2  ;;  %s8728_s22 = sand.u32 1, %s9920_s19  }
 0xb0b   : > { %s8729_s18 = scalar_lea.sflag [#allocation4], %s8728_s22 }
 0xb0c   : > { %p9515_p3 = pnand %p9518_p2, %p10062_p8 }
 0xb0e   : > { %9915 = dma.done.wait (!%p9515_p3), %s8729_s18, 256  }
 0xb0f   : > { %9917 = vsyncadd (!%p9515_p3), %s8729_s18, 4294967040  ;;  %s26_s24 = sadd.s32 1, %s9940_s24   ;;  %s17568_s28 = sld [smem:[#allocation6_spill]] }
 0xb10   : > { %p23_p5 = scmp.ge.s32.totalorder %s26_s24, 4   ;;  %s17569_s19 = smov %s9924_s20 }
 0xb11   : > { %s17570_s20 = smov %s9928_s21  ;;  %s17571_s21 = smov %s10068_s12 }
 0xb12   : > { %s17572_s22 = smov %s9936_s23  ;;  %25 = sbr.rel (!%p23_p5) target bundleno = 7 (0x7), region = 113 }
 0xb15   : > { %s17573_s23 = smov %s17568_s28 }
 0xb19   :  { %8734 = vsyncpa [#allocation4], 1 }
 0xb1a   :  { %8736 = vsyncpa [#allocation4 + $0x1], 1 }

</bundles_post_ra>
